<compile_context>
chip_gen: v7x
topology: tpu7x:2x2x1
jax: 0.10.0
libtpu: 0.0.40
codegen_flags: <defaults>
</compile_context>

<pallas_src>
import numpy as np
import jax
import jax.numpy as jnp
from jax import lax
from jax.experimental import pallas as pl
from jax.experimental.pallas import tpu as pltpu

IMAGE_SIZE = 222
NUM_COEFF = 175
DUMP = 175            # bucket for pixels not covered by any coefficient ring
NC = 176              # 175 coefficient buckets + 1 dump bucket
TK = 8192             # K-tile (multiple of 128); safe for v7x's 64 MiB VMEM
NSPLIT = 2            # leading "parallel" split of the K reduction (v7x 2 TCs)
HIDDEN = 128
BN_EPS = 1e-5

RING_PARAM_SPECS = [
    ("layer1", 1),
    ("layer2_00", 2), ("layer2_01", 2), ("layer2_10", 2), ("layer2_11", 2),
    ("layer3_00", 3), ("layer3_01", 3), ("layer3_02", 3),
    ("layer3_10", 3), ("layer3_11", 3), ("layer3_12", 3),
    ("layer3_20", 3), ("layer3_21", 3), ("layer3_22", 3),
]


def get_dim(level):
    dimsize = IMAGE_SIZE / level
    if dimsize % 2 == 1:
        dimsize += 1
    return int(dimsize // 2)


def generate_filter_np(weights, level):
    """Closed form of the torch generateFilter ring accumulation."""
    F = int(IMAGE_SIZE / level)
    c = (F - 1) / 2.0
    ax = np.arange(F)
    d = np.maximum(np.abs(ax[:, None] - c), np.abs(ax[None, :] - c))
    ring = np.floor(d).astype(np.int64)          # ring index 0..len(weights)-1
    return weights[ring]


def build_filter_bank(ring_params, dtype):
    fb = np.zeros((IMAGE_SIZE, IMAGE_SIZE, 3), dtype=dtype)
    fb[:, :, 0] = generate_filter_np(ring_params["layer1"].astype(dtype), 1)
    bs = IMAGE_SIZE // 2
    for bi in range(2):
        for bj in range(2):
            f = generate_filter_np(ring_params[f"layer2_{bi}{bj}"].astype(dtype), 2)
            fb[bi * bs:(bi + 1) * bs, bj * bs:(bj + 1) * bs, 1] = f
    bs = IMAGE_SIZE // 3
    for bi in range(3):
        for bj in range(3):
            f = generate_filter_np(ring_params[f"layer3_{bi}{bj}"].astype(dtype), 3)
            fb[bi * bs:(bi + 1) * bs, bj * bs:(bj + 1) * bs, 2] = f
    return fb


def build_index_map_and_T():
    """Per-pixel annulus bucket index and telescoping matrix T (176, 175).

    Torch computes c_k = S(rect_k) - c_{k-1} within each (layer, block) chain.
    With disjoint annulus sums A_m: c_k = sum_{m<=k, (k-m) even} A_m, i.e.
    coefficients = annulus_sums @ T.
    """
    idx_map = np.full((IMAGE_SIZE, IMAGE_SIZE, 3), DUMP, dtype=np.int32)
    T = np.zeros((NC, NUM_COEFF), dtype=np.float32)
    coeff_idx = 0
    for layer in range(1, 4):
        maxR = get_dim(layer)
        bs = IMAGE_SIZE // layer
        ch = layer - 1
        for bi in range(layer):
            for bj in range(layer):
                chain = []
                prev = np.zeros((IMAGE_SIZE, IMAGE_SIZE), dtype=bool)
                for r in range(maxR - 1, -1, -4):
                    rect = np.zeros((IMAGE_SIZE, IMAGE_SIZE), dtype=bool)
                    rect[bi * bs + r:(bi + 1) * bs - r,
                         bj * bs + r:(bj + 1) * bs - r] = True
                    ring = rect & ~prev
                    idx_map[:, :, ch][ring] = coeff_idx
                    chain.append(coeff_idx)
                    prev = rect
                    coeff_idx += 1
                for k, ck in enumerate(chain):
                    for m in range(k, -1, -2):
                        T[chain[m], ck] = 1.0
    assert coeff_idx == 174  # torch writes 174 coefficients; #174 stays zero
    return idx_map, T


# --------------------------- Pallas kernels ----------------------------------
def ring_sum_kernel(x_ref, filt_ref, idx_ref, acc_ref, iota_ref):
    """Phase 1: x * filterBank + segment sum into NC annulus buckets (MXU)."""
    k = pl.program_id(1)

    @pl.when(k == 0)
    def _init():
        acc_ref[...] = jnp.zeros_like(acc_ref)
        # Hoisted bucket-id iota: generated once per K-split, reused every step
        # (keeps the per-step VPU work to one compare + one cast).
        iota_ref[...] = lax.broadcasted_iota(jnp.int32, iota_ref.shape, 0)

    # Hot path: f32 elementwise multiply, bf16 operands for the MXU,
    # f32 accumulation.
    weighted = (x_ref[...] * filt_ref[...]).astype(jnp.bfloat16)        # (B, TK)
    # One-hot segment matrix built transposed (NC, TK); idx streams lane-major
    # as (1, TK) and broadcasts along sublanes.
    onehot = (iota_ref[...] == idx_ref[...]).astype(jnp.bfloat16)       # (NC, TK)
    # Contract the TK (last) dims of both operands: (B,TK) x (NC,TK) -> (B,NC).
    acc_ref[...] += lax.dot_general(
        weighted, onehot,
        dimension_numbers=(((1,), (1,)), ((), ())),
        preferred_element_type=jnp.float32)


def head_kernel(part_ref, t_ref, gamma_ref, beta_ref,
                w1_ref, b1_ref, w2_ref, b2_ref, out_ref):
    """Phase 2: combine split-K partials, telescoping, BatchNorm, fc1/ReLU/fc2."""
    acc = part_ref[0]
    for s in range(1, NSPLIT):
        acc = acc + part_ref[s]                                         # (B, NC)
    # annulus sums -> coefficients (telescoping subtraction chain)
    coeff = jnp.dot(acc, t_ref[...], preferred_element_type=jnp.float32)  # (B,175)
    # BatchNorm1d, training-mode batch statistics (biased variance).
    # TODO(synk): running_mean/running_var buffer updates are not replicated.
    mean = jnp.mean(coeff, axis=0, keepdims=True)
    var = jnp.mean(jnp.square(coeff - mean), axis=0, keepdims=True)
    xhat = (coeff - mean) * lax.rsqrt(var + BN_EPS)
    h = xhat * gamma_ref[...] + beta_ref[...]
    # fc1 + ReLU + fc2
    h = jnp.dot(h, w1_ref[...], preferred_element_type=jnp.float32) + b1_ref[...]
    h = jnp.maximum(h, 0.0)
    out = jnp.dot(h, w2_ref[...], preferred_element_type=jnp.float32) + b2_ref[...]
    out_ref[...] = out.astype(out_ref.dtype)


def dft_ring_forward(x, fbank, idx_map, t_mat, gamma, beta, w1, b1, w2, b2):
    B = x.shape[0]
    C = w2.shape[1]
    K = IMAGE_SIZE * IMAGE_SIZE * 3
    inner_steps = pl.cdiv(pl.cdiv(K, TK), NSPLIT)
    Kpad = NSPLIT * inner_steps * TK

    # Lane-major flattening (row-major H, W, C order). Padding maps x/filt to 0
    # and idx to the DUMP bucket whose T row is all zeros.
    x_flat = jnp.pad(x.reshape(B, K), ((0, 0), (0, Kpad - K)))
    filt_flat = jnp.pad(fbank.reshape(1, K), ((0, 0), (0, Kpad - K)))
    idx_flat = jnp.pad(idx_map.reshape(1, K), ((0, 0), (0, Kpad - K)),
                       constant_values=DUMP)

    kmap = lambda p, k: (0, p * inner_steps + k)
    grid_spec = pltpu.PrefetchScalarGridSpec(
        num_scalar_prefetch=0,
        grid=(NSPLIT, inner_steps),
        in_specs=[
            pl.BlockSpec((B, TK), kmap),             # x           (lane-major)
            pl.BlockSpec((1, TK), kmap),             # filterBank  (lane-major)
            pl.BlockSpec((1, TK), kmap),             # bucket idx  (lane-major)
        ],
        # One (B, NC) partial accumulator per K-split; leading dim squeezed.
        out_specs=pl.BlockSpec((None, B, NC), lambda p, k: (p, 0, 0)),
        scratch_shapes=[pltpu.VMEM((NC, TK), jnp.int32)],   # hoisted iota
    )
    partials = pl.pallas_call(
        ring_sum_kernel,
        out_shape=jax.ShapeDtypeStruct((NSPLIT, B, NC), jnp.float32),
        grid_spec=grid_spec,
        compiler_params=pltpu.CompilerParams(
            dimension_semantics=("parallel", "arbitrary"),
            vmem_limit_bytes=48 * 1024 * 1024),
    )(x_flat, filt_flat, idx_flat)

    # Tiny tail: everything fits in VMEM, single invocation (no grid). The
    # constant operands (T, BN affine, fc weights) live only here, so they are
    # never (double-)buffered alongside the hot K-loop.
    return pl.pallas_call(
        head_kernel,
        out_shape=jax.ShapeDtypeStruct((B, C), jnp.float32),
    )(partials, t_mat, gamma, beta, w1, b1, w2, b2)


# --------------------------- numpy reference ---------------------------------
def reference_forward(x, fb32, gamma, beta, w1, b1, w2, b2):
    """Torch-forward reference. The kernel feeds the MXU bf16 operands, so the
    reference applies the same bf16 quantization to x*filterBank and does the
    remainder (segment sums, telescoping, BN, FCs) in float64."""
    prod32 = x.astype(np.float32) * fb32[None].astype(np.float32)
    prod = np.asarray(
        jnp.asarray(prod32).astype(jnp.bfloat16).astype(jnp.float32)
    ).astype(np.float64)
    B = x.shape[0]
    coeff = np.zeros((B, NUM_COEFF), np.float64)
    ci = 0
    for layer in range(1, 4):
        maxR = get_dim(layer)
        bs = IMAGE_SIZE // layer
        for bi in range(layer):
            for bj in range(layer):
                for r in range(maxR - 1, -1, -4):
                    xm, xM = bi * bs + r, (bi + 1) * bs - r
                    ym, yM = bj * bs + r, (bj + 1) * bs - r
                    coeff[:, ci] = prod[:, xm:xM, ym:yM, layer - 1].sum(axis=(1, 2))
                    if r < maxR - 1:
                        coeff[:, ci] -= coeff[:, ci - 1]
                    ci += 1
    mean = coeff.mean(axis=0, keepdims=True)
    var = coeff.var(axis=0, keepdims=True)
    xhat = (coeff - mean) / np.sqrt(var + BN_EPS)
    h = xhat * gamma[None] + beta[None]
    h = np.maximum(h @ w1 + b1[None], 0.0)
    return h @ w2 + b2[None]


if __name__ == "__main__":
    B, C = 2, 10

    key = jax.random.PRNGKey(0)
    keys = jax.random.split(key, len(RING_PARAM_SPECS) + 5)

    ring_params = {}
    for i, (name, lvl) in enumerate(RING_PARAM_SPECS):
        ring_params[name] = np.asarray(
            jax.random.uniform(keys[i], (get_dim(lvl),), dtype=jnp.float32))

    k_w1, k_b1, k_w2, k_b2, k_x = keys[len(RING_PARAM_SPECS):]
    lim1 = 1.0 / np.sqrt(NUM_COEFF)
    w1 = np.asarray(jax.random.uniform(k_w1, (NUM_COEFF, HIDDEN), jnp.float32, -lim1, lim1))
    b1 = np.asarray(jax.random.uniform(k_b1, (HIDDEN,), jnp.float32, -lim1, lim1))
    lim2 = 1.0 / np.sqrt(HIDDEN)
    w2 = np.asarray(jax.random.uniform(k_w2, (HIDDEN, C), jnp.float32, -lim2, lim2))
    b2 = np.asarray(jax.random.uniform(k_b2, (C,), jnp.float32, -lim2, lim2))
    gamma = np.ones((NUM_COEFF,), np.float32)
    beta = np.zeros((NUM_COEFF,), np.float32)

    x = np.asarray(jax.random.uniform(
        k_x, (B, IMAGE_SIZE, IMAGE_SIZE, 3), dtype=jnp.float32))

    fb32 = build_filter_bank(ring_params, np.float32)
    idx_map, T = build_index_map_and_T()

    out = dft_ring_forward(
        jnp.asarray(x), jnp.asarray(fb32), jnp.asarray(idx_map), jnp.asarray(T),
        jnp.asarray(gamma).reshape(1, -1), jnp.asarray(beta).reshape(1, -1),
        jnp.asarray(w1), jnp.asarray(b1).reshape(1, -1),
        jnp.asarray(w2), jnp.asarray(b2).reshape(1, -1))
    out = jax.block_until_ready(out)

    ref = reference_forward(x, fb32,
                            gamma.astype(np.float64), beta.astype(np.float64),
                            w1.astype(np.float64), b1.astype(np.float64),
                            w2.astype(np.float64), b2.astype(np.float64))
    np.testing.assert_allclose(np.asarray(out), ref, rtol=3e-2, atol=3e-2)
    print("KERNEL_OK")
</pallas_src>

<mosaic_0001>
module attributes {stable_mosaic.version = 11 : i64} {
  func.func @ring_sum_kernel(%arg0: i32, %arg1: i32, %arg2: memref<2x8192xf32, #tpu.memory_space<vmem>>, %arg3: memref<1x8192xf32, #tpu.memory_space<vmem>>, %arg4: memref<1x8192xi32, #tpu.memory_space<vmem>>, %arg5: memref<1x2x176xf32, #tpu.memory_space<vmem>>, %arg6: memref<176x8192xi32, #tpu.memory_space<vmem>>) attributes {dimension_semantics = [#tpu.dimension_semantics<parallel>, #tpu.dimension_semantics<arbitrary>], iteration_bounds = array<i64: 2, 10>, scalar_prefetch = 0 : i64, scratch_operands = 1 : i64, tpu.core_type = #tpu.core_type<tc>, window_params = [{transform_indices = @transform_0, window_bounds = array<i64: 2, 8192>}, {transform_indices = @transform_1, window_bounds = array<i64: 1, 8192>}, {transform_indices = @transform_2, window_bounds = array<i64: 1, 8192>}, {transform_indices = @transform_3, window_bounds = array<i64: 1, 2, 176>}]} {
    %c0_i32 = arith.constant 0 : i32
    %0 = arith.cmpi eq, %arg1, %c0_i32 : i32
    %1 = arith.extui %0 : i1 to i32
    %c0_i32_0 = arith.constant 0 : i32
    %2 = arith.cmpi ne, %1, %c0_i32_0 : i32
    scf.if %2 {
      %cst_14 = arith.constant 0.000000e+00 : f32
      %22 = vector.broadcast %cst_14 : f32 to vector<2x176xf32>
      %c0_15 = arith.constant 0 : index
      %c0_16 = arith.constant 0 : index
      %c0_17 = arith.constant 0 : index
      %23 = vector.load %arg5[%c0_15, %c0_16, %c0_17] : memref<1x2x176xf32, #tpu.memory_space<vmem>>, vector<1x2x176xf32>
      %24 = vector.shape_cast %23 : vector<1x2x176xf32> to vector<2x176xf32>
      %25 = vector.shape_cast %22 : vector<2x176xf32> to vector<1x2x176xf32>
      tpu.vector_store %arg5[%c0_15, %c0_16, %c0_17], %25 {strides = array<i32>} : memref<1x2x176xf32, #tpu.memory_space<vmem>>, vector<1x2x176xf32>,
      %26 = tpu.iota {dimensions = array<i32: 0>} : vector<176x8192xi32>
      %c0_18 = arith.constant 0 : index
      %c0_19 = arith.constant 0 : index
      %27 = vector.load %arg6[%c0_18, %c0_19] : memref<176x8192xi32, #tpu.memory_space<vmem>>, vector<176x8192xi32>
      tpu.vector_store %arg6[%c0_18, %c0_19], %26 {strides = array<i32>} : memref<176x8192xi32, #tpu.memory_space<vmem>>, vector<176x8192xi32>,
    } else {
    }
    %c0 = arith.constant 0 : index
    %c0_1 = arith.constant 0 : index
    %3 = vector.load %arg2[%c0, %c0_1] : memref<2x8192xf32, #tpu.memory_space<vmem>>, vector<2x8192xf32>
    %c0_2 = arith.constant 0 : index
    %c0_3 = arith.constant 0 : index
    %4 = vector.load %arg3[%c0_2, %c0_3] : memref<1x8192xf32, #tpu.memory_space<vmem>>, vector<1x8192xf32>
    %5 = vector.broadcast %4 : vector<1x8192xf32> to vector<2x8192xf32>
    %6 = arith.mulf %3, %5 : vector<2x8192xf32>
    %7 = arith.truncf %6 : vector<2x8192xf32> to vector<2x8192xbf16>
    %c0_4 = arith.constant 0 : index
    %c0_5 = arith.constant 0 : index
    %8 = vector.load %arg6[%c0_4, %c0_5] : memref<176x8192xi32, #tpu.memory_space<vmem>>, vector<176x8192xi32>
    %c0_6 = arith.constant 0 : index
    %c0_7 = arith.constant 0 : index
    %9 = vector.load %arg4[%c0_6, %c0_7] : memref<1x8192xi32, #tpu.memory_space<vmem>>, vector<1x8192xi32>
    %10 = vector.broadcast %9 : vector<1x8192xi32> to vector<176x8192xi32>
    %11 = arith.cmpi eq, %8, %10 : vector<176x8192xi32>
    %12 = arith.extui %11 : vector<176x8192xi1> to vector<176x8192xi32>
    %13 = arith.sitofp %12 : vector<176x8192xi32> to vector<176x8192xf32>
    %14 = arith.truncf %13 : vector<176x8192xf32> to vector<176x8192xbf16>
    %c0_8 = arith.constant 0 : index
    %c0_9 = arith.constant 0 : index
    %c0_10 = arith.constant 0 : index
    %15 = vector.load %arg5[%c0_8, %c0_9, %c0_10] : memref<1x2x176xf32, #tpu.memory_space<vmem>>, vector<1x2x176xf32>
    %16 = vector.shape_cast %15 : vector<1x2x176xf32> to vector<2x176xf32>
    %cst = arith.constant dense<0.000000e+00> : vector<2x176xf32>
    %17 = tpu.matmul %7, %14, %cst {dimension_numbers = #tpu.dot_dimension_numbers<[1], [1], [0], [0], [0, 0, 1, 0], [], []>} : vector<2x8192xbf16>, vector<176x8192xbf16>, vector<2x176xf32> -> vector<2x176xf32>
    %18 = arith.addf %16, %17 : vector<2x176xf32>
    %c0_11 = arith.constant 0 : index
    %c0_12 = arith.constant 0 : index
    %c0_13 = arith.constant 0 : index
    %19 = vector.load %arg5[%c0_11, %c0_12, %c0_13] : memref<1x2x176xf32, #tpu.memory_space<vmem>>, vector<1x2x176xf32>
    %20 = vector.shape_cast %19 : vector<1x2x176xf32> to vector<2x176xf32>
    %21 = vector.shape_cast %18 : vector<2x176xf32> to vector<1x2x176xf32>
    tpu.vector_store %arg5[%c0_11, %c0_12, %c0_13], %21 {strides = array<i32>} : memref<1x2x176xf32, #tpu.memory_space<vmem>>, vector<1x2x176xf32>,
    return
  }
  func.func @transform_0(%arg0: i32, %arg1: i32) -> (i32, i32) {
    %c10_i32 = arith.constant 10 : i32
    %0 = arith.muli %arg0, %c10_i32 : i32
    %1 = arith.addi %0, %arg1 : i32
    %c0_i32 = arith.constant 0 : i32
    %c0_i32_0 = arith.constant 0 : i32
    return %c0_i32, %1 : i32, i32
  }
  func.func @transform_1(%arg0: i32, %arg1: i32) -> (i32, i32) {
    %c10_i32 = arith.constant 10 : i32
    %0 = arith.muli %arg0, %c10_i32 : i32
    %1 = arith.addi %0, %arg1 : i32
    %c0_i32 = arith.constant 0 : i32
    %c0_i32_0 = arith.constant 0 : i32
    return %c0_i32, %1 : i32, i32
  }
  func.func @transform_2(%arg0: i32, %arg1: i32) -> (i32, i32) {
    %c10_i32 = arith.constant 10 : i32
    %0 = arith.muli %arg0, %c10_i32 : i32
    %1 = arith.addi %0, %arg1 : i32
    %c0_i32 = arith.constant 0 : i32
    %c0_i32_0 = arith.constant 0 : i32
    return %c0_i32, %1 : i32, i32
  }
  func.func @transform_3(%arg0: i32, %arg1: i32) -> (i32, i32, i32) {
    %c0_i32 = arith.constant 0 : i32
    %c0_i32_0 = arith.constant 0 : i32
    %c0_i32_1 = arith.constant 0 : i32
    return %arg0, %c0_i32, %c0_i32_0 : i32, i32, i32
  }
}

</mosaic_0001>

<bundles_post_ra>
// kernel: tpu_custom_call.1
= control target key start
LH: loop header
LB: loop body
LE: loop exit
PB: predicated region body
PF: predicated region fallthrough
CT: control target
= control target key end

     0   :  { %s19277_s0 = inlined_call_operand.hbm [shape: f32[2,163840], index: 0, kind: input, shape index: {}]   ;;  %s19278_s1 = inlined_call_operand.hbm [shape: f32[1,163840], index: 1, kind: input, shape index: {}]   ;;  %s19279_s2 = inlined_call_operand.hbm [shape: s32[1,163840], index: 2, kind: input, shape index: {}]   ;;  %s19280_s3 = inlined_call_operand.hbm [shape: f32[2,2,176], index: 3, kind: output, shape index: {}]  }
   0x1   :  { %19293 = sst [smem:[#allocation22_spill]] %s19278_s1 }
   0x2   :  { %8 = vsyncpa [#allocation4], 0 }
   0x3   :  { %10 = vsyncpa [#allocation4 + $0x1], 0 }
   0x4   :  { %11 = vsyncpa [#allocation7], 0 }
   0x5   :  { %13 = vsyncpa [#allocation7 + $0x1], 0 }
   0x6   :  { %14 = vsyncpa [#allocation5], 0 }
   0x7   :  { %16 = vsyncpa [#allocation5 + $0x1], 0  ;;  %s14163_s12 = smov 0   ;;  %s14165_s13 = smov 0  }
   0x8   :  { %s14167_s14 = smov 0   ;;  %s14169_s15 = smov 0  }
   0x9   :  { %s14171_s16 = smov 0   ;;  %s14173_s17 = smov 0  }
   0xa   :  { %s14175_s18 = smov 0   ;;  %s14177_s19 = smov 0  }
   0xb   :  { %s14179_s20 = smov 0   ;;  %s14181_s21 = smov 0  }
   0xc   :  { %s14183_s22 = smov 0  }
   0xd LB: > { %19294 = sst [smem:[#allocation13_spill]] %s14102_s14  ;;  %s14217_s23 = sadd.s32 4294967295, %s14134_s22   ;;  %s14134_s22 = sphi %s14183_s22, %s22_s22   ;;  %s14130_s21 = sphi %s14181_s21, %s19432_s21   ;;  %s14126_s20 = sphi %s14179_s20, %s19431_s20   ;;  %s14122_s19 = sphi %s14177_s19, %s19430_s19   ;;  %s14118_s18 = sphi %s14175_s18, %s19429_s18   ;;  %s14114_s17 = sphi %s14173_s17, %s19428_s17   ;;  %s14110_s16 = sphi %s14171_s16, %s19436_s16   ;;  %s14106_s15 = sphi %s14169_s15, %s19435_s15   ;;  %s14102_s14 = sphi %s14167_s14, %s19426_s14   ;;  %s14098_s13 = sphi %s14165_s13, %s19434_s13   ;;  %s14094_s12 = sphi %s14163_s12, %s19433_s12  }
   0xe   : > { %19295 = sst [smem:[#allocation14_spill]] %s14114_s17  ;;  %s10822_s24 = sadd.s32 4294967294, %s14134_s22  }
   0xf   : > { %19296 = sst [smem:[#allocation15_spill]] %s14126_s20  ;;  %s31_s25 = sadd.s32 1, %s14126_s20 }
  0x10   : > { %19297 = sst [smem:[#allocation16_spill]] %s14130_s21  ;;  %s34_s26 = sadd.s32 1, %s14130_s21 }
  0x11   : > { %p32_p0 = scmp.ge.s32.totalorder %s31_s25, 10  ;;  %s38_s27 = smul.u32 10, %s14130_s21 }
  0x12   : > { %s45_s28 = sadd.s32 1, %s14114_s17  ;;  %p52_p1 = scmp.ne.s32.totalorder %s14114_s17, %s14110_s16 }
  0x13   : > { %s19438_s25 = smov (%p32_p0, %s31_s25), 0  ;;  %s19440_s26 = smov (!%p32_p0, %s34_s26), %s14130_s21 }
  0x14   : > { %19298 = sst [smem:[#allocation17_spill]] %s19438_s25  ;;  %s14230_s29 = sadd.s32 %s14126_s20, %s38_s27 }
  0x15   : > { %p53_p2 = scmp.eq.s32.totalorder %s14134_s22, 0  ;;  %p36_p3 = scmp.ge.s32.totalorder %s19440_s26, 2 }
  0x16   : > { %p58_p4 = scmp.ne.s32.totalorder %s14110_s16, %s14106_s15  ;;  %p59_p6 = scmp.eq.s32.totalorder %s14217_s23, 0 }
  0x17   : > { %p14234_p5 = por %p53_p2, %p52_p1  ;;  %s19442_s26 = smov (%p36_p3, %s19440_s26), 0 }
  0x18   : > { %19300 = sst [smem:[#allocation18_spill]] %s19442_s26  ;;  %p14241_p7 = por %p59_p6, %p58_p4 }
  0x19   : > { %s131_s5 = sadd.s32 1, %s14102_s14  ;;  %s40_s6 = smul.u32 10, %s19442_s26 }
  0x1a   : > { %s19301_s4 = scalar_select %p14241_p7, 1, 0 }
  0x1b   : > { %s128_s7 = ssub.s32 %s14130_s21, %s19442_s26  ;;  %p141_p9 = scmp.ne.s32.totalorder %s14102_s14, %s14098_s13 }
  0x1c   : > { %p129_p8 = scmp.eq.s32.totalorder %s128_s7, 0  ;;  %s41_s8 = sadd.s32 %s40_s6, %s19438_s25 }
  0x1d   : > { %p142_p10 = scmp.eq.s32.totalorder %s14217_s23, 19  ;;  %s42_s9 = ssub.s32 %s14230_s29, %s41_s8 }
  0x1e   : > { %p147_p11 = scmp.ne.s32.totalorder %s14098_s13, %s14094_s12  ;;  %p43_p12 = scmp.eq.s32.totalorder %s42_s9, 0 }
  0x1f   : > { %p14256_p13 = por %p142_p10, %p141_p9  ;;  %p148_p0 = scmp.eq.s32.totalorder %s10822_s24, 19 }
  0x20   : > { %s14261_s11 = scalar_select %p129_p8, %s14102_s14, %s131_s5  }
  0x21   : > { %s19302_s10 = scalar_select %p14256_p13, 1, 0 }
  0x22   : > { %19303 = sst [smem:[#allocation19_spill]] %s14261_s11  ;;  %p13809_p1 = scmp.lt.s32.totalorder %s14134_s22, 20 }
  0x23   : > { %s14264_s15 = scalar_select %p43_p12, %s14114_s17, %s45_s28  }
  0x24   : > { %s14270_s27 = sand.u32 1, %s14114_s17   ;;  %p14272_p2 = por %p148_p0, %p147_p11 }
  0x25   : > { %19304 = sst [smem:[#allocation20_spill]] %s14264_s15  ;;  %s189_s7 = sand.u32 1, %s14134_s22  }
  0x26   : > { %s19305_s6 = scalar_select %p14272_p2, 1, 0 }
  0x27   : > { %p14279_p3 = pnand %p13809_p1, %p14234_p5  ;;  %s19285_s28 = sshll.u32 %s14270_s27, 6 }
  0x28   : > { %19306 = sst [smem:[#allocation21_spill]] %s19305_s6  ;;  %s19286_s5 = sshll.u32 %s14230_s29, 10 }
  0x29   : > { %s19307_s8 = scalar_select %p14279_p3, 1, 0 }
  0x2a   : > { %s19308_s1 = sld [smem:[#allocation22_spill]]  ;;  %s193_s25 = scalar_lea.vmem [#allocation6], %s19285_s28 }
  0x2b   : > { %s203_s30 = sshll.u32 %s193_s25, 4  ;;  %s14296_s21 = scalar_lea.sflag [#allocation7], %s189_s7  ;;  %s14294_s30 = int_to_ptr.vmem [resolvable:$true] %s203_s30 }
  0x2c   : > { %p14302_p5 = pneg %p14279_p3 }
  0x30   : > { %s14290_s26 = scalar_lea.hbm %s19308_s1, %s19286_s5  ;;  %s13923_s28 = scalar_lea.hbm %s19308_s1, 20480 }
  0x31   : > { %s13918_s20 = scalar_lea.hbm %s14290_s26, 1024  ;;  %p13924_p9 = scmp.lt.u32.totalorder %s14290_s26, %s19308_s1 }
  0x32   : > { %p13919_p4 = scmp.ne.s32.totalorder %s14290_s26, %s13918_s20  ;;  %p13925_p10 = scmp.lt.u32.totalorder %s13923_s28, %s13918_s20 }
  0x33   : > { %p13927_p12 = scmp.lt.u32.totalorder %s13918_s20, %s14290_s26 }
  0x34   : > { %p13921_p6 = pnand %p14302_p5, %p13919_p4  ;;  %p13926_p11 = por %p13925_p10, %p13924_p9 }
  0x36   : > { %p13922_p8 = pneg %p13921_p6  ;;  %p13928_p0 = por %p13927_p12, %p13926_p11 }
  0x38   : > { %p13929_p1 = pnand %p13928_p0, %p13922_p8 }
  0x3a   : > { %13932 = shalt.err (!%p13929_p1)
}
  0x3b   : > { %s13933_s7 = scalar_lea.vmem %s14294_s30, 1024  ;;  %s14136_s24 = smov [#allocation6]  }
  0x3c   : > { %p13934_p4 = scmp.ne.s32.totalorder %s14294_s30, %s13933_s7  ;;  %s13938_s9 = sshll.u32 %s14136_s24, 4  ;;  %s13939_s9 = int_to_ptr.vmem [resolvable:$false] %s13938_s9 }
  0x3d   : > { %s13940_s5 = scalar_lea.vmem %s13939_s9, 2048  ;;  %p13941_p13 = scmp.lt.s32.totalorder %s14294_s30, %s13939_s9 }
  0x3e   : > { %p13936_p6 = pnand %p13934_p4, %p14302_p5  ;;  %p13942_p7 = scmp.lt.s32.totalorder %s13940_s5, %s13933_s7 }
  0x40   : > { %p13937_p2 = pneg %p13936_p6  ;;  %p13943_p9 = por %p13942_p7, %p13941_p13 }
  0x42   : > { %p13944_p10 = pnand %p13943_p9, %p13937_p2 }
  0x44   : > { %13947 = shalt.err (!%p13944_p10)
}
  0x45   : > { %13801 = dma.hbm_to_vmem [thread:$0]  (!%p14279_p3), %s14290_s26, 1024, %s14294_s30, %s14296_s21  }
  0x46   : > { %s19310_s20 = sshll.u32 %s14230_s29, 10  ;;  %p10834_p7 = scmp.ge.s32.totalorder %s14134_s22, 1 }
  0x47   : > { %s14331_s7 = scalar_lea.hbm %s19279_s2, %s19310_s20  ;;  %p229_p13 = scmp.lt.s32.totalorder %s14134_s22, 21 }
  0x48   : > { %s10825_s9 = sshll.u32 %s14270_s27, 7  ;;  %s13661_s5 = sshll.u32 %s14230_s29, 11 }
  0x49   : > { %p14335_p2 = pnand %p10834_p7, %p229_p13  ;;  %s14344_s11 = scalar_lea.hbm %s19277_s0, %s13661_s5 }
  0x4a   : > { %s172_s26 = scalar_lea.vmem [#allocation3], %s10825_s9  ;;  %s19312_s20 = sshll.u32 %s14270_s27, 6 }
  0x4b   : > { %s19311_s24 = scalar_select %p14335_p2, 1, 0 }
  0x4c   : > { %s182_s30 = sshll.u32 %s172_s26, 4  ;;  %s14350_s28 = scalar_lea.vmem [#allocation8], %s19312_s20  ;;  %s14346_s30 = int_to_ptr.vmem [resolvable:$true] %s182_s30 }
  0x4d   : > { %s224_s25 = sshll.u32 %s14350_s28, 4  ;;  %s169_s14 = scalar_lea.sflag [#allocation4], %s14270_s27  ;;  %s225_s25 = int_to_ptr.vmem [resolvable:$true] %s224_s25 }
  0x4e   : > { %s13948_s29 = scalar_lea.hbm %s14344_s11, 2048  ;;  %s13953_s5 = scalar_lea.hbm %s19277_s0, 40960 }
  0x4f   : > { %p13949_p8 = scmp.ne.s32.totalorder %s14344_s11, %s13948_s29  ;;  %p13954_p0 = scmp.lt.u32.totalorder %s14344_s11, %s19277_s0 }
  0x50   : > { %p13955_p1 = scmp.lt.u32.totalorder %s13953_s5, %s13948_s29  ;;  %p13957_p6 = scmp.lt.u32.totalorder %s13948_s29, %s14344_s11 }
  0x51   : > { %p13951_p11 = pnand %p13949_p8, %p14302_p5 }
  0x52   : > { %p13956_p4 = por %p13955_p1, %p13954_p0 }
  0x53   : > { %p13952_p12 = pneg %p13951_p11 }
  0x54   : > { %p13958_p9 = por %p13957_p6, %p13956_p4 }
  0x56   : > { %p13959_p10 = pnand %p13958_p9, %p13952_p12 }
  0x58   : > { %13962 = shalt.err (!%p13959_p10)
}
  0x59   : > { %s13963_s27 = scalar_lea.vmem %s14346_s30, 2048  ;;  %s14137_s26 = smov [#allocation3]  }
  0x5a   : > { %p13964_p7 = scmp.ne.s32.totalorder %s14346_s30, %s13963_s27  ;;  %s13968_s20 = sshll.u32 %s14137_s26, 4  ;;  %s13969_s20 = int_to_ptr.vmem [resolvable:$false] %s13968_s20 }
  0x5b   : > { %s13970_s6 = scalar_lea.vmem %s13969_s20, 4096  ;;  %p13971_p11 = scmp.lt.s32.totalorder %s14346_s30, %s13969_s20 }
  0x5c   : > { %p13966_p13 = pnand %p13964_p7, %p14302_p5  ;;  %p13972_p2 = scmp.lt.s32.totalorder %s13970_s6, %s13963_s27 }
  0x5e   : > { %p13967_p8 = pneg %p13966_p13  ;;  %p13973_p0 = por %p13972_p2, %p13971_p11 }
  0x60   : > { %p13974_p1 = pnand %p13973_p0, %p13967_p8 }
  0x62   : > { %13977 = shalt.err (!%p13974_p1)
}
  0x63   : > { %13798 = dma.hbm_to_vmem [thread:$0]  (!%p14279_p3), %s14344_s11, 2048, %s14346_s30, %s169_s14  }
  0x64   : > { %s13978_s29 = scalar_lea.hbm %s14331_s7, 1024  ;;  %s13983_s5 = scalar_lea.hbm %s19279_s2, 20480 }
  0x65   : > { %p13979_p12 = scmp.ne.s32.totalorder %s14331_s7, %s13978_s29  ;;  %p13984_p6 = scmp.lt.u32.totalorder %s14331_s7, %s19279_s2 }
  0x66   : > { %p13985_p9 = scmp.lt.u32.totalorder %s13983_s5, %s13978_s29  ;;  %p13987_p7 = scmp.lt.u32.totalorder %s13978_s29, %s14331_s7 }
  0x67   : > { %p13981_p4 = pnand %p13979_p12, %p14302_p5 }
  0x68   : > { %p13986_p10 = por %p13985_p9, %p13984_p6 }
  0x69   : > { %p13982_p2 = pneg %p13981_p4 }
  0x6a   : > { %p13988_p13 = por %p13987_p7, %p13986_p10 }
  0x6c   : > { %p13989_p8 = pnand %p13988_p13, %p13982_p2 }
  0x6e   : > { %13992 = shalt.err (!%p13989_p8)
}
  0x6f   : > { %s13993_s14 = scalar_lea.vmem %s225_s25, 1024  ;;  %s14138_s11 = smov [#allocation8]  }
  0x70   : > { %p13994_p11 = scmp.ne.s32.totalorder %s225_s25, %s13993_s14  ;;  %s13998_s30 = sshll.u32 %s14138_s11, 4  ;;  %s13999_s30 = int_to_ptr.vmem [resolvable:$false] %s13998_s30 }
  0x71   : > { %s14000_s28 = scalar_lea.vmem %s13999_s30, 2048  ;;  %p14001_p12 = scmp.lt.s32.totalorder %s225_s25, %s13999_s30 }
  0x72   : > { %p13996_p0 = pnand %p13994_p11, %p14302_p5  ;;  %p14002_p4 = scmp.lt.s32.totalorder %s14000_s28, %s13993_s14 }
  0x74   : > { %p13997_p1 = pneg %p13996_p0  ;;  %p14003_p3 = por %p14002_p4, %p14001_p12 }
  0x76   : > { %p14004_p6 = pnand %p14003_p3, %p13997_p1 }
  0x78   : > { %14007 = shalt.err (!%p14004_p6)
}
  0x79   : > { %p19313_p9 = scmp.ne.s32.totalorder %s19307_s8, 0  ;;  %p19314_p2 = scmp.ne.s32.totalorder %s19311_s24, 0 }
  0x7a   : > { %s235_s15 = sand.u32 (!%p19314_p2), 1, %s14110_s16   ;;  %p19315_p5 = scmp.ne.s32.totalorder (!%p19314_p2), %s19301_s4, 0 }
  0x7b   : > { %13804 = dma.hbm_to_vmem [thread:$0]  (!%p19313_p9), %s14331_s7, 1024, %s225_s25, %s14296_s21  }
  0x7c   : > { %233 = sbr.rel (%p19314_p2) target bundleno = 2500 (0x9c4), region = 32  ;;  %s10835_s26 = sshll.u32 (!%p19314_p2), %s235_s15, 7 }
  0x7d   : > { %s236_s20 = scalar_lea.sflag (!%p19314_p2), [#allocation4], %s235_s15  ;;  %s14398_s6 = scalar_lea.vmem (!%p19314_p2), [#allocation3], %s10835_s26 }
  0x83   : > { %14081 = dma.done.wait (%p19315_p5), %s236_s20, 2048  }
  0x84   : > { %14083 = vsyncadd (%p19315_p5), %s236_s20, 4294965248  ;;  %s244_s8 = sand.u32 1, %s14217_s23   ;;  %s10836_s29 = sshll.u32 %s235_s15, 6 }
  0x85   : > { %s245_s21 = scalar_lea.sflag [#allocation7], %s244_s8  ;;  %s14405_s7 = scalar_lea.vmem [#allocation6], %s10836_s29 }
  0x86   : > { %14085 = dma.done.wait (%p19315_p5), %s245_s21, 2048  }
  0x87   : > { %14087 = vsyncadd (%p19315_p5), %s245_s21, 4294965248  ;;  %s287_s24 = sand.u32 1, %s14098_s13   ;;  %s14414_s1 = scalar_lea.vmem [#allocation8], %s10836_s29 }
  0x88   : > { %s10838_s25 = sshll.u32 %s287_s24, 2  ;;  %p10839_p3 = scmp.ne.s32.totalorder %s14118_s18, 0 }
  0x89   : > { %s14416_s17 = scalar_lea.vmem [#allocation9], %s10838_s25  ;;  %vm304_vm0 = vcmask (!%p10839_p3), 1041408   ;;  %vm305_vm1 = vcmask (!%p10839_p3), 388098   ;;  %v308_v0 = vlaneseq (!%p10839_p3)  ;;  %v14139_v1 = vmov (!%p10839_p3), 0.0  }
  0x8a   : > { %303 = sbr.rel (%p10839_p3) target bundleno = 845 (0x34d), region = 48  ;;  %vm306_vm2 = vmor (!%p10839_p3), %vm305_vm1, %vm304_vm0 }
  0x8b   : > { %307 = vst.msk [vmem:[%s14416_s17] sm:$0xf] (!%p10839_p3), %vm306_vm2, %v14139_v1  ;;  %v14420_v2 = vshrl.u32 (!%p10839_p3), %v308_v0, 7 }
  0x8d   : > { %331 = vst [vmem:[#allocation2] sm:$0xff] (!%p10839_p3), %v14420_v2  ;;  %332 = vst [vmem:[#allocation2 + $0x8] sm:$0xff] (!%p10839_p3), %v14420_v2  ;;  %v14487_v3 = vadd.s32 (!%p10839_p3), 8, %v14420_v2  ;;  %v14490_v4 = vadd.s32 (!%p10839_p3), 16, %v14420_v2  ;;  %v14493_v5 = vadd.s32 (!%p10839_p3), 24, %v14420_v2  ;;  %v14496_v6 = vadd.s32 (!%p10839_p3), 32, %v14420_v2 }
  0x8e   : > { %333 = vst [vmem:[#allocation2 + $0x10] sm:$0xff] (!%p10839_p3), %v14420_v2  ;;  %334 = vst [vmem:[#allocation2 + $0x18] sm:$0xff] (!%p10839_p3), %v14420_v2  ;;  %v14499_v7 = vadd.s32 (!%p10839_p3), 40, %v14420_v2  ;;  %v14502_v8 = vadd.s32 (!%p10839_p3), 48, %v14420_v2  ;;  %v14505_v9 = vadd.s32 (!%p10839_p3), 56, %v14420_v2  ;;  %v14508_v10 = vadd.s32 (!%p10839_p3), 64, %v14420_v2 }
  0x8f   : > { %335 = vst [vmem:[#allocation2 + $0x20] sm:$0xff] (!%p10839_p3), %v14420_v2  ;;  %336 = vst [vmem:[#allocation2 + $0x28] sm:$0xff] (!%p10839_p3), %v14420_v2  ;;  %v14767_v11 = vadd.s32 (!%p10839_p3), 72, %v14420_v2  ;;  %v14770_v12 = vadd.s32 (!%p10839_p3), 80, %v14420_v2  ;;  %v14773_v13 = vadd.s32 (!%p10839_p3), 88, %v14420_v2  ;;  %v14776_v14 = vadd.s32 (!%p10839_p3), 96, %v14420_v2 }
  0x90   : > { %337 = vst [vmem:[#allocation2 + $0x30] sm:$0xff] (!%p10839_p3), %v14420_v2  ;;  %338 = vst [vmem:[#allocation2 + $0x38] sm:$0xff] (!%p10839_p3), %v14420_v2 }
  0x91   : > { %339 = vst [vmem:[#allocation2 + $0x40] sm:$0xff] %v14420_v2  ;;  %340 = vst [vmem:[#allocation2 + $0x48] sm:$0xff] %v14420_v2 }
  0x92   : > { %341 = vst [vmem:[#allocation2 + $0x50] sm:$0xff] %v14420_v2  ;;  %342 = vst [vmem:[#allocation2 + $0x58] sm:$0xff] %v14420_v2 }
  0x93   : > { %343 = vst [vmem:[#allocation2 + $0x60] sm:$0xff] %v14420_v2  ;;  %344 = vst [vmem:[#allocation2 + $0x68] sm:$0xff] %v14420_v2 }
  0x94   : > { %345 = vst [vmem:[#allocation2 + $0x70] sm:$0xff] %v14420_v2  ;;  %346 = vst [vmem:[#allocation2 + $0x78] sm:$0xff] %v14420_v2  ;;  %v15034_v15 = vld [vmem:[#allocation2] sm:$0xff] }
  0x95   : > { %347 = vst [vmem:[#allocation2 + $0x80] sm:$0xff] %v14420_v2  ;;  %348 = vst [vmem:[#allocation2 + $0x88] sm:$0xff] %v14420_v2  ;;  %v15037_v16 = vadd.s32 104, %v15034_v15  ;;  %v15040_v17 = vadd.s32 112, %v15034_v15  ;;  %v15043_v18 = vadd.s32 120, %v15034_v15  ;;  %v15046_v19 = vadd.s32 128, %v15034_v15 }
  0x96   : > { %349 = vst [vmem:[#allocation2 + $0x90] sm:$0xff] %v14420_v2  ;;  %350 = vst [vmem:[#allocation2 + $0x98] sm:$0xff] %v14420_v2  ;;  %v15305_v20 = vadd.s32 136, %v15034_v15  ;;  %v15308_v21 = vadd.s32 144, %v15034_v15  ;;  %v15311_v22 = vadd.s32 152, %v15034_v15  ;;  %v15314_v23 = vadd.s32 160, %v15034_v15 }
  0x97   : > { %351 = vst [vmem:[#allocation2 + $0xa0] sm:$0xff] %v14420_v2  ;;  %352 = vst [vmem:[#allocation2 + $0xa8] sm:$0xff] %v14420_v2  ;;  %v13903_v24 = vld [vmem:[#allocation2] sm:$0xff] }
  0x98   : > { %353 = vst [vmem:[#allocation2 + $0xb0] sm:$0xff] %v14420_v2  ;;  %354 = vst [vmem:[#allocation2 + $0xb8] sm:$0xff] %v14420_v2  ;;  %v15572_v25 = vadd.s32 168, %v13903_v24 }
  0x99   : > { %355 = vst [vmem:[#allocation2 + $0xc0] sm:$0xff] %v14420_v2  ;;  %356 = vst [vmem:[#allocation2 + $0xc8] sm:$0xff] %v14420_v2 }
  0x9a   : > { %357 = vst [vmem:[#allocation2 + $0xd0] sm:$0xff] %v14420_v2  ;;  %358 = vst [vmem:[#allocation2 + $0xd8] sm:$0xff] %v14420_v2 }
  0x9b   : > { %359 = vst [vmem:[#allocation2 + $0xe0] sm:$0xff] %v14420_v2  ;;  %360 = vst [vmem:[#allocation2 + $0xe8] sm:$0xff] %v14420_v2 }
  0x9c   : > { %361 = vst [vmem:[#allocation2 + $0xf0] sm:$0xff] %v14420_v2  ;;  %362 = vst [vmem:[#allocation2 + $0xf8] sm:$0xff] %v14420_v2 }
  0x9d   : > { %363 = vst [vmem:[#allocation2 + $0x100] sm:$0xff] %v14420_v2  ;;  %364 = vst [vmem:[#allocation2 + $0x108] sm:$0xff] %v14420_v2 }
  0x9e   : > { %365 = vst [vmem:[#allocation2 + $0x110] sm:$0xff] %v14420_v2  ;;  %366 = vst [vmem:[#allocation2 + $0x118] sm:$0xff] %v14420_v2 }
  0x9f   : > { %367 = vst [vmem:[#allocation2 + $0x120] sm:$0xff] %v14420_v2  ;;  %368 = vst [vmem:[#allocation2 + $0x128] sm:$0xff] %v14420_v2 }
  0xa0   : > { %369 = vst [vmem:[#allocation2 + $0x130] sm:$0xff] %v14420_v2  ;;  %370 = vst [vmem:[#allocation2 + $0x138] sm:$0xff] %v14420_v2 }
  0xa1   : > { %371 = vst [vmem:[#allocation2 + $0x140] sm:$0xff] %v14420_v2  ;;  %372 = vst [vmem:[#allocation2 + $0x148] sm:$0xff] %v14420_v2 }
  0xa2   : > { %373 = vst [vmem:[#allocation2 + $0x150] sm:$0xff] %v14420_v2  ;;  %374 = vst [vmem:[#allocation2 + $0x158] sm:$0xff] %v14420_v2 }
  0xa3   : > { %375 = vst [vmem:[#allocation2 + $0x160] sm:$0xff] %v14420_v2  ;;  %376 = vst [vmem:[#allocation2 + $0x168] sm:$0xff] %v14420_v2 }
  0xa4   : > { %377 = vst [vmem:[#allocation2 + $0x170] sm:$0xff] %v14420_v2  ;;  %378 = vst [vmem:[#allocation2 + $0x178] sm:$0xff] %v14420_v2 }
  0xa5   : > { %379 = vst [vmem:[#allocation2 + $0x180] sm:$0xff] %v14420_v2  ;;  %380 = vst [vmem:[#allocation2 + $0x188] sm:$0xff] %v14420_v2 }
  0xa6   : > { %381 = vst [vmem:[#allocation2 + $0x190] sm:$0xff] %v14420_v2  ;;  %382 = vst [vmem:[#allocation2 + $0x198] sm:$0xff] %v14420_v2 }
  0xa7   : > { %383 = vst [vmem:[#allocation2 + $0x1a0] sm:$0xff] %v14420_v2  ;;  %384 = vst [vmem:[#allocation2 + $0x1a8] sm:$0xff] %v14420_v2 }
  0xa8   : > { %385 = vst [vmem:[#allocation2 + $0x1b0] sm:$0xff] %v14420_v2  ;;  %386 = vst [vmem:[#allocation2 + $0x1b8] sm:$0xff] %v14420_v2 }
  0xa9   : > { %387 = vst [vmem:[#allocation2 + $0x1c0] sm:$0xff] %v14420_v2  ;;  %388 = vst [vmem:[#allocation2 + $0x1c8] sm:$0xff] %v14420_v2 }
  0xaa   : > { %389 = vst [vmem:[#allocation2 + $0x1d0] sm:$0xff] %v14420_v2  ;;  %390 = vst [vmem:[#allocation2 + $0x1d8] sm:$0xff] %v14420_v2 }
  0xab   : > { %391 = vst [vmem:[#allocation2 + $0x1e0] sm:$0xff] %v14420_v2  ;;  %392 = vst [vmem:[#allocation2 + $0x1e8] sm:$0xff] %v14420_v2 }
  0xac   : > { %393 = vst [vmem:[#allocation2 + $0x1f0] sm:$0xff] %v14420_v2  ;;  %394 = vst [vmem:[#allocation2 + $0x1f8] sm:$0xff] %v14420_v2 }
  0xad   : > { %395 = vst [vmem:[#allocation2 + $0x200] sm:$0xff] %v14487_v3  ;;  %396 = vst [vmem:[#allocation2 + $0x208] sm:$0xff] %v14487_v3 }
  0xae   : > { %397 = vst [vmem:[#allocation2 + $0x210] sm:$0xff] %v14487_v3  ;;  %398 = vst [vmem:[#allocation2 + $0x218] sm:$0xff] %v14487_v3 }
  0xaf   : > { %399 = vst [vmem:[#allocation2 + $0x220] sm:$0xff] %v14487_v3  ;;  %400 = vst [vmem:[#allocation2 + $0x228] sm:$0xff] %v14487_v3 }
  0xb0   : > { %401 = vst [vmem:[#allocation2 + $0x230] sm:$0xff] %v14487_v3  ;;  %402 = vst [vmem:[#allocation2 + $0x238] sm:$0xff] %v14487_v3 }
  0xb1   : > { %403 = vst [vmem:[#allocation2 + $0x240] sm:$0xff] %v14487_v3  ;;  %404 = vst [vmem:[#allocation2 + $0x248] sm:$0xff] %v14487_v3 }
  0xb2   : > { %405 = vst [vmem:[#allocation2 + $0x250] sm:$0xff] %v14487_v3  ;;  %406 = vst [vmem:[#allocation2 + $0x258] sm:$0xff] %v14487_v3 }
  0xb3   : > { %407 = vst [vmem:[#allocation2 + $0x260] sm:$0xff] %v14487_v3  ;;  %408 = vst [vmem:[#allocation2 + $0x268] sm:$0xff] %v14487_v3 }
  0xb4   : > { %409 = vst [vmem:[#allocation2 + $0x270] sm:$0xff] %v14487_v3  ;;  %410 = vst [vmem:[#allocation2 + $0x278] sm:$0xff] %v14487_v3 }
  0xb5   : > { %411 = vst [vmem:[#allocation2 + $0x280] sm:$0xff] %v14487_v3  ;;  %412 = vst [vmem:[#allocation2 + $0x288] sm:$0xff] %v14487_v3 }
  0xb6   : > { %413 = vst [vmem:[#allocation2 + $0x290] sm:$0xff] %v14487_v3  ;;  %414 = vst [vmem:[#allocation2 + $0x298] sm:$0xff] %v14487_v3 }
  0xb7   : > { %415 = vst [vmem:[#allocation2 + $0x2a0] sm:$0xff] %v14487_v3  ;;  %416 = vst [vmem:[#allocation2 + $0x2a8] sm:$0xff] %v14487_v3 }
  0xb8   : > { %417 = vst [vmem:[#allocation2 + $0x2b0] sm:$0xff] %v14487_v3  ;;  %418 = vst [vmem:[#allocation2 + $0x2b8] sm:$0xff] %v14487_v3 }
  0xb9   : > { %419 = vst [vmem:[#allocation2 + $0x2c0] sm:$0xff] %v14487_v3  ;;  %420 = vst [vmem:[#allocation2 + $0x2c8] sm:$0xff] %v14487_v3 }
  0xba   : > { %421 = vst [vmem:[#allocation2 + $0x2d0] sm:$0xff] %v14487_v3  ;;  %422 = vst [vmem:[#allocation2 + $0x2d8] sm:$0xff] %v14487_v3 }
  0xbb   : > { %423 = vst [vmem:[#allocation2 + $0x2e0] sm:$0xff] %v14487_v3  ;;  %424 = vst [vmem:[#allocation2 + $0x2e8] sm:$0xff] %v14487_v3 }
  0xbc   : > { %425 = vst [vmem:[#allocation2 + $0x2f0] sm:$0xff] %v14487_v3  ;;  %426 = vst [vmem:[#allocation2 + $0x2f8] sm:$0xff] %v14487_v3 }
  0xbd   : > { %427 = vst [vmem:[#allocation2 + $0x300] sm:$0xff] %v14487_v3  ;;  %428 = vst [vmem:[#allocation2 + $0x308] sm:$0xff] %v14487_v3 }
  0xbe   : > { %429 = vst [vmem:[#allocation2 + $0x310] sm:$0xff] %v14487_v3  ;;  %430 = vst [vmem:[#allocation2 + $0x318] sm:$0xff] %v14487_v3 }
  0xbf   : > { %431 = vst [vmem:[#allocation2 + $0x320] sm:$0xff] %v14487_v3  ;;  %432 = vst [vmem:[#allocation2 + $0x328] sm:$0xff] %v14487_v3 }
  0xc0   : > { %433 = vst [vmem:[#allocation2 + $0x330] sm:$0xff] %v14487_v3  ;;  %434 = vst [vmem:[#allocation2 + $0x338] sm:$0xff] %v14487_v3 }
  0xc1   : > { %435 = vst [vmem:[#allocation2 + $0x340] sm:$0xff] %v14487_v3  ;;  %436 = vst [vmem:[#allocation2 + $0x348] sm:$0xff] %v14487_v3 }
  0xc2   : > { %437 = vst [vmem:[#allocation2 + $0x350] sm:$0xff] %v14487_v3  ;;  %438 = vst [vmem:[#allocation2 + $0x358] sm:$0xff] %v14487_v3 }
  0xc3   : > { %439 = vst [vmem:[#allocation2 + $0x360] sm:$0xff] %v14487_v3  ;;  %440 = vst [vmem:[#allocation2 + $0x368] sm:$0xff] %v14487_v3 }
  0xc4   : > { %441 = vst [vmem:[#allocation2 + $0x370] sm:$0xff] %v14487_v3  ;;  %442 = vst [vmem:[#allocation2 + $0x378] sm:$0xff] %v14487_v3 }
  0xc5   : > { %443 = vst [vmem:[#allocation2 + $0x380] sm:$0xff] %v14487_v3  ;;  %444 = vst [vmem:[#allocation2 + $0x388] sm:$0xff] %v14487_v3 }
  0xc6   : > { %445 = vst [vmem:[#allocation2 + $0x390] sm:$0xff] %v14487_v3  ;;  %446 = vst [vmem:[#allocation2 + $0x398] sm:$0xff] %v14487_v3 }
  0xc7   : > { %447 = vst [vmem:[#allocation2 + $0x3a0] sm:$0xff] %v14487_v3  ;;  %448 = vst [vmem:[#allocation2 + $0x3a8] sm:$0xff] %v14487_v3 }
  0xc8   : > { %449 = vst [vmem:[#allocation2 + $0x3b0] sm:$0xff] %v14487_v3  ;;  %450 = vst [vmem:[#allocation2 + $0x3b8] sm:$0xff] %v14487_v3 }
  0xc9   : > { %451 = vst [vmem:[#allocation2 + $0x3c0] sm:$0xff] %v14487_v3  ;;  %452 = vst [vmem:[#allocation2 + $0x3c8] sm:$0xff] %v14487_v3 }
  0xca   : > { %453 = vst [vmem:[#allocation2 + $0x3d0] sm:$0xff] %v14487_v3  ;;  %454 = vst [vmem:[#allocation2 + $0x3d8] sm:$0xff] %v14487_v3 }
  0xcb   : > { %455 = vst [vmem:[#allocation2 + $0x3e0] sm:$0xff] %v14487_v3  ;;  %456 = vst [vmem:[#allocation2 + $0x3e8] sm:$0xff] %v14487_v3 }
  0xcc   : > { %457 = vst [vmem:[#allocation2 + $0x3f0] sm:$0xff] %v14487_v3  ;;  %458 = vst [vmem:[#allocation2 + $0x3f8] sm:$0xff] %v14487_v3 }
  0xcd   : > { %459 = vst [vmem:[#allocation2 + $0x400] sm:$0xff] %v14490_v4  ;;  %460 = vst [vmem:[#allocation2 + $0x408] sm:$0xff] %v14490_v4 }
  0xce   : > { %461 = vst [vmem:[#allocation2 + $0x410] sm:$0xff] %v14490_v4  ;;  %462 = vst [vmem:[#allocation2 + $0x418] sm:$0xff] %v14490_v4 }
  0xcf   : > { %463 = vst [vmem:[#allocation2 + $0x420] sm:$0xff] %v14490_v4  ;;  %464 = vst [vmem:[#allocation2 + $0x428] sm:$0xff] %v14490_v4 }
  0xd0   : > { %465 = vst [vmem:[#allocation2 + $0x430] sm:$0xff] %v14490_v4  ;;  %466 = vst [vmem:[#allocation2 + $0x438] sm:$0xff] %v14490_v4 }
  0xd1   : > { %467 = vst [vmem:[#allocation2 + $0x440] sm:$0xff] %v14490_v4  ;;  %468 = vst [vmem:[#allocation2 + $0x448] sm:$0xff] %v14490_v4 }
  0xd2   : > { %469 = vst [vmem:[#allocation2 + $0x450] sm:$0xff] %v14490_v4  ;;  %470 = vst [vmem:[#allocation2 + $0x458] sm:$0xff] %v14490_v4 }
  0xd3   : > { %471 = vst [vmem:[#allocation2 + $0x460] sm:$0xff] %v14490_v4  ;;  %472 = vst [vmem:[#allocation2 + $0x468] sm:$0xff] %v14490_v4 }
  0xd4   : > { %473 = vst [vmem:[#allocation2 + $0x470] sm:$0xff] %v14490_v4  ;;  %474 = vst [vmem:[#allocation2 + $0x478] sm:$0xff] %v14490_v4 }
  0xd5   : > { %475 = vst [vmem:[#allocation2 + $0x480] sm:$0xff] %v14490_v4  ;;  %476 = vst [vmem:[#allocation2 + $0x488] sm:$0xff] %v14490_v4 }
  0xd6   : > { %477 = vst [vmem:[#allocation2 + $0x490] sm:$0xff] %v14490_v4  ;;  %478 = vst [vmem:[#allocation2 + $0x498] sm:$0xff] %v14490_v4 }
  0xd7   : > { %479 = vst [vmem:[#allocation2 + $0x4a0] sm:$0xff] %v14490_v4  ;;  %480 = vst [vmem:[#allocation2 + $0x4a8] sm:$0xff] %v14490_v4 }
  0xd8   : > { %481 = vst [vmem:[#allocation2 + $0x4b0] sm:$0xff] %v14490_v4  ;;  %482 = vst [vmem:[#allocation2 + $0x4b8] sm:$0xff] %v14490_v4 }
  0xd9   : > { %483 = vst [vmem:[#allocation2 + $0x4c0] sm:$0xff] %v14490_v4  ;;  %484 = vst [vmem:[#allocation2 + $0x4c8] sm:$0xff] %v14490_v4 }
  0xda   : > { %485 = vst [vmem:[#allocation2 + $0x4d0] sm:$0xff] %v14490_v4  ;;  %486 = vst [vmem:[#allocation2 + $0x4d8] sm:$0xff] %v14490_v4 }
  0xdb   : > { %487 = vst [vmem:[#allocation2 + $0x4e0] sm:$0xff] %v14490_v4  ;;  %488 = vst [vmem:[#allocation2 + $0x4e8] sm:$0xff] %v14490_v4 }
  0xdc   : > { %489 = vst [vmem:[#allocation2 + $0x4f0] sm:$0xff] %v14490_v4  ;;  %490 = vst [vmem:[#allocation2 + $0x4f8] sm:$0xff] %v14490_v4 }
  0xdd   : > { %491 = vst [vmem:[#allocation2 + $0x500] sm:$0xff] %v14490_v4  ;;  %492 = vst [vmem:[#allocation2 + $0x508] sm:$0xff] %v14490_v4 }
  0xde   : > { %493 = vst [vmem:[#allocation2 + $0x510] sm:$0xff] %v14490_v4  ;;  %494 = vst [vmem:[#allocation2 + $0x518] sm:$0xff] %v14490_v4 }
  0xdf   : > { %495 = vst [vmem:[#allocation2 + $0x520] sm:$0xff] %v14490_v4  ;;  %496 = vst [vmem:[#allocation2 + $0x528] sm:$0xff] %v14490_v4 }
  0xe0   : > { %497 = vst [vmem:[#allocation2 + $0x530] sm:$0xff] %v14490_v4  ;;  %498 = vst [vmem:[#allocation2 + $0x538] sm:$0xff] %v14490_v4 }
  0xe1   : > { %499 = vst [vmem:[#allocation2 + $0x540] sm:$0xff] %v14490_v4  ;;  %500 = vst [vmem:[#allocation2 + $0x548] sm:$0xff] %v14490_v4 }
  0xe2   : > { %501 = vst [vmem:[#allocation2 + $0x550] sm:$0xff] %v14490_v4  ;;  %502 = vst [vmem:[#allocation2 + $0x558] sm:$0xff] %v14490_v4 }
  0xe3   : > { %503 = vst [vmem:[#allocation2 + $0x560] sm:$0xff] %v14490_v4  ;;  %504 = vst [vmem:[#allocation2 + $0x568] sm:$0xff] %v14490_v4 }
  0xe4   : > { %505 = vst [vmem:[#allocation2 + $0x570] sm:$0xff] %v14490_v4  ;;  %506 = vst [vmem:[#allocation2 + $0x578] sm:$0xff] %v14490_v4 }
  0xe5   : > { %507 = vst [vmem:[#allocation2 + $0x580] sm:$0xff] %v14490_v4  ;;  %508 = vst [vmem:[#allocation2 + $0x588] sm:$0xff] %v14490_v4 }
  0xe6   : > { %509 = vst [vmem:[#allocation2 + $0x590] sm:$0xff] %v14490_v4  ;;  %510 = vst [vmem:[#allocation2 + $0x598] sm:$0xff] %v14490_v4 }
  0xe7   : > { %511 = vst [vmem:[#allocation2 + $0x5a0] sm:$0xff] %v14490_v4  ;;  %512 = vst [vmem:[#allocation2 + $0x5a8] sm:$0xff] %v14490_v4 }
  0xe8   : > { %513 = vst [vmem:[#allocation2 + $0x5b0] sm:$0xff] %v14490_v4  ;;  %514 = vst [vmem:[#allocation2 + $0x5b8] sm:$0xff] %v14490_v4 }
  0xe9   : > { %515 = vst [vmem:[#allocation2 + $0x5c0] sm:$0xff] %v14490_v4  ;;  %516 = vst [vmem:[#allocation2 + $0x5c8] sm:$0xff] %v14490_v4 }
  0xea   : > { %517 = vst [vmem:[#allocation2 + $0x5d0] sm:$0xff] %v14490_v4  ;;  %518 = vst [vmem:[#allocation2 + $0x5d8] sm:$0xff] %v14490_v4 }
  0xeb   : > { %519 = vst [vmem:[#allocation2 + $0x5e0] sm:$0xff] %v14490_v4  ;;  %520 = vst [vmem:[#allocation2 + $0x5e8] sm:$0xff] %v14490_v4 }
  0xec   : > { %521 = vst [vmem:[#allocation2 + $0x5f0] sm:$0xff] %v14490_v4  ;;  %522 = vst [vmem:[#allocation2 + $0x5f8] sm:$0xff] %v14490_v4 }
  0xed   : > { %523 = vst [vmem:[#allocation2 + $0x600] sm:$0xff] %v14493_v5  ;;  %524 = vst [vmem:[#allocation2 + $0x608] sm:$0xff] %v14493_v5 }
  0xee   : > { %525 = vst [vmem:[#allocation2 + $0x610] sm:$0xff] %v14493_v5  ;;  %526 = vst [vmem:[#allocation2 + $0x618] sm:$0xff] %v14493_v5 }
  0xef   : > { %527 = vst [vmem:[#allocation2 + $0x620] sm:$0xff] %v14493_v5  ;;  %528 = vst [vmem:[#allocation2 + $0x628] sm:$0xff] %v14493_v5 }
  0xf0   : > { %529 = vst [vmem:[#allocation2 + $0x630] sm:$0xff] %v14493_v5  ;;  %530 = vst [vmem:[#allocation2 + $0x638] sm:$0xff] %v14493_v5 }
  0xf1   : > { %531 = vst [vmem:[#allocation2 + $0x640] sm:$0xff] %v14493_v5  ;;  %532 = vst [vmem:[#allocation2 + $0x648] sm:$0xff] %v14493_v5 }
  0xf2   : > { %533 = vst [vmem:[#allocation2 + $0x650] sm:$0xff] %v14493_v5  ;;  %534 = vst [vmem:[#allocation2 + $0x658] sm:$0xff] %v14493_v5 }
  0xf3   : > { %535 = vst [vmem:[#allocation2 + $0x660] sm:$0xff] %v14493_v5  ;;  %536 = vst [vmem:[#allocation2 + $0x668] sm:$0xff] %v14493_v5 }
  0xf4   : > { %537 = vst [vmem:[#allocation2 + $0x670] sm:$0xff] %v14493_v5  ;;  %538 = vst [vmem:[#allocation2 + $0x678] sm:$0xff] %v14493_v5 }
  0xf5   : > { %539 = vst [vmem:[#allocation2 + $0x680] sm:$0xff] %v14493_v5  ;;  %540 = vst [vmem:[#allocation2 + $0x688] sm:$0xff] %v14493_v5 }
  0xf6   : > { %541 = vst [vmem:[#allocation2 + $0x690] sm:$0xff] %v14493_v5  ;;  %542 = vst [vmem:[#allocation2 + $0x698] sm:$0xff] %v14493_v5 }
  0xf7   : > { %543 = vst [vmem:[#allocation2 + $0x6a0] sm:$0xff] %v14493_v5  ;;  %544 = vst [vmem:[#allocation2 + $0x6a8] sm:$0xff] %v14493_v5 }
  0xf8   : > { %545 = vst [vmem:[#allocation2 + $0x6b0] sm:$0xff] %v14493_v5  ;;  %546 = vst [vmem:[#allocation2 + $0x6b8] sm:$0xff] %v14493_v5 }
  0xf9   : > { %547 = vst [vmem:[#allocation2 + $0x6c0] sm:$0xff] %v14493_v5  ;;  %548 = vst [vmem:[#allocation2 + $0x6c8] sm:$0xff] %v14493_v5 }
  0xfa   : > { %549 = vst [vmem:[#allocation2 + $0x6d0] sm:$0xff] %v14493_v5  ;;  %550 = vst [vmem:[#allocation2 + $0x6d8] sm:$0xff] %v14493_v5 }
  0xfb   : > { %551 = vst [vmem:[#allocation2 + $0x6e0] sm:$0xff] %v14493_v5  ;;  %552 = vst [vmem:[#allocation2 + $0x6e8] sm:$0xff] %v14493_v5 }
  0xfc   : > { %553 = vst [vmem:[#allocation2 + $0x6f0] sm:$0xff] %v14493_v5  ;;  %554 = vst [vmem:[#allocation2 + $0x6f8] sm:$0xff] %v14493_v5 }
  0xfd   : > { %555 = vst [vmem:[#allocation2 + $0x700] sm:$0xff] %v14493_v5  ;;  %556 = vst [vmem:[#allocation2 + $0x708] sm:$0xff] %v14493_v5 }
  0xfe   : > { %557 = vst [vmem:[#allocation2 + $0x710] sm:$0xff] %v14493_v5  ;;  %558 = vst [vmem:[#allocation2 + $0x718] sm:$0xff] %v14493_v5 }
  0xff   : > { %559 = vst [vmem:[#allocation2 + $0x720] sm:$0xff] %v14493_v5  ;;  %560 = vst [vmem:[#allocation2 + $0x728] sm:$0xff] %v14493_v5 }
 0x100   : > { %561 = vst [vmem:[#allocation2 + $0x730] sm:$0xff] %v14493_v5  ;;  %562 = vst [vmem:[#allocation2 + $0x738] sm:$0xff] %v14493_v5 }
 0x101   : > { %563 = vst [vmem:[#allocation2 + $0x740] sm:$0xff] %v14493_v5  ;;  %564 = vst [vmem:[#allocation2 + $0x748] sm:$0xff] %v14493_v5 }
 0x102   : > { %565 = vst [vmem:[#allocation2 + $0x750] sm:$0xff] %v14493_v5  ;;  %566 = vst [vmem:[#allocation2 + $0x758] sm:$0xff] %v14493_v5 }
 0x103   : > { %567 = vst [vmem:[#allocation2 + $0x760] sm:$0xff] %v14493_v5  ;;  %568 = vst [vmem:[#allocation2 + $0x768] sm:$0xff] %v14493_v5 }
 0x104   : > { %569 = vst [vmem:[#allocation2 + $0x770] sm:$0xff] %v14493_v5  ;;  %570 = vst [vmem:[#allocation2 + $0x778] sm:$0xff] %v14493_v5 }
 0x105   : > { %571 = vst [vmem:[#allocation2 + $0x780] sm:$0xff] %v14493_v5  ;;  %572 = vst [vmem:[#allocation2 + $0x788] sm:$0xff] %v14493_v5 }
 0x106   : > { %573 = vst [vmem:[#allocation2 + $0x790] sm:$0xff] %v14493_v5  ;;  %574 = vst [vmem:[#allocation2 + $0x798] sm:$0xff] %v14493_v5 }
 0x107   : > { %575 = vst [vmem:[#allocation2 + $0x7a0] sm:$0xff] %v14493_v5  ;;  %576 = vst [vmem:[#allocation2 + $0x7a8] sm:$0xff] %v14493_v5 }
 0x108   : > { %577 = vst [vmem:[#allocation2 + $0x7b0] sm:$0xff] %v14493_v5  ;;  %578 = vst [vmem:[#allocation2 + $0x7b8] sm:$0xff] %v14493_v5 }
 0x109   : > { %579 = vst [vmem:[#allocation2 + $0x7c0] sm:$0xff] %v14493_v5  ;;  %580 = vst [vmem:[#allocation2 + $0x7c8] sm:$0xff] %v14493_v5 }
 0x10a   : > { %581 = vst [vmem:[#allocation2 + $0x7d0] sm:$0xff] %v14493_v5  ;;  %582 = vst [vmem:[#allocation2 + $0x7d8] sm:$0xff] %v14493_v5 }
 0x10b   : > { %583 = vst [vmem:[#allocation2 + $0x7e0] sm:$0xff] %v14493_v5  ;;  %584 = vst [vmem:[#allocation2 + $0x7e8] sm:$0xff] %v14493_v5 }
 0x10c   : > { %585 = vst [vmem:[#allocation2 + $0x7f0] sm:$0xff] %v14493_v5  ;;  %586 = vst [vmem:[#allocation2 + $0x7f8] sm:$0xff] %v14493_v5 }
 0x10d   : > { %587 = vst [vmem:[#allocation2 + $0x800] sm:$0xff] %v14496_v6  ;;  %588 = vst [vmem:[#allocation2 + $0x808] sm:$0xff] %v14496_v6 }
 0x10e   : > { %589 = vst [vmem:[#allocation2 + $0x810] sm:$0xff] %v14496_v6  ;;  %590 = vst [vmem:[#allocation2 + $0x818] sm:$0xff] %v14496_v6 }
 0x10f   : > { %591 = vst [vmem:[#allocation2 + $0x820] sm:$0xff] %v14496_v6  ;;  %592 = vst [vmem:[#allocation2 + $0x828] sm:$0xff] %v14496_v6 }
 0x110   : > { %593 = vst [vmem:[#allocation2 + $0x830] sm:$0xff] %v14496_v6  ;;  %594 = vst [vmem:[#allocation2 + $0x838] sm:$0xff] %v14496_v6 }
 0x111   : > { %595 = vst [vmem:[#allocation2 + $0x840] sm:$0xff] %v14496_v6  ;;  %596 = vst [vmem:[#allocation2 + $0x848] sm:$0xff] %v14496_v6 }
 0x112   : > { %597 = vst [vmem:[#allocation2 + $0x850] sm:$0xff] %v14496_v6  ;;  %598 = vst [vmem:[#allocation2 + $0x858] sm:$0xff] %v14496_v6 }
 0x113   : > { %599 = vst [vmem:[#allocation2 + $0x860] sm:$0xff] %v14496_v6  ;;  %600 = vst [vmem:[#allocation2 + $0x868] sm:$0xff] %v14496_v6 }
 0x114   : > { %601 = vst [vmem:[#allocation2 + $0x870] sm:$0xff] %v14496_v6  ;;  %602 = vst [vmem:[#allocation2 + $0x878] sm:$0xff] %v14496_v6 }
 0x115   : > { %603 = vst [vmem:[#allocation2 + $0x880] sm:$0xff] %v14496_v6  ;;  %604 = vst [vmem:[#allocation2 + $0x888] sm:$0xff] %v14496_v6 }
 0x116   : > { %605 = vst [vmem:[#allocation2 + $0x890] sm:$0xff] %v14496_v6  ;;  %606 = vst [vmem:[#allocation2 + $0x898] sm:$0xff] %v14496_v6 }
 0x117   : > { %607 = vst [vmem:[#allocation2 + $0x8a0] sm:$0xff] %v14496_v6  ;;  %608 = vst [vmem:[#allocation2 + $0x8a8] sm:$0xff] %v14496_v6 }
 0x118   : > { %609 = vst [vmem:[#allocation2 + $0x8b0] sm:$0xff] %v14496_v6  ;;  %610 = vst [vmem:[#allocation2 + $0x8b8] sm:$0xff] %v14496_v6 }
 0x119   : > { %611 = vst [vmem:[#allocation2 + $0x8c0] sm:$0xff] %v14496_v6  ;;  %612 = vst [vmem:[#allocation2 + $0x8c8] sm:$0xff] %v14496_v6 }
 0x11a   : > { %613 = vst [vmem:[#allocation2 + $0x8d0] sm:$0xff] %v14496_v6  ;;  %614 = vst [vmem:[#allocation2 + $0x8d8] sm:$0xff] %v14496_v6 }
 0x11b   : > { %615 = vst [vmem:[#allocation2 + $0x8e0] sm:$0xff] %v14496_v6  ;;  %616 = vst [vmem:[#allocation2 + $0x8e8] sm:$0xff] %v14496_v6 }
 0x11c   : > { %617 = vst [vmem:[#allocation2 + $0x8f0] sm:$0xff] %v14496_v6  ;;  %618 = vst [vmem:[#allocation2 + $0x8f8] sm:$0xff] %v14496_v6 }
 0x11d   : > { %619 = vst [vmem:[#allocation2 + $0x900] sm:$0xff] %v14496_v6  ;;  %620 = vst [vmem:[#allocation2 + $0x908] sm:$0xff] %v14496_v6 }
 0x11e   : > { %621 = vst [vmem:[#allocation2 + $0x910] sm:$0xff] %v14496_v6  ;;  %622 = vst [vmem:[#allocation2 + $0x918] sm:$0xff] %v14496_v6 }
 0x11f   : > { %623 = vst [vmem:[#allocation2 + $0x920] sm:$0xff] %v14496_v6  ;;  %624 = vst [vmem:[#allocation2 + $0x928] sm:$0xff] %v14496_v6 }
 0x120   : > { %625 = vst [vmem:[#allocation2 + $0x930] sm:$0xff] %v14496_v6  ;;  %626 = vst [vmem:[#allocation2 + $0x938] sm:$0xff] %v14496_v6 }
 0x121   : > { %627 = vst [vmem:[#allocation2 + $0x940] sm:$0xff] %v14496_v6  ;;  %628 = vst [vmem:[#allocation2 + $0x948] sm:$0xff] %v14496_v6 }
 0x122   : > { %629 = vst [vmem:[#allocation2 + $0x950] sm:$0xff] %v14496_v6  ;;  %630 = vst [vmem:[#allocation2 + $0x958] sm:$0xff] %v14496_v6 }
 0x123   : > { %631 = vst [vmem:[#allocation2 + $0x960] sm:$0xff] %v14496_v6  ;;  %632 = vst [vmem:[#allocation2 + $0x968] sm:$0xff] %v14496_v6 }
 0x124   : > { %633 = vst [vmem:[#allocation2 + $0x970] sm:$0xff] %v14496_v6  ;;  %634 = vst [vmem:[#allocation2 + $0x978] sm:$0xff] %v14496_v6 }
 0x125   : > { %635 = vst [vmem:[#allocation2 + $0x980] sm:$0xff] %v14496_v6  ;;  %636 = vst [vmem:[#allocation2 + $0x988] sm:$0xff] %v14496_v6 }
 0x126   : > { %637 = vst [vmem:[#allocation2 + $0x990] sm:$0xff] %v14496_v6  ;;  %638 = vst [vmem:[#allocation2 + $0x998] sm:$0xff] %v14496_v6 }
 0x127   : > { %639 = vst [vmem:[#allocation2 + $0x9a0] sm:$0xff] %v14496_v6  ;;  %640 = vst [vmem:[#allocation2 + $0x9a8] sm:$0xff] %v14496_v6 }
 0x128   : > { %641 = vst [vmem:[#allocation2 + $0x9b0] sm:$0xff] %v14496_v6  ;;  %642 = vst [vmem:[#allocation2 + $0x9b8] sm:$0xff] %v14496_v6 }
 0x129   : > { %643 = vst [vmem:[#allocation2 + $0x9c0] sm:$0xff] %v14496_v6  ;;  %644 = vst [vmem:[#allocation2 + $0x9c8] sm:$0xff] %v14496_v6 }
 0x12a   : > { %645 = vst [vmem:[#allocation2 + $0x9d0] sm:$0xff] %v14496_v6  ;;  %646 = vst [vmem:[#allocation2 + $0x9d8] sm:$0xff] %v14496_v6 }
 0x12b   : > { %647 = vst [vmem:[#allocation2 + $0x9e0] sm:$0xff] %v14496_v6  ;;  %648 = vst [vmem:[#allocation2 + $0x9e8] sm:$0xff] %v14496_v6 }
 0x12c   : > { %649 = vst [vmem:[#allocation2 + $0x9f0] sm:$0xff] %v14496_v6  ;;  %650 = vst [vmem:[#allocation2 + $0x9f8] sm:$0xff] %v14496_v6 }
 0x12d   : > { %651 = vst [vmem:[#allocation2 + $0xa00] sm:$0xff] %v14499_v7  ;;  %652 = vst [vmem:[#allocation2 + $0xa08] sm:$0xff] %v14499_v7 }
 0x12e   : > { %653 = vst [vmem:[#allocation2 + $0xa10] sm:$0xff] %v14499_v7  ;;  %654 = vst [vmem:[#allocation2 + $0xa18] sm:$0xff] %v14499_v7 }
 0x12f   : > { %655 = vst [vmem:[#allocation2 + $0xa20] sm:$0xff] %v14499_v7  ;;  %656 = vst [vmem:[#allocation2 + $0xa28] sm:$0xff] %v14499_v7 }
 0x130   : > { %657 = vst [vmem:[#allocation2 + $0xa30] sm:$0xff] %v14499_v7  ;;  %658 = vst [vmem:[#allocation2 + $0xa38] sm:$0xff] %v14499_v7 }
 0x131   : > { %659 = vst [vmem:[#allocation2 + $0xa40] sm:$0xff] %v14499_v7  ;;  %660 = vst [vmem:[#allocation2 + $0xa48] sm:$0xff] %v14499_v7 }
 0x132   : > { %661 = vst [vmem:[#allocation2 + $0xa50] sm:$0xff] %v14499_v7  ;;  %662 = vst [vmem:[#allocation2 + $0xa58] sm:$0xff] %v14499_v7 }
 0x133   : > { %663 = vst [vmem:[#allocation2 + $0xa60] sm:$0xff] %v14499_v7  ;;  %664 = vst [vmem:[#allocation2 + $0xa68] sm:$0xff] %v14499_v7 }
 0x134   : > { %665 = vst [vmem:[#allocation2 + $0xa70] sm:$0xff] %v14499_v7  ;;  %666 = vst [vmem:[#allocation2 + $0xa78] sm:$0xff] %v14499_v7 }
 0x135   : > { %667 = vst [vmem:[#allocation2 + $0xa80] sm:$0xff] %v14499_v7  ;;  %668 = vst [vmem:[#allocation2 + $0xa88] sm:$0xff] %v14499_v7 }
 0x136   : > { %669 = vst [vmem:[#allocation2 + $0xa90] sm:$0xff] %v14499_v7  ;;  %670 = vst [vmem:[#allocation2 + $0xa98] sm:$0xff] %v14499_v7 }
 0x137   : > { %671 = vst [vmem:[#allocation2 + $0xaa0] sm:$0xff] %v14499_v7  ;;  %672 = vst [vmem:[#allocation2 + $0xaa8] sm:$0xff] %v14499_v7 }
 0x138   : > { %673 = vst [vmem:[#allocation2 + $0xab0] sm:$0xff] %v14499_v7  ;;  %674 = vst [vmem:[#allocation2 + $0xab8] sm:$0xff] %v14499_v7 }
 0x139   : > { %675 = vst [vmem:[#allocation2 + $0xac0] sm:$0xff] %v14499_v7  ;;  %676 = vst [vmem:[#allocation2 + $0xac8] sm:$0xff] %v14499_v7 }
 0x13a   : > { %677 = vst [vmem:[#allocation2 + $0xad0] sm:$0xff] %v14499_v7  ;;  %678 = vst [vmem:[#allocation2 + $0xad8] sm:$0xff] %v14499_v7 }
 0x13b   : > { %679 = vst [vmem:[#allocation2 + $0xae0] sm:$0xff] %v14499_v7  ;;  %680 = vst [vmem:[#allocation2 + $0xae8] sm:$0xff] %v14499_v7 }
 0x13c   : > { %681 = vst [vmem:[#allocation2 + $0xaf0] sm:$0xff] %v14499_v7  ;;  %682 = vst [vmem:[#allocation2 + $0xaf8] sm:$0xff] %v14499_v7 }
 0x13d   : > { %683 = vst [vmem:[#allocation2 + $0xb00] sm:$0xff] %v14499_v7  ;;  %684 = vst [vmem:[#allocation2 + $0xb08] sm:$0xff] %v14499_v7 }
 0x13e   : > { %685 = vst [vmem:[#allocation2 + $0xb10] sm:$0xff] %v14499_v7  ;;  %686 = vst [vmem:[#allocation2 + $0xb18] sm:$0xff] %v14499_v7 }
 0x13f   : > { %687 = vst [vmem:[#allocation2 + $0xb20] sm:$0xff] %v14499_v7  ;;  %688 = vst [vmem:[#allocation2 + $0xb28] sm:$0xff] %v14499_v7 }
 0x140   : > { %689 = vst [vmem:[#allocation2 + $0xb30] sm:$0xff] %v14499_v7  ;;  %690 = vst [vmem:[#allocation2 + $0xb38] sm:$0xff] %v14499_v7 }
 0x141   : > { %691 = vst [vmem:[#allocation2 + $0xb40] sm:$0xff] %v14499_v7  ;;  %692 = vst [vmem:[#allocation2 + $0xb48] sm:$0xff] %v14499_v7 }
 0x142   : > { %693 = vst [vmem:[#allocation2 + $0xb50] sm:$0xff] %v14499_v7  ;;  %694 = vst [vmem:[#allocation2 + $0xb58] sm:$0xff] %v14499_v7 }
 0x143   : > { %695 = vst [vmem:[#allocation2 + $0xb60] sm:$0xff] %v14499_v7  ;;  %696 = vst [vmem:[#allocation2 + $0xb68] sm:$0xff] %v14499_v7 }
 0x144   : > { %697 = vst [vmem:[#allocation2 + $0xb70] sm:$0xff] %v14499_v7  ;;  %698 = vst [vmem:[#allocation2 + $0xb78] sm:$0xff] %v14499_v7 }
 0x145   : > { %699 = vst [vmem:[#allocation2 + $0xb80] sm:$0xff] %v14499_v7  ;;  %700 = vst [vmem:[#allocation2 + $0xb88] sm:$0xff] %v14499_v7 }
 0x146   : > { %701 = vst [vmem:[#allocation2 + $0xb90] sm:$0xff] %v14499_v7  ;;  %702 = vst [vmem:[#allocation2 + $0xb98] sm:$0xff] %v14499_v7 }
 0x147   : > { %703 = vst [vmem:[#allocation2 + $0xba0] sm:$0xff] %v14499_v7  ;;  %704 = vst [vmem:[#allocation2 + $0xba8] sm:$0xff] %v14499_v7 }
 0x148   : > { %705 = vst [vmem:[#allocation2 + $0xbb0] sm:$0xff] %v14499_v7  ;;  %706 = vst [vmem:[#allocation2 + $0xbb8] sm:$0xff] %v14499_v7 }
 0x149   : > { %707 = vst [vmem:[#allocation2 + $0xbc0] sm:$0xff] %v14499_v7  ;;  %708 = vst [vmem:[#allocation2 + $0xbc8] sm:$0xff] %v14499_v7 }
 0x14a   : > { %709 = vst [vmem:[#allocation2 + $0xbd0] sm:$0xff] %v14499_v7  ;;  %710 = vst [vmem:[#allocation2 + $0xbd8] sm:$0xff] %v14499_v7 }
 0x14b   : > { %711 = vst [vmem:[#allocation2 + $0xbe0] sm:$0xff] %v14499_v7  ;;  %712 = vst [vmem:[#allocation2 + $0xbe8] sm:$0xff] %v14499_v7 }
 0x14c   : > { %713 = vst [vmem:[#allocation2 + $0xbf0] sm:$0xff] %v14499_v7  ;;  %714 = vst [vmem:[#allocation2 + $0xbf8] sm:$0xff] %v14499_v7 }
 0x14d   : > { %715 = vst [vmem:[#allocation2 + $0xc00] sm:$0xff] %v14502_v8  ;;  %716 = vst [vmem:[#allocation2 + $0xc08] sm:$0xff] %v14502_v8 }
 0x14e   : > { %717 = vst [vmem:[#allocation2 + $0xc10] sm:$0xff] %v14502_v8  ;;  %718 = vst [vmem:[#allocation2 + $0xc18] sm:$0xff] %v14502_v8 }
 0x14f   : > { %719 = vst [vmem:[#allocation2 + $0xc20] sm:$0xff] %v14502_v8  ;;  %720 = vst [vmem:[#allocation2 + $0xc28] sm:$0xff] %v14502_v8 }
 0x150   : > { %721 = vst [vmem:[#allocation2 + $0xc30] sm:$0xff] %v14502_v8  ;;  %722 = vst [vmem:[#allocation2 + $0xc38] sm:$0xff] %v14502_v8 }
 0x151   : > { %723 = vst [vmem:[#allocation2 + $0xc40] sm:$0xff] %v14502_v8  ;;  %724 = vst [vmem:[#allocation2 + $0xc48] sm:$0xff] %v14502_v8 }
 0x152   : > { %725 = vst [vmem:[#allocation2 + $0xc50] sm:$0xff] %v14502_v8  ;;  %726 = vst [vmem:[#allocation2 + $0xc58] sm:$0xff] %v14502_v8 }
 0x153   : > { %727 = vst [vmem:[#allocation2 + $0xc60] sm:$0xff] %v14502_v8  ;;  %728 = vst [vmem:[#allocation2 + $0xc68] sm:$0xff] %v14502_v8 }
 0x154   : > { %729 = vst [vmem:[#allocation2 + $0xc70] sm:$0xff] %v14502_v8  ;;  %730 = vst [vmem:[#allocation2 + $0xc78] sm:$0xff] %v14502_v8 }
 0x155   : > { %731 = vst [vmem:[#allocation2 + $0xc80] sm:$0xff] %v14502_v8  ;;  %732 = vst [vmem:[#allocation2 + $0xc88] sm:$0xff] %v14502_v8 }
 0x156   : > { %733 = vst [vmem:[#allocation2 + $0xc90] sm:$0xff] %v14502_v8  ;;  %734 = vst [vmem:[#allocation2 + $0xc98] sm:$0xff] %v14502_v8 }
 0x157   : > { %735 = vst [vmem:[#allocation2 + $0xca0] sm:$0xff] %v14502_v8  ;;  %736 = vst [vmem:[#allocation2 + $0xca8] sm:$0xff] %v14502_v8 }
 0x158   : > { %737 = vst [vmem:[#allocation2 + $0xcb0] sm:$0xff] %v14502_v8  ;;  %738 = vst [vmem:[#allocation2 + $0xcb8] sm:$0xff] %v14502_v8 }
 0x159   : > { %739 = vst [vmem:[#allocation2 + $0xcc0] sm:$0xff] %v14502_v8  ;;  %740 = vst [vmem:[#allocation2 + $0xcc8] sm:$0xff] %v14502_v8 }
 0x15a   : > { %741 = vst [vmem:[#allocation2 + $0xcd0] sm:$0xff] %v14502_v8  ;;  %742 = vst [vmem:[#allocation2 + $0xcd8] sm:$0xff] %v14502_v8 }
 0x15b   : > { %743 = vst [vmem:[#allocation2 + $0xce0] sm:$0xff] %v14502_v8  ;;  %744 = vst [vmem:[#allocation2 + $0xce8] sm:$0xff] %v14502_v8 }
 0x15c   : > { %745 = vst [vmem:[#allocation2 + $0xcf0] sm:$0xff] %v14502_v8  ;;  %746 = vst [vmem:[#allocation2 + $0xcf8] sm:$0xff] %v14502_v8 }
 0x15d   : > { %747 = vst [vmem:[#allocation2 + $0xd00] sm:$0xff] %v14502_v8  ;;  %748 = vst [vmem:[#allocation2 + $0xd08] sm:$0xff] %v14502_v8 }
 0x15e   : > { %749 = vst [vmem:[#allocation2 + $0xd10] sm:$0xff] %v14502_v8  ;;  %750 = vst [vmem:[#allocation2 + $0xd18] sm:$0xff] %v14502_v8 }
 0x15f   : > { %751 = vst [vmem:[#allocation2 + $0xd20] sm:$0xff] %v14502_v8  ;;  %752 = vst [vmem:[#allocation2 + $0xd28] sm:$0xff] %v14502_v8 }
 0x160   : > { %753 = vst [vmem:[#allocation2 + $0xd30] sm:$0xff] %v14502_v8  ;;  %754 = vst [vmem:[#allocation2 + $0xd38] sm:$0xff] %v14502_v8 }
 0x161   : > { %755 = vst [vmem:[#allocation2 + $0xd40] sm:$0xff] %v14502_v8  ;;  %756 = vst [vmem:[#allocation2 + $0xd48] sm:$0xff] %v14502_v8 }
 0x162   : > { %757 = vst [vmem:[#allocation2 + $0xd50] sm:$0xff] %v14502_v8  ;;  %758 = vst [vmem:[#allocation2 + $0xd58] sm:$0xff] %v14502_v8 }
 0x163   : > { %759 = vst [vmem:[#allocation2 + $0xd60] sm:$0xff] %v14502_v8  ;;  %760 = vst [vmem:[#allocation2 + $0xd68] sm:$0xff] %v14502_v8 }
 0x164   : > { %761 = vst [vmem:[#allocation2 + $0xd70] sm:$0xff] %v14502_v8  ;;  %762 = vst [vmem:[#allocation2 + $0xd78] sm:$0xff] %v14502_v8 }
 0x165   : > { %763 = vst [vmem:[#allocation2 + $0xd80] sm:$0xff] %v14502_v8  ;;  %764 = vst [vmem:[#allocation2 + $0xd88] sm:$0xff] %v14502_v8 }
 0x166   : > { %765 = vst [vmem:[#allocation2 + $0xd90] sm:$0xff] %v14502_v8  ;;  %766 = vst [vmem:[#allocation2 + $0xd98] sm:$0xff] %v14502_v8 }
 0x167   : > { %767 = vst [vmem:[#allocation2 + $0xda0] sm:$0xff] %v14502_v8  ;;  %768 = vst [vmem:[#allocation2 + $0xda8] sm:$0xff] %v14502_v8 }
 0x168   : > { %769 = vst [vmem:[#allocation2 + $0xdb0] sm:$0xff] %v14502_v8  ;;  %770 = vst [vmem:[#allocation2 + $0xdb8] sm:$0xff] %v14502_v8 }
 0x169   : > { %771 = vst [vmem:[#allocation2 + $0xdc0] sm:$0xff] %v14502_v8  ;;  %772 = vst [vmem:[#allocation2 + $0xdc8] sm:$0xff] %v14502_v8 }
 0x16a   : > { %773 = vst [vmem:[#allocation2 + $0xdd0] sm:$0xff] %v14502_v8  ;;  %774 = vst [vmem:[#allocation2 + $0xdd8] sm:$0xff] %v14502_v8 }
 0x16b   : > { %775 = vst [vmem:[#allocation2 + $0xde0] sm:$0xff] %v14502_v8  ;;  %776 = vst [vmem:[#allocation2 + $0xde8] sm:$0xff] %v14502_v8 }
 0x16c   : > { %777 = vst [vmem:[#allocation2 + $0xdf0] sm:$0xff] %v14502_v8  ;;  %778 = vst [vmem:[#allocation2 + $0xdf8] sm:$0xff] %v14502_v8 }
 0x16d   : > { %779 = vst [vmem:[#allocation2 + $0xe00] sm:$0xff] %v14505_v9  ;;  %780 = vst [vmem:[#allocation2 + $0xe08] sm:$0xff] %v14505_v9 }
 0x16e   : > { %781 = vst [vmem:[#allocation2 + $0xe10] sm:$0xff] %v14505_v9  ;;  %782 = vst [vmem:[#allocation2 + $0xe18] sm:$0xff] %v14505_v9 }
 0x16f   : > { %783 = vst [vmem:[#allocation2 + $0xe20] sm:$0xff] %v14505_v9  ;;  %784 = vst [vmem:[#allocation2 + $0xe28] sm:$0xff] %v14505_v9 }
 0x170   : > { %785 = vst [vmem:[#allocation2 + $0xe30] sm:$0xff] %v14505_v9  ;;  %786 = vst [vmem:[#allocation2 + $0xe38] sm:$0xff] %v14505_v9 }
 0x171   : > { %787 = vst [vmem:[#allocation2 + $0xe40] sm:$0xff] %v14505_v9  ;;  %788 = vst [vmem:[#allocation2 + $0xe48] sm:$0xff] %v14505_v9 }
 0x172   : > { %789 = vst [vmem:[#allocation2 + $0xe50] sm:$0xff] %v14505_v9  ;;  %790 = vst [vmem:[#allocation2 + $0xe58] sm:$0xff] %v14505_v9 }
 0x173   : > { %791 = vst [vmem:[#allocation2 + $0xe60] sm:$0xff] %v14505_v9  ;;  %792 = vst [vmem:[#allocation2 + $0xe68] sm:$0xff] %v14505_v9 }
 0x174   : > { %793 = vst [vmem:[#allocation2 + $0xe70] sm:$0xff] %v14505_v9  ;;  %794 = vst [vmem:[#allocation2 + $0xe78] sm:$0xff] %v14505_v9 }
 0x175   : > { %795 = vst [vmem:[#allocation2 + $0xe80] sm:$0xff] %v14505_v9  ;;  %796 = vst [vmem:[#allocation2 + $0xe88] sm:$0xff] %v14505_v9 }
 0x176   : > { %797 = vst [vmem:[#allocation2 + $0xe90] sm:$0xff] %v14505_v9  ;;  %798 = vst [vmem:[#allocation2 + $0xe98] sm:$0xff] %v14505_v9 }
 0x177   : > { %799 = vst [vmem:[#allocation2 + $0xea0] sm:$0xff] %v14505_v9  ;;  %800 = vst [vmem:[#allocation2 + $0xea8] sm:$0xff] %v14505_v9 }
 0x178   : > { %801 = vst [vmem:[#allocation2 + $0xeb0] sm:$0xff] %v14505_v9  ;;  %802 = vst [vmem:[#allocation2 + $0xeb8] sm:$0xff] %v14505_v9 }
 0x179   : > { %803 = vst [vmem:[#allocation2 + $0xec0] sm:$0xff] %v14505_v9  ;;  %804 = vst [vmem:[#allocation2 + $0xec8] sm:$0xff] %v14505_v9 }
 0x17a   : > { %805 = vst [vmem:[#allocation2 + $0xed0] sm:$0xff] %v14505_v9  ;;  %806 = vst [vmem:[#allocation2 + $0xed8] sm:$0xff] %v14505_v9 }
 0x17b   : > { %807 = vst [vmem:[#allocation2 + $0xee0] sm:$0xff] %v14505_v9  ;;  %808 = vst [vmem:[#allocation2 + $0xee8] sm:$0xff] %v14505_v9 }
 0x17c   : > { %809 = vst [vmem:[#allocation2 + $0xef0] sm:$0xff] %v14505_v9  ;;  %810 = vst [vmem:[#allocation2 + $0xef8] sm:$0xff] %v14505_v9 }
 0x17d   : > { %811 = vst [vmem:[#allocation2 + $0xf00] sm:$0xff] %v14505_v9  ;;  %812 = vst [vmem:[#allocation2 + $0xf08] sm:$0xff] %v14505_v9 }
 0x17e   : > { %813 = vst [vmem:[#allocation2 + $0xf10] sm:$0xff] %v14505_v9  ;;  %814 = vst [vmem:[#allocation2 + $0xf18] sm:$0xff] %v14505_v9 }
 0x17f   : > { %815 = vst [vmem:[#allocation2 + $0xf20] sm:$0xff] %v14505_v9  ;;  %816 = vst [vmem:[#allocation2 + $0xf28] sm:$0xff] %v14505_v9 }
 0x180   : > { %817 = vst [vmem:[#allocation2 + $0xf30] sm:$0xff] %v14505_v9  ;;  %818 = vst [vmem:[#allocation2 + $0xf38] sm:$0xff] %v14505_v9 }
 0x181   : > { %819 = vst [vmem:[#allocation2 + $0xf40] sm:$0xff] %v14505_v9  ;;  %820 = vst [vmem:[#allocation2 + $0xf48] sm:$0xff] %v14505_v9 }
 0x182   : > { %821 = vst [vmem:[#allocation2 + $0xf50] sm:$0xff] %v14505_v9  ;;  %822 = vst [vmem:[#allocation2 + $0xf58] sm:$0xff] %v14505_v9 }
 0x183   : > { %823 = vst [vmem:[#allocation2 + $0xf60] sm:$0xff] %v14505_v9  ;;  %824 = vst [vmem:[#allocation2 + $0xf68] sm:$0xff] %v14505_v9 }
 0x184   : > { %825 = vst [vmem:[#allocation2 + $0xf70] sm:$0xff] %v14505_v9  ;;  %826 = vst [vmem:[#allocation2 + $0xf78] sm:$0xff] %v14505_v9 }
 0x185   : > { %827 = vst [vmem:[#allocation2 + $0xf80] sm:$0xff] %v14505_v9  ;;  %828 = vst [vmem:[#allocation2 + $0xf88] sm:$0xff] %v14505_v9 }
 0x186   : > { %829 = vst [vmem:[#allocation2 + $0xf90] sm:$0xff] %v14505_v9  ;;  %830 = vst [vmem:[#allocation2 + $0xf98] sm:$0xff] %v14505_v9 }
 0x187   : > { %831 = vst [vmem:[#allocation2 + $0xfa0] sm:$0xff] %v14505_v9  ;;  %832 = vst [vmem:[#allocation2 + $0xfa8] sm:$0xff] %v14505_v9 }
 0x188   : > { %833 = vst [vmem:[#allocation2 + $0xfb0] sm:$0xff] %v14505_v9  ;;  %834 = vst [vmem:[#allocation2 + $0xfb8] sm:$0xff] %v14505_v9 }
 0x189   : > { %835 = vst [vmem:[#allocation2 + $0xfc0] sm:$0xff] %v14505_v9  ;;  %836 = vst [vmem:[#allocation2 + $0xfc8] sm:$0xff] %v14505_v9 }
 0x18a   : > { %837 = vst [vmem:[#allocation2 + $0xfd0] sm:$0xff] %v14505_v9  ;;  %838 = vst [vmem:[#allocation2 + $0xfd8] sm:$0xff] %v14505_v9 }
 0x18b   : > { %839 = vst [vmem:[#allocation2 + $0xfe0] sm:$0xff] %v14505_v9  ;;  %840 = vst [vmem:[#allocation2 + $0xfe8] sm:$0xff] %v14505_v9 }
 0x18c   : > { %841 = vst [vmem:[#allocation2 + $0xff0] sm:$0xff] %v14505_v9  ;;  %842 = vst [vmem:[#allocation2 + $0xff8] sm:$0xff] %v14505_v9 }
 0x18d   : > { %843 = vst [vmem:[#allocation2 + $0x1000] sm:$0xff] %v14508_v10  ;;  %844 = vst [vmem:[#allocation2 + $0x1008] sm:$0xff] %v14508_v10 }
 0x18e   : > { %845 = vst [vmem:[#allocation2 + $0x1010] sm:$0xff] %v14508_v10  ;;  %846 = vst [vmem:[#allocation2 + $0x1018] sm:$0xff] %v14508_v10 }
 0x18f   : > { %847 = vst [vmem:[#allocation2 + $0x1020] sm:$0xff] %v14508_v10  ;;  %848 = vst [vmem:[#allocation2 + $0x1028] sm:$0xff] %v14508_v10 }
 0x190   : > { %849 = vst [vmem:[#allocation2 + $0x1030] sm:$0xff] %v14508_v10  ;;  %850 = vst [vmem:[#allocation2 + $0x1038] sm:$0xff] %v14508_v10 }
 0x191   : > { %851 = vst [vmem:[#allocation2 + $0x1040] sm:$0xff] %v14508_v10  ;;  %852 = vst [vmem:[#allocation2 + $0x1048] sm:$0xff] %v14508_v10 }
 0x192   : > { %853 = vst [vmem:[#allocation2 + $0x1050] sm:$0xff] %v14508_v10  ;;  %854 = vst [vmem:[#allocation2 + $0x1058] sm:$0xff] %v14508_v10 }
 0x193   : > { %855 = vst [vmem:[#allocation2 + $0x1060] sm:$0xff] %v14508_v10  ;;  %856 = vst [vmem:[#allocation2 + $0x1068] sm:$0xff] %v14508_v10 }
 0x194   : > { %857 = vst [vmem:[#allocation2 + $0x1070] sm:$0xff] %v14508_v10  ;;  %858 = vst [vmem:[#allocation2 + $0x1078] sm:$0xff] %v14508_v10 }
 0x195   : > { %859 = vst [vmem:[#allocation2 + $0x1080] sm:$0xff] %v14508_v10  ;;  %860 = vst [vmem:[#allocation2 + $0x1088] sm:$0xff] %v14508_v10 }
 0x196   : > { %861 = vst [vmem:[#allocation2 + $0x1090] sm:$0xff] %v14508_v10  ;;  %862 = vst [vmem:[#allocation2 + $0x1098] sm:$0xff] %v14508_v10 }
 0x197   : > { %863 = vst [vmem:[#allocation2 + $0x10a0] sm:$0xff] %v14508_v10  ;;  %864 = vst [vmem:[#allocation2 + $0x10a8] sm:$0xff] %v14508_v10 }
 0x198   : > { %865 = vst [vmem:[#allocation2 + $0x10b0] sm:$0xff] %v14508_v10  ;;  %866 = vst [vmem:[#allocation2 + $0x10b8] sm:$0xff] %v14508_v10 }
 0x199   : > { %867 = vst [vmem:[#allocation2 + $0x10c0] sm:$0xff] %v14508_v10  ;;  %868 = vst [vmem:[#allocation2 + $0x10c8] sm:$0xff] %v14508_v10 }
 0x19a   : > { %869 = vst [vmem:[#allocation2 + $0x10d0] sm:$0xff] %v14508_v10  ;;  %870 = vst [vmem:[#allocation2 + $0x10d8] sm:$0xff] %v14508_v10 }
 0x19b   : > { %871 = vst [vmem:[#allocation2 + $0x10e0] sm:$0xff] %v14508_v10  ;;  %872 = vst [vmem:[#allocation2 + $0x10e8] sm:$0xff] %v14508_v10 }
 0x19c   : > { %873 = vst [vmem:[#allocation2 + $0x10f0] sm:$0xff] %v14508_v10  ;;  %874 = vst [vmem:[#allocation2 + $0x10f8] sm:$0xff] %v14508_v10 }
 0x19d   : > { %875 = vst [vmem:[#allocation2 + $0x1100] sm:$0xff] %v14508_v10  ;;  %876 = vst [vmem:[#allocation2 + $0x1108] sm:$0xff] %v14508_v10 }
 0x19e   : > { %877 = vst [vmem:[#allocation2 + $0x1110] sm:$0xff] %v14508_v10  ;;  %878 = vst [vmem:[#allocation2 + $0x1118] sm:$0xff] %v14508_v10 }
 0x19f   : > { %879 = vst [vmem:[#allocation2 + $0x1120] sm:$0xff] %v14508_v10  ;;  %880 = vst [vmem:[#allocation2 + $0x1128] sm:$0xff] %v14508_v10 }
 0x1a0   : > { %881 = vst [vmem:[#allocation2 + $0x1130] sm:$0xff] %v14508_v10  ;;  %882 = vst [vmem:[#allocation2 + $0x1138] sm:$0xff] %v14508_v10 }
 0x1a1   : > { %883 = vst [vmem:[#allocation2 + $0x1140] sm:$0xff] %v14508_v10  ;;  %884 = vst [vmem:[#allocation2 + $0x1148] sm:$0xff] %v14508_v10 }
 0x1a2   : > { %885 = vst [vmem:[#allocation2 + $0x1150] sm:$0xff] %v14508_v10  ;;  %886 = vst [vmem:[#allocation2 + $0x1158] sm:$0xff] %v14508_v10 }
 0x1a3   : > { %887 = vst [vmem:[#allocation2 + $0x1160] sm:$0xff] %v14508_v10  ;;  %888 = vst [vmem:[#allocation2 + $0x1168] sm:$0xff] %v14508_v10 }
 0x1a4   : > { %889 = vst [vmem:[#allocation2 + $0x1170] sm:$0xff] %v14508_v10  ;;  %890 = vst [vmem:[#allocation2 + $0x1178] sm:$0xff] %v14508_v10 }
 0x1a5   : > { %891 = vst [vmem:[#allocation2 + $0x1180] sm:$0xff] %v14508_v10  ;;  %892 = vst [vmem:[#allocation2 + $0x1188] sm:$0xff] %v14508_v10 }
 0x1a6   : > { %893 = vst [vmem:[#allocation2 + $0x1190] sm:$0xff] %v14508_v10  ;;  %894 = vst [vmem:[#allocation2 + $0x1198] sm:$0xff] %v14508_v10 }
 0x1a7   : > { %895 = vst [vmem:[#allocation2 + $0x11a0] sm:$0xff] %v14508_v10  ;;  %896 = vst [vmem:[#allocation2 + $0x11a8] sm:$0xff] %v14508_v10 }
 0x1a8   : > { %897 = vst [vmem:[#allocation2 + $0x11b0] sm:$0xff] %v14508_v10  ;;  %898 = vst [vmem:[#allocation2 + $0x11b8] sm:$0xff] %v14508_v10 }
 0x1a9   : > { %899 = vst [vmem:[#allocation2 + $0x11c0] sm:$0xff] %v14508_v10  ;;  %900 = vst [vmem:[#allocation2 + $0x11c8] sm:$0xff] %v14508_v10 }
 0x1aa   : > { %901 = vst [vmem:[#allocation2 + $0x11d0] sm:$0xff] %v14508_v10  ;;  %902 = vst [vmem:[#allocation2 + $0x11d8] sm:$0xff] %v14508_v10 }
 0x1ab   : > { %903 = vst [vmem:[#allocation2 + $0x11e0] sm:$0xff] %v14508_v10  ;;  %904 = vst [vmem:[#allocation2 + $0x11e8] sm:$0xff] %v14508_v10 }
 0x1ac   : > { %905 = vst [vmem:[#allocation2 + $0x11f0] sm:$0xff] %v14508_v10  ;;  %906 = vst [vmem:[#allocation2 + $0x11f8] sm:$0xff] %v14508_v10 }
 0x1ad   : > { %907 = vst [vmem:[#allocation2 + $0x1200] sm:$0xff] %v14767_v11  ;;  %908 = vst [vmem:[#allocation2 + $0x1208] sm:$0xff] %v14767_v11 }
 0x1ae   : > { %909 = vst [vmem:[#allocation2 + $0x1210] sm:$0xff] %v14767_v11  ;;  %910 = vst [vmem:[#allocation2 + $0x1218] sm:$0xff] %v14767_v11 }
 0x1af   : > { %911 = vst [vmem:[#allocation2 + $0x1220] sm:$0xff] %v14767_v11  ;;  %912 = vst [vmem:[#allocation2 + $0x1228] sm:$0xff] %v14767_v11 }
 0x1b0   : > { %913 = vst [vmem:[#allocation2 + $0x1230] sm:$0xff] %v14767_v11  ;;  %914 = vst [vmem:[#allocation2 + $0x1238] sm:$0xff] %v14767_v11 }
 0x1b1   : > { %915 = vst [vmem:[#allocation2 + $0x1240] sm:$0xff] %v14767_v11  ;;  %916 = vst [vmem:[#allocation2 + $0x1248] sm:$0xff] %v14767_v11 }
 0x1b2   : > { %917 = vst [vmem:[#allocation2 + $0x1250] sm:$0xff] %v14767_v11  ;;  %918 = vst [vmem:[#allocation2 + $0x1258] sm:$0xff] %v14767_v11 }
 0x1b3   : > { %919 = vst [vmem:[#allocation2 + $0x1260] sm:$0xff] %v14767_v11  ;;  %920 = vst [vmem:[#allocation2 + $0x1268] sm:$0xff] %v14767_v11 }
 0x1b4   : > { %921 = vst [vmem:[#allocation2 + $0x1270] sm:$0xff] %v14767_v11  ;;  %922 = vst [vmem:[#allocation2 + $0x1278] sm:$0xff] %v14767_v11 }
 0x1b5   : > { %923 = vst [vmem:[#allocation2 + $0x1280] sm:$0xff] %v14767_v11  ;;  %924 = vst [vmem:[#allocation2 + $0x1288] sm:$0xff] %v14767_v11 }
 0x1b6   : > { %925 = vst [vmem:[#allocation2 + $0x1290] sm:$0xff] %v14767_v11  ;;  %926 = vst [vmem:[#allocation2 + $0x1298] sm:$0xff] %v14767_v11 }
 0x1b7   : > { %927 = vst [vmem:[#allocation2 + $0x12a0] sm:$0xff] %v14767_v11  ;;  %928 = vst [vmem:[#allocation2 + $0x12a8] sm:$0xff] %v14767_v11 }
 0x1b8   : > { %929 = vst [vmem:[#allocation2 + $0x12b0] sm:$0xff] %v14767_v11  ;;  %930 = vst [vmem:[#allocation2 + $0x12b8] sm:$0xff] %v14767_v11 }
 0x1b9   : > { %931 = vst [vmem:[#allocation2 + $0x12c0] sm:$0xff] %v14767_v11  ;;  %932 = vst [vmem:[#allocation2 + $0x12c8] sm:$0xff] %v14767_v11 }
 0x1ba   : > { %933 = vst [vmem:[#allocation2 + $0x12d0] sm:$0xff] %v14767_v11  ;;  %934 = vst [vmem:[#allocation2 + $0x12d8] sm:$0xff] %v14767_v11 }
 0x1bb   : > { %935 = vst [vmem:[#allocation2 + $0x12e0] sm:$0xff] %v14767_v11  ;;  %936 = vst [vmem:[#allocation2 + $0x12e8] sm:$0xff] %v14767_v11 }
 0x1bc   : > { %937 = vst [vmem:[#allocation2 + $0x12f0] sm:$0xff] %v14767_v11  ;;  %938 = vst [vmem:[#allocation2 + $0x12f8] sm:$0xff] %v14767_v11 }
 0x1bd   : > { %939 = vst [vmem:[#allocation2 + $0x1300] sm:$0xff] %v14767_v11  ;;  %940 = vst [vmem:[#allocation2 + $0x1308] sm:$0xff] %v14767_v11 }
 0x1be   : > { %941 = vst [vmem:[#allocation2 + $0x1310] sm:$0xff] %v14767_v11  ;;  %942 = vst [vmem:[#allocation2 + $0x1318] sm:$0xff] %v14767_v11 }
 0x1bf   : > { %943 = vst [vmem:[#allocation2 + $0x1320] sm:$0xff] %v14767_v11  ;;  %944 = vst [vmem:[#allocation2 + $0x1328] sm:$0xff] %v14767_v11 }
 0x1c0   : > { %945 = vst [vmem:[#allocation2 + $0x1330] sm:$0xff] %v14767_v11  ;;  %946 = vst [vmem:[#allocation2 + $0x1338] sm:$0xff] %v14767_v11 }
 0x1c1   : > { %947 = vst [vmem:[#allocation2 + $0x1340] sm:$0xff] %v14767_v11  ;;  %948 = vst [vmem:[#allocation2 + $0x1348] sm:$0xff] %v14767_v11 }
 0x1c2   : > { %949 = vst [vmem:[#allocation2 + $0x1350] sm:$0xff] %v14767_v11  ;;  %950 = vst [vmem:[#allocation2 + $0x1358] sm:$0xff] %v14767_v11 }
 0x1c3   : > { %951 = vst [vmem:[#allocation2 + $0x1360] sm:$0xff] %v14767_v11  ;;  %952 = vst [vmem:[#allocation2 + $0x1368] sm:$0xff] %v14767_v11 }
 0x1c4   : > { %953 = vst [vmem:[#allocation2 + $0x1370] sm:$0xff] %v14767_v11  ;;  %954 = vst [vmem:[#allocation2 + $0x1378] sm:$0xff] %v14767_v11 }
 0x1c5   : > { %955 = vst [vmem:[#allocation2 + $0x1380] sm:$0xff] %v14767_v11  ;;  %956 = vst [vmem:[#allocation2 + $0x1388] sm:$0xff] %v14767_v11 }
 0x1c6   : > { %957 = vst [vmem:[#allocation2 + $0x1390] sm:$0xff] %v14767_v11  ;;  %958 = vst [vmem:[#allocation2 + $0x1398] sm:$0xff] %v14767_v11 }
 0x1c7   : > { %959 = vst [vmem:[#allocation2 + $0x13a0] sm:$0xff] %v14767_v11  ;;  %960 = vst [vmem:[#allocation2 + $0x13a8] sm:$0xff] %v14767_v11 }
 0x1c8   : > { %961 = vst [vmem:[#allocation2 + $0x13b0] sm:$0xff] %v14767_v11  ;;  %962 = vst [vmem:[#allocation2 + $0x13b8] sm:$0xff] %v14767_v11 }
 0x1c9   : > { %963 = vst [vmem:[#allocation2 + $0x13c0] sm:$0xff] %v14767_v11  ;;  %964 = vst [vmem:[#allocation2 + $0x13c8] sm:$0xff] %v14767_v11 }
 0x1ca   : > { %965 = vst [vmem:[#allocation2 + $0x13d0] sm:$0xff] %v14767_v11  ;;  %966 = vst [vmem:[#allocation2 + $0x13d8] sm:$0xff] %v14767_v11 }
 0x1cb   : > { %967 = vst [vmem:[#allocation2 + $0x13e0] sm:$0xff] %v14767_v11  ;;  %968 = vst [vmem:[#allocation2 + $0x13e8] sm:$0xff] %v14767_v11 }
 0x1cc   : > { %969 = vst [vmem:[#allocation2 + $0x13f0] sm:$0xff] %v14767_v11  ;;  %970 = vst [vmem:[#allocation2 + $0x13f8] sm:$0xff] %v14767_v11 }
 0x1cd   : > { %971 = vst [vmem:[#allocation2 + $0x1400] sm:$0xff] %v14770_v12  ;;  %972 = vst [vmem:[#allocation2 + $0x1408] sm:$0xff] %v14770_v12 }
 0x1ce   : > { %973 = vst [vmem:[#allocation2 + $0x1410] sm:$0xff] %v14770_v12  ;;  %974 = vst [vmem:[#allocation2 + $0x1418] sm:$0xff] %v14770_v12 }
 0x1cf   : > { %975 = vst [vmem:[#allocation2 + $0x1420] sm:$0xff] %v14770_v12  ;;  %976 = vst [vmem:[#allocation2 + $0x1428] sm:$0xff] %v14770_v12 }
 0x1d0   : > { %977 = vst [vmem:[#allocation2 + $0x1430] sm:$0xff] %v14770_v12  ;;  %978 = vst [vmem:[#allocation2 + $0x1438] sm:$0xff] %v14770_v12 }
 0x1d1   : > { %979 = vst [vmem:[#allocation2 + $0x1440] sm:$0xff] %v14770_v12  ;;  %980 = vst [vmem:[#allocation2 + $0x1448] sm:$0xff] %v14770_v12 }
 0x1d2   : > { %981 = vst [vmem:[#allocation2 + $0x1450] sm:$0xff] %v14770_v12  ;;  %982 = vst [vmem:[#allocation2 + $0x1458] sm:$0xff] %v14770_v12 }
 0x1d3   : > { %983 = vst [vmem:[#allocation2 + $0x1460] sm:$0xff] %v14770_v12  ;;  %984 = vst [vmem:[#allocation2 + $0x1468] sm:$0xff] %v14770_v12 }
 0x1d4   : > { %985 = vst [vmem:[#allocation2 + $0x1470] sm:$0xff] %v14770_v12  ;;  %986 = vst [vmem:[#allocation2 + $0x1478] sm:$0xff] %v14770_v12 }
 0x1d5   : > { %987 = vst [vmem:[#allocation2 + $0x1480] sm:$0xff] %v14770_v12  ;;  %988 = vst [vmem:[#allocation2 + $0x1488] sm:$0xff] %v14770_v12 }
 0x1d6   : > { %989 = vst [vmem:[#allocation2 + $0x1490] sm:$0xff] %v14770_v12  ;;  %990 = vst [vmem:[#allocation2 + $0x1498] sm:$0xff] %v14770_v12 }
 0x1d7   : > { %991 = vst [vmem:[#allocation2 + $0x14a0] sm:$0xff] %v14770_v12  ;;  %992 = vst [vmem:[#allocation2 + $0x14a8] sm:$0xff] %v14770_v12 }
 0x1d8   : > { %993 = vst [vmem:[#allocation2 + $0x14b0] sm:$0xff] %v14770_v12  ;;  %994 = vst [vmem:[#allocation2 + $0x14b8] sm:$0xff] %v14770_v12 }
 0x1d9   : > { %995 = vst [vmem:[#allocation2 + $0x14c0] sm:$0xff] %v14770_v12  ;;  %996 = vst [vmem:[#allocation2 + $0x14c8] sm:$0xff] %v14770_v12 }
 0x1da   : > { %997 = vst [vmem:[#allocation2 + $0x14d0] sm:$0xff] %v14770_v12  ;;  %998 = vst [vmem:[#allocation2 + $0x14d8] sm:$0xff] %v14770_v12 }
 0x1db   : > { %999 = vst [vmem:[#allocation2 + $0x14e0] sm:$0xff] %v14770_v12  ;;  %1000 = vst [vmem:[#allocation2 + $0x14e8] sm:$0xff] %v14770_v12 }
 0x1dc   : > { %1001 = vst [vmem:[#allocation2 + $0x14f0] sm:$0xff] %v14770_v12  ;;  %1002 = vst [vmem:[#allocation2 + $0x14f8] sm:$0xff] %v14770_v12 }
 0x1dd   : > { %1003 = vst [vmem:[#allocation2 + $0x1500] sm:$0xff] %v14770_v12  ;;  %1004 = vst [vmem:[#allocation2 + $0x1508] sm:$0xff] %v14770_v12 }
 0x1de   : > { %1005 = vst [vmem:[#allocation2 + $0x1510] sm:$0xff] %v14770_v12  ;;  %1006 = vst [vmem:[#allocation2 + $0x1518] sm:$0xff] %v14770_v12 }
 0x1df   : > { %1007 = vst [vmem:[#allocation2 + $0x1520] sm:$0xff] %v14770_v12  ;;  %1008 = vst [vmem:[#allocation2 + $0x1528] sm:$0xff] %v14770_v12 }
 0x1e0   : > { %1009 = vst [vmem:[#allocation2 + $0x1530] sm:$0xff] %v14770_v12  ;;  %1010 = vst [vmem:[#allocation2 + $0x1538] sm:$0xff] %v14770_v12 }
 0x1e1   : > { %1011 = vst [vmem:[#allocation2 + $0x1540] sm:$0xff] %v14770_v12  ;;  %1012 = vst [vmem:[#allocation2 + $0x1548] sm:$0xff] %v14770_v12 }
 0x1e2   : > { %1013 = vst [vmem:[#allocation2 + $0x1550] sm:$0xff] %v14770_v12  ;;  %1014 = vst [vmem:[#allocation2 + $0x1558] sm:$0xff] %v14770_v12 }
 0x1e3   : > { %1015 = vst [vmem:[#allocation2 + $0x1560] sm:$0xff] %v14770_v12  ;;  %1016 = vst [vmem:[#allocation2 + $0x1568] sm:$0xff] %v14770_v12 }
 0x1e4   : > { %1017 = vst [vmem:[#allocation2 + $0x1570] sm:$0xff] %v14770_v12  ;;  %1018 = vst [vmem:[#allocation2 + $0x1578] sm:$0xff] %v14770_v12 }
 0x1e5   : > { %1019 = vst [vmem:[#allocation2 + $0x1580] sm:$0xff] %v14770_v12  ;;  %1020 = vst [vmem:[#allocation2 + $0x1588] sm:$0xff] %v14770_v12 }
 0x1e6   : > { %1021 = vst [vmem:[#allocation2 + $0x1590] sm:$0xff] %v14770_v12  ;;  %1022 = vst [vmem:[#allocation2 + $0x1598] sm:$0xff] %v14770_v12 }
 0x1e7   : > { %1023 = vst [vmem:[#allocation2 + $0x15a0] sm:$0xff] %v14770_v12  ;;  %1024 = vst [vmem:[#allocation2 + $0x15a8] sm:$0xff] %v14770_v12 }
 0x1e8   : > { %1025 = vst [vmem:[#allocation2 + $0x15b0] sm:$0xff] %v14770_v12  ;;  %1026 = vst [vmem:[#allocation2 + $0x15b8] sm:$0xff] %v14770_v12 }
 0x1e9   : > { %1027 = vst [vmem:[#allocation2 + $0x15c0] sm:$0xff] %v14770_v12  ;;  %1028 = vst [vmem:[#allocation2 + $0x15c8] sm:$0xff] %v14770_v12 }
 0x1ea   : > { %1029 = vst [vmem:[#allocation2 + $0x15d0] sm:$0xff] %v14770_v12  ;;  %1030 = vst [vmem:[#allocation2 + $0x15d8] sm:$0xff] %v14770_v12 }
 0x1eb   : > { %1031 = vst [vmem:[#allocation2 + $0x15e0] sm:$0xff] %v14770_v12  ;;  %1032 = vst [vmem:[#allocation2 + $0x15e8] sm:$0xff] %v14770_v12 }
 0x1ec   : > { %1033 = vst [vmem:[#allocation2 + $0x15f0] sm:$0xff] %v14770_v12  ;;  %1034 = vst [vmem:[#allocation2 + $0x15f8] sm:$0xff] %v14770_v12 }
 0x1ed   : > { %1035 = vst [vmem:[#allocation2 + $0x1600] sm:$0xff] %v14773_v13  ;;  %1036 = vst [vmem:[#allocation2 + $0x1608] sm:$0xff] %v14773_v13 }
 0x1ee   : > { %1037 = vst [vmem:[#allocation2 + $0x1610] sm:$0xff] %v14773_v13  ;;  %1038 = vst [vmem:[#allocation2 + $0x1618] sm:$0xff] %v14773_v13 }
 0x1ef   : > { %1039 = vst [vmem:[#allocation2 + $0x1620] sm:$0xff] %v14773_v13  ;;  %1040 = vst [vmem:[#allocation2 + $0x1628] sm:$0xff] %v14773_v13 }
 0x1f0   : > { %1041 = vst [vmem:[#allocation2 + $0x1630] sm:$0xff] %v14773_v13  ;;  %1042 = vst [vmem:[#allocation2 + $0x1638] sm:$0xff] %v14773_v13 }
 0x1f1   : > { %1043 = vst [vmem:[#allocation2 + $0x1640] sm:$0xff] %v14773_v13  ;;  %1044 = vst [vmem:[#allocation2 + $0x1648] sm:$0xff] %v14773_v13 }
 0x1f2   : > { %1045 = vst [vmem:[#allocation2 + $0x1650] sm:$0xff] %v14773_v13  ;;  %1046 = vst [vmem:[#allocation2 + $0x1658] sm:$0xff] %v14773_v13 }
 0x1f3   : > { %1047 = vst [vmem:[#allocation2 + $0x1660] sm:$0xff] %v14773_v13  ;;  %1048 = vst [vmem:[#allocation2 + $0x1668] sm:$0xff] %v14773_v13 }
 0x1f4   : > { %1049 = vst [vmem:[#allocation2 + $0x1670] sm:$0xff] %v14773_v13  ;;  %1050 = vst [vmem:[#allocation2 + $0x1678] sm:$0xff] %v14773_v13 }
 0x1f5   : > { %1051 = vst [vmem:[#allocation2 + $0x1680] sm:$0xff] %v14773_v13  ;;  %1052 = vst [vmem:[#allocation2 + $0x1688] sm:$0xff] %v14773_v13 }
 0x1f6   : > { %1053 = vst [vmem:[#allocation2 + $0x1690] sm:$0xff] %v14773_v13  ;;  %1054 = vst [vmem:[#allocation2 + $0x1698] sm:$0xff] %v14773_v13 }
 0x1f7   : > { %1055 = vst [vmem:[#allocation2 + $0x16a0] sm:$0xff] %v14773_v13  ;;  %1056 = vst [vmem:[#allocation2 + $0x16a8] sm:$0xff] %v14773_v13 }
 0x1f8   : > { %1057 = vst [vmem:[#allocation2 + $0x16b0] sm:$0xff] %v14773_v13  ;;  %1058 = vst [vmem:[#allocation2 + $0x16b8] sm:$0xff] %v14773_v13 }
 0x1f9   : > { %1059 = vst [vmem:[#allocation2 + $0x16c0] sm:$0xff] %v14773_v13  ;;  %1060 = vst [vmem:[#allocation2 + $0x16c8] sm:$0xff] %v14773_v13 }
 0x1fa   : > { %1061 = vst [vmem:[#allocation2 + $0x16d0] sm:$0xff] %v14773_v13  ;;  %1062 = vst [vmem:[#allocation2 + $0x16d8] sm:$0xff] %v14773_v13 }
 0x1fb   : > { %1063 = vst [vmem:[#allocation2 + $0x16e0] sm:$0xff] %v14773_v13  ;;  %1064 = vst [vmem:[#allocation2 + $0x16e8] sm:$0xff] %v14773_v13 }
 0x1fc   : > { %1065 = vst [vmem:[#allocation2 + $0x16f0] sm:$0xff] %v14773_v13  ;;  %1066 = vst [vmem:[#allocation2 + $0x16f8] sm:$0xff] %v14773_v13 }
 0x1fd   : > { %1067 = vst [vmem:[#allocation2 + $0x1700] sm:$0xff] %v14773_v13  ;;  %1068 = vst [vmem:[#allocation2 + $0x1708] sm:$0xff] %v14773_v13 }
 0x1fe   : > { %1069 = vst [vmem:[#allocation2 + $0x1710] sm:$0xff] %v14773_v13  ;;  %1070 = vst [vmem:[#allocation2 + $0x1718] sm:$0xff] %v14773_v13 }
 0x1ff   : > { %1071 = vst [vmem:[#allocation2 + $0x1720] sm:$0xff] %v14773_v13  ;;  %1072 = vst [vmem:[#allocation2 + $0x1728] sm:$0xff] %v14773_v13 }
 0x200   : > { %1073 = vst [vmem:[#allocation2 + $0x1730] sm:$0xff] %v14773_v13  ;;  %1074 = vst [vmem:[#allocation2 + $0x1738] sm:$0xff] %v14773_v13 }
 0x201   : > { %1075 = vst [vmem:[#allocation2 + $0x1740] sm:$0xff] %v14773_v13  ;;  %1076 = vst [vmem:[#allocation2 + $0x1748] sm:$0xff] %v14773_v13 }
 0x202   : > { %1077 = vst [vmem:[#allocation2 + $0x1750] sm:$0xff] %v14773_v13  ;;  %1078 = vst [vmem:[#allocation2 + $0x1758] sm:$0xff] %v14773_v13 }
 0x203   : > { %1079 = vst [vmem:[#allocation2 + $0x1760] sm:$0xff] %v14773_v13  ;;  %1080 = vst [vmem:[#allocation2 + $0x1768] sm:$0xff] %v14773_v13 }
 0x204   : > { %1081 = vst [vmem:[#allocation2 + $0x1770] sm:$0xff] %v14773_v13  ;;  %1082 = vst [vmem:[#allocation2 + $0x1778] sm:$0xff] %v14773_v13 }
 0x205   : > { %1083 = vst [vmem:[#allocation2 + $0x1780] sm:$0xff] %v14773_v13  ;;  %1084 = vst [vmem:[#allocation2 + $0x1788] sm:$0xff] %v14773_v13 }
 0x206   : > { %1085 = vst [vmem:[#allocation2 + $0x1790] sm:$0xff] %v14773_v13  ;;  %1086 = vst [vmem:[#allocation2 + $0x1798] sm:$0xff] %v14773_v13 }
 0x207   : > { %1087 = vst [vmem:[#allocation2 + $0x17a0] sm:$0xff] %v14773_v13  ;;  %1088 = vst [vmem:[#allocation2 + $0x17a8] sm:$0xff] %v14773_v13 }
 0x208   : > { %1089 = vst [vmem:[#allocation2 + $0x17b0] sm:$0xff] %v14773_v13  ;;  %1090 = vst [vmem:[#allocation2 + $0x17b8] sm:$0xff] %v14773_v13 }
 0x209   : > { %1091 = vst [vmem:[#allocation2 + $0x17c0] sm:$0xff] %v14773_v13  ;;  %1092 = vst [vmem:[#allocation2 + $0x17c8] sm:$0xff] %v14773_v13 }
 0x20a   : > { %1093 = vst [vmem:[#allocation2 + $0x17d0] sm:$0xff] %v14773_v13  ;;  %1094 = vst [vmem:[#allocation2 + $0x17d8] sm:$0xff] %v14773_v13 }
 0x20b   : > { %1095 = vst [vmem:[#allocation2 + $0x17e0] sm:$0xff] %v14773_v13  ;;  %1096 = vst [vmem:[#allocation2 + $0x17e8] sm:$0xff] %v14773_v13 }
 0x20c   : > { %1097 = vst [vmem:[#allocation2 + $0x17f0] sm:$0xff] %v14773_v13  ;;  %1098 = vst [vmem:[#allocation2 + $0x17f8] sm:$0xff] %v14773_v13 }
 0x20d   : > { %1099 = vst [vmem:[#allocation2 + $0x1800] sm:$0xff] %v14776_v14  ;;  %1100 = vst [vmem:[#allocation2 + $0x1808] sm:$0xff] %v14776_v14 }
 0x20e   : > { %1101 = vst [vmem:[#allocation2 + $0x1810] sm:$0xff] %v14776_v14  ;;  %1102 = vst [vmem:[#allocation2 + $0x1818] sm:$0xff] %v14776_v14 }
 0x20f   : > { %1103 = vst [vmem:[#allocation2 + $0x1820] sm:$0xff] %v14776_v14  ;;  %1104 = vst [vmem:[#allocation2 + $0x1828] sm:$0xff] %v14776_v14 }
 0x210   : > { %1105 = vst [vmem:[#allocation2 + $0x1830] sm:$0xff] %v14776_v14  ;;  %1106 = vst [vmem:[#allocation2 + $0x1838] sm:$0xff] %v14776_v14 }
 0x211   : > { %1107 = vst [vmem:[#allocation2 + $0x1840] sm:$0xff] %v14776_v14  ;;  %1108 = vst [vmem:[#allocation2 + $0x1848] sm:$0xff] %v14776_v14 }
 0x212   : > { %1109 = vst [vmem:[#allocation2 + $0x1850] sm:$0xff] %v14776_v14  ;;  %1110 = vst [vmem:[#allocation2 + $0x1858] sm:$0xff] %v14776_v14 }
 0x213   : > { %1111 = vst [vmem:[#allocation2 + $0x1860] sm:$0xff] %v14776_v14  ;;  %1112 = vst [vmem:[#allocation2 + $0x1868] sm:$0xff] %v14776_v14 }
 0x214   : > { %1113 = vst [vmem:[#allocation2 + $0x1870] sm:$0xff] %v14776_v14  ;;  %1114 = vst [vmem:[#allocation2 + $0x1878] sm:$0xff] %v14776_v14 }
 0x215   : > { %1115 = vst [vmem:[#allocation2 + $0x1880] sm:$0xff] %v14776_v14  ;;  %1116 = vst [vmem:[#allocation2 + $0x1888] sm:$0xff] %v14776_v14 }
 0x216   : > { %1117 = vst [vmem:[#allocation2 + $0x1890] sm:$0xff] %v14776_v14  ;;  %1118 = vst [vmem:[#allocation2 + $0x1898] sm:$0xff] %v14776_v14 }
 0x217   : > { %1119 = vst [vmem:[#allocation2 + $0x18a0] sm:$0xff] %v14776_v14  ;;  %1120 = vst [vmem:[#allocation2 + $0x18a8] sm:$0xff] %v14776_v14 }
 0x218   : > { %1121 = vst [vmem:[#allocation2 + $0x18b0] sm:$0xff] %v14776_v14  ;;  %1122 = vst [vmem:[#allocation2 + $0x18b8] sm:$0xff] %v14776_v14 }
 0x219   : > { %1123 = vst [vmem:[#allocation2 + $0x18c0] sm:$0xff] %v14776_v14  ;;  %1124 = vst [vmem:[#allocation2 + $0x18c8] sm:$0xff] %v14776_v14 }
 0x21a   : > { %1125 = vst [vmem:[#allocation2 + $0x18d0] sm:$0xff] %v14776_v14  ;;  %1126 = vst [vmem:[#allocation2 + $0x18d8] sm:$0xff] %v14776_v14 }
 0x21b   : > { %1127 = vst [vmem:[#allocation2 + $0x18e0] sm:$0xff] %v14776_v14  ;;  %1128 = vst [vmem:[#allocation2 + $0x18e8] sm:$0xff] %v14776_v14 }
 0x21c   : > { %1129 = vst [vmem:[#allocation2 + $0x18f0] sm:$0xff] %v14776_v14  ;;  %1130 = vst [vmem:[#allocation2 + $0x18f8] sm:$0xff] %v14776_v14 }
 0x21d   : > { %1131 = vst [vmem:[#allocation2 + $0x1900] sm:$0xff] %v14776_v14  ;;  %1132 = vst [vmem:[#allocation2 + $0x1908] sm:$0xff] %v14776_v14 }
 0x21e   : > { %1133 = vst [vmem:[#allocation2 + $0x1910] sm:$0xff] %v14776_v14  ;;  %1134 = vst [vmem:[#allocation2 + $0x1918] sm:$0xff] %v14776_v14 }
 0x21f   : > { %1135 = vst [vmem:[#allocation2 + $0x1920] sm:$0xff] %v14776_v14  ;;  %1136 = vst [vmem:[#allocation2 + $0x1928] sm:$0xff] %v14776_v14 }
 0x220   : > { %1137 = vst [vmem:[#allocation2 + $0x1930] sm:$0xff] %v14776_v14  ;;  %1138 = vst [vmem:[#allocation2 + $0x1938] sm:$0xff] %v14776_v14 }
 0x221   : > { %1139 = vst [vmem:[#allocation2 + $0x1940] sm:$0xff] %v14776_v14  ;;  %1140 = vst [vmem:[#allocation2 + $0x1948] sm:$0xff] %v14776_v14 }
 0x222   : > { %1141 = vst [vmem:[#allocation2 + $0x1950] sm:$0xff] %v14776_v14  ;;  %1142 = vst [vmem:[#allocation2 + $0x1958] sm:$0xff] %v14776_v14 }
 0x223   : > { %1143 = vst [vmem:[#allocation2 + $0x1960] sm:$0xff] %v14776_v14  ;;  %1144 = vst [vmem:[#allocation2 + $0x1968] sm:$0xff] %v14776_v14 }
 0x224   : > { %1145 = vst [vmem:[#allocation2 + $0x1970] sm:$0xff] %v14776_v14  ;;  %1146 = vst [vmem:[#allocation2 + $0x1978] sm:$0xff] %v14776_v14 }
 0x225   : > { %1147 = vst [vmem:[#allocation2 + $0x1980] sm:$0xff] %v14776_v14  ;;  %1148 = vst [vmem:[#allocation2 + $0x1988] sm:$0xff] %v14776_v14 }
 0x226   : > { %1149 = vst [vmem:[#allocation2 + $0x1990] sm:$0xff] %v14776_v14  ;;  %1150 = vst [vmem:[#allocation2 + $0x1998] sm:$0xff] %v14776_v14 }
 0x227   : > { %1151 = vst [vmem:[#allocation2 + $0x19a0] sm:$0xff] %v14776_v14  ;;  %1152 = vst [vmem:[#allocation2 + $0x19a8] sm:$0xff] %v14776_v14 }
 0x228   : > { %1153 = vst [vmem:[#allocation2 + $0x19b0] sm:$0xff] %v14776_v14  ;;  %1154 = vst [vmem:[#allocation2 + $0x19b8] sm:$0xff] %v14776_v14 }
 0x229   : > { %1155 = vst [vmem:[#allocation2 + $0x19c0] sm:$0xff] %v14776_v14  ;;  %1156 = vst [vmem:[#allocation2 + $0x19c8] sm:$0xff] %v14776_v14 }
 0x22a   : > { %1157 = vst [vmem:[#allocation2 + $0x19d0] sm:$0xff] %v14776_v14  ;;  %1158 = vst [vmem:[#allocation2 + $0x19d8] sm:$0xff] %v14776_v14 }
 0x22b   : > { %1159 = vst [vmem:[#allocation2 + $0x19e0] sm:$0xff] %v14776_v14  ;;  %1160 = vst [vmem:[#allocation2 + $0x19e8] sm:$0xff] %v14776_v14 }
 0x22c   : > { %1161 = vst [vmem:[#allocation2 + $0x19f0] sm:$0xff] %v14776_v14  ;;  %1162 = vst [vmem:[#allocation2 + $0x19f8] sm:$0xff] %v14776_v14 }
 0x22d   : > { %1163 = vst [vmem:[#allocation2 + $0x1a00] sm:$0xff] %v15037_v16  ;;  %1164 = vst [vmem:[#allocation2 + $0x1a08] sm:$0xff] %v15037_v16 }
 0x22e   : > { %1165 = vst [vmem:[#allocation2 + $0x1a10] sm:$0xff] %v15037_v16  ;;  %1166 = vst [vmem:[#allocation2 + $0x1a18] sm:$0xff] %v15037_v16 }
 0x22f   : > { %1167 = vst [vmem:[#allocation2 + $0x1a20] sm:$0xff] %v15037_v16  ;;  %1168 = vst [vmem:[#allocation2 + $0x1a28] sm:$0xff] %v15037_v16 }
 0x230   : > { %1169 = vst [vmem:[#allocation2 + $0x1a30] sm:$0xff] %v15037_v16  ;;  %1170 = vst [vmem:[#allocation2 + $0x1a38] sm:$0xff] %v15037_v16 }
 0x231   : > { %1171 = vst [vmem:[#allocation2 + $0x1a40] sm:$0xff] %v15037_v16  ;;  %1172 = vst [vmem:[#allocation2 + $0x1a48] sm:$0xff] %v15037_v16 }
 0x232   : > { %1173 = vst [vmem:[#allocation2 + $0x1a50] sm:$0xff] %v15037_v16  ;;  %1174 = vst [vmem:[#allocation2 + $0x1a58] sm:$0xff] %v15037_v16 }
 0x233   : > { %1175 = vst [vmem:[#allocation2 + $0x1a60] sm:$0xff] %v15037_v16  ;;  %1176 = vst [vmem:[#allocation2 + $0x1a68] sm:$0xff] %v15037_v16 }
 0x234   : > { %1177 = vst [vmem:[#allocation2 + $0x1a70] sm:$0xff] %v15037_v16  ;;  %1178 = vst [vmem:[#allocation2 + $0x1a78] sm:$0xff] %v15037_v16 }
 0x235   : > { %1179 = vst [vmem:[#allocation2 + $0x1a80] sm:$0xff] %v15037_v16  ;;  %1180 = vst [vmem:[#allocation2 + $0x1a88] sm:$0xff] %v15037_v16 }
 0x236   : > { %1181 = vst [vmem:[#allocation2 + $0x1a90] sm:$0xff] %v15037_v16  ;;  %1182 = vst [vmem:[#allocation2 + $0x1a98] sm:$0xff] %v15037_v16 }
 0x237   : > { %1183 = vst [vmem:[#allocation2 + $0x1aa0] sm:$0xff] %v15037_v16  ;;  %1184 = vst [vmem:[#allocation2 + $0x1aa8] sm:$0xff] %v15037_v16 }
 0x238   : > { %1185 = vst [vmem:[#allocation2 + $0x1ab0] sm:$0xff] %v15037_v16  ;;  %1186 = vst [vmem:[#allocation2 + $0x1ab8] sm:$0xff] %v15037_v16 }
 0x239   : > { %1187 = vst [vmem:[#allocation2 + $0x1ac0] sm:$0xff] %v15037_v16  ;;  %1188 = vst [vmem:[#allocation2 + $0x1ac8] sm:$0xff] %v15037_v16 }
 0x23a   : > { %1189 = vst [vmem:[#allocation2 + $0x1ad0] sm:$0xff] %v15037_v16  ;;  %1190 = vst [vmem:[#allocation2 + $0x1ad8] sm:$0xff] %v15037_v16 }
 0x23b   : > { %1191 = vst [vmem:[#allocation2 + $0x1ae0] sm:$0xff] %v15037_v16  ;;  %1192 = vst [vmem:[#allocation2 + $0x1ae8] sm:$0xff] %v15037_v16 }
 0x23c   : > { %1193 = vst [vmem:[#allocation2 + $0x1af0] sm:$0xff] %v15037_v16  ;;  %1194 = vst [vmem:[#allocation2 + $0x1af8] sm:$0xff] %v15037_v16 }
 0x23d   : > { %1195 = vst [vmem:[#allocation2 + $0x1b00] sm:$0xff] %v15037_v16  ;;  %1196 = vst [vmem:[#allocation2 + $0x1b08] sm:$0xff] %v15037_v16 }
 0x23e   : > { %1197 = vst [vmem:[#allocation2 + $0x1b10] sm:$0xff] %v15037_v16  ;;  %1198 = vst [vmem:[#allocation2 + $0x1b18] sm:$0xff] %v15037_v16 }
 0x23f   : > { %1199 = vst [vmem:[#allocation2 + $0x1b20] sm:$0xff] %v15037_v16  ;;  %1200 = vst [vmem:[#allocation2 + $0x1b28] sm:$0xff] %v15037_v16 }
 0x240   : > { %1201 = vst [vmem:[#allocation2 + $0x1b30] sm:$0xff] %v15037_v16  ;;  %1202 = vst [vmem:[#allocation2 + $0x1b38] sm:$0xff] %v15037_v16 }
 0x241   : > { %1203 = vst [vmem:[#allocation2 + $0x1b40] sm:$0xff] %v15037_v16  ;;  %1204 = vst [vmem:[#allocation2 + $0x1b48] sm:$0xff] %v15037_v16 }
 0x242   : > { %1205 = vst [vmem:[#allocation2 + $0x1b50] sm:$0xff] %v15037_v16  ;;  %1206 = vst [vmem:[#allocation2 + $0x1b58] sm:$0xff] %v15037_v16 }
 0x243   : > { %1207 = vst [vmem:[#allocation2 + $0x1b60] sm:$0xff] %v15037_v16  ;;  %1208 = vst [vmem:[#allocation2 + $0x1b68] sm:$0xff] %v15037_v16 }
 0x244   : > { %1209 = vst [vmem:[#allocation2 + $0x1b70] sm:$0xff] %v15037_v16  ;;  %1210 = vst [vmem:[#allocation2 + $0x1b78] sm:$0xff] %v15037_v16 }
 0x245   : > { %1211 = vst [vmem:[#allocation2 + $0x1b80] sm:$0xff] %v15037_v16  ;;  %1212 = vst [vmem:[#allocation2 + $0x1b88] sm:$0xff] %v15037_v16 }
 0x246   : > { %1213 = vst [vmem:[#allocation2 + $0x1b90] sm:$0xff] %v15037_v16  ;;  %1214 = vst [vmem:[#allocation2 + $0x1b98] sm:$0xff] %v15037_v16 }
 0x247   : > { %1215 = vst [vmem:[#allocation2 + $0x1ba0] sm:$0xff] %v15037_v16  ;;  %1216 = vst [vmem:[#allocation2 + $0x1ba8] sm:$0xff] %v15037_v16 }
 0x248   : > { %1217 = vst [vmem:[#allocation2 + $0x1bb0] sm:$0xff] %v15037_v16  ;;  %1218 = vst [vmem:[#allocation2 + $0x1bb8] sm:$0xff] %v15037_v16 }
 0x249   : > { %1219 = vst [vmem:[#allocation2 + $0x1bc0] sm:$0xff] %v15037_v16  ;;  %1220 = vst [vmem:[#allocation2 + $0x1bc8] sm:$0xff] %v15037_v16 }
 0x24a   : > { %1221 = vst [vmem:[#allocation2 + $0x1bd0] sm:$0xff] %v15037_v16  ;;  %1222 = vst [vmem:[#allocation2 + $0x1bd8] sm:$0xff] %v15037_v16 }
 0x24b   : > { %1223 = vst [vmem:[#allocation2 + $0x1be0] sm:$0xff] %v15037_v16  ;;  %1224 = vst [vmem:[#allocation2 + $0x1be8] sm:$0xff] %v15037_v16 }
 0x24c   : > { %1225 = vst [vmem:[#allocation2 + $0x1bf0] sm:$0xff] %v15037_v16  ;;  %1226 = vst [vmem:[#allocation2 + $0x1bf8] sm:$0xff] %v15037_v16 }
 0x24d   : > { %1227 = vst [vmem:[#allocation2 + $0x1c00] sm:$0xff] %v15040_v17  ;;  %1228 = vst [vmem:[#allocation2 + $0x1c08] sm:$0xff] %v15040_v17 }
 0x24e   : > { %1229 = vst [vmem:[#allocation2 + $0x1c10] sm:$0xff] %v15040_v17  ;;  %1230 = vst [vmem:[#allocation2 + $0x1c18] sm:$0xff] %v15040_v17 }
 0x24f   : > { %1231 = vst [vmem:[#allocation2 + $0x1c20] sm:$0xff] %v15040_v17  ;;  %1232 = vst [vmem:[#allocation2 + $0x1c28] sm:$0xff] %v15040_v17 }
 0x250   : > { %1233 = vst [vmem:[#allocation2 + $0x1c30] sm:$0xff] %v15040_v17  ;;  %1234 = vst [vmem:[#allocation2 + $0x1c38] sm:$0xff] %v15040_v17 }
 0x251   : > { %1235 = vst [vmem:[#allocation2 + $0x1c40] sm:$0xff] %v15040_v17  ;;  %1236 = vst [vmem:[#allocation2 + $0x1c48] sm:$0xff] %v15040_v17 }
 0x252   : > { %1237 = vst [vmem:[#allocation2 + $0x1c50] sm:$0xff] %v15040_v17  ;;  %1238 = vst [vmem:[#allocation2 + $0x1c58] sm:$0xff] %v15040_v17 }
 0x253   : > { %1239 = vst [vmem:[#allocation2 + $0x1c60] sm:$0xff] %v15040_v17  ;;  %1240 = vst [vmem:[#allocation2 + $0x1c68] sm:$0xff] %v15040_v17 }
 0x254   : > { %1241 = vst [vmem:[#allocation2 + $0x1c70] sm:$0xff] %v15040_v17  ;;  %1242 = vst [vmem:[#allocation2 + $0x1c78] sm:$0xff] %v15040_v17 }
 0x255   : > { %1243 = vst [vmem:[#allocation2 + $0x1c80] sm:$0xff] %v15040_v17  ;;  %1244 = vst [vmem:[#allocation2 + $0x1c88] sm:$0xff] %v15040_v17 }
 0x256   : > { %1245 = vst [vmem:[#allocation2 + $0x1c90] sm:$0xff] %v15040_v17  ;;  %1246 = vst [vmem:[#allocation2 + $0x1c98] sm:$0xff] %v15040_v17 }
 0x257   : > { %1247 = vst [vmem:[#allocation2 + $0x1ca0] sm:$0xff] %v15040_v17  ;;  %1248 = vst [vmem:[#allocation2 + $0x1ca8] sm:$0xff] %v15040_v17 }
 0x258   : > { %1249 = vst [vmem:[#allocation2 + $0x1cb0] sm:$0xff] %v15040_v17  ;;  %1250 = vst [vmem:[#allocation2 + $0x1cb8] sm:$0xff] %v15040_v17 }
 0x259   : > { %1251 = vst [vmem:[#allocation2 + $0x1cc0] sm:$0xff] %v15040_v17  ;;  %1252 = vst [vmem:[#allocation2 + $0x1cc8] sm:$0xff] %v15040_v17 }
 0x25a   : > { %1253 = vst [vmem:[#allocation2 + $0x1cd0] sm:$0xff] %v15040_v17  ;;  %1254 = vst [vmem:[#allocation2 + $0x1cd8] sm:$0xff] %v15040_v17 }
 0x25b   : > { %1255 = vst [vmem:[#allocation2 + $0x1ce0] sm:$0xff] %v15040_v17  ;;  %1256 = vst [vmem:[#allocation2 + $0x1ce8] sm:$0xff] %v15040_v17 }
 0x25c   : > { %1257 = vst [vmem:[#allocation2 + $0x1cf0] sm:$0xff] %v15040_v17  ;;  %1258 = vst [vmem:[#allocation2 + $0x1cf8] sm:$0xff] %v15040_v17 }
 0x25d   : > { %1259 = vst [vmem:[#allocation2 + $0x1d00] sm:$0xff] %v15040_v17  ;;  %1260 = vst [vmem:[#allocation2 + $0x1d08] sm:$0xff] %v15040_v17 }
 0x25e   : > { %1261 = vst [vmem:[#allocation2 + $0x1d10] sm:$0xff] %v15040_v17  ;;  %1262 = vst [vmem:[#allocation2 + $0x1d18] sm:$0xff] %v15040_v17 }
 0x25f   : > { %1263 = vst [vmem:[#allocation2 + $0x1d20] sm:$0xff] %v15040_v17  ;;  %1264 = vst [vmem:[#allocation2 + $0x1d28] sm:$0xff] %v15040_v17 }
 0x260   : > { %1265 = vst [vmem:[#allocation2 + $0x1d30] sm:$0xff] %v15040_v17  ;;  %1266 = vst [vmem:[#allocation2 + $0x1d38] sm:$0xff] %v15040_v17 }
 0x261   : > { %1267 = vst [vmem:[#allocation2 + $0x1d40] sm:$0xff] %v15040_v17  ;;  %1268 = vst [vmem:[#allocation2 + $0x1d48] sm:$0xff] %v15040_v17 }
 0x262   : > { %1269 = vst [vmem:[#allocation2 + $0x1d50] sm:$0xff] %v15040_v17  ;;  %1270 = vst [vmem:[#allocation2 + $0x1d58] sm:$0xff] %v15040_v17 }
 0x263   : > { %1271 = vst [vmem:[#allocation2 + $0x1d60] sm:$0xff] %v15040_v17  ;;  %1272 = vst [vmem:[#allocation2 + $0x1d68] sm:$0xff] %v15040_v17 }
 0x264   : > { %1273 = vst [vmem:[#allocation2 + $0x1d70] sm:$0xff] %v15040_v17  ;;  %1274 = vst [vmem:[#allocation2 + $0x1d78] sm:$0xff] %v15040_v17 }
 0x265   : > { %1275 = vst [vmem:[#allocation2 + $0x1d80] sm:$0xff] %v15040_v17  ;;  %1276 = vst [vmem:[#allocation2 + $0x1d88] sm:$0xff] %v15040_v17 }
 0x266   : > { %1277 = vst [vmem:[#allocation2 + $0x1d90] sm:$0xff] %v15040_v17  ;;  %1278 = vst [vmem:[#allocation2 + $0x1d98] sm:$0xff] %v15040_v17 }
 0x267   : > { %1279 = vst [vmem:[#allocation2 + $0x1da0] sm:$0xff] %v15040_v17  ;;  %1280 = vst [vmem:[#allocation2 + $0x1da8] sm:$0xff] %v15040_v17 }
 0x268   : > { %1281 = vst [vmem:[#allocation2 + $0x1db0] sm:$0xff] %v15040_v17  ;;  %1282 = vst [vmem:[#allocation2 + $0x1db8] sm:$0xff] %v15040_v17 }
 0x269   : > { %1283 = vst [vmem:[#allocation2 + $0x1dc0] sm:$0xff] %v15040_v17  ;;  %1284 = vst [vmem:[#allocation2 + $0x1dc8] sm:$0xff] %v15040_v17 }
 0x26a   : > { %1285 = vst [vmem:[#allocation2 + $0x1dd0] sm:$0xff] %v15040_v17  ;;  %1286 = vst [vmem:[#allocation2 + $0x1dd8] sm:$0xff] %v15040_v17 }
 0x26b   : > { %1287 = vst [vmem:[#allocation2 + $0x1de0] sm:$0xff] %v15040_v17  ;;  %1288 = vst [vmem:[#allocation2 + $0x1de8] sm:$0xff] %v15040_v17 }
 0x26c   : > { %1289 = vst [vmem:[#allocation2 + $0x1df0] sm:$0xff] %v15040_v17  ;;  %1290 = vst [vmem:[#allocation2 + $0x1df8] sm:$0xff] %v15040_v17 }
 0x26d   : > { %1291 = vst [vmem:[#allocation2 + $0x1e00] sm:$0xff] %v15043_v18  ;;  %1292 = vst [vmem:[#allocation2 + $0x1e08] sm:$0xff] %v15043_v18 }
 0x26e   : > { %1293 = vst [vmem:[#allocation2 + $0x1e10] sm:$0xff] %v15043_v18  ;;  %1294 = vst [vmem:[#allocation2 + $0x1e18] sm:$0xff] %v15043_v18 }
 0x26f   : > { %1295 = vst [vmem:[#allocation2 + $0x1e20] sm:$0xff] %v15043_v18  ;;  %1296 = vst [vmem:[#allocation2 + $0x1e28] sm:$0xff] %v15043_v18 }
 0x270   : > { %1297 = vst [vmem:[#allocation2 + $0x1e30] sm:$0xff] %v15043_v18  ;;  %1298 = vst [vmem:[#allocation2 + $0x1e38] sm:$0xff] %v15043_v18 }
 0x271   : > { %1299 = vst [vmem:[#allocation2 + $0x1e40] sm:$0xff] %v15043_v18  ;;  %1300 = vst [vmem:[#allocation2 + $0x1e48] sm:$0xff] %v15043_v18 }
 0x272   : > { %1301 = vst [vmem:[#allocation2 + $0x1e50] sm:$0xff] %v15043_v18  ;;  %1302 = vst [vmem:[#allocation2 + $0x1e58] sm:$0xff] %v15043_v18 }
 0x273   : > { %1303 = vst [vmem:[#allocation2 + $0x1e60] sm:$0xff] %v15043_v18  ;;  %1304 = vst [vmem:[#allocation2 + $0x1e68] sm:$0xff] %v15043_v18 }
 0x274   : > { %1305 = vst [vmem:[#allocation2 + $0x1e70] sm:$0xff] %v15043_v18  ;;  %1306 = vst [vmem:[#allocation2 + $0x1e78] sm:$0xff] %v15043_v18 }
 0x275   : > { %1307 = vst [vmem:[#allocation2 + $0x1e80] sm:$0xff] %v15043_v18  ;;  %1308 = vst [vmem:[#allocation2 + $0x1e88] sm:$0xff] %v15043_v18 }
 0x276   : > { %1309 = vst [vmem:[#allocation2 + $0x1e90] sm:$0xff] %v15043_v18  ;;  %1310 = vst [vmem:[#allocation2 + $0x1e98] sm:$0xff] %v15043_v18 }
 0x277   : > { %1311 = vst [vmem:[#allocation2 + $0x1ea0] sm:$0xff] %v15043_v18  ;;  %1312 = vst [vmem:[#allocation2 + $0x1ea8] sm:$0xff] %v15043_v18 }
 0x278   : > { %1313 = vst [vmem:[#allocation2 + $0x1eb0] sm:$0xff] %v15043_v18  ;;  %1314 = vst [vmem:[#allocation2 + $0x1eb8] sm:$0xff] %v15043_v18 }
 0x279   : > { %1315 = vst [vmem:[#allocation2 + $0x1ec0] sm:$0xff] %v15043_v18  ;;  %1316 = vst [vmem:[#allocation2 + $0x1ec8] sm:$0xff] %v15043_v18 }
 0x27a   : > { %1317 = vst [vmem:[#allocation2 + $0x1ed0] sm:$0xff] %v15043_v18  ;;  %1318 = vst [vmem:[#allocation2 + $0x1ed8] sm:$0xff] %v15043_v18 }
 0x27b   : > { %1319 = vst [vmem:[#allocation2 + $0x1ee0] sm:$0xff] %v15043_v18  ;;  %1320 = vst [vmem:[#allocation2 + $0x1ee8] sm:$0xff] %v15043_v18 }
 0x27c   : > { %1321 = vst [vmem:[#allocation2 + $0x1ef0] sm:$0xff] %v15043_v18  ;;  %1322 = vst [vmem:[#allocation2 + $0x1ef8] sm:$0xff] %v15043_v18 }
 0x27d   : > { %1323 = vst [vmem:[#allocation2 + $0x1f00] sm:$0xff] %v15043_v18  ;;  %1324 = vst [vmem:[#allocation2 + $0x1f08] sm:$0xff] %v15043_v18 }
 0x27e   : > { %1325 = vst [vmem:[#allocation2 + $0x1f10] sm:$0xff] %v15043_v18  ;;  %1326 = vst [vmem:[#allocation2 + $0x1f18] sm:$0xff] %v15043_v18 }
 0x27f   : > { %1327 = vst [vmem:[#allocation2 + $0x1f20] sm:$0xff] %v15043_v18  ;;  %1328 = vst [vmem:[#allocation2 + $0x1f28] sm:$0xff] %v15043_v18 }
 0x280   : > { %1329 = vst [vmem:[#allocation2 + $0x1f30] sm:$0xff] %v15043_v18  ;;  %1330 = vst [vmem:[#allocation2 + $0x1f38] sm:$0xff] %v15043_v18 }
 0x281   : > { %1331 = vst [vmem:[#allocation2 + $0x1f40] sm:$0xff] %v15043_v18  ;;  %1332 = vst [vmem:[#allocation2 + $0x1f48] sm:$0xff] %v15043_v18 }
 0x282   : > { %1333 = vst [vmem:[#allocation2 + $0x1f50] sm:$0xff] %v15043_v18  ;;  %1334 = vst [vmem:[#allocation2 + $0x1f58] sm:$0xff] %v15043_v18 }
 0x283   : > { %1335 = vst [vmem:[#allocation2 + $0x1f60] sm:$0xff] %v15043_v18  ;;  %1336 = vst [vmem:[#allocation2 + $0x1f68] sm:$0xff] %v15043_v18 }
 0x284   : > { %1337 = vst [vmem:[#allocation2 + $0x1f70] sm:$0xff] %v15043_v18  ;;  %1338 = vst [vmem:[#allocation2 + $0x1f78] sm:$0xff] %v15043_v18 }
 0x285   : > { %1339 = vst [vmem:[#allocation2 + $0x1f80] sm:$0xff] %v15043_v18  ;;  %1340 = vst [vmem:[#allocation2 + $0x1f88] sm:$0xff] %v15043_v18 }
 0x286   : > { %1341 = vst [vmem:[#allocation2 + $0x1f90] sm:$0xff] %v15043_v18  ;;  %1342 = vst [vmem:[#allocation2 + $0x1f98] sm:$0xff] %v15043_v18 }
 0x287   : > { %1343 = vst [vmem:[#allocation2 + $0x1fa0] sm:$0xff] %v15043_v18  ;;  %1344 = vst [vmem:[#allocation2 + $0x1fa8] sm:$0xff] %v15043_v18 }
 0x288   : > { %1345 = vst [vmem:[#allocation2 + $0x1fb0] sm:$0xff] %v15043_v18  ;;  %1346 = vst [vmem:[#allocation2 + $0x1fb8] sm:$0xff] %v15043_v18 }
 0x289   : > { %1347 = vst [vmem:[#allocation2 + $0x1fc0] sm:$0xff] %v15043_v18  ;;  %1348 = vst [vmem:[#allocation2 + $0x1fc8] sm:$0xff] %v15043_v18 }
 0x28a   : > { %1349 = vst [vmem:[#allocation2 + $0x1fd0] sm:$0xff] %v15043_v18  ;;  %1350 = vst [vmem:[#allocation2 + $0x1fd8] sm:$0xff] %v15043_v18 }
 0x28b   : > { %1351 = vst [vmem:[#allocation2 + $0x1fe0] sm:$0xff] %v15043_v18  ;;  %1352 = vst [vmem:[#allocation2 + $0x1fe8] sm:$0xff] %v15043_v18 }
 0x28c   : > { %1353 = vst [vmem:[#allocation2 + $0x1ff0] sm:$0xff] %v15043_v18  ;;  %1354 = vst [vmem:[#allocation2 + $0x1ff8] sm:$0xff] %v15043_v18 }
 0x28d   : > { %1355 = vst [vmem:[#allocation2 + $0x2000] sm:$0xff] %v15046_v19  ;;  %1356 = vst [vmem:[#allocation2 + $0x2008] sm:$0xff] %v15046_v19 }
 0x28e   : > { %1357 = vst [vmem:[#allocation2 + $0x2010] sm:$0xff] %v15046_v19  ;;  %1358 = vst [vmem:[#allocation2 + $0x2018] sm:$0xff] %v15046_v19 }
 0x28f   : > { %1359 = vst [vmem:[#allocation2 + $0x2020] sm:$0xff] %v15046_v19  ;;  %1360 = vst [vmem:[#allocation2 + $0x2028] sm:$0xff] %v15046_v19 }
 0x290   : > { %1361 = vst [vmem:[#allocation2 + $0x2030] sm:$0xff] %v15046_v19  ;;  %1362 = vst [vmem:[#allocation2 + $0x2038] sm:$0xff] %v15046_v19 }
 0x291   : > { %1363 = vst [vmem:[#allocation2 + $0x2040] sm:$0xff] %v15046_v19  ;;  %1364 = vst [vmem:[#allocation2 + $0x2048] sm:$0xff] %v15046_v19 }
 0x292   : > { %1365 = vst [vmem:[#allocation2 + $0x2050] sm:$0xff] %v15046_v19  ;;  %1366 = vst [vmem:[#allocation2 + $0x2058] sm:$0xff] %v15046_v19 }
 0x293   : > { %1367 = vst [vmem:[#allocation2 + $0x2060] sm:$0xff] %v15046_v19  ;;  %1368 = vst [vmem:[#allocation2 + $0x2068] sm:$0xff] %v15046_v19 }
 0x294   : > { %1369 = vst [vmem:[#allocation2 + $0x2070] sm:$0xff] %v15046_v19  ;;  %1370 = vst [vmem:[#allocation2 + $0x2078] sm:$0xff] %v15046_v19 }
 0x295   : > { %1371 = vst [vmem:[#allocation2 + $0x2080] sm:$0xff] %v15046_v19  ;;  %1372 = vst [vmem:[#allocation2 + $0x2088] sm:$0xff] %v15046_v19 }
 0x296   : > { %1373 = vst [vmem:[#allocation2 + $0x2090] sm:$0xff] %v15046_v19  ;;  %1374 = vst [vmem:[#allocation2 + $0x2098] sm:$0xff] %v15046_v19 }
 0x297   : > { %1375 = vst [vmem:[#allocation2 + $0x20a0] sm:$0xff] %v15046_v19  ;;  %1376 = vst [vmem:[#allocation2 + $0x20a8] sm:$0xff] %v15046_v19 }
 0x298   : > { %1377 = vst [vmem:[#allocation2 + $0x20b0] sm:$0xff] %v15046_v19  ;;  %1378 = vst [vmem:[#allocation2 + $0x20b8] sm:$0xff] %v15046_v19 }
 0x299   : > { %1379 = vst [vmem:[#allocation2 + $0x20c0] sm:$0xff] %v15046_v19  ;;  %1380 = vst [vmem:[#allocation2 + $0x20c8] sm:$0xff] %v15046_v19 }
 0x29a   : > { %1381 = vst [vmem:[#allocation2 + $0x20d0] sm:$0xff] %v15046_v19  ;;  %1382 = vst [vmem:[#allocation2 + $0x20d8] sm:$0xff] %v15046_v19 }
 0x29b   : > { %1383 = vst [vmem:[#allocation2 + $0x20e0] sm:$0xff] %v15046_v19  ;;  %1384 = vst [vmem:[#allocation2 + $0x20e8] sm:$0xff] %v15046_v19 }
 0x29c   : > { %1385 = vst [vmem:[#allocation2 + $0x20f0] sm:$0xff] %v15046_v19  ;;  %1386 = vst [vmem:[#allocation2 + $0x20f8] sm:$0xff] %v15046_v19 }
 0x29d   : > { %1387 = vst [vmem:[#allocation2 + $0x2100] sm:$0xff] %v15046_v19  ;;  %1388 = vst [vmem:[#allocation2 + $0x2108] sm:$0xff] %v15046_v19 }
 0x29e   : > { %1389 = vst [vmem:[#allocation2 + $0x2110] sm:$0xff] %v15046_v19  ;;  %1390 = vst [vmem:[#allocation2 + $0x2118] sm:$0xff] %v15046_v19 }
 0x29f   : > { %1391 = vst [vmem:[#allocation2 + $0x2120] sm:$0xff] %v15046_v19  ;;  %1392 = vst [vmem:[#allocation2 + $0x2128] sm:$0xff] %v15046_v19 }
 0x2a0   : > { %1393 = vst [vmem:[#allocation2 + $0x2130] sm:$0xff] %v15046_v19  ;;  %1394 = vst [vmem:[#allocation2 + $0x2138] sm:$0xff] %v15046_v19 }
 0x2a1   : > { %1395 = vst [vmem:[#allocation2 + $0x2140] sm:$0xff] %v15046_v19  ;;  %1396 = vst [vmem:[#allocation2 + $0x2148] sm:$0xff] %v15046_v19 }
 0x2a2   : > { %1397 = vst [vmem:[#allocation2 + $0x2150] sm:$0xff] %v15046_v19  ;;  %1398 = vst [vmem:[#allocation2 + $0x2158] sm:$0xff] %v15046_v19 }
 0x2a3   : > { %1399 = vst [vmem:[#allocation2 + $0x2160] sm:$0xff] %v15046_v19  ;;  %1400 = vst [vmem:[#allocation2 + $0x2168] sm:$0xff] %v15046_v19 }
 0x2a4   : > { %1401 = vst [vmem:[#allocation2 + $0x2170] sm:$0xff] %v15046_v19  ;;  %1402 = vst [vmem:[#allocation2 + $0x2178] sm:$0xff] %v15046_v19 }
 0x2a5   : > { %1403 = vst [vmem:[#allocation2 + $0x2180] sm:$0xff] %v15046_v19  ;;  %1404 = vst [vmem:[#allocation2 + $0x2188] sm:$0xff] %v15046_v19 }
 0x2a6   : > { %1405 = vst [vmem:[#allocation2 + $0x2190] sm:$0xff] %v15046_v19  ;;  %1406 = vst [vmem:[#allocation2 + $0x2198] sm:$0xff] %v15046_v19 }
 0x2a7   : > { %1407 = vst [vmem:[#allocation2 + $0x21a0] sm:$0xff] %v15046_v19  ;;  %1408 = vst [vmem:[#allocation2 + $0x21a8] sm:$0xff] %v15046_v19 }
 0x2a8   : > { %1409 = vst [vmem:[#allocation2 + $0x21b0] sm:$0xff] %v15046_v19  ;;  %1410 = vst [vmem:[#allocation2 + $0x21b8] sm:$0xff] %v15046_v19 }
 0x2a9   : > { %1411 = vst [vmem:[#allocation2 + $0x21c0] sm:$0xff] %v15046_v19  ;;  %1412 = vst [vmem:[#allocation2 + $0x21c8] sm:$0xff] %v15046_v19 }
 0x2aa   : > { %1413 = vst [vmem:[#allocation2 + $0x21d0] sm:$0xff] %v15046_v19  ;;  %1414 = vst [vmem:[#allocation2 + $0x21d8] sm:$0xff] %v15046_v19 }
 0x2ab   : > { %1415 = vst [vmem:[#allocation2 + $0x21e0] sm:$0xff] %v15046_v19  ;;  %1416 = vst [vmem:[#allocation2 + $0x21e8] sm:$0xff] %v15046_v19 }
 0x2ac   : > { %1417 = vst [vmem:[#allocation2 + $0x21f0] sm:$0xff] %v15046_v19  ;;  %1418 = vst [vmem:[#allocation2 + $0x21f8] sm:$0xff] %v15046_v19 }
 0x2ad   : > { %1419 = vst [vmem:[#allocation2 + $0x2200] sm:$0xff] %v15305_v20  ;;  %1420 = vst [vmem:[#allocation2 + $0x2208] sm:$0xff] %v15305_v20 }
 0x2ae   : > { %1421 = vst [vmem:[#allocation2 + $0x2210] sm:$0xff] %v15305_v20  ;;  %1422 = vst [vmem:[#allocation2 + $0x2218] sm:$0xff] %v15305_v20 }
 0x2af   : > { %1423 = vst [vmem:[#allocation2 + $0x2220] sm:$0xff] %v15305_v20  ;;  %1424 = vst [vmem:[#allocation2 + $0x2228] sm:$0xff] %v15305_v20 }
 0x2b0   : > { %1425 = vst [vmem:[#allocation2 + $0x2230] sm:$0xff] %v15305_v20  ;;  %1426 = vst [vmem:[#allocation2 + $0x2238] sm:$0xff] %v15305_v20 }
 0x2b1   : > { %1427 = vst [vmem:[#allocation2 + $0x2240] sm:$0xff] %v15305_v20  ;;  %1428 = vst [vmem:[#allocation2 + $0x2248] sm:$0xff] %v15305_v20 }
 0x2b2   : > { %1429 = vst [vmem:[#allocation2 + $0x2250] sm:$0xff] %v15305_v20  ;;  %1430 = vst [vmem:[#allocation2 + $0x2258] sm:$0xff] %v15305_v20 }
 0x2b3   : > { %1431 = vst [vmem:[#allocation2 + $0x2260] sm:$0xff] %v15305_v20  ;;  %1432 = vst [vmem:[#allocation2 + $0x2268] sm:$0xff] %v15305_v20 }
 0x2b4   : > { %1433 = vst [vmem:[#allocation2 + $0x2270] sm:$0xff] %v15305_v20  ;;  %1434 = vst [vmem:[#allocation2 + $0x2278] sm:$0xff] %v15305_v20 }
 0x2b5   : > { %1435 = vst [vmem:[#allocation2 + $0x2280] sm:$0xff] %v15305_v20  ;;  %1436 = vst [vmem:[#allocation2 + $0x2288] sm:$0xff] %v15305_v20 }
 0x2b6   : > { %1437 = vst [vmem:[#allocation2 + $0x2290] sm:$0xff] %v15305_v20  ;;  %1438 = vst [vmem:[#allocation2 + $0x2298] sm:$0xff] %v15305_v20 }
 0x2b7   : > { %1439 = vst [vmem:[#allocation2 + $0x22a0] sm:$0xff] %v15305_v20  ;;  %1440 = vst [vmem:[#allocation2 + $0x22a8] sm:$0xff] %v15305_v20 }
 0x2b8   : > { %1441 = vst [vmem:[#allocation2 + $0x22b0] sm:$0xff] %v15305_v20  ;;  %1442 = vst [vmem:[#allocation2 + $0x22b8] sm:$0xff] %v15305_v20 }
 0x2b9   : > { %1443 = vst [vmem:[#allocation2 + $0x22c0] sm:$0xff] %v15305_v20  ;;  %1444 = vst [vmem:[#allocation2 + $0x22c8] sm:$0xff] %v15305_v20 }
 0x2ba   : > { %1445 = vst [vmem:[#allocation2 + $0x22d0] sm:$0xff] %v15305_v20  ;;  %1446 = vst [vmem:[#allocation2 + $0x22d8] sm:$0xff] %v15305_v20 }
 0x2bb   : > { %1447 = vst [vmem:[#allocation2 + $0x22e0] sm:$0xff] %v15305_v20  ;;  %1448 = vst [vmem:[#allocation2 + $0x22e8] sm:$0xff] %v15305_v20 }
 0x2bc   : > { %1449 = vst [vmem:[#allocation2 + $0x22f0] sm:$0xff] %v15305_v20  ;;  %1450 = vst [vmem:[#allocation2 + $0x22f8] sm:$0xff] %v15305_v20 }
 0x2bd   : > { %1451 = vst [vmem:[#allocation2 + $0x2300] sm:$0xff] %v15305_v20  ;;  %1452 = vst [vmem:[#allocation2 + $0x2308] sm:$0xff] %v15305_v20 }
 0x2be   : > { %1453 = vst [vmem:[#allocation2 + $0x2310] sm:$0xff] %v15305_v20  ;;  %1454 = vst [vmem:[#allocation2 + $0x2318] sm:$0xff] %v15305_v20 }
 0x2bf   : > { %1455 = vst [vmem:[#allocation2 + $0x2320] sm:$0xff] %v15305_v20  ;;  %1456 = vst [vmem:[#allocation2 + $0x2328] sm:$0xff] %v15305_v20 }
 0x2c0   : > { %1457 = vst [vmem:[#allocation2 + $0x2330] sm:$0xff] %v15305_v20  ;;  %1458 = vst [vmem:[#allocation2 + $0x2338] sm:$0xff] %v15305_v20 }
 0x2c1   : > { %1459 = vst [vmem:[#allocation2 + $0x2340] sm:$0xff] %v15305_v20  ;;  %1460 = vst [vmem:[#allocation2 + $0x2348] sm:$0xff] %v15305_v20 }
 0x2c2   : > { %1461 = vst [vmem:[#allocation2 + $0x2350] sm:$0xff] %v15305_v20  ;;  %1462 = vst [vmem:[#allocation2 + $0x2358] sm:$0xff] %v15305_v20 }
 0x2c3   : > { %1463 = vst [vmem:[#allocation2 + $0x2360] sm:$0xff] %v15305_v20  ;;  %1464 = vst [vmem:[#allocation2 + $0x2368] sm:$0xff] %v15305_v20 }
 0x2c4   : > { %1465 = vst [vmem:[#allocation2 + $0x2370] sm:$0xff] %v15305_v20  ;;  %1466 = vst [vmem:[#allocation2 + $0x2378] sm:$0xff] %v15305_v20 }
 0x2c5   : > { %1467 = vst [vmem:[#allocation2 + $0x2380] sm:$0xff] %v15305_v20  ;;  %1468 = vst [vmem:[#allocation2 + $0x2388] sm:$0xff] %v15305_v20 }
 0x2c6   : > { %1469 = vst [vmem:[#allocation2 + $0x2390] sm:$0xff] %v15305_v20  ;;  %1470 = vst [vmem:[#allocation2 + $0x2398] sm:$0xff] %v15305_v20 }
 0x2c7   : > { %1471 = vst [vmem:[#allocation2 + $0x23a0] sm:$0xff] %v15305_v20  ;;  %1472 = vst [vmem:[#allocation2 + $0x23a8] sm:$0xff] %v15305_v20 }
 0x2c8   : > { %1473 = vst [vmem:[#allocation2 + $0x23b0] sm:$0xff] %v15305_v20  ;;  %1474 = vst [vmem:[#allocation2 + $0x23b8] sm:$0xff] %v15305_v20 }
 0x2c9   : > { %1475 = vst [vmem:[#allocation2 + $0x23c0] sm:$0xff] %v15305_v20  ;;  %1476 = vst [vmem:[#allocation2 + $0x23c8] sm:$0xff] %v15305_v20 }
 0x2ca   : > { %1477 = vst [vmem:[#allocation2 + $0x23d0] sm:$0xff] %v15305_v20  ;;  %1478 = vst [vmem:[#allocation2 + $0x23d8] sm:$0xff] %v15305_v20 }
 0x2cb   : > { %1479 = vst [vmem:[#allocation2 + $0x23e0] sm:$0xff] %v15305_v20  ;;  %1480 = vst [vmem:[#allocation2 + $0x23e8] sm:$0xff] %v15305_v20 }
 0x2cc   : > { %1481 = vst [vmem:[#allocation2 + $0x23f0] sm:$0xff] %v15305_v20  ;;  %1482 = vst [vmem:[#allocation2 + $0x23f8] sm:$0xff] %v15305_v20 }
 0x2cd   : > { %1483 = vst [vmem:[#allocation2 + $0x2400] sm:$0xff] %v15308_v21  ;;  %1484 = vst [vmem:[#allocation2 + $0x2408] sm:$0xff] %v15308_v21 }
 0x2ce   : > { %1485 = vst [vmem:[#allocation2 + $0x2410] sm:$0xff] %v15308_v21  ;;  %1486 = vst [vmem:[#allocation2 + $0x2418] sm:$0xff] %v15308_v21 }
 0x2cf   : > { %1487 = vst [vmem:[#allocation2 + $0x2420] sm:$0xff] %v15308_v21  ;;  %1488 = vst [vmem:[#allocation2 + $0x2428] sm:$0xff] %v15308_v21 }
 0x2d0   : > { %1489 = vst [vmem:[#allocation2 + $0x2430] sm:$0xff] %v15308_v21  ;;  %1490 = vst [vmem:[#allocation2 + $0x2438] sm:$0xff] %v15308_v21 }
 0x2d1   : > { %1491 = vst [vmem:[#allocation2 + $0x2440] sm:$0xff] %v15308_v21  ;;  %1492 = vst [vmem:[#allocation2 + $0x2448] sm:$0xff] %v15308_v21 }
 0x2d2   : > { %1493 = vst [vmem:[#allocation2 + $0x2450] sm:$0xff] %v15308_v21  ;;  %1494 = vst [vmem:[#allocation2 + $0x2458] sm:$0xff] %v15308_v21 }
 0x2d3   : > { %1495 = vst [vmem:[#allocation2 + $0x2460] sm:$0xff] %v15308_v21  ;;  %1496 = vst [vmem:[#allocation2 + $0x2468] sm:$0xff] %v15308_v21 }
 0x2d4   : > { %1497 = vst [vmem:[#allocation2 + $0x2470] sm:$0xff] %v15308_v21  ;;  %1498 = vst [vmem:[#allocation2 + $0x2478] sm:$0xff] %v15308_v21 }
 0x2d5   : > { %1499 = vst [vmem:[#allocation2 + $0x2480] sm:$0xff] %v15308_v21  ;;  %1500 = vst [vmem:[#allocation2 + $0x2488] sm:$0xff] %v15308_v21 }
 0x2d6   : > { %1501 = vst [vmem:[#allocation2 + $0x2490] sm:$0xff] %v15308_v21  ;;  %1502 = vst [vmem:[#allocation2 + $0x2498] sm:$0xff] %v15308_v21 }
 0x2d7   : > { %1503 = vst [vmem:[#allocation2 + $0x24a0] sm:$0xff] %v15308_v21  ;;  %1504 = vst [vmem:[#allocation2 + $0x24a8] sm:$0xff] %v15308_v21 }
 0x2d8   : > { %1505 = vst [vmem:[#allocation2 + $0x24b0] sm:$0xff] %v15308_v21  ;;  %1506 = vst [vmem:[#allocation2 + $0x24b8] sm:$0xff] %v15308_v21 }
 0x2d9   : > { %1507 = vst [vmem:[#allocation2 + $0x24c0] sm:$0xff] %v15308_v21  ;;  %1508 = vst [vmem:[#allocation2 + $0x24c8] sm:$0xff] %v15308_v21 }
 0x2da   : > { %1509 = vst [vmem:[#allocation2 + $0x24d0] sm:$0xff] %v15308_v21  ;;  %1510 = vst [vmem:[#allocation2 + $0x24d8] sm:$0xff] %v15308_v21 }
 0x2db   : > { %1511 = vst [vmem:[#allocation2 + $0x24e0] sm:$0xff] %v15308_v21  ;;  %1512 = vst [vmem:[#allocation2 + $0x24e8] sm:$0xff] %v15308_v21 }
 0x2dc   : > { %1513 = vst [vmem:[#allocation2 + $0x24f0] sm:$0xff] %v15308_v21  ;;  %1514 = vst [vmem:[#allocation2 + $0x24f8] sm:$0xff] %v15308_v21 }
 0x2dd   : > { %1515 = vst [vmem:[#allocation2 + $0x2500] sm:$0xff] %v15308_v21  ;;  %1516 = vst [vmem:[#allocation2 + $0x2508] sm:$0xff] %v15308_v21 }
 0x2de   : > { %1517 = vst [vmem:[#allocation2 + $0x2510] sm:$0xff] %v15308_v21  ;;  %1518 = vst [vmem:[#allocation2 + $0x2518] sm:$0xff] %v15308_v21 }
 0x2df   : > { %1519 = vst [vmem:[#allocation2 + $0x2520] sm:$0xff] %v15308_v21  ;;  %1520 = vst [vmem:[#allocation2 + $0x2528] sm:$0xff] %v15308_v21 }
 0x2e0   : > { %1521 = vst [vmem:[#allocation2 + $0x2530] sm:$0xff] %v15308_v21  ;;  %1522 = vst [vmem:[#allocation2 + $0x2538] sm:$0xff] %v15308_v21 }
 0x2e1   : > { %1523 = vst [vmem:[#allocation2 + $0x2540] sm:$0xff] %v15308_v21  ;;  %1524 = vst [vmem:[#allocation2 + $0x2548] sm:$0xff] %v15308_v21 }
 0x2e2   : > { %1525 = vst [vmem:[#allocation2 + $0x2550] sm:$0xff] %v15308_v21  ;;  %1526 = vst [vmem:[#allocation2 + $0x2558] sm:$0xff] %v15308_v21 }
 0x2e3   : > { %1527 = vst [vmem:[#allocation2 + $0x2560] sm:$0xff] %v15308_v21  ;;  %1528 = vst [vmem:[#allocation2 + $0x2568] sm:$0xff] %v15308_v21 }
 0x2e4   : > { %1529 = vst [vmem:[#allocation2 + $0x2570] sm:$0xff] %v15308_v21  ;;  %1530 = vst [vmem:[#allocation2 + $0x2578] sm:$0xff] %v15308_v21 }
 0x2e5   : > { %1531 = vst [vmem:[#allocation2 + $0x2580] sm:$0xff] %v15308_v21  ;;  %1532 = vst [vmem:[#allocation2 + $0x2588] sm:$0xff] %v15308_v21 }
 0x2e6   : > { %1533 = vst [vmem:[#allocation2 + $0x2590] sm:$0xff] %v15308_v21  ;;  %1534 = vst [vmem:[#allocation2 + $0x2598] sm:$0xff] %v15308_v21 }
 0x2e7   : > { %1535 = vst [vmem:[#allocation2 + $0x25a0] sm:$0xff] %v15308_v21  ;;  %1536 = vst [vmem:[#allocation2 + $0x25a8] sm:$0xff] %v15308_v21 }
 0x2e8   : > { %1537 = vst [vmem:[#allocation2 + $0x25b0] sm:$0xff] %v15308_v21  ;;  %1538 = vst [vmem:[#allocation2 + $0x25b8] sm:$0xff] %v15308_v21 }
 0x2e9   : > { %1539 = vst [vmem:[#allocation2 + $0x25c0] sm:$0xff] %v15308_v21  ;;  %1540 = vst [vmem:[#allocation2 + $0x25c8] sm:$0xff] %v15308_v21 }
 0x2ea   : > { %1541 = vst [vmem:[#allocation2 + $0x25d0] sm:$0xff] %v15308_v21  ;;  %1542 = vst [vmem:[#allocation2 + $0x25d8] sm:$0xff] %v15308_v21 }
 0x2eb   : > { %1543 = vst [vmem:[#allocation2 + $0x25e0] sm:$0xff] %v15308_v21  ;;  %1544 = vst [vmem:[#allocation2 + $0x25e8] sm:$0xff] %v15308_v21 }
 0x2ec   : > { %1545 = vst [vmem:[#allocation2 + $0x25f0] sm:$0xff] %v15308_v21  ;;  %1546 = vst [vmem:[#allocation2 + $0x25f8] sm:$0xff] %v15308_v21 }
 0x2ed   : > { %1547 = vst [vmem:[#allocation2 + $0x2600] sm:$0xff] %v15311_v22  ;;  %1548 = vst [vmem:[#allocation2 + $0x2608] sm:$0xff] %v15311_v22 }
 0x2ee   : > { %1549 = vst [vmem:[#allocation2 + $0x2610] sm:$0xff] %v15311_v22  ;;  %1550 = vst [vmem:[#allocation2 + $0x2618] sm:$0xff] %v15311_v22 }
 0x2ef   : > { %1551 = vst [vmem:[#allocation2 + $0x2620] sm:$0xff] %v15311_v22  ;;  %1552 = vst [vmem:[#allocation2 + $0x2628] sm:$0xff] %v15311_v22 }
 0x2f0   : > { %1553 = vst [vmem:[#allocation2 + $0x2630] sm:$0xff] %v15311_v22  ;;  %1554 = vst [vmem:[#allocation2 + $0x2638] sm:$0xff] %v15311_v22 }
 0x2f1   : > { %1555 = vst [vmem:[#allocation2 + $0x2640] sm:$0xff] %v15311_v22  ;;  %1556 = vst [vmem:[#allocation2 + $0x2648] sm:$0xff] %v15311_v22 }
 0x2f2   : > { %1557 = vst [vmem:[#allocation2 + $0x2650] sm:$0xff] %v15311_v22  ;;  %1558 = vst [vmem:[#allocation2 + $0x2658] sm:$0xff] %v15311_v22 }
 0x2f3   : > { %1559 = vst [vmem:[#allocation2 + $0x2660] sm:$0xff] %v15311_v22  ;;  %1560 = vst [vmem:[#allocation2 + $0x2668] sm:$0xff] %v15311_v22 }
 0x2f4   : > { %1561 = vst [vmem:[#allocation2 + $0x2670] sm:$0xff] %v15311_v22  ;;  %1562 = vst [vmem:[#allocation2 + $0x2678] sm:$0xff] %v15311_v22 }
 0x2f5   : > { %1563 = vst [vmem:[#allocation2 + $0x2680] sm:$0xff] %v15311_v22  ;;  %1564 = vst [vmem:[#allocation2 + $0x2688] sm:$0xff] %v15311_v22 }
 0x2f6   : > { %1565 = vst [vmem:[#allocation2 + $0x2690] sm:$0xff] %v15311_v22  ;;  %1566 = vst [vmem:[#allocation2 + $0x2698] sm:$0xff] %v15311_v22 }
 0x2f7   : > { %1567 = vst [vmem:[#allocation2 + $0x26a0] sm:$0xff] %v15311_v22  ;;  %1568 = vst [vmem:[#allocation2 + $0x26a8] sm:$0xff] %v15311_v22 }
 0x2f8   : > { %1569 = vst [vmem:[#allocation2 + $0x26b0] sm:$0xff] %v15311_v22  ;;  %1570 = vst [vmem:[#allocation2 + $0x26b8] sm:$0xff] %v15311_v22 }
 0x2f9   : > { %1571 = vst [vmem:[#allocation2 + $0x26c0] sm:$0xff] %v15311_v22  ;;  %1572 = vst [vmem:[#allocation2 + $0x26c8] sm:$0xff] %v15311_v22 }
 0x2fa   : > { %1573 = vst [vmem:[#allocation2 + $0x26d0] sm:$0xff] %v15311_v22  ;;  %1574 = vst [vmem:[#allocation2 + $0x26d8] sm:$0xff] %v15311_v22 }
 0x2fb   : > { %1575 = vst [vmem:[#allocation2 + $0x26e0] sm:$0xff] %v15311_v22  ;;  %1576 = vst [vmem:[#allocation2 + $0x26e8] sm:$0xff] %v15311_v22 }
 0x2fc   : > { %1577 = vst [vmem:[#allocation2 + $0x26f0] sm:$0xff] %v15311_v22  ;;  %1578 = vst [vmem:[#allocation2 + $0x26f8] sm:$0xff] %v15311_v22 }
 0x2fd   : > { %1579 = vst [vmem:[#allocation2 + $0x2700] sm:$0xff] %v15311_v22  ;;  %1580 = vst [vmem:[#allocation2 + $0x2708] sm:$0xff] %v15311_v22 }
 0x2fe   : > { %1581 = vst [vmem:[#allocation2 + $0x2710] sm:$0xff] %v15311_v22  ;;  %1582 = vst [vmem:[#allocation2 + $0x2718] sm:$0xff] %v15311_v22 }
 0x2ff   : > { %1583 = vst [vmem:[#allocation2 + $0x2720] sm:$0xff] %v15311_v22  ;;  %1584 = vst [vmem:[#allocation2 + $0x2728] sm:$0xff] %v15311_v22 }
 0x300   : > { %1585 = vst [vmem:[#allocation2 + $0x2730] sm:$0xff] %v15311_v22  ;;  %1586 = vst [vmem:[#allocation2 + $0x2738] sm:$0xff] %v15311_v22 }
 0x301   : > { %1587 = vst [vmem:[#allocation2 + $0x2740] sm:$0xff] %v15311_v22  ;;  %1588 = vst [vmem:[#allocation2 + $0x2748] sm:$0xff] %v15311_v22 }
 0x302   : > { %1589 = vst [vmem:[#allocation2 + $0x2750] sm:$0xff] %v15311_v22  ;;  %1590 = vst [vmem:[#allocation2 + $0x2758] sm:$0xff] %v15311_v22 }
 0x303   : > { %1591 = vst [vmem:[#allocation2 + $0x2760] sm:$0xff] %v15311_v22  ;;  %1592 = vst [vmem:[#allocation2 + $0x2768] sm:$0xff] %v15311_v22 }
 0x304   : > { %1593 = vst [vmem:[#allocation2 + $0x2770] sm:$0xff] %v15311_v22  ;;  %1594 = vst [vmem:[#allocation2 + $0x2778] sm:$0xff] %v15311_v22 }
 0x305   : > { %1595 = vst [vmem:[#allocation2 + $0x2780] sm:$0xff] %v15311_v22  ;;  %1596 = vst [vmem:[#allocation2 + $0x2788] sm:$0xff] %v15311_v22 }
 0x306   : > { %1597 = vst [vmem:[#allocation2 + $0x2790] sm:$0xff] %v15311_v22  ;;  %1598 = vst [vmem:[#allocation2 + $0x2798] sm:$0xff] %v15311_v22 }
 0x307   : > { %1599 = vst [vmem:[#allocation2 + $0x27a0] sm:$0xff] %v15311_v22  ;;  %1600 = vst [vmem:[#allocation2 + $0x27a8] sm:$0xff] %v15311_v22 }
 0x308   : > { %1601 = vst [vmem:[#allocation2 + $0x27b0] sm:$0xff] %v15311_v22  ;;  %1602 = vst [vmem:[#allocation2 + $0x27b8] sm:$0xff] %v15311_v22 }
 0x309   : > { %1603 = vst [vmem:[#allocation2 + $0x27c0] sm:$0xff] %v15311_v22  ;;  %1604 = vst [vmem:[#allocation2 + $0x27c8] sm:$0xff] %v15311_v22 }
 0x30a   : > { %1605 = vst [vmem:[#allocation2 + $0x27d0] sm:$0xff] %v15311_v22  ;;  %1606 = vst [vmem:[#allocation2 + $0x27d8] sm:$0xff] %v15311_v22 }
 0x30b   : > { %1607 = vst [vmem:[#allocation2 + $0x27e0] sm:$0xff] %v15311_v22  ;;  %1608 = vst [vmem:[#allocation2 + $0x27e8] sm:$0xff] %v15311_v22 }
 0x30c   : > { %1609 = vst [vmem:[#allocation2 + $0x27f0] sm:$0xff] %v15311_v22  ;;  %1610 = vst [vmem:[#allocation2 + $0x27f8] sm:$0xff] %v15311_v22 }
 0x30d   : > { %1611 = vst [vmem:[#allocation2 + $0x2800] sm:$0xff] %v15314_v23  ;;  %1612 = vst [vmem:[#allocation2 + $0x2808] sm:$0xff] %v15314_v23 }
 0x30e   : > { %1613 = vst [vmem:[#allocation2 + $0x2810] sm:$0xff] %v15314_v23  ;;  %1614 = vst [vmem:[#allocation2 + $0x2818] sm:$0xff] %v15314_v23 }
 0x30f   : > { %1615 = vst [vmem:[#allocation2 + $0x2820] sm:$0xff] %v15314_v23  ;;  %1616 = vst [vmem:[#allocation2 + $0x2828] sm:$0xff] %v15314_v23 }
 0x310   : > { %1617 = vst [vmem:[#allocation2 + $0x2830] sm:$0xff] %v15314_v23  ;;  %1618 = vst [vmem:[#allocation2 + $0x2838] sm:$0xff] %v15314_v23 }
 0x311   : > { %1619 = vst [vmem:[#allocation2 + $0x2840] sm:$0xff] %v15314_v23  ;;  %1620 = vst [vmem:[#allocation2 + $0x2848] sm:$0xff] %v15314_v23 }
 0x312   : > { %1621 = vst [vmem:[#allocation2 + $0x2850] sm:$0xff] %v15314_v23  ;;  %1622 = vst [vmem:[#allocation2 + $0x2858] sm:$0xff] %v15314_v23 }
 0x313   : > { %1623 = vst [vmem:[#allocation2 + $0x2860] sm:$0xff] %v15314_v23  ;;  %1624 = vst [vmem:[#allocation2 + $0x2868] sm:$0xff] %v15314_v23 }
 0x314   : > { %1625 = vst [vmem:[#allocation2 + $0x2870] sm:$0xff] %v15314_v23  ;;  %1626 = vst [vmem:[#allocation2 + $0x2878] sm:$0xff] %v15314_v23 }
 0x315   : > { %1627 = vst [vmem:[#allocation2 + $0x2880] sm:$0xff] %v15314_v23  ;;  %1628 = vst [vmem:[#allocation2 + $0x2888] sm:$0xff] %v15314_v23 }
 0x316   : > { %1629 = vst [vmem:[#allocation2 + $0x2890] sm:$0xff] %v15314_v23  ;;  %1630 = vst [vmem:[#allocation2 + $0x2898] sm:$0xff] %v15314_v23 }
 0x317   : > { %1631 = vst [vmem:[#allocation2 + $0x28a0] sm:$0xff] %v15314_v23  ;;  %1632 = vst [vmem:[#allocation2 + $0x28a8] sm:$0xff] %v15314_v23 }
 0x318   : > { %1633 = vst [vmem:[#allocation2 + $0x28b0] sm:$0xff] %v15314_v23  ;;  %1634 = vst [vmem:[#allocation2 + $0x28b8] sm:$0xff] %v15314_v23 }
 0x319   : > { %1635 = vst [vmem:[#allocation2 + $0x28c0] sm:$0xff] %v15314_v23  ;;  %1636 = vst [vmem:[#allocation2 + $0x28c8] sm:$0xff] %v15314_v23 }
 0x31a   : > { %1637 = vst [vmem:[#allocation2 + $0x28d0] sm:$0xff] %v15314_v23  ;;  %1638 = vst [vmem:[#allocation2 + $0x28d8] sm:$0xff] %v15314_v23 }
 0x31b   : > { %1639 = vst [vmem:[#allocation2 + $0x28e0] sm:$0xff] %v15314_v23  ;;  %1640 = vst [vmem:[#allocation2 + $0x28e8] sm:$0xff] %v15314_v23 }
 0x31c   : > { %1641 = vst [vmem:[#allocation2 + $0x28f0] sm:$0xff] %v15314_v23  ;;  %1642 = vst [vmem:[#allocation2 + $0x28f8] sm:$0xff] %v15314_v23 }
 0x31d   : > { %1643 = vst [vmem:[#allocation2 + $0x2900] sm:$0xff] %v15314_v23  ;;  %1644 = vst [vmem:[#allocation2 + $0x2908] sm:$0xff] %v15314_v23 }
 0x31e   : > { %1645 = vst [vmem:[#allocation2 + $0x2910] sm:$0xff] %v15314_v23  ;;  %1646 = vst [vmem:[#allocation2 + $0x2918] sm:$0xff] %v15314_v23 }
 0x31f   : > { %1647 = vst [vmem:[#allocation2 + $0x2920] sm:$0xff] %v15314_v23  ;;  %1648 = vst [vmem:[#allocation2 + $0x2928] sm:$0xff] %v15314_v23 }
 0x320   : > { %1649 = vst [vmem:[#allocation2 + $0x2930] sm:$0xff] %v15314_v23  ;;  %1650 = vst [vmem:[#allocation2 + $0x2938] sm:$0xff] %v15314_v23 }
 0x321   : > { %1651 = vst [vmem:[#allocation2 + $0x2940] sm:$0xff] %v15314_v23  ;;  %1652 = vst [vmem:[#allocation2 + $0x2948] sm:$0xff] %v15314_v23 }
 0x322   : > { %1653 = vst [vmem:[#allocation2 + $0x2950] sm:$0xff] %v15314_v23  ;;  %1654 = vst [vmem:[#allocation2 + $0x2958] sm:$0xff] %v15314_v23 }
 0x323   : > { %1655 = vst [vmem:[#allocation2 + $0x2960] sm:$0xff] %v15314_v23  ;;  %1656 = vst [vmem:[#allocation2 + $0x2968] sm:$0xff] %v15314_v23 }
 0x324   : > { %1657 = vst [vmem:[#allocation2 + $0x2970] sm:$0xff] %v15314_v23  ;;  %1658 = vst [vmem:[#allocation2 + $0x2978] sm:$0xff] %v15314_v23 }
 0x325   : > { %1659 = vst [vmem:[#allocation2 + $0x2980] sm:$0xff] %v15314_v23  ;;  %1660 = vst [vmem:[#allocation2 + $0x2988] sm:$0xff] %v15314_v23 }
 0x326   : > { %1661 = vst [vmem:[#allocation2 + $0x2990] sm:$0xff] %v15314_v23  ;;  %1662 = vst [vmem:[#allocation2 + $0x2998] sm:$0xff] %v15314_v23 }
 0x327   : > { %1663 = vst [vmem:[#allocation2 + $0x29a0] sm:$0xff] %v15314_v23  ;;  %1664 = vst [vmem:[#allocation2 + $0x29a8] sm:$0xff] %v15314_v23 }
 0x328   : > { %1665 = vst [vmem:[#allocation2 + $0x29b0] sm:$0xff] %v15314_v23  ;;  %1666 = vst [vmem:[#allocation2 + $0x29b8] sm:$0xff] %v15314_v23 }
 0x329   : > { %1667 = vst [vmem:[#allocation2 + $0x29c0] sm:$0xff] %v15314_v23  ;;  %1668 = vst [vmem:[#allocation2 + $0x29c8] sm:$0xff] %v15314_v23 }
 0x32a   : > { %1669 = vst [vmem:[#allocation2 + $0x29d0] sm:$0xff] %v15314_v23  ;;  %1670 = vst [vmem:[#allocation2 + $0x29d8] sm:$0xff] %v15314_v23 }
 0x32b   : > { %1671 = vst [vmem:[#allocation2 + $0x29e0] sm:$0xff] %v15314_v23  ;;  %1672 = vst [vmem:[#allocation2 + $0x29e8] sm:$0xff] %v15314_v23 }
 0x32c   : > { %1673 = vst [vmem:[#allocation2 + $0x29f0] sm:$0xff] %v15314_v23  ;;  %1674 = vst [vmem:[#allocation2 + $0x29f8] sm:$0xff] %v15314_v23 }
 0x32d   : > { %1675 = vst [vmem:[#allocation2 + $0x2a00] sm:$0xff] %v15572_v25  ;;  %1676 = vst [vmem:[#allocation2 + $0x2a08] sm:$0xff] %v15572_v25 }
 0x32e   : > { %1677 = vst [vmem:[#allocation2 + $0x2a10] sm:$0xff] %v15572_v25  ;;  %1678 = vst [vmem:[#allocation2 + $0x2a18] sm:$0xff] %v15572_v25 }
 0x32f   : > { %1679 = vst [vmem:[#allocation2 + $0x2a20] sm:$0xff] %v15572_v25  ;;  %1680 = vst [vmem:[#allocation2 + $0x2a28] sm:$0xff] %v15572_v25 }
 0x330   : > { %1681 = vst [vmem:[#allocation2 + $0x2a30] sm:$0xff] %v15572_v25  ;;  %1682 = vst [vmem:[#allocation2 + $0x2a38] sm:$0xff] %v15572_v25 }
 0x331   : > { %1683 = vst [vmem:[#allocation2 + $0x2a40] sm:$0xff] %v15572_v25  ;;  %1684 = vst [vmem:[#allocation2 + $0x2a48] sm:$0xff] %v15572_v25 }
 0x332   : > { %1685 = vst [vmem:[#allocation2 + $0x2a50] sm:$0xff] %v15572_v25  ;;  %1686 = vst [vmem:[#allocation2 + $0x2a58] sm:$0xff] %v15572_v25 }
 0x333   : > { %1687 = vst [vmem:[#allocation2 + $0x2a60] sm:$0xff] %v15572_v25  ;;  %1688 = vst [vmem:[#allocation2 + $0x2a68] sm:$0xff] %v15572_v25 }
 0x334   : > { %1689 = vst [vmem:[#allocation2 + $0x2a70] sm:$0xff] %v15572_v25  ;;  %1690 = vst [vmem:[#allocation2 + $0x2a78] sm:$0xff] %v15572_v25 }
 0x335   : > { %1691 = vst [vmem:[#allocation2 + $0x2a80] sm:$0xff] %v15572_v25  ;;  %1692 = vst [vmem:[#allocation2 + $0x2a88] sm:$0xff] %v15572_v25 }
 0x336   : > { %1693 = vst [vmem:[#allocation2 + $0x2a90] sm:$0xff] %v15572_v25  ;;  %1694 = vst [vmem:[#allocation2 + $0x2a98] sm:$0xff] %v15572_v25 }
 0x337   : > { %1695 = vst [vmem:[#allocation2 + $0x2aa0] sm:$0xff] %v15572_v25  ;;  %1696 = vst [vmem:[#allocation2 + $0x2aa8] sm:$0xff] %v15572_v25 }
 0x338   : > { %1697 = vst [vmem:[#allocation2 + $0x2ab0] sm:$0xff] %v15572_v25  ;;  %1698 = vst [vmem:[#allocation2 + $0x2ab8] sm:$0xff] %v15572_v25 }
 0x339   : > { %1699 = vst [vmem:[#allocation2 + $0x2ac0] sm:$0xff] %v15572_v25  ;;  %1700 = vst [vmem:[#allocation2 + $0x2ac8] sm:$0xff] %v15572_v25 }
 0x33a   : > { %1701 = vst [vmem:[#allocation2 + $0x2ad0] sm:$0xff] %v15572_v25  ;;  %1702 = vst [vmem:[#allocation2 + $0x2ad8] sm:$0xff] %v15572_v25 }
 0x33b   : > { %1703 = vst [vmem:[#allocation2 + $0x2ae0] sm:$0xff] %v15572_v25  ;;  %1704 = vst [vmem:[#allocation2 + $0x2ae8] sm:$0xff] %v15572_v25 }
 0x33c   : > { %1705 = vst [vmem:[#allocation2 + $0x2af0] sm:$0xff] %v15572_v25  ;;  %1706 = vst [vmem:[#allocation2 + $0x2af8] sm:$0xff] %v15572_v25 }
 0x33d   : > { %1707 = vst [vmem:[#allocation2 + $0x2b00] sm:$0xff] %v15572_v25  ;;  %1708 = vst [vmem:[#allocation2 + $0x2b08] sm:$0xff] %v15572_v25 }
 0x33e   : > { %1709 = vst [vmem:[#allocation2 + $0x2b10] sm:$0xff] %v15572_v25  ;;  %1710 = vst [vmem:[#allocation2 + $0x2b18] sm:$0xff] %v15572_v25 }
 0x33f   : > { %1711 = vst [vmem:[#allocation2 + $0x2b20] sm:$0xff] %v15572_v25  ;;  %1712 = vst [vmem:[#allocation2 + $0x2b28] sm:$0xff] %v15572_v25 }
 0x340   : > { %1713 = vst [vmem:[#allocation2 + $0x2b30] sm:$0xff] %v15572_v25  ;;  %1714 = vst [vmem:[#allocation2 + $0x2b38] sm:$0xff] %v15572_v25 }
 0x341   : > { %1715 = vst [vmem:[#allocation2 + $0x2b40] sm:$0xff] %v15572_v25  ;;  %1716 = vst [vmem:[#allocation2 + $0x2b48] sm:$0xff] %v15572_v25 }
 0x342   : > { %1717 = vst [vmem:[#allocation2 + $0x2b50] sm:$0xff] %v15572_v25  ;;  %1718 = vst [vmem:[#allocation2 + $0x2b58] sm:$0xff] %v15572_v25 }
 0x343   : > { %1719 = vst [vmem:[#allocation2 + $0x2b60] sm:$0xff] %v15572_v25  ;;  %1720 = vst [vmem:[#allocation2 + $0x2b68] sm:$0xff] %v15572_v25 }
 0x344   : > { %1721 = vst [vmem:[#allocation2 + $0x2b70] sm:$0xff] %v15572_v25  ;;  %1722 = vst [vmem:[#allocation2 + $0x2b78] sm:$0xff] %v15572_v25 }
 0x345   : > { %1723 = vst [vmem:[#allocation2 + $0x2b80] sm:$0xff] %v15572_v25  ;;  %1724 = vst [vmem:[#allocation2 + $0x2b88] sm:$0xff] %v15572_v25 }
 0x346   : > { %1725 = vst [vmem:[#allocation2 + $0x2b90] sm:$0xff] %v15572_v25  ;;  %1726 = vst [vmem:[#allocation2 + $0x2b98] sm:$0xff] %v15572_v25 }
 0x347   : > { %1727 = vst [vmem:[#allocation2 + $0x2ba0] sm:$0xff] %v15572_v25  ;;  %1728 = vst [vmem:[#allocation2 + $0x2ba8] sm:$0xff] %v15572_v25 }
 0x348   : > { %1729 = vst [vmem:[#allocation2 + $0x2bb0] sm:$0xff] %v15572_v25  ;;  %1730 = vst [vmem:[#allocation2 + $0x2bb8] sm:$0xff] %v15572_v25 }
 0x349   : > { %1731 = vst [vmem:[#allocation2 + $0x2bc0] sm:$0xff] %v15572_v25  ;;  %1732 = vst [vmem:[#allocation2 + $0x2bc8] sm:$0xff] %v15572_v25 }
 0x34a   : > { %1733 = vst [vmem:[#allocation2 + $0x2bd0] sm:$0xff] %v15572_v25  ;;  %1734 = vst [vmem:[#allocation2 + $0x2bd8] sm:$0xff] %v15572_v25 }
 0x34b   : > { %1735 = vst [vmem:[#allocation2 + $0x2be0] sm:$0xff] %v15572_v25  ;;  %1736 = vst [vmem:[#allocation2 + $0x2be8] sm:$0xff] %v15572_v25 }
 0x34c   : > { %1737 = vst [vmem:[#allocation2 + $0x2bf0] sm:$0xff] %v15572_v25  ;;  %1738 = vst [vmem:[#allocation2 + $0x2bf8] sm:$0xff] %v15572_v25 }
 0x34d PF: > { %v1771_v26 = vlaneseq  ;;  %v15897_v28 = vld [vmem:[%s14414_s1] sm:$0xff]  ;;  %v2812_v32 = vld [vmem:[#allocation2 + $0x208] sm:$0xff]  ;;  %v14140_v48 = vmov 1.0|1.0   ;;  %v14141_v9 = vmov 1983009808  }
 0x34e   : > { %v15900_v29 = vld [vmem:[%s14414_s1 + $0x20] sm:$0xff]  ;;  %v2780_v34 = vld [vmem:[#allocation2 + $0x108] sm:$0xff]  ;;  %v2030_v10 = vunpack.c.l.s4 %v14141_v9  ;;  %s13664_s18 = sshll.u32 %s14122_s19, 6  ;;  %s10691_s23 = sshll.u32 %s14416_s17, 4  ;;  %s19214_s23 = int_to_ptr.vmem [resolvable:$true] %s10691_s23 }
 0x34f   : > { %v15894_v27 = vshrl.u32 %v1771_v26, 7  ;;  %v2844_v35 = vld [vmem:[#allocation2 + $0x308] sm:$0xff]  ;;  %v2811_v39 = vld [vmem:[#allocation2 + $0x200] sm:$0xff]  ;;  %s19212_s9 = scalar_lea.hbm %s19280_s3, %s13664_s18  ;;  %s10677_s27 = scalar_lea.sflag [#allocation5], %s287_s24 }
 0x350   : > { %v2748_v31 = vld [vmem:[#allocation2 + $0x8] sm:$0xff]  ;;  %v2747_v36 = vld [vmem:[#allocation2] sm:$0xff]  ;;  %v2031_v17 = vunpack.c.0.s8 %v2030_v10  ;;  %s14008_s14 = scalar_lea.vmem %s19214_s23, 64  ;;  %p19422_p7 = scmp.ne.s32.totalorder %s19302_s10, 0 }
 0x351   : > { %v15903_v30 = vsub.s32 1, %v15894_v27  ;;  %v15906_v33 = vsub.s32 0, %v15894_v27  ;;  %v2779_v41 = vld [vmem:[#allocation2 + $0x100] sm:$0xff]  ;;  %v2876_v44 = vld [vmem:[#allocation2 + $0x408] sm:$0xff]  ;;  %v15991_v20 = vsub.s32 2, %v15894_v27  ;;  %v15994_v21 = vsub.s32 3, %v15894_v27  ;;  %p14009_p10 = scmp.ne.s32.totalorder %s19214_s23, %s14008_s14 }
 0x352   : > { %v2843_v42 = vld [vmem:[#allocation2 + $0x300] sm:$0xff]  ;;  %v2940_v45 = vld [vmem:[#allocation2 + $0x608] sm:$0xff]  ;;  %v16005_v25 = vsub.s32 %v2031_v17, %v15894_v27  ;;  %s14142_s19 = smov [#allocation9]  }
 0x353   : > { %v15910_v37 = vrot.slane %v15897_v28, %v15903_v30  ;;  %v15914_v38 = vrot.slane %v15900_v29, %v15903_v30  ;;  %v15918_v40 = vrot.slane %v15897_v28, %v15906_v33  ;;  %v15922_v43 = vrot.slane %v15900_v29, %v15906_v33  ;;  %v2908_v46 = vld [vmem:[#allocation2 + $0x508] sm:$0xff]  ;;  %v2875_v49 = vld [vmem:[#allocation2 + $0x400] sm:$0xff]  ;;  %p14010_p13 = pnand %p14009_p10, %p19422_p7  ;;  %s14012_s11 = sshll.u32 %s14142_s19, 4  ;;  %s14013_s11 = int_to_ptr.vmem [resolvable:$false] %s14012_s11 }
 0x354   : > { %v2972_v47 = vld [vmem:[#allocation2 + $0x708] sm:$0xff]  ;;  %v2939_v50 = vld [vmem:[#allocation2 + $0x600] sm:$0xff]  ;;  %s14014_s30 = scalar_lea.vmem %s14013_s11, 128  ;;  %p14015_p11 = scmp.lt.s32.totalorder %s19214_s23, %s14013_s11 }
 0x355   : > { %vm4420_vm3 = vcmp.eq.s32.totalorder %v2748_v31, %v15910_v37  ;;  %vm4484_vm4 = vcmp.eq.s32.totalorder %v2812_v32, %v15910_v37  ;;  %vm4452_vm5 = vcmp.eq.s32.totalorder %v2780_v34, %v15914_v38  ;;  %vm4516_vm6 = vcmp.eq.s32.totalorder %v2844_v35, %v15914_v38  ;;  %v2907_v51 = vld [vmem:[#allocation2 + $0x500] sm:$0xff]  ;;  %v3004_v53 = vld [vmem:[#allocation2 + $0x808] sm:$0xff]  ;;  %p14011_p8 = pneg %p14010_p13  ;;  %p14016_p0 = scmp.lt.s32.totalorder %s14014_s30, %s14008_s14 }
 0x356   : > { %vm12248_vm7 = vmpackc.low %vm4484_vm4, %vm4420_vm3  ;;  %vm4419_vm8 = vcmp.eq.s32.totalorder %v2747_v36, %v15918_v40  ;;  %vm4483_vm9 = vcmp.eq.s32.totalorder %v2811_v39, %v15918_v40  ;;  %vm4451_vm10 = vcmp.eq.s32.totalorder %v2779_v41, %v15922_v43  ;;  %vm4515_vm11 = vcmp.eq.s32.totalorder %v2843_v42, %v15922_v43  ;;  %v2971_v52 = vld [vmem:[#allocation2 + $0x700] sm:$0xff]  ;;  %v3068_v54 = vld [vmem:[#allocation2 + $0xa08] sm:$0xff] }
 0x357   : > { %12249 = vmatprep.subr.msk.bf16.mxu1 %vm12248_vm7, %v14140_v48  ;;  %vm12952_vm12 = vmpackc.low %vm4516_vm6, %vm4452_vm5  ;;  %vm4548_vm13 = vcmp.eq.s32.totalorder %v2876_v44, %v15910_v37  ;;  %vm4612_vm14 = vcmp.eq.s32.totalorder %v2940_v45, %v15910_v37  ;;  %vm4580_vm0 = vcmp.eq.s32.totalorder %v2908_v46, %v15914_v38  ;;  %vm4644_vm1 = vcmp.eq.s32.totalorder %v2972_v47, %v15914_v38  ;;  %v3036_v55 = vld [vmem:[#allocation2 + $0x908] sm:$0xff]  ;;  %v3003_v57 = vld [vmem:[#allocation2 + $0x800] sm:$0xff]  ;;  %p14017_p1 = por %p14016_p0, %p14015_p11 }
 0x358   : > { %12953 = vmatprep.subr.msk.bf16.mxu0 %vm12952_vm12, %v14140_v48  ;;  %vm12250_vm15 = vmpackc.low %vm4483_vm9, %vm4419_vm8  ;;  %vm4547_vm4 = vcmp.eq.s32.totalorder %v2875_v49, %v15918_v40  ;;  %vm4611_vm5 = vcmp.eq.s32.totalorder %v2939_v50, %v15918_v40  ;;  %v3100_v56 = vld [vmem:[#allocation2 + $0xb08] sm:$0xff]  ;;  %vm4579_vm7 = vcmp.eq.s32.totalorder %v2907_v51, %v15922_v43  ;;  %vm4643_vm8 = vcmp.eq.s32.totalorder %v2971_v52, %v15922_v43  ;;  %v3067_v58 = vld [vmem:[#allocation2 + $0xa00] sm:$0xff] }
 0x359   : > { %12251 = vmatpush1.bf16.xpose.msk.msra.mxu1 %vm12250_vm15, %v14140_v48  ;;  %vm12954_vm2 = vmpackc.low %vm4515_vm11, %vm4451_vm10  ;;  %vm4676_vm9 = vcmp.eq.s32.totalorder %v3004_v53, %v15910_v37  ;;  %vm4740_vm10 = vcmp.eq.s32.totalorder %v3068_v54, %v15910_v37  ;;  %vm4708_vm12 = vcmp.eq.s32.totalorder %v3036_v55, %v15914_v38  ;;  %v3035_v59 = vld [vmem:[#allocation2 + $0x900] sm:$0xff]  ;;  %v3132_v61 = vld [vmem:[#allocation2 + $0xc08] sm:$0xff]  ;;  %p14018_p12 = pnand %p14017_p1, %p14011_p8 }
 0x35a   : > { %12955 = vmatpush1.bf16.xpose.msk.msra.mxu0 %vm12954_vm2, %v14140_v48  ;;  %vm12252_vm3 = vmpackc.low %vm4612_vm14, %vm4548_vm13  ;;  %vm4772_vm13 = vcmp.eq.s32.totalorder %v3100_v56, %v15914_v38  ;;  %v3099_v60 = vld [vmem:[#allocation2 + $0xb00] sm:$0xff]  ;;  %v3196_v62 = vld [vmem:[#allocation2 + $0xe08] sm:$0xff]  ;;  %vm4739_vm2 = vcmp.eq.s32.totalorder %v3067_v58, %v15918_v40 }
 0x35b   : > { %12253 = vmatprep.subr.msk.bf16.mxu1 %vm12252_vm3, %v14140_v48  ;;  %vm12956_vm6 = vmpackc.low %vm4644_vm1, %vm4580_vm0  ;;  %vm4675_vm1 = vcmp.eq.s32.totalorder %v3003_v57, %v15918_v40  ;;  %v3164_v63 = vld [vmem:[#allocation2 + $0xd08] sm:$0xff]  ;;  %vm4707_vm3 = vcmp.eq.s32.totalorder %v3035_v59, %v15922_v43  ;;  %v3131_v1 = vld [vmem:[#allocation2 + $0xc00] sm:$0xff] }
 0x35c   : > { %12957 = vmatprep.subr.msk.bf16.mxu0 %vm12956_vm6, %v14140_v48  ;;  %vm12254_vm11 = vmpackc.low %vm4611_vm5, %vm4547_vm4  ;;  %v3228_v0 = vld [vmem:[#allocation2 + $0xf08] sm:$0xff]  ;;  %vm4771_vm4 = vcmp.eq.s32.totalorder %v3099_v60, %v15922_v43  ;;  %vm4804_vm5 = vcmp.eq.s32.totalorder %v3132_v61, %v15910_v37  ;;  %vm4868_vm6 = vcmp.eq.s32.totalorder %v3196_v62, %v15910_v37  ;;  %v3195_v2 = vld [vmem:[#allocation2 + $0xe00] sm:$0xff] }
 0x35d   : > { %vm12958_vm14 = vmpackc.low %vm4643_vm8, %vm4579_vm7  ;;  %vm4836_vm8 = vcmp.eq.s32.totalorder %v3164_v63, %v15914_v38  ;;  %v3163_v3 = vld [vmem:[#allocation2 + $0xd00] sm:$0xff]  ;;  %v3260_v5 = vld [vmem:[#allocation2 + $0x1008] sm:$0xff] }
 0x35e   : > { %vm12256_vm15 = vmpackc.low %vm4740_vm10, %vm4676_vm9  ;;  %vm4900_vm9 = vcmp.eq.s32.totalorder %v3228_v0, %v15914_v38  ;;  %v3227_v4 = vld [vmem:[#allocation2 + $0xf00] sm:$0xff]  ;;  %v3324_v6 = vld [vmem:[#allocation2 + $0x1208] sm:$0xff] }
 0x35f   : > { %vm12960_vm0 = vmpackc.low %vm4772_vm13, %vm4708_vm12  ;;  %vm4803_vm13 = vcmp.eq.s32.totalorder %v3131_v1, %v15918_v40  ;;  %v3292_v7 = vld [vmem:[#allocation2 + $0x1108] sm:$0xff]  ;;  %v3259_v11 = vld [vmem:[#allocation2 + $0x1000] sm:$0xff] }
 0x360   : > { %vm12258_vm7 = vmpackc.low %vm4739_vm2, %vm4675_vm1  ;;  %v3356_v8 = vld [vmem:[#allocation2 + $0x1308] sm:$0xff]  ;;  %vm4932_vm1 = vcmp.eq.s32.totalorder %v3260_v5, %v15910_v37  ;;  %vm4996_vm2 = vcmp.eq.s32.totalorder %v3324_v6, %v15910_v37  ;;  %v3323_v12 = vld [vmem:[#allocation2 + $0x1200] sm:$0xff] }
 0x361   : > { %12255 = vmatpush1.bf16.xpose.msk.msra.mxu1 %vm12254_vm11, %v14140_v48  ;;  %vm12962_vm10 = vmpackc.low %vm4771_vm4, %vm4707_vm3  ;;  %vm4964_vm4 = vcmp.eq.s32.totalorder %v3292_v7, %v15914_v38  ;;  %v3291_v13 = vld [vmem:[#allocation2 + $0x1100] sm:$0xff]  ;;  %v3388_v15 = vld [vmem:[#allocation2 + $0x1408] sm:$0xff] }
 0x362   : > { %12959 = vmatpush1.bf16.xpose.msk.msra.mxu0 %vm12958_vm14, %v14140_v48  ;;  %12257 = vmatprep.subr.msk.bf16.mxu1 %vm12256_vm15, %v14140_v48  ;;  %vm12260_vm11 = vmpackc.low %vm4868_vm6, %vm4804_vm5  ;;  %vm4867_vm14 = vcmp.eq.s32.totalorder %v3195_v2, %v15918_v40  ;;  %vm4835_vm15 = vcmp.eq.s32.totalorder %v3163_v3, %v15922_v43  ;;  %vm5028_vm5 = vcmp.eq.s32.totalorder %v3356_v8, %v15914_v38  ;;  %v3355_v14 = vld [vmem:[#allocation2 + $0x1300] sm:$0xff]  ;;  %v3452_v16 = vld [vmem:[#allocation2 + $0x1608] sm:$0xff] }
 0x363   : > { %12961 = vmatprep.subr.msk.bf16.mxu0 %vm12960_vm0, %v14140_v48  ;;  %vm12964_vm12 = vmpackc.low %vm4900_vm9, %vm4836_vm8  ;;  %vm4899_vm0 = vcmp.eq.s32.totalorder %v3227_v4, %v15922_v43  ;;  %vm4931_vm9 = vcmp.eq.s32.totalorder %v3259_v11, %v15918_v40  ;;  %v3420_v18 = vld [vmem:[#allocation2 + $0x1508] sm:$0xff]  ;;  %v3387_v23 = vld [vmem:[#allocation2 + $0x1400] sm:$0xff] }
 0x364   : > { %vm12262_vm3 = vmpackc.low %vm4867_vm14, %vm4803_vm13  ;;  %v3484_v19 = vld [vmem:[#allocation2 + $0x1708] sm:$0xff]  ;;  %vm5060_vm13 = vcmp.eq.s32.totalorder %v3388_v15, %v15910_v37  ;;  %vm5124_vm14 = vcmp.eq.s32.totalorder %v3452_v16, %v15910_v37  ;;  %v3451_v24 = vld [vmem:[#allocation2 + $0x1600] sm:$0xff] }
 0x365   : > { %vm12966_vm6 = vmpackc.low %vm4899_vm0, %vm4835_vm15  ;;  %vm5092_vm0 = vcmp.eq.s32.totalorder %v3420_v18, %v15914_v38  ;;  %v16012_v31 = vld [vmem:[%s14405_s7] sm:$0xff]  ;;  %v3516_v46 = vld [vmem:[#allocation2 + $0x1808] sm:$0xff] }
 0x366   : > { %vm12968_vm8 = vmpackc.low %vm5028_vm5, %vm4964_vm4  ;;  %v3419_v34 = vld [vmem:[#allocation2 + $0x1500] sm:$0xff]  ;;  %v1774_v35 = vrot.slane %v16012_v31, %v15906_v33  ;;  %v1778_v36 = vrot.slane %v16012_v31, %v15903_v30  ;;  %v1782_v39 = vrot.slane %v16012_v31, %v15991_v20  ;;  %v1786_v41 = vrot.slane %v16012_v31, %v15994_v21  ;;  %v3580_v47 = vld [vmem:[#allocation2 + $0x1a08] sm:$0xff] }
 0x367   : > { %vm5059_vm5 = vcmp.eq.s32.totalorder %v3387_v23, %v15918_v40  ;;  %v3483_v44 = vld [vmem:[#allocation2 + $0x1700] sm:$0xff]  ;;  %v3548_v53 = vld [vmem:[#allocation2 + $0x1908] sm:$0xff] }
 0x368   : > { %v16033_v45 = vld [vmem:[%s14405_s7 + $0x20] sm:$0xff]  ;;  %v2027_v49 = vcombine.low %v1774_v35, %v1778_v36  ;;  %v2028_v50 = vcombine.low %v1782_v39, %v1786_v41  ;;  %v3612_v54 = vld [vmem:[#allocation2 + $0x1b08] sm:$0xff] }
 0x369   : > { %12259 = vmatpush1.bf16.xpose.msk.msra.mxu1 %vm12258_vm7, %v14140_v48  ;;  %vm12264_vm7 = vmpackc.low %vm4996_vm2, %vm4932_vm1  ;;  %vm5156_vm1 = vcmp.eq.s32.totalorder %v3484_v19, %v15914_v38  ;;  %v1902_v51 = vrot.slane %v16033_v45, %v15906_v33  ;;  %v1906_v52 = vrot.slane %v16033_v45, %v15903_v30  ;;  %v1910_v55 = vrot.slane %v16033_v45, %v15991_v20  ;;  %v1739_v60 = vld [vmem:[%s14398_s6] sm:$0xff]  ;;  %v3644_v9 = vld [vmem:[#allocation2 + $0x1c08] sm:$0xff] }
 0x36a   : > { %12963 = vmatpush1.bf16.xpose.msk.msra.mxu0 %vm12962_vm10, %v14140_v48  ;;  %12261 = vmatprep.subr.msk.bf16.mxu1 %vm12260_vm11, %v14140_v48  ;;  %vm4995_vm10 = vcmp.eq.s32.totalorder %v3323_v12, %v15918_v40  ;;  %vm4963_vm11 = vcmp.eq.s32.totalorder %v3291_v13, %v15922_v43  ;;  %vm16026_vm4 = vmpackc.low %vm5156_vm1, %vm5092_vm0  ;;  %v1914_v56 = vrot.slane %v16033_v45, %v15994_v21  ;;  %v3515_v1 = vld [vmem:[#allocation2 + $0x1800] sm:$0xff]  ;;  %v3708_v10 = vld [vmem:[#allocation2 + $0x1e08] sm:$0xff] }
 0x36b   : > { %12965 = vmatprep.subr.msk.bf16.mxu0 %vm12964_vm12, %v14140_v48  ;;  %vm5027_vm12 = vcmp.eq.s32.totalorder %v3355_v14, %v15922_v43  ;;  %vm15998_vm15 = vmpackc.low %vm4995_vm10, %vm4931_vm9  ;;  %v2035_v57 = vrot.slane %v2027_v49, %v16005_v25  ;;  %v2042_v58 = vrot.slane %v2028_v50, %v16005_v25  ;;  %v2163_v59 = vcombine.low %v1902_v51, %v1906_v52  ;;  %v3579_v3 = vld [vmem:[#allocation2 + $0x1a00] sm:$0xff]  ;;  %v3676_v12 = vld [vmem:[#allocation2 + $0x1d08] sm:$0xff] }
 0x36c   : > { %vm16007_vm2 = vmpackc.low %vm5027_vm12, %vm4963_vm11  ;;  %vm5188_vm9 = vcmp.eq.s32.totalorder %v3516_v46, %v15910_v37  ;;  %vm5252_vm10 = vcmp.eq.s32.totalorder %v3580_v47, %v15910_v37  ;;  %v2164_v61 = vcombine.low %v1910_v55, %v1914_v56  ;;  %vm5220_vm12 = vcmp.eq.s32.totalorder %v3548_v53, %v15914_v38  ;;  %v1747_v5 = vld [vmem:[%s14398_s6 + $0x40] sm:$0xff]  ;;  %v3740_v13 = vld [vmem:[#allocation2 + $0x1f08] sm:$0xff] }
 0x36d   : > { %v2043_v63 = vcombine.low %v2035_v57, %v2042_v58  ;;  %v2171_v0 = vrot.slane %v2163_v59, %v16005_v25  ;;  %v3547_v6 = vld [vmem:[#allocation2 + $0x1900] sm:$0xff]  ;;  %vm5187_vm1 = vcmp.eq.s32.totalorder %v3515_v1, %v15918_v40  ;;  %v3772_v32 = vld [vmem:[#allocation2 + $0x2008] sm:$0xff]  ;;  %v16150_v1 = vrot.slane %v15900_v29, %v15994_v21 }
 0x36e   : > { %v2178_v2 = vrot.slane %v2164_v61, %v16005_v25  ;;  %v3611_v7 = vld [vmem:[#allocation2 + $0x1b00] sm:$0xff]  ;;  %v3804_v35 = vld [vmem:[#allocation2 + $0x2108] sm:$0xff] }
 0x36f   : > { %v16076_v4 = vmul.f32 %v2043_v63, %v1739_v60  ;;  %v3643_v19 = vld [vmem:[#allocation2 + $0x1c00] sm:$0xff]  ;;  %v3868_v36 = vld [vmem:[#allocation2 + $0x2308] sm:$0xff]  ;;  %v16145_v63 = vrot.slane %v15897_v28, %v15994_v21 }
 0x370   : > { %v2179_v8 = vcombine.low %v2171_v0, %v2178_v2  ;;  %v3707_v22 = vld [vmem:[#allocation2 + $0x1e00] sm:$0xff]  ;;  %v3900_v46 = vld [vmem:[#allocation2 + $0x2408] sm:$0xff]  ;;  %v2750_v0 = vld [vmem:[#allocation2 + $0x18] sm:$0xff] }
 0x371   : > { %12263 = vmatpush1.bf16.xpose.msk.msra.mxu1 %vm12262_vm3, %v14140_v48  ;;  %vm16014_vm3 = vmpackc.low %vm5124_vm14, %vm5060_vm13  ;;  %vm5284_vm13 = vcmp.eq.s32.totalorder %v3612_v54, %v15914_v38  ;;  %v16084_v11 = vrot.slane %v16076_v4, %v16005_v25  ;;  %v3675_v23 = vld [vmem:[#allocation2 + $0x1d00] sm:$0xff]  ;;  %v3964_v47 = vld [vmem:[#allocation2 + $0x2608] sm:$0xff] }
 0x372   : > { %12967 = vmatpush1.bf16.xpose.msk.msra.mxu0 %vm12966_vm6, %v14140_v48  ;;  %12265 = vmatprep.subr.msk.bf16.mxu1 %vm12264_vm7, %v14140_v48  ;;  %vm5123_vm6 = vcmp.eq.s32.totalorder %v3451_v24, %v15918_v40  ;;  %vm5091_vm7 = vcmp.eq.s32.totalorder %v3419_v34, %v15922_v43  ;;  %vm12976_vm0 = vmpackc.low %vm5284_vm13, %vm5220_vm12  ;;  %v16090_v14 = vmul.f32 %v2179_v8, %v1747_v5  ;;  %v3739_v24 = vld [vmem:[#allocation2 + $0x1f00] sm:$0xff]  ;;  %v3836_v34 = vld [vmem:[#allocation2 + $0x2208] sm:$0xff] }
 0x373   : > { %12969 = vmatprep.subr.msk.bf16.mxu0 %vm12968_vm8, %v14140_v48  ;;  %vm5155_vm8 = vcmp.eq.s32.totalorder %v3483_v44, %v15922_v43  ;;  %vm16066_vm11 = vmpackc.low %vm5123_vm6, %vm5059_vm5  ;;  %v2362_v15 = vcombine.high %v16084_v11, %v16084_v11  ;;  %vm5316_vm5 = vcmp.eq.s32.totalorder %v3644_v9, %v15910_v37  ;;  %vm5380_vm6 = vcmp.eq.s32.totalorder %v3708_v10, %v15910_v37  ;;  %v3771_v39 = vld [vmem:[#allocation2 + $0x2000] sm:$0xff]  ;;  %v3932_v49 = vld [vmem:[#allocation2 + $0x2508] sm:$0xff] }
 0x374   : > { %vm12974_vm14 = vmpackc.low %vm5155_vm8, %vm5091_vm7  ;;  %v16101_v16 = vrot.slane %v16090_v14, %v16005_v25  ;;  %vm5348_vm8 = vcmp.eq.s32.totalorder %v3676_v12, %v15914_v38  ;;  %vm5315_vm13 = vcmp.eq.s32.totalorder %v3643_v19, %v15918_v40  ;;  %v3835_v41 = vld [vmem:[#allocation2 + $0x2200] sm:$0xff]  ;;  %v3996_v50 = vld [vmem:[#allocation2 + $0x2708] sm:$0xff]  ;;  %v2483_v5 = vcombine.high %v16090_v14, %v16090_v14 }
 0x375   : > { %v2684_v17 = vpack.c.bf16 %v2362_v15, %v2362_v15  ;;  %v3803_v42 = vld [vmem:[#allocation2 + $0x2100] sm:$0xff]  ;;  %v4028_v55 = vld [vmem:[#allocation2 + $0x2808] sm:$0xff]  ;;  %v2846_v2 = vld [vmem:[#allocation2 + $0x318] sm:$0xff]  ;;  %v2683_v15 = vpack.c.bf16 %v16084_v11, %v16084_v11 }
 0x376   : > { %v2498_v18 = vcombine.high %v16101_v16, %v16101_v16  ;;  %v3867_v44 = vld [vmem:[#allocation2 + $0x2300] sm:$0xff]  ;;  %v4092_v56 = vld [vmem:[#allocation2 + $0x2a08] sm:$0xff]  ;;  %v2781_v8 = vld [vmem:[#allocation2 + $0x110] sm:$0xff]  ;;  %v16179_v10 = vrot.slane %v2483_v5, %v16005_v25 }
 0x377   : > { %9380 = vmatprep.mubr.bf16.mxu1 %v2684_v17  ;;  %v3899_v51 = vld [vmem:[#allocation2 + $0x2400] sm:$0xff]  ;;  %v4060_v57 = vld [vmem:[#allocation2 + $0x2908] sm:$0xff]  ;;  %v2845_v9 = vld [vmem:[#allocation2 + $0x310] sm:$0xff] }
 0x378   : > { %v2716_v26 = vpack.c.bf16 %v2498_v18, %v2498_v18  ;;  %v3963_v52 = vld [vmem:[#allocation2 + $0x2600] sm:$0xff]  ;;  %v4124_v58 = vld [vmem:[#allocation2 + $0x2b08] sm:$0xff]  ;;  %v2942_v12 = vld [vmem:[#allocation2 + $0x618] sm:$0xff]  ;;  %v2499_v17 = vcombine.high %v16179_v10, %v16179_v10  ;;  %v2715_v18 = vpack.c.bf16 %v16101_v16, %v16101_v16 }
 0x379   : > { %12267 = vmatpush1.bf16.xpose.msk.msra.mxu1 %vm15998_vm15, %v14140_v48  ;;  %vm12272_vm15 = vmpackc.low %vm5252_vm10, %vm5188_vm9  ;;  %vm5412_vm9 = vcmp.eq.s32.totalorder %v3740_v13, %v15914_v38  ;;  %v3931_v53 = vld [vmem:[#allocation2 + $0x2500] sm:$0xff]  ;;  %v2974_v13 = vld [vmem:[#allocation2 + $0x718] sm:$0xff] }
 0x37a   : > { %12971 = vmatpush1.bf16.xpose.msk.msra.mxu0 %vm16007_vm2, %v14140_v48  ;;  %12269 = vmatprep.subr.msk.bf16.mxu1 %vm16014_vm3, %v14140_v48  ;;  %vm5251_vm2 = vcmp.eq.s32.totalorder %v3579_v3, %v15918_v40  ;;  %vm5219_vm3 = vcmp.eq.s32.totalorder %v3547_v6, %v15922_v43  ;;  %vm12980_vm12 = vmpackc.low %vm5412_vm9, %vm5348_vm8  ;;  %vm5443_vm9 = vcmp.eq.s32.totalorder %v3771_v39, %v15918_v40  ;;  %v3995_v54 = vld [vmem:[#allocation2 + $0x2700] sm:$0xff]  ;;  %v2877_v19 = vld [vmem:[#allocation2 + $0x410] sm:$0xff] }
 0x37b   : > { %12973 = vmatprep.subr.msk.bf16.mxu0 %vm16026_vm4, %v14140_v48  ;;  %vm5283_vm4 = vcmp.eq.s32.totalorder %v3611_v7, %v15922_v43  ;;  %vm12274_vm7 = vmpackc.low %vm5251_vm2, %vm5187_vm1  ;;  %10036 = vmatprep.mubr.bf16.mxu0 %v2716_v26  ;;  %vm5444_vm1 = vcmp.eq.s32.totalorder %v3772_v32, %v15910_v37  ;;  %vm5508_vm2 = vcmp.eq.s32.totalorder %v3836_v34, %v15910_v37  ;;  %v4027_v59 = vld [vmem:[#allocation2 + $0x2800] sm:$0xff]  ;;  %v3006_v32 = vld [vmem:[#allocation2 + $0x818] sm:$0xff] }
 0x37c   : > { %vm12978_vm10 = vmpackc.low %vm5283_vm4, %vm5219_vm3  ;;  %vm5476_vm4 = vcmp.eq.s32.totalorder %v3804_v35, %v15914_v38  ;;  %v4091_v60 = vld [vmem:[#allocation2 + $0x2a00] sm:$0xff]  ;;  %v2347_v3 = vcombine.high %v16076_v4, %v16076_v4  ;;  %v2813_v4 = vld [vmem:[#allocation2 + $0x210] sm:$0xff]  ;;  %v16173_v6 = vrot.slane %v15900_v29, %v15991_v20  ;;  %v2718_v26 = vpack.c.bf16 %v2499_v17, %v2499_v17 }
 0x37d   : > { %v4059_v61 = vld [vmem:[#allocation2 + $0x2900] sm:$0xff]  ;;  %v2910_v29 = vld [vmem:[#allocation2 + $0x518] sm:$0xff]  ;;  %v3069_v39 = vld [vmem:[#allocation2 + $0xa10] sm:$0xff] }
 0x37e   : > { %v4123_v62 = vld [vmem:[#allocation2 + $0x2b00] sm:$0xff]  ;;  %v16176_v7 = vrot.slane %v2347_v3, %v16005_v25  ;;  %v3070_v34 = vld [vmem:[#allocation2 + $0xa18] sm:$0xff]  ;;  %v3453_v3 = vld [vmem:[#allocation2 + $0x1610] sm:$0xff] }
 0x37f   : > { %v3038_v16 = vld [vmem:[#allocation2 + $0x918] sm:$0xff]  ;;  %v3421_v5 = vld [vmem:[#allocation2 + $0x1510] sm:$0xff] }
 0x380   : > { %v2363_v14 = vcombine.high %v16176_v7, %v16176_v7  ;;  %v3102_v35 = vld [vmem:[#allocation2 + $0xb18] sm:$0xff] }
 0x381   : > { %12271 = vmatpush1.bf16.xpose.msk.msra.mxu1 %vm16066_vm11, %v14140_v48  ;;  %vm12276_vm11 = vmpackc.low %vm5380_vm6, %vm5316_vm5  ;;  %vm5540_vm5 = vcmp.eq.s32.totalorder %v3868_v36, %v15914_v38  ;;  %v3005_v36 = vld [vmem:[#allocation2 + $0x810] sm:$0xff]  ;;  %v3710_v17 = vld [vmem:[#allocation2 + $0x1e18] sm:$0xff] }
 0x382   : > { %12975 = vmatpush1.bf16.xpose.msk.msra.mxu0 %vm12974_vm14, %v14140_v48  ;;  %12273 = vmatprep.subr.msk.bf16.mxu1 %vm12272_vm15, %v14140_v48  ;;  %vm5379_vm14 = vcmp.eq.s32.totalorder %v3707_v22, %v15918_v40  ;;  %vm5347_vm15 = vcmp.eq.s32.totalorder %v3675_v23, %v15922_v43  ;;  %vm12984_vm8 = vmpackc.low %vm5540_vm5, %vm5476_vm4  ;;  %vm5571_vm5 = vcmp.eq.s32.totalorder %v3899_v51, %v15918_v40  ;;  %v2941_v22 = vld [vmem:[#allocation2 + $0x610] sm:$0xff] }
 0x383   : > { %12977 = vmatprep.subr.msk.bf16.mxu0 %vm12976_vm0, %v14140_v48  ;;  %vm5411_vm0 = vcmp.eq.s32.totalorder %v3739_v24, %v15922_v43  ;;  %vm12278_vm3 = vmpackc.low %vm5379_vm14, %vm5315_vm13  ;;  %vm5572_vm13 = vcmp.eq.s32.totalorder %v3900_v46, %v15910_v37  ;;  %vm5636_vm14 = vcmp.eq.s32.totalorder %v3964_v47, %v15910_v37  ;;  %v2686_v11 = vpack.c.bf16 %v2363_v14, %v2363_v14  ;;  %v2909_v23 = vld [vmem:[#allocation2 + $0x510] sm:$0xff]  ;;  %v3198_v46 = vld [vmem:[#allocation2 + $0xe18] sm:$0xff] }
 0x384   : > { %vm12982_vm6 = vmpackc.low %vm5411_vm0, %vm5347_vm15  ;;  %vm5604_vm0 = vcmp.eq.s32.totalorder %v3932_v49, %v15914_v38  ;;  %v2973_v24 = vld [vmem:[#allocation2 + $0x710] sm:$0xff]  ;;  %v3166_v47 = vld [vmem:[#allocation2 + $0xd18] sm:$0xff] }
 0x385   : > { %v3230_v49 = vld [vmem:[#allocation2 + $0xf18] sm:$0xff]  ;;  %v3197_v51 = vld [vmem:[#allocation2 + $0xe10] sm:$0xff] }
 0x386   : > { %v3613_v14 = vld [vmem:[#allocation2 + $0x1b10] sm:$0xff] }
 0x389   : > { %12275 = vmatpush1.bf16.xpose.msk.msra.mxu1 %vm12274_vm7, %v14140_v48  ;;  %vm12280_vm7 = vmpackc.low %vm5508_vm2, %vm5444_vm1  ;;  %vm5668_vm1 = vcmp.eq.s32.totalorder %v3996_v50, %v15914_v38  ;;  %v3133_v50 = vld [vmem:[#allocation2 + $0xc10] sm:$0xff] }
 0x38a   : > { %12979 = vmatpush1.bf16.xpose.msk.msra.mxu0 %vm12978_vm10, %v14140_v48  ;;  %12277 = vmatprep.subr.msk.bf16.mxu1 %vm12276_vm11, %v14140_v48  ;;  %vm5507_vm10 = vcmp.eq.s32.totalorder %v3835_v41, %v15918_v40  ;;  %vm5475_vm11 = vcmp.eq.s32.totalorder %v3803_v42, %v15922_v43  ;;  %vm12988_vm4 = vmpackc.low %vm5668_vm1, %vm5604_vm0  ;;  %vm5699_vm1 = vcmp.eq.s32.totalorder %v4027_v59, %v15918_v40  ;;  %v3037_v41 = vld [vmem:[#allocation2 + $0x910] sm:$0xff] }
 0x38b   : > { %12981 = vmatprep.subr.msk.bf16.mxu0 %vm12980_vm12, %v14140_v48  ;;  %vm5539_vm12 = vcmp.eq.s32.totalorder %v3867_v44, %v15922_v43  ;;  %vm12282_vm15 = vmpackc.low %vm5507_vm10, %vm5443_vm9  ;;  %vm5700_vm9 = vcmp.eq.s32.totalorder %v4028_v55, %v15910_v37  ;;  %vm5764_vm10 = vcmp.eq.s32.totalorder %v4092_v56, %v15910_v37  ;;  %v2814_v37 = vld [vmem:[#allocation2 + $0x218] sm:$0xff]  ;;  %v3101_v42 = vld [vmem:[#allocation2 + $0xb10] sm:$0xff] }
 0x38c   : > { %vm12986_vm2 = vmpackc.low %vm5539_vm12, %vm5475_vm11  ;;  %vm5732_vm12 = vcmp.eq.s32.totalorder %v4060_v57, %v15914_v38  ;;  %v3134_v44 = vld [vmem:[#allocation2 + $0xc18] sm:$0xff]  ;;  %v3325_v59 = vld [vmem:[#allocation2 + $0x1210] sm:$0xff] }
 0x38d   : > { %v3326_v55 = vld [vmem:[#allocation2 + $0x1218] sm:$0xff] }
 0x38e   : > { %v3294_v56 = vld [vmem:[#allocation2 + $0x1118] sm:$0xff] }
 0x38f   : > { %v3358_v57 = vld [vmem:[#allocation2 + $0x1318] sm:$0xff] }
 0x391   : > { %12279 = vmatpush1.bf16.xpose.msk.msra.mxu1 %vm12278_vm3, %v14140_v48  ;;  %vm12284_vm3 = vmpackc.low %vm5636_vm14, %vm5572_vm13  ;;  %vm5796_vm13 = vcmp.eq.s32.totalorder %v4124_v58, %v15914_v38  ;;  %v2782_v38 = vld [vmem:[#allocation2 + $0x118] sm:$0xff]  ;;  %v3261_v58 = vld [vmem:[#allocation2 + $0x1010] sm:$0xff] }
 0x392   : > { %12983 = vmatpush1.bf16.xpose.msk.msra.mxu0 %vm12982_vm6, %v14140_v48  ;;  %12281 = vmatprep.subr.msk.bf16.mxu1 %vm12280_vm7, %v14140_v48  ;;  %vm5635_vm6 = vcmp.eq.s32.totalorder %v3963_v52, %v15918_v40  ;;  %vm5603_vm7 = vcmp.eq.s32.totalorder %v3931_v53, %v15922_v43  ;;  %vm12992_vm0 = vmpackc.low %vm5796_vm13, %vm5732_vm12  ;;  %v3165_v52 = vld [vmem:[#allocation2 + $0xd10] sm:$0xff] }
 0x393   : > { %12985 = vmatprep.subr.msk.bf16.mxu0 %vm12984_vm8, %v14140_v48  ;;  %vm5667_vm8 = vcmp.eq.s32.totalorder %v3995_v54, %v15922_v43  ;;  %vm12286_vm11 = vmpackc.low %vm5635_vm6, %vm5571_vm5  ;;  %vm4422_vm5 = vcmp.eq.s32.totalorder %v2750_v0, %v16145_v63  ;;  %vm4486_vm6 = vcmp.eq.s32.totalorder %v2814_v37, %v16145_v63  ;;  %v3229_v53 = vld [vmem:[#allocation2 + $0xf10] sm:$0xff]  ;;  %v3262_v54 = vld [vmem:[#allocation2 + $0x1018] sm:$0xff] }
 0x394   : > { %vm12990_vm14 = vmpackc.low %vm5667_vm8, %vm5603_vm7  ;;  %vm4454_vm8 = vcmp.eq.s32.totalorder %v2782_v38, %v16150_v1  ;;  %v3454_v0 = vld [vmem:[#allocation2 + $0x1618] sm:$0xff] }
 0x395   : > { %v3422_v37 = vld [vmem:[#allocation2 + $0x1518] sm:$0xff] }
 0x396   : > { %v3486_v38 = vld [vmem:[#allocation2 + $0x1718] sm:$0xff] }
 0x399   : > { %12283 = vmatpush1.bf16.xpose.msk.msra.mxu1 %vm12282_vm15, %v14140_v48  ;;  %vm12288_vm15 = vmpackc.low %vm5764_vm10, %vm5700_vm9  ;;  %vm4518_vm9 = vcmp.eq.s32.totalorder %v2846_v2, %v16150_v1  ;;  %v3389_v2 = vld [vmem:[#allocation2 + $0x1410] sm:$0xff] }
 0x39a   : > { %12987 = vmatpush1.bf16.xpose.msk.msra.mxu0 %vm12986_vm2, %v14140_v48  ;;  %12285 = vmatprep.subr.msk.bf16.mxu1 %vm12284_vm3, %v14140_v48  ;;  %vm5763_vm2 = vcmp.eq.s32.totalorder %v4091_v60, %v15918_v40  ;;  %vm5731_vm3 = vcmp.eq.s32.totalorder %v4059_v61, %v15922_v43  ;;  %v16169_v40 = vrot.slane %v15897_v28, %v15991_v20  ;;  %vm12996_vm12 = vmpackc.low %vm4518_vm9, %vm4454_vm8  ;;  %v2878_v28 = vld [vmem:[#allocation2 + $0x418] sm:$0xff]  ;;  %v3293_v60 = vld [vmem:[#allocation2 + $0x1110] sm:$0xff] }
 0x39b   : > { %12989 = vmatprep.subr.msk.bf16.mxu0 %vm12988_vm4, %v14140_v48  ;;  %vm5795_vm4 = vcmp.eq.s32.totalorder %v4123_v62, %v15922_v43  ;;  %vm12290_vm7 = vmpackc.low %vm5763_vm2, %vm5699_vm1  ;;  %v2749_v43 = vld [vmem:[#allocation2 + $0x10] sm:$0xff]  ;;  %vm4550_vm1 = vcmp.eq.s32.totalorder %v2878_v28, %v16145_v63  ;;  %vm4614_vm2 = vcmp.eq.s32.totalorder %v2942_v12, %v16145_v63  ;;  %v3390_v62 = vld [vmem:[#allocation2 + $0x1418] sm:$0xff] }
 0x39c   : > { %vm12994_vm10 = vmpackc.low %vm5795_vm4, %vm5731_vm3  ;;  %vm4421_vm13 = vcmp.eq.s32.totalorder %v2749_v43, %v16169_v40  ;;  %vm4582_vm4 = vcmp.eq.s32.totalorder %v2910_v29, %v16150_v1  ;;  %vm4549_vm9 = vcmp.eq.s32.totalorder %v2877_v19, %v16169_v40  ;;  %v3357_v61 = vld [vmem:[#allocation2 + $0x1310] sm:$0xff]  ;;  %v3614_v28 = vld [vmem:[#allocation2 + $0x1b18] sm:$0xff] }
 0x39d   : > { %v3485_v43 = vld [vmem:[#allocation2 + $0x1710] sm:$0xff]  ;;  %v3742_v19 = vld [vmem:[#allocation2 + $0x1f18] sm:$0xff] }
 0x39e   : > { %v3517_v12 = vld [vmem:[#allocation2 + $0x1810] sm:$0xff] }
 0x39f   : > { %v3581_v29 = vld [vmem:[#allocation2 + $0x1a10] sm:$0xff] }
 0x3a1   : > { %12287 = vmatpush1.bf16.xpose.msk.msra.mxu1 %vm12286_vm11, %v14140_v48  ;;  %vm12292_vm11 = vmpackc.low %vm4486_vm6, %vm4422_vm5  ;;  %vm4646_vm5 = vcmp.eq.s32.totalorder %v2974_v13, %v16150_v1  ;;  %v3549_v13 = vld [vmem:[#allocation2 + $0x1910] sm:$0xff] }
 0x3a2   : > { %12991 = vmatpush1.bf16.xpose.msk.msra.mxu0 %vm12990_vm14, %v14140_v48  ;;  %12289 = vmatprep.subr.msk.bf16.mxu1 %vm12288_vm15, %v14140_v48  ;;  %vm4485_vm14 = vcmp.eq.s32.totalorder %v2813_v4, %v16169_v40  ;;  %vm4453_vm15 = vcmp.eq.s32.totalorder %v2781_v8, %v16173_v6  ;;  %vm13000_vm8 = vmpackc.low %vm4646_vm5, %vm4582_vm4  ;;  %vm4677_vm5 = vcmp.eq.s32.totalorder %v3005_v36, %v16169_v40  ;;  %v3518_v4 = vld [vmem:[#allocation2 + $0x1818] sm:$0xff]  ;;  %v3837_v36 = vld [vmem:[#allocation2 + $0x2210] sm:$0xff] }
 0x3a3   : > { %12993 = vmatprep.subr.msk.bf16.mxu0 %vm12992_vm0, %v14140_v48  ;;  %vm4517_vm0 = vcmp.eq.s32.totalorder %v2845_v9, %v16173_v6  ;;  %vm12294_vm3 = vmpackc.low %vm4485_vm14, %vm4421_vm13  ;;  %vm4678_vm13 = vcmp.eq.s32.totalorder %v3006_v32, %v16145_v63  ;;  %vm4742_vm14 = vcmp.eq.s32.totalorder %v3070_v34, %v16145_v63  ;;  %v3582_v8 = vld [vmem:[#allocation2 + $0x1a18] sm:$0xff] }
 0x3a4   : > { %vm12998_vm6 = vmpackc.low %vm4517_vm0, %vm4453_vm15  ;;  %vm4710_vm0 = vcmp.eq.s32.totalorder %v3038_v16, %v16150_v1  ;;  %v3550_v9 = vld [vmem:[#allocation2 + $0x1918] sm:$0xff] }
 0x3a5   : > { %v3838_v32 = vld [vmem:[#allocation2 + $0x2218] sm:$0xff] }
 0x3a6   : > { %v3806_v34 = vld [vmem:[#allocation2 + $0x2118] sm:$0xff] }
 0x3a7   : > { %v3870_v16 = vld [vmem:[#allocation2 + $0x2318] sm:$0xff] }
 0x3a9   : > { %12291 = vmatpush1.bf16.xpose.msk.msra.mxu1 %vm12290_vm7, %v14140_v48  ;;  %vm12296_vm7 = vmpackc.low %vm4614_vm2, %vm4550_vm1  ;;  %vm4774_vm1 = vcmp.eq.s32.totalorder %v3102_v35, %v16150_v1  ;;  %v3773_v35 = vld [vmem:[#allocation2 + $0x2010] sm:$0xff] }
 0x3aa   : > { %12995 = vmatpush1.bf16.xpose.msk.msra.mxu0 %vm12994_vm10, %v14140_v48  ;;  %12293 = vmatprep.subr.msk.bf16.mxu1 %vm12292_vm11, %v14140_v48  ;;  %vm4613_vm10 = vcmp.eq.s32.totalorder %v2941_v22, %v16169_v40  ;;  %vm4581_vm11 = vcmp.eq.s32.totalorder %v2909_v23, %v16173_v6  ;;  %vm13004_vm4 = vmpackc.low %vm4774_vm1, %vm4710_vm0  ;;  %vm4805_vm1 = vcmp.eq.s32.totalorder %v3133_v50, %v16169_v40  ;;  %v3645_v22 = vld [vmem:[#allocation2 + $0x1c10] sm:$0xff]  ;;  %v16299_v50 = vsub.s32 4, %v15894_v27 }
 0x3ab   : > { %12997 = vmatprep.subr.msk.bf16.mxu0 %vm12996_vm12, %v14140_v48  ;;  %vm4645_vm12 = vcmp.eq.s32.totalorder %v2973_v24, %v16173_v6  ;;  %vm12298_vm15 = vmpackc.low %vm4613_vm10, %vm4549_vm9  ;;  %vm4806_vm9 = vcmp.eq.s32.totalorder %v3134_v44, %v16145_v63  ;;  %vm4870_vm10 = vcmp.eq.s32.totalorder %v3198_v46, %v16145_v63  ;;  %v3677_v23 = vld [vmem:[#allocation2 + $0x1d10] sm:$0xff]  ;;  %v3966_v44 = vld [vmem:[#allocation2 + $0x2618] sm:$0xff]  ;;  %v16286_v46 = vsub.s32 6, %v15894_v27 }
 0x3ac   : > { %vm13002_vm2 = vmpackc.low %vm4645_vm12, %vm4581_vm11  ;;  %vm4838_vm12 = vcmp.eq.s32.totalorder %v3166_v47, %v16150_v1  ;;  %v3741_v24 = vld [vmem:[#allocation2 + $0x1f10] sm:$0xff]  ;;  %v16289_v47 = vsub.s32 7, %v15894_v27 }
 0x3b0   : > { %9381 = vmatmul.mubr.bf16.vlgmr.msra.gmra.mrb[0].mxu1 %v2683_v15  ;;  %v3646_v15 = vld [vmem:[#allocation2 + $0x1c18] sm:$0xff] }
 0x3b1   : > { %12295 = vmatpush1.bf16.xpose.msk.msra.mxu1 %vm12294_vm3, %v14140_v48  ;;  %10037 = vmatmul.mubr.bf16.vlgmr.msra.gmra.mrb[0].mxu0 %v2715_v18  ;;  %vm12300_vm3 = vmpackc.low %vm4742_vm14, %vm4678_vm13  ;;  %vm4902_vm13 = vcmp.eq.s32.totalorder %v3230_v49, %v16150_v1  ;;  %v3678_v18 = vld [vmem:[#allocation2 + $0x1d18] sm:$0xff]  ;;  %v16292_v49 = vsub.s32 5, %v15894_v27 }
 0x3b2   : > { %12999 = vmatpush1.bf16.xpose.msk.msra.mxu0 %vm12998_vm6, %v14140_v48  ;;  %12297 = vmatprep.subr.msk.bf16.mxu1 %vm12296_vm7, %v14140_v48  ;;  %vm4741_vm6 = vcmp.eq.s32.totalorder %v3069_v39, %v16169_v40  ;;  %vm4709_vm7 = vcmp.eq.s32.totalorder %v3037_v41, %v16173_v6  ;;  %vm13008_vm0 = vmpackc.low %vm4902_vm13, %vm4838_vm12  ;;  %vm4933_vm13 = vcmp.eq.s32.totalorder %v3261_v58, %v16169_v40  ;;  %v3805_v39 = vld [vmem:[#allocation2 + $0x2110] sm:$0xff] }
 0x3b3   : > { %13001 = vmatprep.subr.msk.bf16.mxu0 %vm13000_vm8, %v14140_v48  ;;  %9421 = vmatprep.mubr.bf16.mxu1 %v2686_v11  ;;  %vm4773_vm8 = vcmp.eq.s32.totalorder %v3101_v42, %v16173_v6  ;;  %vm12302_vm11 = vmpackc.low %vm4741_vm6, %vm4677_vm5  ;;  %vm4934_vm5 = vcmp.eq.s32.totalorder %v3262_v54, %v16145_v63  ;;  %vm4998_vm6 = vcmp.eq.s32.totalorder %v3326_v55, %v16145_v63  ;;  %v3709_v11 = vld [vmem:[#allocation2 + $0x1e10] sm:$0xff]  ;;  %v3902_v42 = vld [vmem:[#allocation2 + $0x2418] sm:$0xff] }
 0x3b4   : > { %10077 = vmatprep.mubr.bf16.mxu0 %v2718_v26  ;;  %vm13006_vm14 = vmpackc.low %vm4773_vm8, %vm4709_vm7  ;;  %vm4966_vm8 = vcmp.eq.s32.totalorder %v3294_v56, %v16150_v1  ;;  %v3774_v26 = vld [vmem:[#allocation2 + $0x2018] sm:$0xff]  ;;  %v3869_v41 = vld [vmem:[#allocation2 + $0x2310] sm:$0xff]  ;;  %v1794_v27 = vrot.slane %v16012_v31, %v16292_v49  ;;  %v1798_v54 = vrot.slane %v16012_v31, %v16286_v46  ;;  %v1802_v55 = vrot.slane %v16012_v31, %v16289_v47 }
 0x3b5   : > { %v1918_v56 = vrot.slane %v16033_v45, %v16299_v50  ;;  %v1926_v58 = vrot.slane %v16033_v45, %v16286_v46 }
 0x3b9   : > { %12299 = vmatpush1.bf16.xpose.msk.msra.mxu1 %vm12298_vm15, %v14140_v48  ;;  %vm12304_vm15 = vmpackc.low %vm4870_vm10, %vm4806_vm9  ;;  %vm5030_vm9 = vcmp.eq.s32.totalorder %v3358_v57, %v16150_v1  ;;  %v1922_v57 = vrot.slane %v16033_v45, %v16292_v49 }
 0x3ba   : > { %13003 = vmatpush1.bf16.xpose.msk.msra.mxu0 %vm13002_vm2, %v14140_v48  ;;  %12301 = vmatprep.subr.msk.bf16.mxu1 %vm12300_vm3, %v14140_v48  ;;  %vm4869_vm2 = vcmp.eq.s32.totalorder %v3197_v51, %v16169_v40  ;;  %vm4837_vm3 = vcmp.eq.s32.totalorder %v3165_v52, %v16173_v6  ;;  %vm13012_vm12 = vmpackc.low %vm5030_vm9, %vm4966_vm8  ;;  %vm5061_vm9 = vcmp.eq.s32.totalorder %v3389_v2, %v16169_v40  ;;  %v3934_v51 = vld [vmem:[#allocation2 + $0x2518] sm:$0xff] }
 0x3bb   : > { %13005 = vmatprep.subr.msk.bf16.mxu0 %vm13004_vm4, %v14140_v48  ;;  %vm4901_vm4 = vcmp.eq.s32.totalorder %v3229_v53, %v16173_v6  ;;  %vm12306_vm7 = vmpackc.low %vm4869_vm2, %vm4805_vm1  ;;  %vm5062_vm1 = vcmp.eq.s32.totalorder %v3390_v62, %v16145_v63  ;;  %vm5126_vm2 = vcmp.eq.s32.totalorder %v3454_v0, %v16145_v63  ;;  %v3998_v52 = vld [vmem:[#allocation2 + $0x2718] sm:$0xff]  ;;  %v1790_v53 = vrot.slane %v16012_v31, %v16299_v50  ;;  %v3901_v31 = vld [vmem:[#allocation2 + $0x2410] sm:$0xff] }
 0x3bc   : > { %vm13010_vm10 = vmpackc.low %vm4901_vm4, %vm4837_vm3  ;;  %vm5094_vm4 = vcmp.eq.s32.totalorder %v3422_v37, %v16150_v1  ;;  %v3933_v62 = vld [vmem:[#allocation2 + $0x2510] sm:$0xff]  ;;  %v2180_v37 = vcombine.low %v1918_v56, %v1922_v57  ;;  %v4030_v2 = vld [vmem:[#allocation2 + $0x2818] sm:$0xff] }
 0x3bd   : > { %v3997_v0 = vld [vmem:[#allocation2 + $0x2710] sm:$0xff]  ;;  %v2976_v56 = vld [vmem:[#allocation2 + $0x728] sm:$0xff] }
 0x3c1   : > { %12303 = vmatpush1.bf16.xpose.msk.msra.mxu1 %vm12302_vm11, %v14140_v48  ;;  %vm12308_vm11 = vmpackc.low %vm4998_vm6, %vm4934_vm5  ;;  %vm5158_vm5 = vcmp.eq.s32.totalorder %v3486_v38, %v16150_v1 }
 0x3c2   : > { %13007 = vmatpush1.bf16.xpose.msk.msra.mxu0 %vm13006_vm14, %v14140_v48  ;;  %12305 = vmatprep.subr.msk.bf16.mxu1 %vm12304_vm15, %v14140_v48  ;;  %vm4997_vm14 = vcmp.eq.s32.totalorder %v3325_v59, %v16169_v40  ;;  %vm4965_vm15 = vcmp.eq.s32.totalorder %v3293_v60, %v16173_v6  ;;  %vm13016_vm8 = vmpackc.low %vm5158_vm5, %vm5094_vm4  ;;  %vm5189_vm5 = vcmp.eq.s32.totalorder %v3517_v12, %v16169_v40  ;;  %v3232_v12 = vld [vmem:[#allocation2 + $0xf28] sm:$0xff] }
 0x3c3   : > { %13009 = vmatprep.subr.msk.bf16.mxu0 %vm13008_vm0, %v14140_v48  ;;  %vm5029_vm0 = vcmp.eq.s32.totalorder %v3357_v61, %v16173_v6  ;;  %vm12310_vm3 = vmpackc.low %vm4997_vm14, %vm4933_vm13  ;;  %vm5190_vm13 = vcmp.eq.s32.totalorder %v3518_v4, %v16145_v63  ;;  %vm5254_vm14 = vcmp.eq.s32.totalorder %v3582_v8, %v16145_v63  ;;  %v1930_v59 = vrot.slane %v16033_v45, %v16289_v47  ;;  %v3965_v45 = vld [vmem:[#allocation2 + $0x2610] sm:$0xff] }
 0x3c4   : > { %vm13014_vm6 = vmpackc.low %vm5029_vm0, %vm4965_vm15  ;;  %vm5222_vm0 = vcmp.eq.s32.totalorder %v3550_v9, %v16150_v1  ;;  %v2044_v60 = vcombine.low %v1790_v53, %v1794_v27  ;;  %v2045_v61 = vcombine.low %v1798_v54, %v1802_v55  ;;  %v2188_v9 = vrot.slane %v2180_v37, %v16005_v25  ;;  %v2880_v27 = vld [vmem:[#allocation2 + $0x428] sm:$0xff] }
 0x3c5   : > { %v2181_v38 = vcombine.low %v1926_v58, %v1930_v59  ;;  %v2944_v54 = vld [vmem:[#allocation2 + $0x628] sm:$0xff]  ;;  %v2685_v58 = vpack.c.bf16 %v16176_v7, %v16176_v7 }
 0x3c6   : > { %v2052_v4 = vrot.slane %v2044_v60, %v16005_v25  ;;  %v2059_v8 = vrot.slane %v2045_v61, %v16005_v25  ;;  %v2912_v55 = vld [vmem:[#allocation2 + $0x528] sm:$0xff]  ;;  %v2943_v60 = vld [vmem:[#allocation2 + $0x620] sm:$0xff] }
 0x3c7   : > { %v2911_v61 = vld [vmem:[#allocation2 + $0x520] sm:$0xff]  ;;  %v3008_v37 = vld [vmem:[#allocation2 + $0x828] sm:$0xff] }
 0x3c9   : > { %12307 = vmatpush1.bf16.xpose.msk.msra.mxu1 %vm12306_vm7, %v14140_v48  ;;  %vm12312_vm7 = vmpackc.low %vm5126_vm2, %vm5062_vm1  ;;  %vm5286_vm1 = vcmp.eq.s32.totalorder %v3614_v28, %v16150_v1  ;;  %v2195_v28 = vrot.slane %v2181_v38, %v16005_v25  ;;  %v3072_v38 = vld [vmem:[#allocation2 + $0xa28] sm:$0xff] }
 0x3ca   : > { %13011 = vmatpush1.bf16.xpose.msk.msra.mxu0 %vm13010_vm10, %v14140_v48  ;;  %12309 = vmatprep.subr.msk.bf16.mxu1 %vm12308_vm11, %v14140_v48  ;;  %vm5125_vm10 = vcmp.eq.s32.totalorder %v3453_v3, %v16169_v40  ;;  %vm5093_vm11 = vcmp.eq.s32.totalorder %v3421_v5, %v16173_v6  ;;  %vm13020_vm4 = vmpackc.low %vm5286_vm1, %vm5222_vm0  ;;  %vm5317_vm1 = vcmp.eq.s32.totalorder %v3645_v22, %v16169_v40  ;;  %v4094_v3 = vld [vmem:[#allocation2 + $0x2a18] sm:$0xff]  ;;  %v1740_v22 = vld [vmem:[%s14398_s6 + $0x8] sm:$0xff] }
 0x3cb   : > { %13013 = vmatprep.subr.msk.bf16.mxu0 %vm13012_vm12, %v14140_v48  ;;  %vm5157_vm12 = vcmp.eq.s32.totalorder %v3485_v43, %v16173_v6  ;;  %vm12314_vm15 = vmpackc.low %vm5125_vm10, %vm5061_vm9  ;;  %vm5318_vm9 = vcmp.eq.s32.totalorder %v3646_v15, %v16145_v63  ;;  %vm5382_vm10 = vcmp.eq.s32.totalorder %v3710_v17, %v16145_v63  ;;  %v4062_v5 = vld [vmem:[#allocation2 + $0x2918] sm:$0xff]  ;;  %v2060_v15 = vcombine.low %v2052_v4, %v2059_v8  ;;  %v3103_v4 = vld [vmem:[#allocation2 + $0xb20] sm:$0xff] }
 0x3cc   : > { %vm13018_vm2 = vmpackc.low %vm5157_vm12, %vm5093_vm11  ;;  %vm5350_vm12 = vcmp.eq.s32.totalorder %v3678_v18, %v16150_v1  ;;  %v4126_v43 = vld [vmem:[#allocation2 + $0x2b18] sm:$0xff]  ;;  %v4125_v18 = vld [vmem:[#allocation2 + $0x2b10] sm:$0xff] }
 0x3cd   : > { %v3136_v8 = vld [vmem:[#allocation2 + $0xc28] sm:$0xff] }
 0x3ce   : > { %v3328_v17 = vld [vmem:[#allocation2 + $0x1228] sm:$0xff] }
 0x3d1   : > { %12311 = vmatpush1.bf16.xpose.msk.msra.mxu1 %vm12310_vm3, %v14140_v48  ;;  %vm12316_vm3 = vmpackc.low %vm5254_vm14, %vm5190_vm13  ;;  %vm5414_vm13 = vcmp.eq.s32.totalorder %v3742_v19, %v16150_v1 }
 0x3d2   : > { %13015 = vmatpush1.bf16.xpose.msk.msra.mxu0 %vm13014_vm6, %v14140_v48  ;;  %12313 = vmatprep.subr.msk.bf16.mxu1 %vm12312_vm7, %v14140_v48  ;;  %vm5253_vm6 = vcmp.eq.s32.totalorder %v3581_v29, %v16169_v40  ;;  %vm5221_vm7 = vcmp.eq.s32.totalorder %v3549_v13, %v16173_v6  ;;  %vm13024_vm0 = vmpackc.low %vm5414_vm13, %vm5350_vm12  ;;  %vm5445_vm13 = vcmp.eq.s32.totalorder %v3773_v35, %v16169_v40  ;;  %v4029_v29 = vld [vmem:[#allocation2 + $0x2810] sm:$0xff]  ;;  %v2848_v35 = vld [vmem:[#allocation2 + $0x328] sm:$0xff] }
 0x3d3   : > { %13017 = vmatprep.subr.msk.bf16.mxu0 %vm13016_vm8, %v14140_v48  ;;  %vm5285_vm8 = vcmp.eq.s32.totalorder %v3613_v14, %v16173_v6  ;;  %vm12318_vm11 = vmpackc.low %vm5253_vm6, %vm5189_vm5  ;;  %vm5446_vm5 = vcmp.eq.s32.totalorder %v3774_v26, %v16145_v63  ;;  %vm5510_vm6 = vcmp.eq.s32.totalorder %v3838_v32, %v16145_v63  ;;  %v4061_v14 = vld [vmem:[#allocation2 + $0x2910] sm:$0xff]  ;;  %v16375_v26 = vld [vmem:[%s14414_s1 + $0x20] sm:$0xff] }
 0x3d4   : > { %vm13022_vm14 = vmpackc.low %vm5285_vm8, %vm5221_vm7  ;;  %vm5478_vm8 = vcmp.eq.s32.totalorder %v3806_v34, %v16150_v1  ;;  %v16379_v32 = vrot.slane %v16375_v26, %v16292_v49  ;;  %v1748_v34 = vld [vmem:[%s14398_s6 + $0x48] sm:$0xff]  ;;  %v3199_v13 = vld [vmem:[#allocation2 + $0xe20] sm:$0xff] }
 0x3d9   : > { %12315 = vmatpush1.bf16.xpose.msk.msra.mxu1 %vm12314_vm15, %v14140_v48  ;;  %vm12320_vm15 = vmpackc.low %vm5382_vm10, %vm5318_vm9  ;;  %vm5542_vm9 = vcmp.eq.s32.totalorder %v3870_v16, %v16150_v1  ;;  %v2784_v16 = vld [vmem:[#allocation2 + $0x128] sm:$0xff] }
 0x3da   : > { %13019 = vmatpush1.bf16.xpose.msk.msra.mxu0 %vm13018_vm2, %v14140_v48  ;;  %12317 = vmatprep.subr.msk.bf16.mxu1 %vm12316_vm3, %v14140_v48  ;;  %vm5381_vm2 = vcmp.eq.s32.totalorder %v3709_v11, %v16169_v40  ;;  %vm5349_vm3 = vcmp.eq.s32.totalorder %v3677_v23, %v16173_v6  ;;  %vm13028_vm12 = vmpackc.low %vm5542_vm9, %vm5478_vm8  ;;  %vm5573_vm9 = vcmp.eq.s32.totalorder %v3901_v31, %v16169_v40  ;;  %v2752_v23 = vld [vmem:[#allocation2 + $0x28] sm:$0xff] }
 0x3db   : > { %13021 = vmatprep.subr.msk.bf16.mxu0 %vm13020_vm4, %v14140_v48  ;;  %vm5413_vm4 = vcmp.eq.s32.totalorder %v3741_v24, %v16173_v6  ;;  %vm12322_vm7 = vmpackc.low %vm5381_vm2, %vm5317_vm1  ;;  %vm5574_vm1 = vcmp.eq.s32.totalorder %v3902_v42, %v16145_v63  ;;  %vm5638_vm2 = vcmp.eq.s32.totalorder %v3966_v44, %v16145_v63  ;;  %v2196_v11 = vcombine.low %v2188_v9, %v2195_v28  ;;  %v2816_v24 = vld [vmem:[#allocation2 + $0x228] sm:$0xff] }
 0x3dc   : > { %vm13026_vm10 = vmpackc.low %vm5413_vm4, %vm5349_vm3  ;;  %vm5606_vm4 = vcmp.eq.s32.totalorder %v3934_v51, %v16150_v1  ;;  %v16409_v42 = vrot.slane %v16375_v26, %v16299_v50  ;;  %v2783_v51 = vld [vmem:[#allocation2 + $0x120] sm:$0xff]  ;;  %v2717_v31 = vpack.c.bf16 %v16179_v10, %v16179_v10  ;;  %v3040_v10 = vld [vmem:[#allocation2 + $0x928] sm:$0xff] }
 0x3dd   : > { %v3200_v9 = vld [vmem:[#allocation2 + $0xe28] sm:$0xff] }
 0x3de   : > { %v3168_v28 = vld [vmem:[#allocation2 + $0xd28] sm:$0xff] }
 0x3e1   : > { %12319 = vmatpush1.bf16.xpose.msk.msra.mxu1 %vm12318_vm11, %v14140_v48  ;;  %vm12324_vm11 = vmpackc.low %vm5510_vm6, %vm5446_vm5  ;;  %vm5670_vm5 = vcmp.eq.s32.totalorder %v3998_v52, %v16150_v1  ;;  %v2847_v52 = vld [vmem:[#allocation2 + $0x320] sm:$0xff] }
 0x3e2   : > { %13023 = vmatpush1.bf16.xpose.msk.msra.mxu0 %vm13022_vm14, %v14140_v48  ;;  %12321 = vmatprep.subr.msk.bf16.mxu1 %vm12320_vm15, %v14140_v48  ;;  %vm5509_vm14 = vcmp.eq.s32.totalorder %v3837_v36, %v16169_v40  ;;  %vm5477_vm15 = vcmp.eq.s32.totalorder %v3805_v39, %v16173_v6  ;;  %vm13032_vm8 = vmpackc.low %vm5670_vm5, %vm5606_vm4  ;;  %vm5701_vm5 = vcmp.eq.s32.totalorder %v4029_v29, %v16169_v40  ;;  %v3135_v29 = vld [vmem:[#allocation2 + $0xc20] sm:$0xff] }
 0x3e3   : > { %13025 = vmatprep.subr.msk.bf16.mxu0 %vm13024_vm0, %v14140_v48  ;;  %vm5541_vm0 = vcmp.eq.s32.totalorder %v3869_v41, %v16173_v6  ;;  %vm12326_vm3 = vmpackc.low %vm5509_vm14, %vm5445_vm13  ;;  %vm5702_vm13 = vcmp.eq.s32.totalorder %v4030_v2, %v16145_v63  ;;  %vm5766_vm14 = vcmp.eq.s32.totalorder %v4094_v3, %v16145_v63  ;;  %v4093_v63 = vld [vmem:[#allocation2 + $0x2a10] sm:$0xff]  ;;  %v16395_v36 = vmul.f32 %v2060_v15, %v1740_v22  ;;  %v2815_v41 = vld [vmem:[#allocation2 + $0x220] sm:$0xff] }
 0x3e4   : > { %vm13030_vm6 = vmpackc.low %vm5541_vm0, %vm5477_vm15  ;;  %vm5734_vm0 = vcmp.eq.s32.totalorder %v4062_v5, %v16150_v1  ;;  %v16399_v39 = vmul.f32 %v2196_v11, %v1748_v34  ;;  %v3104_v2 = vld [vmem:[#allocation2 + $0xb28] sm:$0xff]  ;;  %v3007_v3 = vld [vmem:[#allocation2 + $0x820] sm:$0xff] }
 0x3e5   : > { %v16413_v44 = vrot.slane %v16395_v36, %v16005_v25  ;;  %v3071_v5 = vld [vmem:[#allocation2 + $0xa20] sm:$0xff]  ;;  %v3264_v15 = vld [vmem:[#allocation2 + $0x1028] sm:$0xff] }
 0x3e6   : > { %v16417_v53 = vrot.slane %v16399_v39, %v16005_v25  ;;  %v3360_v22 = vld [vmem:[#allocation2 + $0x1328] sm:$0xff]  ;;  %v3263_v11 = vld [vmem:[#allocation2 + $0x1020] sm:$0xff] }
 0x3e7   : > { %v2379_v57 = vcombine.high %v16413_v44, %v16413_v44  ;;  %v3359_v34 = vld [vmem:[#allocation2 + $0x1320] sm:$0xff] }
 0x3e8   : > { %v2515_v59 = vcombine.high %v16417_v53, %v16417_v53 }
 0x3e9   : > { %12323 = vmatpush1.bf16.xpose.msk.msra.mxu1 %vm12322_vm7, %v14140_v48  ;;  %vm12328_vm7 = vmpackc.low %vm5638_vm2, %vm5574_vm1  ;;  %vm5798_vm1 = vcmp.eq.s32.totalorder %v4126_v43, %v16150_v1  ;;  %v16366_v1 = vld [vmem:[%s14414_s1] sm:$0xff]  ;;  %v2688_v7 = vpack.c.bf16 %v2379_v57, %v2379_v57  ;;  %v3552_v57 = vld [vmem:[#allocation2 + $0x1928] sm:$0xff] }
 0x3ea   : > { %13027 = vmatpush1.bf16.xpose.msk.msra.mxu0 %vm13026_vm10, %v14140_v48  ;;  %12325 = vmatprep.subr.msk.bf16.mxu1 %vm12324_vm11, %v14140_v48  ;;  %vm5637_vm10 = vcmp.eq.s32.totalorder %v3965_v45, %v16169_v40  ;;  %vm5605_vm11 = vcmp.eq.s32.totalorder %v3933_v62, %v16173_v6  ;;  %vm16361_vm4 = vmpackc.low %vm5798_vm1, %vm5734_vm0  ;;  %v16370_v19 = vrot.slane %v16366_v1, %v16292_v49  ;;  %v2879_v45 = vld [vmem:[#allocation2 + $0x420] sm:$0xff] }
 0x3eb   : > { %13029 = vmatprep.subr.msk.bf16.mxu0 %vm13028_vm12, %v14140_v48  ;;  %vm5669_vm12 = vcmp.eq.s32.totalorder %v3997_v0, %v16173_v6  ;;  %vm12330_vm15 = vmpackc.low %vm5637_vm10, %vm5573_vm9  ;;  %v2975_v62 = vld [vmem:[#allocation2 + $0x720] sm:$0xff]  ;;  %v2720_v0 = vpack.c.bf16 %v2515_v59, %v2515_v59 }
 0x3ec   : > { %vm16353_vm2 = vmpackc.low %vm5669_vm12, %vm5605_vm11  ;;  %vm4424_vm9 = vcmp.eq.s32.totalorder %v2752_v23, %v16370_v19  ;;  %vm4488_vm10 = vcmp.eq.s32.totalorder %v2816_v24, %v16370_v19  ;;  %vm4456_vm12 = vcmp.eq.s32.totalorder %v2784_v16, %v16379_v32  ;;  %v3039_v43 = vld [vmem:[#allocation2 + $0x920] sm:$0xff]  ;;  %v3392_v16 = vld [vmem:[#allocation2 + $0x1428] sm:$0xff] }
 0x3ed   : > { %v3327_v23 = vld [vmem:[#allocation2 + $0x1220] sm:$0xff] }
 0x3ee   : > { %v3295_v24 = vld [vmem:[#allocation2 + $0x1120] sm:$0xff] }
 0x3ef   : > { %v3519_v59 = vld [vmem:[#allocation2 + $0x1820] sm:$0xff] }
 0x3f1   : > { %12327 = vmatpush1.bf16.xpose.msk.msra.mxu1 %vm12326_vm3, %v14140_v48  ;;  %vm16357_vm3 = vmpackc.low %vm5766_vm14, %vm5702_vm13  ;;  %vm4520_vm13 = vcmp.eq.s32.totalorder %v2848_v35, %v16379_v32  ;;  %v3456_v35 = vld [vmem:[#allocation2 + $0x1628] sm:$0xff] }
 0x3f2   : > { %13031 = vmatpush1.bf16.xpose.msk.msra.mxu0 %vm13030_vm6, %v14140_v48  ;;  %12329 = vmatprep.subr.msk.bf16.mxu1 %vm12328_vm7, %v14140_v48  ;;  %vm5765_vm6 = vcmp.eq.s32.totalorder %v4093_v63, %v16169_v40  ;;  %vm5733_vm7 = vcmp.eq.s32.totalorder %v4061_v14, %v16173_v6  ;;  %v16405_v40 = vrot.slane %v16366_v1, %v16299_v50  ;;  %vm13040_vm0 = vmpackc.low %vm4520_vm13, %vm4456_vm12  ;;  %v3167_v63 = vld [vmem:[#allocation2 + $0xd20] sm:$0xff] }
 0x3f3   : > { %13033 = vmatprep.subr.msk.bf16.mxu0 %vm13032_vm8, %v14140_v48  ;;  %vm5797_vm8 = vcmp.eq.s32.totalorder %v4125_v18, %v16173_v6  ;;  %vm12334_vm11 = vmpackc.low %vm5765_vm6, %vm5701_vm5  ;;  %v2751_v6 = vld [vmem:[#allocation2 + $0x20] sm:$0xff]  ;;  %vm4552_vm5 = vcmp.eq.s32.totalorder %v2880_v27, %v16370_v19  ;;  %vm4616_vm6 = vcmp.eq.s32.totalorder %v2944_v54, %v16370_v19  ;;  %v3296_v18 = vld [vmem:[#allocation2 + $0x1128] sm:$0xff] }
 0x3f4   : > { %vm13038_vm14 = vmpackc.low %vm5797_vm8, %vm5733_vm7  ;;  %vm4423_vm1 = vcmp.eq.s32.totalorder %v2751_v6, %v16405_v40  ;;  %vm4584_vm8 = vcmp.eq.s32.totalorder %v2912_v55, %v16379_v32  ;;  %vm4551_vm13 = vcmp.eq.s32.totalorder %v2879_v45, %v16405_v40  ;;  %v3231_v14 = vld [vmem:[#allocation2 + $0xf20] sm:$0xff]  ;;  %v3424_v6 = vld [vmem:[#allocation2 + $0x1528] sm:$0xff] }
 0x3f5   : > { %v3423_v27 = vld [vmem:[#allocation2 + $0x1520] sm:$0xff]  ;;  %v3520_v55 = vld [vmem:[#allocation2 + $0x1828] sm:$0xff] }
 0x3f6   : > { %v3487_v54 = vld [vmem:[#allocation2 + $0x1720] sm:$0xff] }
 0x3f7   : > { %v3551_v45 = vld [vmem:[#allocation2 + $0x1920] sm:$0xff] }
 0x3f9   : > { %12331 = vmatpush1.bf16.xpose.msk.msra.mxu1 %vm12330_vm15, %v14140_v48  ;;  %vm12336_vm15 = vmpackc.low %vm4488_vm10, %vm4424_vm9  ;;  %vm4648_vm9 = vcmp.eq.s32.totalorder %v2976_v56, %v16379_v32  ;;  %v3584_v56 = vld [vmem:[#allocation2 + $0x1a28] sm:$0xff] }
 0x3fa   : > { %13035 = vmatpush1.bf16.xpose.msk.msra.mxu0 %vm16353_vm2, %v14140_v48  ;;  %12333 = vmatprep.subr.msk.bf16.mxu1 %vm16357_vm3, %v14140_v48  ;;  %vm4487_vm2 = vcmp.eq.s32.totalorder %v2815_v41, %v16405_v40  ;;  %vm4455_vm3 = vcmp.eq.s32.totalorder %v2783_v51, %v16409_v42  ;;  %vm13044_vm12 = vmpackc.low %vm4648_vm9, %vm4584_vm8  ;;  %vm4679_vm9 = vcmp.eq.s32.totalorder %v3007_v3, %v16405_v40  ;;  %v3488_v41 = vld [vmem:[#allocation2 + $0x1728] sm:$0xff]  ;;  %v3391_v51 = vld [vmem:[#allocation2 + $0x1420] sm:$0xff] }
 0x3fb   : > { %13037 = vmatprep.subr.msk.bf16.mxu0 %vm16361_vm4, %v14140_v48  ;;  %vm4519_vm4 = vcmp.eq.s32.totalorder %v2847_v52, %v16409_v42  ;;  %vm12338_vm7 = vmpackc.low %vm4487_vm2, %vm4423_vm1  ;;  %vm4680_vm1 = vcmp.eq.s32.totalorder %v3008_v37, %v16370_v19  ;;  %vm4744_vm2 = vcmp.eq.s32.totalorder %v3072_v38, %v16370_v19  ;;  %v3455_v52 = vld [vmem:[#allocation2 + $0x1620] sm:$0xff]  ;;  %v3776_v3 = vld [vmem:[#allocation2 + $0x2028] sm:$0xff] }
 0x3fc   : > { %vm13042_vm10 = vmpackc.low %vm4519_vm4, %vm4455_vm3  ;;  %vm4712_vm4 = vcmp.eq.s32.totalorder %v3040_v10, %v16379_v32  ;;  %v3647_v37 = vld [vmem:[#allocation2 + $0x1c20] sm:$0xff] }
 0x3fd   : > { %v3711_v38 = vld [vmem:[#allocation2 + $0x1e20] sm:$0xff] }
 0x3fe   : > { %v3679_v10 = vld [vmem:[#allocation2 + $0x1d20] sm:$0xff] }
 0x401   : > { %12335 = vmatpush1.bf16.xpose.msk.msra.mxu1 %vm12334_vm11, %v14140_v48  ;;  %vm12340_vm11 = vmpackc.low %vm4616_vm6, %vm4552_vm5  ;;  %vm4776_vm5 = vcmp.eq.s32.totalorder %v3104_v2, %v16379_v32  ;;  %v3743_v2 = vld [vmem:[#allocation2 + $0x1f20] sm:$0xff] }
 0x402   : > { %13039 = vmatpush1.bf16.xpose.msk.msra.mxu0 %vm13038_vm14, %v14140_v48  ;;  %12337 = vmatprep.subr.msk.bf16.mxu1 %vm12336_vm15, %v14140_v48  ;;  %vm4615_vm14 = vcmp.eq.s32.totalorder %v2943_v60, %v16405_v40  ;;  %vm4583_vm15 = vcmp.eq.s32.totalorder %v2911_v61, %v16409_v42  ;;  %vm13048_vm8 = vmpackc.low %vm4776_vm5, %vm4712_vm4  ;;  %vm4807_vm5 = vcmp.eq.s32.totalorder %v3135_v29, %v16405_v40  ;;  %v3615_v60 = vld [vmem:[#allocation2 + $0x1b20] sm:$0xff]  ;;  %v3712_v61 = vld [vmem:[#allocation2 + $0x1e28] sm:$0xff] }
 0x403   : > { %13041 = vmatprep.subr.msk.bf16.mxu0 %vm13040_vm0, %v14140_v48  ;;  %vm4647_vm0 = vcmp.eq.s32.totalorder %v2975_v62, %v16409_v42  ;;  %vm12342_vm3 = vmpackc.low %vm4615_vm14, %vm4551_vm13  ;;  %vm4808_vm13 = vcmp.eq.s32.totalorder %v3136_v8, %v16370_v19  ;;  %vm4872_vm14 = vcmp.eq.s32.totalorder %v3200_v9, %v16370_v19  ;;  %v3680_v62 = vld [vmem:[#allocation2 + $0x1d28] sm:$0xff]  ;;  %v3775_v8 = vld [vmem:[#allocation2 + $0x2020] sm:$0xff] }
 0x404   : > { %vm13046_vm6 = vmpackc.low %vm4647_vm0, %vm4583_vm15  ;;  %vm4840_vm0 = vcmp.eq.s32.totalorder %v3168_v28, %v16379_v32  ;;  %v3839_v9 = vld [vmem:[#allocation2 + $0x2220] sm:$0xff]  ;;  %v3904_v29 = vld [vmem:[#allocation2 + $0x2428] sm:$0xff] }
 0x405   : > { %v3807_v28 = vld [vmem:[#allocation2 + $0x2120] sm:$0xff] }
 0x408   : > { %9422 = vmatmul.mubr.bf16.vlgmr.msra.gmra.mrb[0].mxu1 %v2685_v58  ;;  %v3616_v58 = vld [vmem:[#allocation2 + $0x1b28] sm:$0xff] }
 0x409   : > { %12339 = vmatpush1.bf16.xpose.msk.msra.mxu1 %vm12338_vm7, %v14140_v48  ;;  %10078 = vmatmul.mubr.bf16.vlgmr.msra.gmra.mrb[0].mxu0 %v2717_v31  ;;  %vm12344_vm7 = vmpackc.low %vm4744_vm2, %vm4680_vm1  ;;  %vm4904_vm1 = vcmp.eq.s32.totalorder %v3232_v12, %v16379_v32  ;;  %v3583_v31 = vld [vmem:[#allocation2 + $0x1a20] sm:$0xff] }
 0x40a   : > { %13043 = vmatpush1.bf16.xpose.msk.msra.mxu0 %vm13042_vm10, %v14140_v48  ;;  %12341 = vmatprep.subr.msk.bf16.mxu1 %vm12340_vm11, %v14140_v48  ;;  %vm4743_vm10 = vcmp.eq.s32.totalorder %v3071_v5, %v16405_v40  ;;  %vm4711_vm11 = vcmp.eq.s32.totalorder %v3039_v43, %v16409_v42  ;;  %vm13052_vm4 = vmpackc.low %vm4904_vm1, %vm4840_vm0  ;;  %vm4935_vm1 = vcmp.eq.s32.totalorder %v3263_v11, %v16405_v40  ;;  %v3840_v5 = vld [vmem:[#allocation2 + $0x2228] sm:$0xff]  ;;  %v3871_v12 = vld [vmem:[#allocation2 + $0x2320] sm:$0xff] }
 0x40b   : > { %13045 = vmatprep.subr.msk.bf16.mxu0 %vm13044_vm12, %v14140_v48  ;;  %9462 = vmatprep.mubr.bf16.mxu1 %v2688_v7  ;;  %vm4775_vm12 = vcmp.eq.s32.totalorder %v3103_v4, %v16409_v42  ;;  %vm12346_vm15 = vmpackc.low %vm4743_vm10, %vm4679_vm9  ;;  %vm4936_vm9 = vcmp.eq.s32.totalorder %v3264_v15, %v16370_v19  ;;  %vm5000_vm10 = vcmp.eq.s32.totalorder %v3328_v17, %v16370_v19  ;;  %v3648_v7 = vld [vmem:[#allocation2 + $0x1c28] sm:$0xff]  ;;  %v3903_v15 = vld [vmem:[#allocation2 + $0x2420] sm:$0xff] }
 0x40c   : > { %10118 = vmatprep.mubr.bf16.mxu0 %v2720_v0  ;;  %vm13050_vm2 = vmpackc.low %vm4775_vm12, %vm4711_vm11  ;;  %vm4968_vm12 = vcmp.eq.s32.totalorder %v3296_v18, %v16379_v32  ;;  %v3744_v0 = vld [vmem:[#allocation2 + $0x1f28] sm:$0xff]  ;;  %v3967_v17 = vld [vmem:[#allocation2 + $0x2620] sm:$0xff] }
 0x40d   : > { %v3808_v43 = vld [vmem:[#allocation2 + $0x2128] sm:$0xff]  ;;  %v3935_v18 = vld [vmem:[#allocation2 + $0x2520] sm:$0xff] }
 0x40e   : > { %v3872_v4 = vld [vmem:[#allocation2 + $0x2328] sm:$0xff] }
 0x40f   : > { %v4032_v11 = vld [vmem:[#allocation2 + $0x2828] sm:$0xff] }
 0x411   : > { %12343 = vmatpush1.bf16.xpose.msk.msra.mxu1 %vm12342_vm3, %v14140_v48  ;;  %vm12348_vm3 = vmpackc.low %vm4872_vm14, %vm4808_vm13  ;;  %vm5032_vm13 = vcmp.eq.s32.totalorder %v3360_v22, %v16379_v32  ;;  %v3999_v22 = vld [vmem:[#allocation2 + $0x2720] sm:$0xff] }
 0x412   : > { %13047 = vmatpush1.bf16.xpose.msk.msra.mxu0 %vm13046_vm6, %v14140_v48  ;;  %12345 = vmatprep.subr.msk.bf16.mxu1 %vm12344_vm7, %v14140_v48  ;;  %vm4871_vm6 = vcmp.eq.s32.totalorder %v3199_v13, %v16405_v40  ;;  %vm4839_vm7 = vcmp.eq.s32.totalorder %v3167_v63, %v16409_v42  ;;  %vm13056_vm0 = vmpackc.low %vm5032_vm13, %vm4968_vm12  ;;  %vm5063_vm13 = vcmp.eq.s32.totalorder %v3391_v51, %v16405_v40  ;;  %v3968_v13 = vld [vmem:[#allocation2 + $0x2628] sm:$0xff] }
 0x413   : > { %13049 = vmatprep.subr.msk.bf16.mxu0 %vm13048_vm8, %v14140_v48  ;;  %vm4903_vm8 = vcmp.eq.s32.totalorder %v3231_v14, %v16409_v42  ;;  %vm12350_vm11 = vmpackc.low %vm4871_vm6, %vm4807_vm5  ;;  %vm5064_vm5 = vcmp.eq.s32.totalorder %v3392_v16, %v16370_v19  ;;  %vm5128_vm6 = vcmp.eq.s32.totalorder %v3456_v35, %v16370_v19  ;;  %v3936_v63 = vld [vmem:[#allocation2 + $0x2528] sm:$0xff]  ;;  %v4031_v16 = vld [vmem:[#allocation2 + $0x2820] sm:$0xff]  ;;  %v16549_v51 = vrot.slane %v16366_v1, %v16289_v47 }
 0x414   : > { %vm13054_vm14 = vmpackc.low %vm4903_vm8, %vm4839_vm7  ;;  %vm5096_vm8 = vcmp.eq.s32.totalorder %v3424_v6, %v16379_v32  ;;  %v4000_v14 = vld [vmem:[#allocation2 + $0x2728] sm:$0xff]  ;;  %v4095_v35 = vld [vmem:[#allocation2 + $0x2a20] sm:$0xff] }
 0x415   : > { %v4063_v6 = vld [vmem:[#allocation2 + $0x2920] sm:$0xff] }
 0x419   : > { %12347 = vmatpush1.bf16.xpose.msk.msra.mxu1 %vm12346_vm15, %v14140_v48  ;;  %vm12352_vm15 = vmpackc.low %vm5000_vm10, %vm4936_vm9  ;;  %vm5160_vm9 = vcmp.eq.s32.totalorder %v3488_v41, %v16379_v32  ;;  %v4127_v41 = vld [vmem:[#allocation2 + $0x2b20] sm:$0xff] }
 0x41a   : > { %13051 = vmatpush1.bf16.xpose.msk.msra.mxu0 %vm13050_vm2, %v14140_v48  ;;  %12349 = vmatprep.subr.msk.bf16.mxu1 %vm12348_vm3, %v14140_v48  ;;  %vm4999_vm2 = vcmp.eq.s32.totalorder %v3327_v23, %v16405_v40  ;;  %vm4967_vm3 = vcmp.eq.s32.totalorder %v3295_v24, %v16409_v42  ;;  %vm13060_vm12 = vmpackc.low %vm5160_vm9, %vm5096_vm8  ;;  %vm5191_vm9 = vcmp.eq.s32.totalorder %v3519_v59, %v16405_v40  ;;  %v4096_v23 = vld [vmem:[#allocation2 + $0x2a28] sm:$0xff]  ;;  %v2849_v59 = vld [vmem:[#allocation2 + $0x330] sm:$0xff] }
 0x41b   : > { %13053 = vmatprep.subr.msk.bf16.mxu0 %vm13052_vm4, %v14140_v48  ;;  %vm5031_vm4 = vcmp.eq.s32.totalorder %v3359_v34, %v16409_v42  ;;  %vm12354_vm7 = vmpackc.low %vm4999_vm2, %vm4935_vm1  ;;  %vm5192_vm1 = vcmp.eq.s32.totalorder %v3520_v55, %v16370_v19  ;;  %vm5256_vm2 = vcmp.eq.s32.totalorder %v3584_v56, %v16370_v19  ;;  %v4064_v24 = vld [vmem:[#allocation2 + $0x2928] sm:$0xff]  ;;  %v2364_v55 = vcombine.high %v16395_v36, %v16395_v36  ;;  %v2817_v36 = vld [vmem:[#allocation2 + $0x230] sm:$0xff] }
 0x41c   : > { %vm13058_vm10 = vmpackc.low %vm5031_vm4, %vm4967_vm3  ;;  %vm5224_vm4 = vcmp.eq.s32.totalorder %v3552_v57, %v16379_v32  ;;  %v4128_v34 = vld [vmem:[#allocation2 + $0x2b28] sm:$0xff]  ;;  %v2500_v56 = vcombine.high %v16399_v39, %v16399_v39  ;;  %v16577_v57 = vrot.slane %v16375_v26, %v16286_v46  ;;  %v2785_v39 = vld [vmem:[#allocation2 + $0x130] sm:$0xff] }
 0x421   : > { %12351 = vmatpush1.bf16.xpose.msk.msra.mxu1 %vm12350_vm11, %v14140_v48  ;;  %vm12356_vm11 = vmpackc.low %vm5128_vm6, %vm5064_vm5  ;;  %vm5288_vm5 = vcmp.eq.s32.totalorder %v3616_v58, %v16379_v32  ;;  %v16580_v58 = vrot.slane %v2364_v55, %v16005_v25  ;;  %v3393_v55 = vld [vmem:[#allocation2 + $0x1430] sm:$0xff] }
 0x422   : > { %13055 = vmatpush1.bf16.xpose.msk.msra.mxu0 %vm13054_vm14, %v14140_v48  ;;  %12353 = vmatprep.subr.msk.bf16.mxu1 %vm12352_vm15, %v14140_v48  ;;  %vm5127_vm14 = vcmp.eq.s32.totalorder %v3455_v52, %v16405_v40  ;;  %vm5095_vm15 = vcmp.eq.s32.totalorder %v3423_v27, %v16409_v42  ;;  %vm13064_vm8 = vmpackc.low %vm5288_vm5, %vm5224_vm4  ;;  %vm5319_vm5 = vcmp.eq.s32.totalorder %v3647_v37, %v16405_v40  ;;  %v2754_v52 = vld [vmem:[#allocation2 + $0x38] sm:$0xff]  ;;  %v2881_v37 = vld [vmem:[#allocation2 + $0x430] sm:$0xff] }
 0x423   : > { %13057 = vmatprep.subr.msk.bf16.mxu0 %vm13056_vm0, %v14140_v48  ;;  %vm5159_vm0 = vcmp.eq.s32.totalorder %v3487_v54, %v16409_v42  ;;  %vm12358_vm3 = vmpackc.low %vm5127_vm14, %vm5063_vm13  ;;  %vm5320_vm13 = vcmp.eq.s32.totalorder %v3648_v7, %v16370_v19  ;;  %vm5384_vm14 = vcmp.eq.s32.totalorder %v3712_v61, %v16370_v19  ;;  %v16554_v27 = vrot.slane %v16375_v26, %v16289_v47  ;;  %v2850_v54 = vld [vmem:[#allocation2 + $0x338] sm:$0xff] }
 0x424   : > { %vm13062_vm6 = vmpackc.low %vm5159_vm0, %vm5095_vm15  ;;  %vm5352_vm0 = vcmp.eq.s32.totalorder %v3680_v62, %v16379_v32  ;;  %v2914_v26 = vld [vmem:[#allocation2 + $0x538] sm:$0xff]  ;;  %v2380_v7 = vcombine.high %v16580_v58, %v16580_v58  ;;  %v2687_v61 = vpack.c.bf16 %v16413_v44, %v16413_v44 }
 0x426   : > { %v2690_v44 = vpack.c.bf16 %v2380_v7, %v2380_v7  ;;  %v3553_v7 = vld [vmem:[#allocation2 + $0x1930] sm:$0xff] }
 0x429   : > { %12355 = vmatpush1.bf16.xpose.msk.msra.mxu1 %vm12354_vm7, %v14140_v48  ;;  %vm12360_vm7 = vmpackc.low %vm5256_vm2, %vm5192_vm1  ;;  %vm5416_vm1 = vcmp.eq.s32.totalorder %v3744_v0, %v16379_v32  ;;  %v2719_v0 = vpack.c.bf16 %v16417_v53, %v16417_v53  ;;  %v3042_v53 = vld [vmem:[#allocation2 + $0x938] sm:$0xff] }
 0x42a   : > { %13059 = vmatpush1.bf16.xpose.msk.msra.mxu0 %vm13058_vm10, %v14140_v48  ;;  %12357 = vmatprep.subr.msk.bf16.mxu1 %vm12356_vm11, %v14140_v48  ;;  %vm5255_vm10 = vcmp.eq.s32.totalorder %v3583_v31, %v16405_v40  ;;  %vm5223_vm11 = vcmp.eq.s32.totalorder %v3551_v45, %v16409_v42  ;;  %vm13068_vm4 = vmpackc.low %vm5416_vm1, %vm5352_vm0  ;;  %vm5447_vm1 = vcmp.eq.s32.totalorder %v3775_v8, %v16405_v40  ;;  %v2946_v45 = vld [vmem:[#allocation2 + $0x638] sm:$0xff]  ;;  %v3009_v8 = vld [vmem:[#allocation2 + $0x830] sm:$0xff] }
 0x42b   : > { %13061 = vmatprep.subr.msk.bf16.mxu0 %vm13060_vm12, %v14140_v48  ;;  %vm5287_vm12 = vcmp.eq.s32.totalorder %v3615_v60, %v16409_v42  ;;  %vm12362_vm15 = vmpackc.low %vm5255_vm10, %vm5191_vm9  ;;  %vm5448_vm9 = vcmp.eq.s32.totalorder %v3776_v3, %v16370_v19  ;;  %vm5512_vm10 = vcmp.eq.s32.totalorder %v3840_v5, %v16370_v19  ;;  %v16583_v31 = vrot.slane %v2500_v56, %v16005_v25  ;;  %v2978_v60 = vld [vmem:[#allocation2 + $0x738] sm:$0xff]  ;;  %v3457_v56 = vld [vmem:[#allocation2 + $0x1630] sm:$0xff] }
 0x42c   : > { %vm13066_vm2 = vmpackc.low %vm5287_vm12, %vm5223_vm11  ;;  %vm5480_vm12 = vcmp.eq.s32.totalorder %v3808_v43, %v16379_v32  ;;  %v3010_v5 = vld [vmem:[#allocation2 + $0x838] sm:$0xff] }
 0x42d   : > { %v2516_v62 = vcombine.high %v16583_v31, %v16583_v31  ;;  %v3074_v43 = vld [vmem:[#allocation2 + $0xa38] sm:$0xff] }
 0x42f   : > { %v2722_v3 = vpack.c.bf16 %v2516_v62, %v2516_v62  ;;  %v3650_v62 = vld [vmem:[#allocation2 + $0x1c38] sm:$0xff] }
 0x431   : > { %12359 = vmatpush1.bf16.xpose.msk.msra.mxu1 %vm12358_vm3, %v14140_v48  ;;  %vm12364_vm3 = vmpackc.low %vm5384_vm14, %vm5320_vm13  ;;  %vm5544_vm13 = vcmp.eq.s32.totalorder %v3872_v4, %v16379_v32  ;;  %v3106_v4 = vld [vmem:[#allocation2 + $0xb38] sm:$0xff] }
 0x432   : > { %13063 = vmatpush1.bf16.xpose.msk.msra.mxu0 %vm13062_vm6, %v14140_v48  ;;  %12361 = vmatprep.subr.msk.bf16.mxu1 %vm12360_vm7, %v14140_v48  ;;  %vm5383_vm6 = vcmp.eq.s32.totalorder %v3711_v38, %v16405_v40  ;;  %vm5351_vm7 = vcmp.eq.s32.totalorder %v3679_v10, %v16409_v42  ;;  %vm13072_vm0 = vmpackc.low %vm5544_vm13, %vm5480_vm12  ;;  %vm5575_vm13 = vcmp.eq.s32.totalorder %v3903_v15, %v16405_v40  ;;  %v2945_v38 = vld [vmem:[#allocation2 + $0x630] sm:$0xff] }
 0x433   : > { %13065 = vmatprep.subr.msk.bf16.mxu0 %vm13064_vm8, %v14140_v48  ;;  %vm5415_vm8 = vcmp.eq.s32.totalorder %v3743_v2, %v16409_v42  ;;  %vm12366_vm11 = vmpackc.low %vm5383_vm6, %vm5319_vm5  ;;  %vm5576_vm5 = vcmp.eq.s32.totalorder %v3904_v29, %v16370_v19  ;;  %vm5640_vm6 = vcmp.eq.s32.totalorder %v3968_v13, %v16370_v19  ;;  %v2913_v10 = vld [vmem:[#allocation2 + $0x530] sm:$0xff]  ;;  %v3138_v29 = vld [vmem:[#allocation2 + $0xc38] sm:$0xff] }
 0x434   : > { %vm13070_vm14 = vmpackc.low %vm5415_vm8, %vm5351_vm7  ;;  %vm5608_vm8 = vcmp.eq.s32.totalorder %v3936_v63, %v16379_v32  ;;  %v2977_v2 = vld [vmem:[#allocation2 + $0x730] sm:$0xff]  ;;  %v3202_v13 = vld [vmem:[#allocation2 + $0xe38] sm:$0xff] }
 0x435   : > { %v3170_v63 = vld [vmem:[#allocation2 + $0xd38] sm:$0xff]  ;;  %v3137_v15 = vld [vmem:[#allocation2 + $0xc30] sm:$0xff] }
 0x439   : > { %12363 = vmatpush1.bf16.xpose.msk.msra.mxu1 %vm12362_vm15, %v14140_v48  ;;  %vm12368_vm15 = vmpackc.low %vm5512_vm10, %vm5448_vm9  ;;  %vm5672_vm9 = vcmp.eq.s32.totalorder %v4000_v14, %v16379_v32  ;;  %v3234_v14 = vld [vmem:[#allocation2 + $0xf38] sm:$0xff] }
 0x43a   : > { %13067 = vmatpush1.bf16.xpose.msk.msra.mxu0 %vm13066_vm2, %v14140_v48  ;;  %12365 = vmatprep.subr.msk.bf16.mxu1 %vm12364_vm3, %v14140_v48  ;;  %vm5511_vm2 = vcmp.eq.s32.totalorder %v3839_v9, %v16405_v40  ;;  %vm5479_vm3 = vcmp.eq.s32.totalorder %v3807_v28, %v16409_v42  ;;  %vm13076_vm12 = vmpackc.low %vm5672_vm9, %vm5608_vm8  ;;  %vm5703_vm9 = vcmp.eq.s32.totalorder %v4031_v16, %v16405_v40  ;;  %v3073_v9 = vld [vmem:[#allocation2 + $0xa30] sm:$0xff] }
 0x43b   : > { %13069 = vmatprep.subr.msk.bf16.mxu0 %vm13068_vm4, %v14140_v48  ;;  %vm5543_vm4 = vcmp.eq.s32.totalorder %v3871_v12, %v16409_v42  ;;  %vm12370_vm7 = vmpackc.low %vm5511_vm2, %vm5447_vm1  ;;  %vm5704_vm1 = vcmp.eq.s32.totalorder %v4032_v11, %v16370_v19  ;;  %vm5768_vm2 = vcmp.eq.s32.totalorder %v4096_v23, %v16370_v19  ;;  %v2818_v19 = vld [vmem:[#allocation2 + $0x238] sm:$0xff]  ;;  %v3041_v28 = vld [vmem:[#allocation2 + $0x930] sm:$0xff] }
 0x43c   : > { %vm13074_vm10 = vmpackc.low %vm5543_vm4, %vm5479_vm3  ;;  %vm5736_vm4 = vcmp.eq.s32.totalorder %v4064_v24, %v16379_v32  ;;  %v3105_v12 = vld [vmem:[#allocation2 + $0xb30] sm:$0xff]  ;;  %v3266_v11 = vld [vmem:[#allocation2 + $0x1038] sm:$0xff] }
 0x43d   : > { %v3330_v23 = vld [vmem:[#allocation2 + $0x1238] sm:$0xff]  ;;  %v3265_v16 = vld [vmem:[#allocation2 + $0x1030] sm:$0xff] }
 0x43e   : > { %v3298_v24 = vld [vmem:[#allocation2 + $0x1138] sm:$0xff] }
 0x441   : > { %12367 = vmatpush1.bf16.xpose.msk.msra.mxu1 %vm12366_vm11, %v14140_v48  ;;  %vm12372_vm11 = vmpackc.low %vm5640_vm6, %vm5576_vm5  ;;  %vm5800_vm5 = vcmp.eq.s32.totalorder %v4128_v34, %v16379_v32  ;;  %v2786_v32 = vld [vmem:[#allocation2 + $0x138] sm:$0xff] }
 0x442   : > { %13071 = vmatpush1.bf16.xpose.msk.msra.mxu0 %vm13070_vm14, %v14140_v48  ;;  %12369 = vmatprep.subr.msk.bf16.mxu1 %vm12368_vm15, %v14140_v48  ;;  %vm5639_vm14 = vcmp.eq.s32.totalorder %v3967_v17, %v16405_v40  ;;  %vm5607_vm15 = vcmp.eq.s32.totalorder %v3935_v18, %v16409_v42  ;;  %vm13080_vm8 = vmpackc.low %vm5800_vm5, %vm5736_vm4  ;;  %v3201_v17 = vld [vmem:[#allocation2 + $0xe30] sm:$0xff]  ;;  %v3362_v34 = vld [vmem:[#allocation2 + $0x1338] sm:$0xff] }
 0x443   : > { %13073 = vmatprep.subr.msk.bf16.mxu0 %vm13072_vm0, %v14140_v48  ;;  %vm5671_vm0 = vcmp.eq.s32.totalorder %v3999_v22, %v16409_v42  ;;  %vm12374_vm3 = vmpackc.low %vm5639_vm14, %vm5575_vm13  ;;  %vm4426_vm13 = vcmp.eq.s32.totalorder %v2754_v52, %v16549_v51  ;;  %vm4490_vm14 = vcmp.eq.s32.totalorder %v2818_v19, %v16549_v51  ;;  %v3169_v18 = vld [vmem:[#allocation2 + $0xd30] sm:$0xff]  ;;  %v3394_v52 = vld [vmem:[#allocation2 + $0x1438] sm:$0xff] }
 0x444   : > { %vm13078_vm6 = vmpackc.low %vm5671_vm0, %vm5607_vm15  ;;  %vm4458_vm0 = vcmp.eq.s32.totalorder %v2786_v32, %v16554_v27  ;;  %v3233_v22 = vld [vmem:[#allocation2 + $0xf30] sm:$0xff]  ;;  %v3458_v19 = vld [vmem:[#allocation2 + $0x1638] sm:$0xff] }
 0x445   : > { %v3426_v32 = vld [vmem:[#allocation2 + $0x1538] sm:$0xff] }
 0x449   : > { %12371 = vmatpush1.bf16.xpose.msk.msra.mxu1 %vm12370_vm7, %v14140_v48  ;;  %vm12376_vm7 = vmpackc.low %vm5768_vm2, %vm5704_vm1  ;;  %vm4522_vm1 = vcmp.eq.s32.totalorder %v2850_v54, %v16554_v27  ;;  %v3490_v54 = vld [vmem:[#allocation2 + $0x1738] sm:$0xff] }
 0x44a   : > { %13075 = vmatpush1.bf16.xpose.msk.msra.mxu0 %vm13074_vm10, %v14140_v48  ;;  %12373 = vmatprep.subr.msk.bf16.mxu1 %vm12372_vm11, %v14140_v48  ;;  %vm5767_vm10 = vcmp.eq.s32.totalorder %v4095_v35, %v16405_v40  ;;  %vm5735_vm11 = vcmp.eq.s32.totalorder %v4063_v6, %v16409_v42  ;;  %v16573_v40 = vrot.slane %v16366_v1, %v16286_v46  ;;  %vm13084_vm4 = vmpackc.low %vm4522_vm1, %vm4458_vm0  ;;  %v2882_v1 = vld [vmem:[#allocation2 + $0x438] sm:$0xff]  ;;  %v3329_v35 = vld [vmem:[#allocation2 + $0x1230] sm:$0xff] }
 0x44b   : > { %13077 = vmatprep.subr.msk.bf16.mxu0 %vm13076_vm12, %v14140_v48  ;;  %vm5799_vm12 = vcmp.eq.s32.totalorder %v4127_v41, %v16409_v42  ;;  %vm12378_vm15 = vmpackc.low %vm5767_vm10, %vm5703_vm9  ;;  %v2753_v42 = vld [vmem:[#allocation2 + $0x30] sm:$0xff]  ;;  %vm4554_vm9 = vcmp.eq.s32.totalorder %v2882_v1, %v16549_v51  ;;  %vm4618_vm10 = vcmp.eq.s32.totalorder %v2946_v45, %v16549_v51  ;;  %v3554_v1 = vld [vmem:[#allocation2 + $0x1938] sm:$0xff] }
 0x44c   : > { %vm13082_vm2 = vmpackc.low %vm5799_vm12, %vm5735_vm11  ;;  %vm4425_vm5 = vcmp.eq.s32.totalorder %v2753_v42, %v16573_v40  ;;  %vm4586_vm12 = vcmp.eq.s32.totalorder %v2914_v26, %v16554_v27  ;;  %vm4553_vm1 = vcmp.eq.s32.totalorder %v2881_v37, %v16573_v40  ;;  %v3297_v6 = vld [vmem:[#allocation2 + $0x1130] sm:$0xff]  ;;  %v3618_v45 = vld [vmem:[#allocation2 + $0x1b38] sm:$0xff] }
 0x44d   : > { %v3361_v41 = vld [vmem:[#allocation2 + $0x1330] sm:$0xff]  ;;  %v3682_v37 = vld [vmem:[#allocation2 + $0x1d38] sm:$0xff] }
 0x44e   : > { %v3425_v42 = vld [vmem:[#allocation2 + $0x1530] sm:$0xff] }
 0x44f   : > { %v3521_v26 = vld [vmem:[#allocation2 + $0x1830] sm:$0xff] }
 0x451   : > { %12375 = vmatpush1.bf16.xpose.msk.msra.mxu1 %vm12374_vm3, %v14140_v48  ;;  %vm12380_vm3 = vmpackc.low %vm4490_vm14, %vm4426_vm13  ;;  %vm4650_vm13 = vcmp.eq.s32.totalorder %v2978_v60, %v16554_v27  ;;  %v3585_v60 = vld [vmem:[#allocation2 + $0x1a30] sm:$0xff] }
 0x452   : > { %13079 = vmatpush1.bf16.xpose.msk.msra.mxu0 %vm13078_vm6, %v14140_v48  ;;  %12377 = vmatprep.subr.msk.bf16.mxu1 %vm12376_vm7, %v14140_v48  ;;  %vm4489_vm6 = vcmp.eq.s32.totalorder %v2817_v36, %v16573_v40  ;;  %vm4457_vm7 = vcmp.eq.s32.totalorder %v2785_v39, %v16577_v57  ;;  %vm13088_vm0 = vmpackc.low %vm4650_vm13, %vm4586_vm12  ;;  %vm4681_vm13 = vcmp.eq.s32.totalorder %v3009_v8, %v16573_v40  ;;  %v3489_v36 = vld [vmem:[#allocation2 + $0x1730] sm:$0xff]  ;;  %v3522_v39 = vld [vmem:[#allocation2 + $0x1838] sm:$0xff] }
 0x453   : > { %13081 = vmatprep.subr.msk.bf16.mxu0 %vm13080_vm8, %v14140_v48  ;;  %vm4521_vm8 = vcmp.eq.s32.totalorder %v2849_v59, %v16577_v57  ;;  %vm12382_vm11 = vmpackc.low %vm4489_vm6, %vm4425_vm5  ;;  %vm4682_vm5 = vcmp.eq.s32.totalorder %v3010_v5, %v16549_v51  ;;  %vm4746_vm6 = vcmp.eq.s32.totalorder %v3074_v43, %v16549_v51  ;;  %v3586_v59 = vld [vmem:[#allocation2 + $0x1a38] sm:$0xff]  ;;  %v1741_v8 = vld [vmem:[%s14398_s6 + $0x10] sm:$0xff] }
 0x454   : > { %vm13086_vm14 = vmpackc.low %vm4521_vm8, %vm4457_vm7  ;;  %vm4714_vm8 = vcmp.eq.s32.totalorder %v3042_v53, %v16554_v27  ;;  %v3778_v5 = vld [vmem:[#allocation2 + $0x2038] sm:$0xff] }
 0x455   : > { %v3842_v43 = vld [vmem:[#allocation2 + $0x2238] sm:$0xff] }
 0x456   : > { %v3810_v53 = vld [vmem:[#allocation2 + $0x2138] sm:$0xff] }
 0x459   : > { %12379 = vmatpush1.bf16.xpose.msk.msra.mxu1 %vm12378_vm15, %v14140_v48  ;;  %vm12384_vm15 = vmpackc.low %vm4618_vm10, %vm4554_vm9  ;;  %vm4778_vm9 = vcmp.eq.s32.totalorder %v3106_v4, %v16554_v27  ;;  %v3874_v4 = vld [vmem:[#allocation2 + $0x2338] sm:$0xff] }
 0x45a   : > { %13083 = vmatpush1.bf16.xpose.msk.msra.mxu0 %vm13082_vm2, %v14140_v48  ;;  %12381 = vmatprep.subr.msk.bf16.mxu1 %vm12380_vm3, %v14140_v48  ;;  %vm4617_vm2 = vcmp.eq.s32.totalorder %v2945_v38, %v16573_v40  ;;  %vm4585_vm3 = vcmp.eq.s32.totalorder %v2913_v10, %v16577_v57  ;;  %vm13092_vm12 = vmpackc.low %vm4778_vm9, %vm4714_vm8  ;;  %vm4809_vm9 = vcmp.eq.s32.totalorder %v3137_v15, %v16573_v40  ;;  %v3746_v38 = vld [vmem:[#allocation2 + $0x1f38] sm:$0xff]  ;;  %v3713_v10 = vld [vmem:[#allocation2 + $0x1e30] sm:$0xff] }
 0x45b   : > { %13085 = vmatprep.subr.msk.bf16.mxu0 %vm13084_vm4, %v14140_v48  ;;  %vm4649_vm4 = vcmp.eq.s32.totalorder %v2977_v2, %v16577_v57  ;;  %vm12386_vm7 = vmpackc.low %vm4617_vm2, %vm4553_vm1  ;;  %vm4810_vm1 = vcmp.eq.s32.totalorder %v3138_v29, %v16549_v51  ;;  %vm4874_vm2 = vcmp.eq.s32.totalorder %v3202_v13, %v16549_v51  ;;  %v3681_v2 = vld [vmem:[#allocation2 + $0x1d30] sm:$0xff]  ;;  %v3906_v13 = vld [vmem:[#allocation2 + $0x2438] sm:$0xff] }
 0x45c   : > { %vm13090_vm10 = vmpackc.low %vm4649_vm4, %vm4585_vm3  ;;  %vm4842_vm4 = vcmp.eq.s32.totalorder %v3170_v63, %v16554_v27  ;;  %v3873_v29 = vld [vmem:[#allocation2 + $0x2330] sm:$0xff]  ;;  %v3970_v63 = vld [vmem:[#allocation2 + $0x2638] sm:$0xff] }
 0x45d   : > { %v1760_v15 = vld [vmem:[%s14405_s7 + $0x28] sm:$0xff] }
 0x460   : > { %9463 = vmatmul.mubr.bf16.vlgmr.msra.gmra.mrb[0].mxu1 %v2687_v61  ;;  %v3617_v61 = vld [vmem:[#allocation2 + $0x1b30] sm:$0xff] }
 0x461   : > { %12383 = vmatpush1.bf16.xpose.msk.msra.mxu1 %vm12382_vm11, %v14140_v48  ;;  %10119 = vmatmul.mubr.bf16.vlgmr.msra.gmra.mrb[0].mxu0 %v2719_v0  ;;  %vm12388_vm11 = vmpackc.low %vm4746_vm6, %vm4682_vm5  ;;  %vm4906_vm5 = vcmp.eq.s32.totalorder %v3234_v14, %v16554_v27  ;;  %v3714_v0 = vld [vmem:[#allocation2 + $0x1e38] sm:$0xff]  ;;  %v1756_v14 = vld [vmem:[%s14405_s7 + $0x8] sm:$0xff] }
 0x462   : > { %13087 = vmatpush1.bf16.xpose.msk.msra.mxu0 %vm13086_vm14, %v14140_v48  ;;  %12385 = vmatprep.subr.msk.bf16.mxu1 %vm12384_vm15, %v14140_v48  ;;  %vm4745_vm14 = vcmp.eq.s32.totalorder %v3073_v9, %v16573_v40  ;;  %vm4713_vm15 = vcmp.eq.s32.totalorder %v3041_v28, %v16577_v57  ;;  %vm13096_vm8 = vmpackc.low %vm4906_vm5, %vm4842_vm4  ;;  %vm4937_vm5 = vcmp.eq.s32.totalorder %v3265_v16, %v16573_v40  ;;  %v3777_v9 = vld [vmem:[#allocation2 + $0x2030] sm:$0xff] }
 0x463   : > { %13089 = vmatprep.subr.msk.bf16.mxu0 %vm13088_vm0, %v14140_v48  ;;  %9503 = vmatprep.mubr.bf16.mxu1 %v2690_v44  ;;  %vm4777_vm0 = vcmp.eq.s32.totalorder %v3105_v12, %v16577_v57  ;;  %vm12390_vm3 = vmpackc.low %vm4745_vm14, %vm4681_vm13  ;;  %vm4938_vm13 = vcmp.eq.s32.totalorder %v3266_v11, %v16549_v51  ;;  %vm5002_vm14 = vcmp.eq.s32.totalorder %v3330_v23, %v16549_v51  ;;  %v3649_v44 = vld [vmem:[#allocation2 + $0x1c30] sm:$0xff] }
 0x464   : > { %10159 = vmatprep.mubr.bf16.mxu0 %v2722_v3  ;;  %vm13094_vm6 = vmpackc.low %vm4777_vm0, %vm4713_vm15  ;;  %vm4970_vm0 = vcmp.eq.s32.totalorder %v3298_v24, %v16554_v27  ;;  %v3745_v3 = vld [vmem:[#allocation2 + $0x1f30] sm:$0xff]  ;;  %v1810_v11 = vrot.slane %v1756_v14, %v15903_v30  ;;  %v1814_v23 = vrot.slane %v1756_v14, %v15991_v20  ;;  %v1818_v24 = vrot.slane %v1756_v14, %v15994_v21 }
 0x465   : > { %v3841_v28 = vld [vmem:[#allocation2 + $0x2230] sm:$0xff]  ;;  %v1938_v16 = vrot.slane %v1760_v15, %v15903_v30 }
 0x466   : > { %v3809_v12 = vld [vmem:[#allocation2 + $0x2130] sm:$0xff] }
 0x469   : > { %12387 = vmatpush1.bf16.xpose.msk.msra.mxu1 %vm12386_vm7, %v14140_v48  ;;  %vm12392_vm7 = vmpackc.low %vm4874_vm2, %vm4810_vm1  ;;  %vm5034_vm1 = vcmp.eq.s32.totalorder %v3362_v34, %v16554_v27  ;;  %v1934_v34 = vrot.slane %v1760_v15, %v15906_v33 }
 0x46a   : > { %13091 = vmatpush1.bf16.xpose.msk.msra.mxu0 %vm13090_vm10, %v14140_v48  ;;  %12389 = vmatprep.subr.msk.bf16.mxu1 %vm12388_vm11, %v14140_v48  ;;  %vm4873_vm10 = vcmp.eq.s32.totalorder %v3201_v17, %v16573_v40  ;;  %vm4841_vm11 = vcmp.eq.s32.totalorder %v3169_v18, %v16577_v57  ;;  %vm13100_vm4 = vmpackc.low %vm5034_vm1, %vm4970_vm0  ;;  %vm5065_vm1 = vcmp.eq.s32.totalorder %v3393_v55, %v16573_v40  ;;  %v3938_v17 = vld [vmem:[#allocation2 + $0x2538] sm:$0xff]  ;;  %v3937_v55 = vld [vmem:[#allocation2 + $0x2530] sm:$0xff] }
 0x46b   : > { %13093 = vmatprep.subr.msk.bf16.mxu0 %vm13092_vm12, %v14140_v48  ;;  %vm4905_vm12 = vcmp.eq.s32.totalorder %v3233_v22, %v16577_v57  ;;  %vm12394_vm15 = vmpackc.low %vm4873_vm10, %vm4809_vm9  ;;  %vm5066_vm9 = vcmp.eq.s32.totalorder %v3394_v52, %v16549_v51  ;;  %vm5130_vm10 = vcmp.eq.s32.totalorder %v3458_v19, %v16549_v51  ;;  %v4002_v18 = vld [vmem:[#allocation2 + $0x2738] sm:$0xff]  ;;  %v1806_v22 = vrot.slane %v1756_v14, %v15906_v33  ;;  %v3905_v19 = vld [vmem:[#allocation2 + $0x2430] sm:$0xff] }
 0x46c   : > { %vm13098_vm2 = vmpackc.low %vm4905_vm12, %vm4841_vm11  ;;  %vm5098_vm12 = vcmp.eq.s32.totalorder %v3426_v32, %v16554_v27  ;;  %v3969_v32 = vld [vmem:[#allocation2 + $0x2630] sm:$0xff]  ;;  %v2852_v14 = vld [vmem:[#allocation2 + $0x348] sm:$0xff] }
 0x471   : > { %12391 = vmatpush1.bf16.xpose.msk.msra.mxu1 %vm12390_vm3, %v14140_v48  ;;  %vm12396_vm3 = vmpackc.low %vm5002_vm14, %vm4938_vm13  ;;  %vm5162_vm13 = vcmp.eq.s32.totalorder %v3490_v54, %v16554_v27  ;;  %v2721_v54 = vpack.c.bf16 %v16583_v31, %v16583_v31  ;;  %v3044_v31 = vld [vmem:[#allocation2 + $0x948] sm:$0xff] }
 0x472   : > { %13095 = vmatpush1.bf16.xpose.msk.msra.mxu0 %vm13094_vm6, %v14140_v48  ;;  %12393 = vmatprep.subr.msk.bf16.mxu1 %vm12392_vm7, %v14140_v48  ;;  %vm5001_vm6 = vcmp.eq.s32.totalorder %v3329_v35, %v16573_v40  ;;  %vm4969_vm7 = vcmp.eq.s32.totalorder %v3297_v6, %v16577_v57  ;;  %vm13104_vm0 = vmpackc.low %vm5162_vm13, %vm5098_vm12  ;;  %vm5193_vm13 = vcmp.eq.s32.totalorder %v3521_v26, %v16573_v40  ;;  %v4066_v26 = vld [vmem:[#allocation2 + $0x2938] sm:$0xff] }
 0x473   : > { %13097 = vmatprep.subr.msk.bf16.mxu0 %vm13096_vm8, %v14140_v48  ;;  %vm5033_vm8 = vcmp.eq.s32.totalorder %v3361_v41, %v16577_v57  ;;  %vm12398_vm11 = vmpackc.low %vm5001_vm6, %vm4937_vm5  ;;  %vm5194_vm5 = vcmp.eq.s32.totalorder %v3522_v39, %v16549_v51  ;;  %vm5258_vm6 = vcmp.eq.s32.totalorder %v3586_v59, %v16549_v51  ;;  %v1942_v35 = vrot.slane %v1760_v15, %v15991_v20  ;;  %v4034_v39 = vld [vmem:[#allocation2 + $0x2838] sm:$0xff]  ;;  %v2980_v41 = vld [vmem:[#allocation2 + $0x748] sm:$0xff] }
 0x474   : > { %vm13102_vm14 = vmpackc.low %vm5033_vm8, %vm4969_vm7  ;;  %vm5226_vm8 = vcmp.eq.s32.totalorder %v3554_v1, %v16554_v27  ;;  %v1946_v6 = vrot.slane %v1760_v15, %v15994_v21  ;;  %v4098_v59 = vld [vmem:[#allocation2 + $0x2a38] sm:$0xff]  ;;  %v2197_v1 = vcombine.low %v1934_v34, %v1938_v16  ;;  %v2884_v16 = vld [vmem:[#allocation2 + $0x448] sm:$0xff] }
 0x479   : > { %12395 = vmatpush1.bf16.xpose.msk.msra.mxu1 %vm12394_vm15, %v14140_v48  ;;  %vm12400_vm15 = vmpackc.low %vm5130_vm10, %vm5066_vm9  ;;  %vm5290_vm9 = vcmp.eq.s32.totalorder %v3618_v45, %v16554_v27  ;;  %v2198_v45 = vcombine.low %v1942_v35, %v1946_v6  ;;  %v2948_v35 = vld [vmem:[#allocation2 + $0x648] sm:$0xff] }
 0x47a   : > { %13099 = vmatpush1.bf16.xpose.msk.msra.mxu0 %vm13098_vm2, %v14140_v48  ;;  %12397 = vmatprep.subr.msk.bf16.mxu1 %vm12396_vm3, %v14140_v48  ;;  %vm5129_vm2 = vcmp.eq.s32.totalorder %v3457_v56, %v16573_v40  ;;  %vm5097_vm3 = vcmp.eq.s32.totalorder %v3425_v42, %v16577_v57  ;;  %vm13108_vm12 = vmpackc.low %vm5290_vm9, %vm5226_vm8  ;;  %vm5321_vm9 = vcmp.eq.s32.totalorder %v3649_v44, %v16573_v40  ;;  %v4001_v56 = vld [vmem:[#allocation2 + $0x2730] sm:$0xff]  ;;  %v2916_v6 = vld [vmem:[#allocation2 + $0x548] sm:$0xff] }
 0x47b   : > { %13101 = vmatprep.subr.msk.bf16.mxu0 %vm13100_vm4, %v14140_v48  ;;  %vm5161_vm4 = vcmp.eq.s32.totalorder %v3489_v36, %v16577_v57  ;;  %vm12402_vm7 = vmpackc.low %vm5129_vm2, %vm5065_vm1  ;;  %vm5322_vm1 = vcmp.eq.s32.totalorder %v3650_v62, %v16549_v51  ;;  %vm5386_vm2 = vcmp.eq.s32.totalorder %v3714_v0, %v16549_v51  ;;  %v2061_v42 = vcombine.low %v1806_v22, %v1810_v11  ;;  %v3140_v62 = vld [vmem:[#allocation2 + $0xc48] sm:$0xff]  ;;  %v3139_v44 = vld [vmem:[#allocation2 + $0xc40] sm:$0xff] }
 0x47c   : > { %vm13106_vm10 = vmpackc.low %vm5161_vm4, %vm5097_vm3  ;;  %vm5354_vm4 = vcmp.eq.s32.totalorder %v3682_v37, %v16554_v27  ;;  %v2062_v36 = vcombine.low %v1814_v23, %v1818_v24  ;;  %v2205_v0 = vrot.slane %v2197_v1, %v16005_v25  ;;  %v2212_v37 = vrot.slane %v2198_v45, %v16005_v25  ;;  %v2787_v23 = vld [vmem:[#allocation2 + $0x140] sm:$0xff]  ;;  %v3076_v1 = vld [vmem:[#allocation2 + $0xa48] sm:$0xff] }
 0x47d   : > { %v2851_v24 = vld [vmem:[#allocation2 + $0x340] sm:$0xff]  ;;  %v3108_v45 = vld [vmem:[#allocation2 + $0xb48] sm:$0xff] }
 0x481   : > { %12399 = vmatpush1.bf16.xpose.msk.msra.mxu1 %vm12398_vm11, %v14140_v48  ;;  %vm12404_vm11 = vmpackc.low %vm5258_vm6, %vm5194_vm5  ;;  %vm5418_vm5 = vcmp.eq.s32.totalorder %v3746_v38, %v16554_v27  ;;  %v3236_v38 = vld [vmem:[#allocation2 + $0xf48] sm:$0xff] }
 0x482   : > { %13103 = vmatpush1.bf16.xpose.msk.msra.mxu0 %vm13102_vm14, %v14140_v48  ;;  %12401 = vmatprep.subr.msk.bf16.mxu1 %vm12400_vm15, %v14140_v48  ;;  %vm5257_vm14 = vcmp.eq.s32.totalorder %v3585_v60, %v16573_v40  ;;  %vm5225_vm15 = vcmp.eq.s32.totalorder %v3553_v7, %v16577_v57  ;;  %vm13112_vm8 = vmpackc.low %vm5418_vm5, %vm5354_vm4  ;;  %vm5449_vm5 = vcmp.eq.s32.totalorder %v3777_v9, %v16573_v40  ;;  %v4130_v60 = vld [vmem:[#allocation2 + $0x2b38] sm:$0xff] }
 0x483   : > { %13105 = vmatprep.subr.msk.bf16.mxu0 %vm13104_vm0, %v14140_v48  ;;  %vm5289_vm0 = vcmp.eq.s32.totalorder %v3617_v61, %v16577_v57  ;;  %vm12406_vm3 = vmpackc.low %vm5257_vm14, %vm5193_vm13  ;;  %vm5450_vm13 = vcmp.eq.s32.totalorder %v3778_v5, %v16549_v51  ;;  %vm5514_vm14 = vcmp.eq.s32.totalorder %v3842_v43, %v16549_v51  ;;  %v2069_v7 = vrot.slane %v2061_v42, %v16005_v25  ;;  %v4065_v43 = vld [vmem:[#allocation2 + $0x2930] sm:$0xff]  ;;  %v2915_v42 = vld [vmem:[#allocation2 + $0x540] sm:$0xff] }
 0x484   : > { %vm13110_vm6 = vmpackc.low %vm5289_vm0, %vm5225_vm15  ;;  %v2076_v61 = vrot.slane %v2062_v36, %v16005_v25  ;;  %v2213_v9 = vcombine.low %v2205_v0, %v2212_v37  ;;  %v2979_v36 = vld [vmem:[#allocation2 + $0x740] sm:$0xff]  ;;  %v3204_v0 = vld [vmem:[#allocation2 + $0xe48] sm:$0xff] }
 0x485   : > { %v3172_v37 = vld [vmem:[#allocation2 + $0xd48] sm:$0xff] }
 0x486   : > { %v2077_v5 = vcombine.low %v2069_v7, %v2076_v61  ;;  %v3043_v7 = vld [vmem:[#allocation2 + $0x940] sm:$0xff] }
 0x487   : > { %v3107_v61 = vld [vmem:[#allocation2 + $0xb40] sm:$0xff] }
 0x488   : > { %v16811_v15 = vmul.f32 %v2077_v5, %v1741_v8  ;;  %v3268_v5 = vld [vmem:[#allocation2 + $0x1048] sm:$0xff] }
 0x489   : > { %12403 = vmatpush1.bf16.xpose.msk.msra.mxu1 %vm12402_vm7, %v14140_v48  ;;  %vm12408_vm7 = vmpackc.low %vm5386_vm2, %vm5322_vm1  ;;  %vm5482_vm1 = vcmp.eq.s32.totalorder %v3810_v53, %v16554_v27  ;;  %vm5546_vm2 = vcmp.eq.s32.totalorder %v3874_v4, %v16554_v27  ;;  %v4129_v53 = vld [vmem:[#allocation2 + $0x2b30] sm:$0xff]  ;;  %v3364_v8 = vld [vmem:[#allocation2 + $0x1348] sm:$0xff] }
 0x48a   : > { %13107 = vmatpush1.bf16.xpose.msk.msra.mxu0 %vm13106_vm10, %v14140_v48  ;;  %12405 = vmatprep.subr.msk.bf16.mxu1 %vm12404_vm11, %v14140_v48  ;;  %vm5385_vm10 = vcmp.eq.s32.totalorder %v3713_v10, %v16573_v40  ;;  %vm5353_vm11 = vcmp.eq.s32.totalorder %v3681_v2, %v16577_v57  ;;  %vm13116_vm4 = vmpackc.low %vm5546_vm2, %vm5482_vm1  ;;  %vm5577_vm1 = vcmp.eq.s32.totalorder %v3905_v19, %v16573_v40  ;;  %v16779_v10 = vld [vmem:[%s14414_s1 + $0x28] sm:$0xff]  ;;  %v3203_v2 = vld [vmem:[#allocation2 + $0xe40] sm:$0xff] }
 0x48b   : > { %13109 = vmatprep.subr.msk.bf16.mxu0 %vm13108_vm12, %v14140_v48  ;;  %vm5417_vm12 = vcmp.eq.s32.totalorder %v3745_v3, %v16577_v57  ;;  %vm12410_vm15 = vmpackc.low %vm5385_vm10, %vm5321_vm9  ;;  %vm5578_vm9 = vcmp.eq.s32.totalorder %v3906_v13, %v16549_v51  ;;  %vm5642_vm10 = vcmp.eq.s32.totalorder %v3970_v63, %v16549_v51  ;;  %vm5641_vm2 = vcmp.eq.s32.totalorder %v3969_v32, %v16573_v40  ;;  %v4097_v3 = vld [vmem:[#allocation2 + $0x2a30] sm:$0xff]  ;;  %v2788_v63 = vld [vmem:[#allocation2 + $0x148] sm:$0xff] }
 0x48c   : > { %vm16687_vm0 = vmpackc.low %vm5417_vm12, %vm5353_vm11  ;;  %vm5610_vm12 = vcmp.eq.s32.totalorder %v3938_v17, %v16554_v27  ;;  %v1749_v13 = vld [vmem:[%s14398_s6 + $0x50] sm:$0xff]  ;;  %v16825_v22 = vrot.slane %v16779_v10, %v15906_v33  ;;  %v16829_v11 = vrot.slane %v16811_v15, %v16005_v25  ;;  %v2689_v19 = vpack.c.bf16 %v16580_v58, %v16580_v58 }
 0x48d   : > { %v16815_v17 = vmul.f32 %v2213_v9, %v1749_v13  ;;  %v3267_v9 = vld [vmem:[#allocation2 + $0x1040] sm:$0xff] }
 0x48e   : > { %v2396_v52 = vcombine.high %v16829_v11, %v16829_v11  ;;  %v3363_v13 = vld [vmem:[#allocation2 + $0x1340] sm:$0xff] }
 0x48f   : > { %v16833_v34 = vrot.slane %v16815_v17, %v16005_v25 }
 0x490   : > { %v2692_v58 = vpack.c.bf16 %v2396_v52, %v2396_v52  ;;  %v3556_v52 = vld [vmem:[#allocation2 + $0x1948] sm:$0xff] }
 0x491   : > { %12407 = vmatpush1.bf16.xpose.msk.msra.mxu1 %vm12406_vm3, %v14140_v48  ;;  %vm12412_vm3 = vmpackc.low %vm5514_vm14, %vm5450_vm13  ;;  %vm5674_vm13 = vcmp.eq.s32.totalorder %v4002_v18, %v16554_v27  ;;  %v2819_v18 = vld [vmem:[#allocation2 + $0x240] sm:$0xff]  ;;  %v2532_v32 = vcombine.high %v16833_v34, %v16833_v34 }
 0x492   : > { %13111 = vmatpush1.bf16.xpose.msk.msra.mxu0 %vm13110_vm6, %v14140_v48  ;;  %12409 = vmatprep.subr.msk.bf16.mxu1 %vm12408_vm7, %v14140_v48  ;;  %vm5513_vm6 = vcmp.eq.s32.totalorder %v3841_v28, %v16573_v40  ;;  %vm5481_vm7 = vcmp.eq.s32.totalorder %v3809_v12, %v16577_v57  ;;  %v2756_v28 = vld [vmem:[#allocation2 + $0x48] sm:$0xff] }
 0x493   : > { %13113 = vmatprep.subr.msk.bf16.mxu0 %vm13112_vm8, %v14140_v48  ;;  %vm5545_vm8 = vcmp.eq.s32.totalorder %v3873_v29, %v16577_v57  ;;  %vm16719_vm11 = vmpackc.low %vm5513_vm6, %vm5449_vm5  ;;  %vm5706_vm5 = vcmp.eq.s32.totalorder %v4034_v39, %v16549_v51  ;;  %vm5770_vm6 = vcmp.eq.s32.totalorder %v4098_v59, %v16549_v51  ;;  %v16772_v51 = vld [vmem:[%s14414_s1 + $0x8] sm:$0xff]  ;;  %v16795_v29 = vrot.slane %v16779_v10, %v15903_v30 }
 0x494   : > { %vm16729_vm14 = vmpackc.low %vm5545_vm8, %vm5481_vm7  ;;  %vm5738_vm8 = vcmp.eq.s32.totalorder %v4066_v26, %v16554_v27  ;;  %v16787_v4 = vrot.slane %v16772_v51, %v15903_v30  ;;  %v2820_v12 = vld [vmem:[#allocation2 + $0x248] sm:$0xff]  ;;  %v2724_v39 = vpack.c.bf16 %v2532_v32, %v2532_v32  ;;  %v3011_v26 = vld [vmem:[#allocation2 + $0x840] sm:$0xff] }
 0x495   : > { %vm16759_vm7 = vmpackc.low %vm5641_vm2, %vm5577_vm1  ;;  %v3012_v59 = vld [vmem:[#allocation2 + $0x848] sm:$0xff]  ;;  %v3523_v32 = vld [vmem:[#allocation2 + $0x1840] sm:$0xff] }
 0x496   : > { %vm4428_vm1 = vcmp.eq.s32.totalorder %v2756_v28, %v16787_v4  ;;  %vm4492_vm2 = vcmp.eq.s32.totalorder %v2820_v12, %v16787_v4  ;;  %v3331_v28 = vld [vmem:[#allocation2 + $0x1240] sm:$0xff] }
 0x497   : > { %v3299_v12 = vld [vmem:[#allocation2 + $0x1140] sm:$0xff] }
 0x499   : > { %12411 = vmatpush1.bf16.xpose.msk.msra.mxu1 %vm12410_vm15, %v14140_v48  ;;  %vm16737_vm15 = vmpackc.low %vm5642_vm10, %vm5578_vm9  ;;  %vm5802_vm9 = vcmp.eq.s32.totalorder %v4130_v60, %v16554_v27  ;;  %v4033_v27 = vld [vmem:[#allocation2 + $0x2830] sm:$0xff]  ;;  %v3075_v60 = vld [vmem:[#allocation2 + $0xa40] sm:$0xff] }
 0x49a   : > { %13115 = vmatpush1.bf16.xpose.msk.msra.mxu0 %vm16687_vm0, %v14140_v48  ;;  %12413 = vmatprep.subr.msk.bf16.mxu1 %vm12412_vm3, %v14140_v48  ;;  %vm13120_vm0 = vmpackc.low %vm5674_vm13, %vm5610_vm12  ;;  %vm5609_vm3 = vcmp.eq.s32.totalorder %v3937_v55, %v16577_v57  ;;  %vm5705_vm13 = vcmp.eq.s32.totalorder %v4033_v27, %v16573_v40  ;;  %v2883_v55 = vld [vmem:[#allocation2 + $0x440] sm:$0xff] }
 0x49b   : > { %13117 = vmatprep.subr.msk.bf16.mxu0 %vm13116_vm4, %v14140_v48  ;;  %vm5673_vm4 = vcmp.eq.s32.totalorder %v4001_v56, %v16577_v57  ;;  %vm16781_vm12 = vmpackc.low %vm5802_vm9, %vm5738_vm8  ;;  %v2947_v56 = vld [vmem:[#allocation2 + $0x640] sm:$0xff] }
 0x49c   : > { %vm16767_vm10 = vmpackc.low %vm5673_vm4, %vm5609_vm3  ;;  %vm4460_vm4 = vcmp.eq.s32.totalorder %v2788_v63, %v16795_v29  ;;  %v3171_v27 = vld [vmem:[#allocation2 + $0xd40] sm:$0xff]  ;;  %v3396_v63 = vld [vmem:[#allocation2 + $0x1448] sm:$0xff] }
 0x4a1   : > { %12415 = vmatpush1.bf16.xpose.msk.msra.mxu1 %vm16719_vm11, %v14140_v48  ;;  %vm16774_vm11 = vmpackc.low %vm5770_vm6, %vm5706_vm5  ;;  %vm4524_vm5 = vcmp.eq.s32.totalorder %v2852_v14, %v16795_v29  ;;  %v3460_v14 = vld [vmem:[#allocation2 + $0x1648] sm:$0xff] }
 0x4a2   : > { %13119 = vmatpush1.bf16.xpose.msk.msra.mxu0 %vm16729_vm14, %v14140_v48  ;;  %12417 = vmatprep.subr.msk.bf16.mxu1 %vm16737_vm15, %v14140_v48  ;;  %vm5769_vm14 = vcmp.eq.s32.totalorder %v4097_v3, %v16573_v40  ;;  %vm5737_vm15 = vcmp.eq.s32.totalorder %v4065_v43, %v16577_v57  ;;  %v16821_v40 = vrot.slane %v16772_v51, %v15906_v33  ;;  %vm13128_vm8 = vmpackc.low %vm4524_vm5, %vm4460_vm4  ;;  %v3235_v3 = vld [vmem:[#allocation2 + $0xf40] sm:$0xff]  ;;  %v3332_v43 = vld [vmem:[#allocation2 + $0x1248] sm:$0xff] }
 0x4a3   : > { %13121 = vmatprep.subr.msk.bf16.mxu0 %vm13120_vm0, %v14140_v48  ;;  %vm5801_vm0 = vcmp.eq.s32.totalorder %v4129_v53, %v16577_v57  ;;  %vm12422_vm3 = vmpackc.low %vm5769_vm14, %vm5705_vm13  ;;  %v2755_v57 = vld [vmem:[#allocation2 + $0x40] sm:$0xff]  ;;  %vm4556_vm13 = vcmp.eq.s32.totalorder %v2884_v16, %v16787_v4  ;;  %vm4620_vm14 = vcmp.eq.s32.totalorder %v2948_v35, %v16787_v4  ;;  %v3300_v53 = vld [vmem:[#allocation2 + $0x1148] sm:$0xff] }
 0x4a4   : > { %vm13126_vm6 = vmpackc.low %vm5801_vm0, %vm5737_vm15  ;;  %vm4427_vm9 = vcmp.eq.s32.totalorder %v2755_v57, %v16821_v40  ;;  %vm4588_vm0 = vcmp.eq.s32.totalorder %v2916_v6, %v16795_v29  ;;  %vm4555_vm5 = vcmp.eq.s32.totalorder %v2883_v55, %v16821_v40  ;;  %v3428_v57 = vld [vmem:[#allocation2 + $0x1548] sm:$0xff]  ;;  %v3427_v16 = vld [vmem:[#allocation2 + $0x1540] sm:$0xff] }
 0x4a5   : > { %v3491_v35 = vld [vmem:[#allocation2 + $0x1740] sm:$0xff]  ;;  %v3524_v6 = vld [vmem:[#allocation2 + $0x1848] sm:$0xff] }
 0x4a6   : > { %v3555_v55 = vld [vmem:[#allocation2 + $0x1940] sm:$0xff] }
 0x4a9   : > { %12419 = vmatpush1.bf16.xpose.msk.msra.mxu1 %vm16759_vm7, %v14140_v48  ;;  %vm12424_vm7 = vmpackc.low %vm4492_vm2, %vm4428_vm1  ;;  %vm4652_vm1 = vcmp.eq.s32.totalorder %v2980_v41, %v16795_v29  ;;  %v3588_v41 = vld [vmem:[#allocation2 + $0x1a48] sm:$0xff] }
 0x4aa   : > { %13123 = vmatpush1.bf16.xpose.msk.msra.mxu0 %vm16767_vm10, %v14140_v48  ;;  %12421 = vmatprep.subr.msk.bf16.mxu1 %vm16774_vm11, %v14140_v48  ;;  %vm4491_vm10 = vcmp.eq.s32.totalorder %v2819_v18, %v16821_v40  ;;  %vm4459_vm11 = vcmp.eq.s32.totalorder %v2787_v23, %v16825_v22  ;;  %vm13132_vm4 = vmpackc.low %vm4652_vm1, %vm4588_vm0  ;;  %vm4683_vm1 = vcmp.eq.s32.totalorder %v3011_v26, %v16821_v40  ;;  %v3492_v18 = vld [vmem:[#allocation2 + $0x1748] sm:$0xff]  ;;  %v3395_v23 = vld [vmem:[#allocation2 + $0x1440] sm:$0xff] }
 0x4ab   : > { %13125 = vmatprep.subr.msk.bf16.mxu0 %vm16781_vm12, %v14140_v48  ;;  %vm4523_vm12 = vcmp.eq.s32.totalorder %v2851_v24, %v16825_v22  ;;  %vm12426_vm15 = vmpackc.low %vm4491_vm10, %vm4427_vm9  ;;  %vm4684_vm9 = vcmp.eq.s32.totalorder %v3012_v59, %v16787_v4  ;;  %vm4748_vm10 = vcmp.eq.s32.totalorder %v3076_v1, %v16787_v4  ;;  %v3459_v24 = vld [vmem:[#allocation2 + $0x1640] sm:$0xff]  ;;  %v3780_v26 = vld [vmem:[#allocation2 + $0x2048] sm:$0xff] }
 0x4ac   : > { %vm13130_vm2 = vmpackc.low %vm4523_vm12, %vm4459_vm11  ;;  %vm4716_vm12 = vcmp.eq.s32.totalorder %v3044_v31, %v16795_v29  ;;  %v3651_v59 = vld [vmem:[#allocation2 + $0x1c40] sm:$0xff] }
 0x4ad   : > { %v3715_v1 = vld [vmem:[#allocation2 + $0x1e40] sm:$0xff] }
 0x4ae   : > { %v3683_v31 = vld [vmem:[#allocation2 + $0x1d40] sm:$0xff] }
 0x4b1   : > { %12423 = vmatpush1.bf16.xpose.msk.msra.mxu1 %vm12422_vm3, %v14140_v48  ;;  %vm12428_vm3 = vmpackc.low %vm4620_vm14, %vm4556_vm13  ;;  %vm4780_vm13 = vcmp.eq.s32.totalorder %v3108_v45, %v16795_v29  ;;  %v3747_v45 = vld [vmem:[#allocation2 + $0x1f40] sm:$0xff] }
 0x4b2   : > { %13127 = vmatpush1.bf16.xpose.msk.msra.mxu0 %vm13126_vm6, %v14140_v48  ;;  %12425 = vmatprep.subr.msk.bf16.mxu1 %vm12424_vm7, %v14140_v48  ;;  %vm4619_vm6 = vcmp.eq.s32.totalorder %v2947_v56, %v16821_v40  ;;  %vm4587_vm7 = vcmp.eq.s32.totalorder %v2915_v42, %v16825_v22  ;;  %vm13136_vm0 = vmpackc.low %vm4780_vm13, %vm4716_vm12  ;;  %vm4811_vm13 = vcmp.eq.s32.totalorder %v3139_v44, %v16821_v40  ;;  %v3619_v56 = vld [vmem:[#allocation2 + $0x1b40] sm:$0xff]  ;;  %v3716_v42 = vld [vmem:[#allocation2 + $0x1e48] sm:$0xff] }
 0x4b3   : > { %13129 = vmatprep.subr.msk.bf16.mxu0 %vm13128_vm8, %v14140_v48  ;;  %vm4651_vm8 = vcmp.eq.s32.totalorder %v2979_v36, %v16825_v22  ;;  %vm12430_vm11 = vmpackc.low %vm4619_vm6, %vm4555_vm5  ;;  %vm4812_vm5 = vcmp.eq.s32.totalorder %v3140_v62, %v16787_v4  ;;  %vm4876_vm6 = vcmp.eq.s32.totalorder %v3204_v0, %v16787_v4  ;;  %v3684_v36 = vld [vmem:[#allocation2 + $0x1d48] sm:$0xff]  ;;  %v3779_v62 = vld [vmem:[#allocation2 + $0x2040] sm:$0xff] }
 0x4b4   : > { %vm13134_vm14 = vmpackc.low %vm4651_vm8, %vm4587_vm7  ;;  %vm4844_vm8 = vcmp.eq.s32.totalorder %v3172_v37, %v16795_v29  ;;  %v3843_v0 = vld [vmem:[#allocation2 + $0x2240] sm:$0xff]  ;;  %v3908_v44 = vld [vmem:[#allocation2 + $0x2448] sm:$0xff] }
 0x4b5   : > { %v3811_v37 = vld [vmem:[#allocation2 + $0x2140] sm:$0xff] }
 0x4b8   : > { %9504 = vmatmul.mubr.bf16.vlgmr.msra.gmra.mrb[0].mxu1 %v2689_v19  ;;  %v3620_v19 = vld [vmem:[#allocation2 + $0x1b48] sm:$0xff] }
 0x4b9   : > { %12427 = vmatpush1.bf16.xpose.msk.msra.mxu1 %vm12426_vm15, %v14140_v48  ;;  %10160 = vmatmul.mubr.bf16.vlgmr.msra.gmra.mrb[0].mxu0 %v2721_v54  ;;  %vm12432_vm15 = vmpackc.low %vm4748_vm10, %vm4684_vm9  ;;  %vm4908_vm9 = vcmp.eq.s32.totalorder %v3236_v38, %v16795_v29  ;;  %v3587_v54 = vld [vmem:[#allocation2 + $0x1a40] sm:$0xff] }
 0x4ba   : > { %13131 = vmatpush1.bf16.xpose.msk.msra.mxu0 %vm13130_vm2, %v14140_v48  ;;  %12429 = vmatprep.subr.msk.bf16.mxu1 %vm12428_vm3, %v14140_v48  ;;  %vm4747_vm2 = vcmp.eq.s32.totalorder %v3075_v60, %v16821_v40  ;;  %vm4715_vm3 = vcmp.eq.s32.totalorder %v3043_v7, %v16825_v22  ;;  %vm13140_vm12 = vmpackc.low %vm4908_vm9, %vm4844_vm8  ;;  %vm4939_vm9 = vcmp.eq.s32.totalorder %v3267_v9, %v16821_v40  ;;  %v3844_v60 = vld [vmem:[#allocation2 + $0x2248] sm:$0xff]  ;;  %v3875_v38 = vld [vmem:[#allocation2 + $0x2340] sm:$0xff] }
 0x4bb   : > { %13133 = vmatprep.subr.msk.bf16.mxu0 %vm13132_vm4, %v14140_v48  ;;  %9544 = vmatprep.mubr.bf16.mxu1 %v2692_v58  ;;  %vm4779_vm4 = vcmp.eq.s32.totalorder %v3107_v61, %v16825_v22  ;;  %vm12434_vm7 = vmpackc.low %vm4747_vm2, %vm4683_vm1  ;;  %vm4940_vm1 = vcmp.eq.s32.totalorder %v3268_v5, %v16787_v4  ;;  %vm5004_vm2 = vcmp.eq.s32.totalorder %v3332_v43, %v16787_v4  ;;  %v3652_v58 = vld [vmem:[#allocation2 + $0x1c48] sm:$0xff]  ;;  %v3907_v5 = vld [vmem:[#allocation2 + $0x2440] sm:$0xff] }
 0x4bc   : > { %10200 = vmatprep.mubr.bf16.mxu0 %v2724_v39  ;;  %vm13138_vm10 = vmpackc.low %vm4779_vm4, %vm4715_vm3  ;;  %vm4972_vm4 = vcmp.eq.s32.totalorder %v3300_v53, %v16795_v29  ;;  %v3748_v39 = vld [vmem:[#allocation2 + $0x1f48] sm:$0xff]  ;;  %v3971_v43 = vld [vmem:[#allocation2 + $0x2640] sm:$0xff] }
 0x4bd   : > { %v3812_v7 = vld [vmem:[#allocation2 + $0x2148] sm:$0xff]  ;;  %v3939_v53 = vld [vmem:[#allocation2 + $0x2540] sm:$0xff] }
 0x4be   : > { %v3876_v61 = vld [vmem:[#allocation2 + $0x2348] sm:$0xff] }
 0x4bf   : > { %v4036_v9 = vld [vmem:[#allocation2 + $0x2848] sm:$0xff] }
 0x4c1   : > { %12431 = vmatpush1.bf16.xpose.msk.msra.mxu1 %vm12430_vm11, %v14140_v48  ;;  %vm12436_vm11 = vmpackc.low %vm4876_vm6, %vm4812_vm5  ;;  %vm5036_vm5 = vcmp.eq.s32.totalorder %v3364_v8, %v16795_v29  ;;  %v4003_v8 = vld [vmem:[#allocation2 + $0x2740] sm:$0xff] }
 0x4c2   : > { %13135 = vmatpush1.bf16.xpose.msk.msra.mxu0 %vm13134_vm14, %v14140_v48  ;;  %12433 = vmatprep.subr.msk.bf16.mxu1 %vm12432_vm15, %v14140_v48  ;;  %vm4875_vm14 = vcmp.eq.s32.totalorder %v3203_v2, %v16821_v40  ;;  %vm4843_vm15 = vcmp.eq.s32.totalorder %v3171_v27, %v16825_v22  ;;  %vm13144_vm8 = vmpackc.low %vm5036_vm5, %vm4972_vm4  ;;  %vm5067_vm5 = vcmp.eq.s32.totalorder %v3395_v23, %v16821_v40  ;;  %v3972_v2 = vld [vmem:[#allocation2 + $0x2648] sm:$0xff] }
 0x4c3   : > { %13137 = vmatprep.subr.msk.bf16.mxu0 %vm13136_vm0, %v14140_v48  ;;  %vm4907_vm0 = vcmp.eq.s32.totalorder %v3235_v3, %v16825_v22  ;;  %vm12438_vm3 = vmpackc.low %vm4875_vm14, %vm4811_vm13  ;;  %vm5068_vm13 = vcmp.eq.s32.totalorder %v3396_v63, %v16787_v4  ;;  %vm5132_vm14 = vcmp.eq.s32.totalorder %v3460_v14, %v16787_v4  ;;  %v3940_v27 = vld [vmem:[#allocation2 + $0x2548] sm:$0xff]  ;;  %v4035_v63 = vld [vmem:[#allocation2 + $0x2840] sm:$0xff]  ;;  %v16965_v23 = vrot.slane %v16772_v51, %v15994_v21 }
 0x4c4   : > { %vm13142_vm6 = vmpackc.low %vm4907_vm0, %vm4843_vm15  ;;  %vm5100_vm0 = vcmp.eq.s32.totalorder %v3428_v57, %v16795_v29  ;;  %v4004_v3 = vld [vmem:[#allocation2 + $0x2748] sm:$0xff]  ;;  %v4099_v14 = vld [vmem:[#allocation2 + $0x2a40] sm:$0xff] }
 0x4c5   : > { %v4067_v57 = vld [vmem:[#allocation2 + $0x2940] sm:$0xff] }
 0x4c9   : > { %12435 = vmatpush1.bf16.xpose.msk.msra.mxu1 %vm12434_vm7, %v14140_v48  ;;  %vm12440_vm7 = vmpackc.low %vm5004_vm2, %vm4940_vm1  ;;  %vm5164_vm1 = vcmp.eq.s32.totalorder %v3492_v18, %v16795_v29  ;;  %v4131_v18 = vld [vmem:[#allocation2 + $0x2b40] sm:$0xff] }
 0x4ca   : > { %13139 = vmatpush1.bf16.xpose.msk.msra.mxu0 %vm13138_vm10, %v14140_v48  ;;  %12437 = vmatprep.subr.msk.bf16.mxu1 %vm12436_vm11, %v14140_v48  ;;  %vm5003_vm10 = vcmp.eq.s32.totalorder %v3331_v28, %v16821_v40  ;;  %vm4971_vm11 = vcmp.eq.s32.totalorder %v3299_v12, %v16825_v22  ;;  %vm13148_vm4 = vmpackc.low %vm5164_vm1, %vm5100_vm0  ;;  %vm5195_vm1 = vcmp.eq.s32.totalorder %v3523_v32, %v16821_v40  ;;  %v4100_v28 = vld [vmem:[#allocation2 + $0x2a48] sm:$0xff]  ;;  %v2853_v32 = vld [vmem:[#allocation2 + $0x350] sm:$0xff] }
 0x4cb   : > { %13141 = vmatprep.subr.msk.bf16.mxu0 %vm13140_vm12, %v14140_v48  ;;  %vm5035_vm12 = vcmp.eq.s32.totalorder %v3363_v13, %v16825_v22  ;;  %vm12442_vm15 = vmpackc.low %vm5003_vm10, %vm4939_vm9  ;;  %vm5196_vm9 = vcmp.eq.s32.totalorder %v3524_v6, %v16787_v4  ;;  %vm5260_vm10 = vcmp.eq.s32.totalorder %v3588_v41, %v16787_v4  ;;  %v4068_v12 = vld [vmem:[#allocation2 + $0x2948] sm:$0xff]  ;;  %v2381_v6 = vcombine.high %v16811_v15, %v16811_v15  ;;  %v2821_v15 = vld [vmem:[#allocation2 + $0x250] sm:$0xff] }
 0x4cc   : > { %vm13146_vm2 = vmpackc.low %vm5035_vm12, %vm4971_vm11  ;;  %vm5228_vm12 = vcmp.eq.s32.totalorder %v3556_v52, %v16795_v29  ;;  %v4132_v13 = vld [vmem:[#allocation2 + $0x2b48] sm:$0xff]  ;;  %v2517_v41 = vcombine.high %v16815_v17, %v16815_v17  ;;  %v16993_v52 = vrot.slane %v16779_v10, %v15991_v20  ;;  %v2789_v17 = vld [vmem:[#allocation2 + $0x150] sm:$0xff] }
 0x4d1   : > { %12439 = vmatpush1.bf16.xpose.msk.msra.mxu1 %vm12438_vm3, %v14140_v48  ;;  %vm12444_vm3 = vmpackc.low %vm5132_vm14, %vm5068_vm13  ;;  %vm5292_vm13 = vcmp.eq.s32.totalorder %v3620_v19, %v16795_v29  ;;  %v16996_v19 = vrot.slane %v2381_v6, %v16005_v25  ;;  %v3397_v6 = vld [vmem:[#allocation2 + $0x1450] sm:$0xff] }
 0x4d2   : > { %13143 = vmatpush1.bf16.xpose.msk.msra.mxu0 %vm13142_vm6, %v14140_v48  ;;  %12441 = vmatprep.subr.msk.bf16.mxu1 %vm12440_vm7, %v14140_v48  ;;  %vm5131_vm6 = vcmp.eq.s32.totalorder %v3459_v24, %v16821_v40  ;;  %vm5099_vm7 = vcmp.eq.s32.totalorder %v3427_v16, %v16825_v22  ;;  %vm13152_vm0 = vmpackc.low %vm5292_vm13, %vm5228_vm12  ;;  %vm5323_vm13 = vcmp.eq.s32.totalorder %v3651_v59, %v16821_v40  ;;  %v2758_v24 = vld [vmem:[#allocation2 + $0x58] sm:$0xff]  ;;  %v2885_v59 = vld [vmem:[#allocation2 + $0x450] sm:$0xff] }
 0x4d3   : > { %13145 = vmatprep.subr.msk.bf16.mxu0 %vm13144_vm8, %v14140_v48  ;;  %vm5163_vm8 = vcmp.eq.s32.totalorder %v3491_v35, %v16825_v22  ;;  %vm12446_vm11 = vmpackc.low %vm5131_vm6, %vm5067_vm5  ;;  %vm5324_vm5 = vcmp.eq.s32.totalorder %v3652_v58, %v16787_v4  ;;  %vm5388_vm6 = vcmp.eq.s32.totalorder %v3716_v42, %v16787_v4  ;;  %v16970_v16 = vrot.slane %v16779_v10, %v15994_v21  ;;  %v2854_v35 = vld [vmem:[#allocation2 + $0x358] sm:$0xff] }
 0x4d4   : > { %vm13150_vm14 = vmpackc.low %vm5163_vm8, %vm5099_vm7  ;;  %vm5356_vm8 = vcmp.eq.s32.totalorder %v3684_v36, %v16795_v29  ;;  %v2918_v10 = vld [vmem:[#allocation2 + $0x558] sm:$0xff]  ;;  %v2397_v58 = vcombine.high %v16996_v19, %v16996_v19  ;;  %v2691_v42 = vpack.c.bf16 %v16829_v11, %v16829_v11 }
 0x4d6   : > { %v2694_v11 = vpack.c.bf16 %v2397_v58, %v2397_v58  ;;  %v3557_v58 = vld [vmem:[#allocation2 + $0x1950] sm:$0xff] }
 0x4d9   : > { %12443 = vmatpush1.bf16.xpose.msk.msra.mxu1 %vm12442_vm15, %v14140_v48  ;;  %vm12448_vm15 = vmpackc.low %vm5260_vm10, %vm5196_vm9  ;;  %vm5420_vm9 = vcmp.eq.s32.totalorder %v3748_v39, %v16795_v29  ;;  %v2723_v39 = vpack.c.bf16 %v16833_v34, %v16833_v34  ;;  %v3046_v34 = vld [vmem:[#allocation2 + $0x958] sm:$0xff] }
 0x4da   : > { %13147 = vmatpush1.bf16.xpose.msk.msra.mxu0 %vm13146_vm2, %v14140_v48  ;;  %12445 = vmatprep.subr.msk.bf16.mxu1 %vm12444_vm3, %v14140_v48  ;;  %vm5259_vm2 = vcmp.eq.s32.totalorder %v3587_v54, %v16821_v40  ;;  %vm5227_vm3 = vcmp.eq.s32.totalorder %v3555_v55, %v16825_v22  ;;  %vm13156_vm12 = vmpackc.low %vm5420_vm9, %vm5356_vm8  ;;  %vm5451_vm9 = vcmp.eq.s32.totalorder %v3779_v62, %v16821_v40  ;;  %v2950_v55 = vld [vmem:[#allocation2 + $0x658] sm:$0xff]  ;;  %v3013_v62 = vld [vmem:[#allocation2 + $0x850] sm:$0xff] }
 0x4db   : > { %13149 = vmatprep.subr.msk.bf16.mxu0 %vm13148_vm4, %v14140_v48  ;;  %vm5291_vm4 = vcmp.eq.s32.totalorder %v3619_v56, %v16825_v22  ;;  %vm12450_vm7 = vmpackc.low %vm5259_vm2, %vm5195_vm1  ;;  %vm5452_vm1 = vcmp.eq.s32.totalorder %v3780_v26, %v16787_v4  ;;  %vm5516_vm2 = vcmp.eq.s32.totalorder %v3844_v60, %v16787_v4  ;;  %v16999_v54 = vrot.slane %v2517_v41, %v16005_v25  ;;  %v2982_v56 = vld [vmem:[#allocation2 + $0x758] sm:$0xff]  ;;  %v3461_v41 = vld [vmem:[#allocation2 + $0x1650] sm:$0xff] }
 0x4dc   : > { %vm13154_vm10 = vmpackc.low %vm5291_vm4, %vm5227_vm3  ;;  %vm5484_vm4 = vcmp.eq.s32.totalorder %v3812_v7, %v16795_v29  ;;  %v3014_v60 = vld [vmem:[#allocation2 + $0x858] sm:$0xff] }
 0x4dd   : > { %v2533_v36 = vcombine.high %v16999_v54, %v16999_v54  ;;  %v3078_v7 = vld [vmem:[#allocation2 + $0xa58] sm:$0xff] }
 0x4df   : > { %v2726_v26 = vpack.c.bf16 %v2533_v36, %v2533_v36  ;;  %v3654_v36 = vld [vmem:[#allocation2 + $0x1c58] sm:$0xff] }
 0x4e1   : > { %12447 = vmatpush1.bf16.xpose.msk.msra.mxu1 %vm12446_vm11, %v14140_v48  ;;  %vm12452_vm11 = vmpackc.low %vm5388_vm6, %vm5324_vm5  ;;  %vm5548_vm5 = vcmp.eq.s32.totalorder %v3876_v61, %v16795_v29  ;;  %v3110_v61 = vld [vmem:[#allocation2 + $0xb58] sm:$0xff] }
 0x4e2   : > { %13151 = vmatpush1.bf16.xpose.msk.msra.mxu0 %vm13150_vm14, %v14140_v48  ;;  %12449 = vmatprep.subr.msk.bf16.mxu1 %vm12448_vm15, %v14140_v48  ;;  %vm5387_vm14 = vcmp.eq.s32.totalorder %v3715_v1, %v16821_v40  ;;  %vm5355_vm15 = vcmp.eq.s32.totalorder %v3683_v31, %v16825_v22  ;;  %vm13160_vm8 = vmpackc.low %vm5548_vm5, %vm5484_vm4  ;;  %vm5579_vm5 = vcmp.eq.s32.totalorder %v3907_v5, %v16821_v40  ;;  %v2949_v1 = vld [vmem:[#allocation2 + $0x650] sm:$0xff] }
 0x4e3   : > { %13153 = vmatprep.subr.msk.bf16.mxu0 %vm13152_vm0, %v14140_v48  ;;  %vm5419_vm0 = vcmp.eq.s32.totalorder %v3747_v45, %v16825_v22  ;;  %vm12454_vm3 = vmpackc.low %vm5387_vm14, %vm5323_vm13  ;;  %vm5580_vm13 = vcmp.eq.s32.totalorder %v3908_v44, %v16787_v4  ;;  %vm5644_vm14 = vcmp.eq.s32.totalorder %v3972_v2, %v16787_v4  ;;  %v2917_v31 = vld [vmem:[#allocation2 + $0x550] sm:$0xff]  ;;  %v3142_v44 = vld [vmem:[#allocation2 + $0xc58] sm:$0xff] }
 0x4e4   : > { %vm13158_vm6 = vmpackc.low %vm5419_vm0, %vm5355_vm15  ;;  %vm5612_vm0 = vcmp.eq.s32.totalorder %v3940_v27, %v16795_v29  ;;  %v2981_v45 = vld [vmem:[#allocation2 + $0x750] sm:$0xff]  ;;  %v3206_v2 = vld [vmem:[#allocation2 + $0xe58] sm:$0xff] }
 0x4e5   : > { %v3174_v27 = vld [vmem:[#allocation2 + $0xd58] sm:$0xff]  ;;  %v3141_v5 = vld [vmem:[#allocation2 + $0xc50] sm:$0xff] }
 0x4e9   : > { %12451 = vmatpush1.bf16.xpose.msk.msra.mxu1 %vm12450_vm7, %v14140_v48  ;;  %vm12456_vm7 = vmpackc.low %vm5516_vm2, %vm5452_vm1  ;;  %vm5676_vm1 = vcmp.eq.s32.totalorder %v4004_v3, %v16795_v29  ;;  %v3238_v3 = vld [vmem:[#allocation2 + $0xf58] sm:$0xff] }
 0x4ea   : > { %13155 = vmatpush1.bf16.xpose.msk.msra.mxu0 %vm13154_vm10, %v14140_v48  ;;  %12453 = vmatprep.subr.msk.bf16.mxu1 %vm12452_vm11, %v14140_v48  ;;  %vm5515_vm10 = vcmp.eq.s32.totalorder %v3843_v0, %v16821_v40  ;;  %vm5483_vm11 = vcmp.eq.s32.totalorder %v3811_v37, %v16825_v22  ;;  %vm13164_vm4 = vmpackc.low %vm5676_vm1, %vm5612_vm0  ;;  %vm5707_vm1 = vcmp.eq.s32.totalorder %v4035_v63, %v16821_v40  ;;  %v3077_v0 = vld [vmem:[#allocation2 + $0xa50] sm:$0xff] }
 0x4eb   : > { %13157 = vmatprep.subr.msk.bf16.mxu0 %vm13156_vm12, %v14140_v48  ;;  %vm5547_vm12 = vcmp.eq.s32.totalorder %v3875_v38, %v16825_v22  ;;  %vm12458_vm15 = vmpackc.low %vm5515_vm10, %vm5451_vm9  ;;  %vm5708_vm9 = vcmp.eq.s32.totalorder %v4036_v9, %v16787_v4  ;;  %vm5772_vm10 = vcmp.eq.s32.totalorder %v4100_v28, %v16787_v4  ;;  %v2822_v4 = vld [vmem:[#allocation2 + $0x258] sm:$0xff]  ;;  %v3045_v37 = vld [vmem:[#allocation2 + $0x950] sm:$0xff] }
 0x4ec   : > { %vm13162_vm2 = vmpackc.low %vm5547_vm12, %vm5483_vm11  ;;  %vm5740_vm12 = vcmp.eq.s32.totalorder %v4068_v12, %v16795_v29  ;;  %v3109_v38 = vld [vmem:[#allocation2 + $0xb50] sm:$0xff]  ;;  %v3270_v9 = vld [vmem:[#allocation2 + $0x1058] sm:$0xff] }
 0x4ed   : > { %v3334_v28 = vld [vmem:[#allocation2 + $0x1258] sm:$0xff]  ;;  %v3269_v63 = vld [vmem:[#allocation2 + $0x1050] sm:$0xff] }
 0x4ee   : > { %v3302_v12 = vld [vmem:[#allocation2 + $0x1158] sm:$0xff] }
 0x4f1   : > { %12455 = vmatpush1.bf16.xpose.msk.msra.mxu1 %vm12454_vm3, %v14140_v48  ;;  %vm12460_vm3 = vmpackc.low %vm5644_vm14, %vm5580_vm13  ;;  %vm5804_vm13 = vcmp.eq.s32.totalorder %v4132_v13, %v16795_v29  ;;  %v2790_v29 = vld [vmem:[#allocation2 + $0x158] sm:$0xff] }
 0x4f2   : > { %13159 = vmatpush1.bf16.xpose.msk.msra.mxu0 %vm13158_vm6, %v14140_v48  ;;  %12457 = vmatprep.subr.msk.bf16.mxu1 %vm12456_vm7, %v14140_v48  ;;  %vm5643_vm6 = vcmp.eq.s32.totalorder %v3971_v43, %v16821_v40  ;;  %vm5611_vm7 = vcmp.eq.s32.totalorder %v3939_v53, %v16825_v22  ;;  %vm13168_vm0 = vmpackc.low %vm5804_vm13, %vm5740_vm12  ;;  %v3205_v43 = vld [vmem:[#allocation2 + $0xe50] sm:$0xff]  ;;  %v3366_v13 = vld [vmem:[#allocation2 + $0x1358] sm:$0xff] }
 0x4f3   : > { %13161 = vmatprep.subr.msk.bf16.mxu0 %vm13160_vm8, %v14140_v48  ;;  %vm5675_vm8 = vcmp.eq.s32.totalorder %v4003_v8, %v16825_v22  ;;  %vm12462_vm11 = vmpackc.low %vm5643_vm6, %vm5579_vm5  ;;  %vm4430_vm5 = vcmp.eq.s32.totalorder %v2758_v24, %v16965_v23  ;;  %vm4494_vm6 = vcmp.eq.s32.totalorder %v2822_v4, %v16965_v23  ;;  %v3173_v53 = vld [vmem:[#allocation2 + $0xd50] sm:$0xff]  ;;  %v3398_v24 = vld [vmem:[#allocation2 + $0x1458] sm:$0xff] }
 0x4f4   : > { %vm13166_vm14 = vmpackc.low %vm5675_vm8, %vm5611_vm7  ;;  %vm4462_vm8 = vcmp.eq.s32.totalorder %v2790_v29, %v16970_v16  ;;  %v3237_v8 = vld [vmem:[#allocation2 + $0xf50] sm:$0xff]  ;;  %v3462_v4 = vld [vmem:[#allocation2 + $0x1658] sm:$0xff] }
 0x4f5   : > { %v3430_v29 = vld [vmem:[#allocation2 + $0x1558] sm:$0xff] }
 0x4f9   : > { %12459 = vmatpush1.bf16.xpose.msk.msra.mxu1 %vm12458_vm15, %v14140_v48  ;;  %vm12464_vm15 = vmpackc.low %vm5772_vm10, %vm5708_vm9  ;;  %vm4526_vm9 = vcmp.eq.s32.totalorder %v2854_v35, %v16970_v16  ;;  %v3494_v35 = vld [vmem:[#allocation2 + $0x1758] sm:$0xff] }
 0x4fa   : > { %13163 = vmatpush1.bf16.xpose.msk.msra.mxu0 %vm13162_vm2, %v14140_v48  ;;  %12461 = vmatprep.subr.msk.bf16.mxu1 %vm12460_vm3, %v14140_v48  ;;  %vm5771_vm2 = vcmp.eq.s32.totalorder %v4099_v14, %v16821_v40  ;;  %vm5739_vm3 = vcmp.eq.s32.totalorder %v4067_v57, %v16825_v22  ;;  %v16989_v40 = vrot.slane %v16772_v51, %v15991_v20  ;;  %vm13172_vm12 = vmpackc.low %vm4526_vm9, %vm4462_vm8  ;;  %v2886_v51 = vld [vmem:[#allocation2 + $0x458] sm:$0xff]  ;;  %v3333_v14 = vld [vmem:[#allocation2 + $0x1250] sm:$0xff] }
 0x4fb   : > { %13165 = vmatprep.subr.msk.bf16.mxu0 %vm13164_vm4, %v14140_v48  ;;  %vm5803_vm4 = vcmp.eq.s32.totalorder %v4131_v18, %v16825_v22  ;;  %vm12466_vm7 = vmpackc.low %vm5771_vm2, %vm5707_vm1  ;;  %v2757_v22 = vld [vmem:[#allocation2 + $0x50] sm:$0xff]  ;;  %vm4558_vm1 = vcmp.eq.s32.totalorder %v2886_v51, %v16965_v23  ;;  %vm4622_vm2 = vcmp.eq.s32.totalorder %v2950_v55, %v16965_v23  ;;  %v3558_v51 = vld [vmem:[#allocation2 + $0x1958] sm:$0xff] }
 0x4fc   : > { %vm13170_vm10 = vmpackc.low %vm5803_vm4, %vm5739_vm3  ;;  %vm4429_vm13 = vcmp.eq.s32.totalorder %v2757_v22, %v16989_v40  ;;  %vm4590_vm4 = vcmp.eq.s32.totalorder %v2918_v10, %v16970_v16  ;;  %vm4557_vm9 = vcmp.eq.s32.totalorder %v2885_v59, %v16989_v40  ;;  %v3301_v57 = vld [vmem:[#allocation2 + $0x1150] sm:$0xff]  ;;  %v3622_v55 = vld [vmem:[#allocation2 + $0x1b58] sm:$0xff] }
 0x4fd   : > { %v3365_v18 = vld [vmem:[#allocation2 + $0x1350] sm:$0xff]  ;;  %v3686_v59 = vld [vmem:[#allocation2 + $0x1d58] sm:$0xff] }
 0x4fe   : > { %v3429_v22 = vld [vmem:[#allocation2 + $0x1550] sm:$0xff] }
 0x4ff   : > { %v3525_v10 = vld [vmem:[#allocation2 + $0x1850] sm:$0xff] }
 0x501   : > { %12463 = vmatpush1.bf16.xpose.msk.msra.mxu1 %vm12462_vm11, %v14140_v48  ;;  %vm12468_vm11 = vmpackc.low %vm4494_vm6, %vm4430_vm5  ;;  %vm4654_vm5 = vcmp.eq.s32.totalorder %v2982_v56, %v16970_v16  ;;  %v3589_v56 = vld [vmem:[#allocation2 + $0x1a50] sm:$0xff] }
 0x502   : > { %13167 = vmatpush1.bf16.xpose.msk.msra.mxu0 %vm13166_vm14, %v14140_v48  ;;  %12465 = vmatprep.subr.msk.bf16.mxu1 %vm12464_vm15, %v14140_v48  ;;  %vm4493_vm14 = vcmp.eq.s32.totalorder %v2821_v15, %v16989_v40  ;;  %vm4461_vm15 = vcmp.eq.s32.totalorder %v2789_v17, %v16993_v52  ;;  %vm13176_vm8 = vmpackc.low %vm4654_vm5, %vm4590_vm4  ;;  %vm4685_vm5 = vcmp.eq.s32.totalorder %v3013_v62, %v16989_v40  ;;  %v3493_v15 = vld [vmem:[#allocation2 + $0x1750] sm:$0xff]  ;;  %v3526_v17 = vld [vmem:[#allocation2 + $0x1858] sm:$0xff] }
 0x503   : > { %13169 = vmatprep.subr.msk.bf16.mxu0 %vm13168_vm0, %v14140_v48  ;;  %vm4525_vm0 = vcmp.eq.s32.totalorder %v2853_v32, %v16993_v52  ;;  %vm12470_vm3 = vmpackc.low %vm4493_vm14, %vm4429_vm13  ;;  %vm4686_vm13 = vcmp.eq.s32.totalorder %v3014_v60, %v16965_v23  ;;  %vm4750_vm14 = vcmp.eq.s32.totalorder %v3078_v7, %v16965_v23  ;;  %v3590_v32 = vld [vmem:[#allocation2 + $0x1a58] sm:$0xff]  ;;  %v3781_v62 = vld [vmem:[#allocation2 + $0x2050] sm:$0xff] }
 0x504   : > { %vm13174_vm6 = vmpackc.low %vm4525_vm0, %vm4461_vm15  ;;  %vm4718_vm0 = vcmp.eq.s32.totalorder %v3046_v34, %v16970_v16  ;;  %v3782_v60 = vld [vmem:[#allocation2 + $0x2058] sm:$0xff] }
 0x505   : > { %v3846_v7 = vld [vmem:[#allocation2 + $0x2258] sm:$0xff] }
 0x506   : > { %v3814_v34 = vld [vmem:[#allocation2 + $0x2158] sm:$0xff] }
 0x509   : > { %12467 = vmatpush1.bf16.xpose.msk.msra.mxu1 %vm12466_vm7, %v14140_v48  ;;  %vm12472_vm7 = vmpackc.low %vm4622_vm2, %vm4558_vm1  ;;  %vm4782_vm1 = vcmp.eq.s32.totalorder %v3110_v61, %v16970_v16  ;;  %v3878_v61 = vld [vmem:[#allocation2 + $0x2358] sm:$0xff] }
 0x50a   : > { %13171 = vmatpush1.bf16.xpose.msk.msra.mxu0 %vm13170_vm10, %v14140_v48  ;;  %12469 = vmatprep.subr.msk.bf16.mxu1 %vm12468_vm11, %v14140_v48  ;;  %vm4621_vm10 = vcmp.eq.s32.totalorder %v2949_v1, %v16989_v40  ;;  %vm4589_vm11 = vcmp.eq.s32.totalorder %v2917_v31, %v16993_v52  ;;  %vm13180_vm4 = vmpackc.low %vm4782_vm1, %vm4718_vm0  ;;  %vm4813_vm1 = vcmp.eq.s32.totalorder %v3141_v5, %v16989_v40  ;;  %v3750_v1 = vld [vmem:[#allocation2 + $0x1f58] sm:$0xff]  ;;  %v3717_v31 = vld [vmem:[#allocation2 + $0x1e50] sm:$0xff] }
 0x50b   : > { %13173 = vmatprep.subr.msk.bf16.mxu0 %vm13172_vm12, %v14140_v48  ;;  %vm4653_vm12 = vcmp.eq.s32.totalorder %v2981_v45, %v16993_v52  ;;  %vm12474_vm15 = vmpackc.low %vm4621_vm10, %vm4557_vm9  ;;  %vm4814_vm9 = vcmp.eq.s32.totalorder %v3142_v44, %v16965_v23  ;;  %vm4878_vm10 = vcmp.eq.s32.totalorder %v3206_v2, %v16965_v23  ;;  %v3685_v45 = vld [vmem:[#allocation2 + $0x1d50] sm:$0xff]  ;;  %v3910_v44 = vld [vmem:[#allocation2 + $0x2458] sm:$0xff] }
 0x50c   : > { %vm13178_vm2 = vmpackc.low %vm4653_vm12, %vm4589_vm11  ;;  %vm4846_vm12 = vcmp.eq.s32.totalorder %v3174_v27, %v16970_v16  ;;  %v3974_v2 = vld [vmem:[#allocation2 + $0x2658] sm:$0xff]  ;;  %v13906_v5 = vld [vmem:[%s14405_s7 + $0x8] sm:$0xff] }
 0x50d   : > { %v3942_v27 = vld [vmem:[#allocation2 + $0x2558] sm:$0xff] }
 0x510   : > { %9545 = vmatmul.mubr.bf16.vlgmr.msra.gmra.mrb[0].mxu1 %v2691_v42  ;;  %v3621_v42 = vld [vmem:[#allocation2 + $0x1b50] sm:$0xff] }
 0x511   : > { %12471 = vmatpush1.bf16.xpose.msk.msra.mxu1 %vm12470_vm3, %v14140_v48  ;;  %10201 = vmatmul.mubr.bf16.vlgmr.msra.gmra.mrb[0].mxu0 %v2723_v39  ;;  %vm12476_vm3 = vmpackc.low %vm4750_vm14, %vm4686_vm13  ;;  %vm4910_vm13 = vcmp.eq.s32.totalorder %v3238_v3, %v16970_v16  ;;  %v3718_v39 = vld [vmem:[#allocation2 + $0x1e58] sm:$0xff] }
 0x512   : > { %13175 = vmatpush1.bf16.xpose.msk.msra.mxu0 %vm13174_vm6, %v14140_v48  ;;  %12473 = vmatprep.subr.msk.bf16.mxu1 %vm12472_vm7, %v14140_v48  ;;  %vm4749_vm6 = vcmp.eq.s32.totalorder %v3077_v0, %v16989_v40  ;;  %vm4717_vm7 = vcmp.eq.s32.totalorder %v3045_v37, %v16993_v52  ;;  %vm13184_vm0 = vmpackc.low %vm4910_vm13, %vm4846_vm12  ;;  %vm4941_vm13 = vcmp.eq.s32.totalorder %v3269_v63, %v16989_v40  ;;  %v3845_v0 = vld [vmem:[#allocation2 + $0x2250] sm:$0xff]  ;;  %v4006_v3 = vld [vmem:[#allocation2 + $0x2758] sm:$0xff] }
 0x513   : > { %13177 = vmatprep.subr.msk.bf16.mxu0 %vm13176_vm8, %v14140_v48  ;;  %9585 = vmatprep.mubr.bf16.mxu1 %v2694_v11  ;;  %vm4781_vm8 = vcmp.eq.s32.totalorder %v3109_v38, %v16993_v52  ;;  %vm12478_vm11 = vmpackc.low %vm4749_vm6, %vm4685_vm5  ;;  %vm4942_vm5 = vcmp.eq.s32.totalorder %v3270_v9, %v16965_v23  ;;  %vm5006_vm6 = vcmp.eq.s32.totalorder %v3334_v28, %v16965_v23  ;;  %v3653_v11 = vld [vmem:[#allocation2 + $0x1c50] sm:$0xff]  ;;  %v13907_v28 = vld [vmem:[%s14405_s7 + $0x28] sm:$0xff] }
 0x514   : > { %10241 = vmatprep.mubr.bf16.mxu0 %v2726_v26  ;;  %vm13182_vm14 = vmpackc.low %vm4781_vm8, %vm4717_vm7  ;;  %vm4974_vm8 = vcmp.eq.s32.totalorder %v3302_v12, %v16970_v16  ;;  %v3749_v26 = vld [vmem:[#allocation2 + $0x1f50] sm:$0xff]  ;;  %v1834_v9 = vrot.slane %v13906_v5, %v16289_v47  ;;  %v1950_v12 = vrot.slane %v13907_v28, %v16299_v50  ;;  %v1958_v63 = vrot.slane %v13907_v28, %v16286_v46 }
 0x515   : > { %v3813_v37 = vld [vmem:[#allocation2 + $0x2150] sm:$0xff] }
 0x516   : > { %v3877_v38 = vld [vmem:[#allocation2 + $0x2350] sm:$0xff] }
 0x519   : > { %12475 = vmatpush1.bf16.xpose.msk.msra.mxu1 %vm12474_vm15, %v14140_v48  ;;  %vm12480_vm15 = vmpackc.low %vm4878_vm10, %vm4814_vm9  ;;  %vm5038_vm9 = vcmp.eq.s32.totalorder %v3366_v13, %v16970_v16  ;;  %v1954_v13 = vrot.slane %v13907_v28, %v16292_v49 }
 0x51a   : > { %13179 = vmatpush1.bf16.xpose.msk.msra.mxu0 %vm13178_vm2, %v14140_v48  ;;  %12477 = vmatprep.subr.msk.bf16.mxu1 %vm12476_vm3, %v14140_v48  ;;  %vm4877_vm2 = vcmp.eq.s32.totalorder %v3205_v43, %v16989_v40  ;;  %vm4845_vm3 = vcmp.eq.s32.totalorder %v3173_v53, %v16993_v52  ;;  %vm13188_vm12 = vmpackc.low %vm5038_vm9, %vm4974_vm8  ;;  %vm5069_vm9 = vcmp.eq.s32.totalorder %v3397_v6, %v16989_v40  ;;  %v4005_v6 = vld [vmem:[#allocation2 + $0x2750] sm:$0xff] }
 0x51b   : > { %13181 = vmatprep.subr.msk.bf16.mxu0 %vm13180_vm4, %v14140_v48  ;;  %vm4909_vm4 = vcmp.eq.s32.totalorder %v3237_v8, %v16993_v52  ;;  %vm12482_vm7 = vmpackc.low %vm4877_vm2, %vm4813_vm1  ;;  %vm5070_vm1 = vcmp.eq.s32.totalorder %v3398_v24, %v16965_v23  ;;  %vm5134_vm2 = vcmp.eq.s32.totalorder %v3462_v4, %v16965_v23  ;;  %v1822_v43 = vrot.slane %v13906_v5, %v16299_v50  ;;  %v3909_v24 = vld [vmem:[#allocation2 + $0x2450] sm:$0xff] }
 0x51c   : > { %vm13186_vm10 = vmpackc.low %vm4909_vm4, %vm4845_vm3  ;;  %vm5102_vm4 = vcmp.eq.s32.totalorder %v3430_v29, %v16970_v16  ;;  %v1826_v53 = vrot.slane %v13906_v5, %v16292_v49  ;;  %v1830_v8 = vrot.slane %v13906_v5, %v16286_v46  ;;  %v3973_v4 = vld [vmem:[#allocation2 + $0x2650] sm:$0xff]  ;;  %v2725_v29 = vpack.c.bf16 %v16999_v54, %v16999_v54  ;;  %v3048_v54 = vld [vmem:[#allocation2 + $0x968] sm:$0xff] }
 0x521   : > { %12479 = vmatpush1.bf16.xpose.msk.msra.mxu1 %vm12478_vm11, %v14140_v48  ;;  %vm12484_vm11 = vmpackc.low %vm5006_vm6, %vm4942_vm5  ;;  %vm5166_vm5 = vcmp.eq.s32.totalorder %v3494_v35, %v16970_v16  ;;  %v3941_v35 = vld [vmem:[#allocation2 + $0x2550] sm:$0xff] }
 0x522   : > { %13183 = vmatpush1.bf16.xpose.msk.msra.mxu0 %vm13182_vm14, %v14140_v48  ;;  %12481 = vmatprep.subr.msk.bf16.mxu1 %vm12480_vm15, %v14140_v48  ;;  %vm5005_vm14 = vcmp.eq.s32.totalorder %v3333_v14, %v16989_v40  ;;  %vm4973_vm15 = vcmp.eq.s32.totalorder %v3301_v57, %v16993_v52  ;;  %vm13192_vm8 = vmpackc.low %vm5166_vm5, %vm5102_vm4  ;;  %vm5197_vm5 = vcmp.eq.s32.totalorder %v3525_v10, %v16989_v40  ;;  %v4134_v10 = vld [vmem:[#allocation2 + $0x2b58] sm:$0xff]  ;;  %v2984_v57 = vld [vmem:[#allocation2 + $0x768] sm:$0xff] }
 0x523   : > { %13185 = vmatprep.subr.msk.bf16.mxu0 %vm13184_vm0, %v14140_v48  ;;  %vm5037_vm0 = vcmp.eq.s32.totalorder %v3365_v18, %v16993_v52  ;;  %vm12486_vm3 = vmpackc.low %vm5005_vm14, %vm4941_vm13  ;;  %vm5198_vm13 = vcmp.eq.s32.totalorder %v3526_v17, %v16965_v23  ;;  %vm5262_vm14 = vcmp.eq.s32.totalorder %v3590_v32, %v16965_v23  ;;  %v1962_v14 = vrot.slane %v13907_v28, %v16289_v47  ;;  %v4102_v17 = vld [vmem:[#allocation2 + $0x2a58] sm:$0xff]  ;;  %v2855_v28 = vld [vmem:[#allocation2 + $0x360] sm:$0xff] }
 0x524   : > { %vm13190_vm6 = vmpackc.low %vm5037_vm0, %vm4973_vm15  ;;  %vm5230_vm0 = vcmp.eq.s32.totalorder %v3558_v51, %v16970_v16  ;;  %v2214_v32 = vcombine.low %v1950_v12, %v1954_v13  ;;  %v2888_v13 = vld [vmem:[#allocation2 + $0x468] sm:$0xff] }
 0x525   : > { %v2215_v51 = vcombine.low %v1958_v63, %v1962_v14  ;;  %v2952_v63 = vld [vmem:[#allocation2 + $0x668] sm:$0xff] }
 0x526   : > { %v2920_v14 = vld [vmem:[#allocation2 + $0x568] sm:$0xff] }
 0x529   : > { %12483 = vmatpush1.bf16.xpose.msk.msra.mxu1 %vm12482_vm7, %v14140_v48  ;;  %vm12488_vm7 = vmpackc.low %vm5134_vm2, %vm5070_vm1  ;;  %vm5294_vm1 = vcmp.eq.s32.totalorder %v3622_v55, %v16970_v16  ;;  %v4070_v55 = vld [vmem:[#allocation2 + $0x2958] sm:$0xff] }
 0x52a   : > { %13187 = vmatpush1.bf16.xpose.msk.msra.mxu0 %vm13186_vm10, %v14140_v48  ;;  %12485 = vmatprep.subr.msk.bf16.mxu1 %vm12484_vm11, %v14140_v48  ;;  %vm5133_vm10 = vcmp.eq.s32.totalorder %v3461_v41, %v16989_v40  ;;  %vm5101_vm11 = vcmp.eq.s32.totalorder %v3429_v22, %v16993_v52  ;;  %vm13196_vm4 = vmpackc.low %vm5294_vm1, %vm5230_vm0  ;;  %vm5325_vm1 = vcmp.eq.s32.totalorder %v3653_v11, %v16989_v40  ;;  %v4037_v11 = vld [vmem:[#allocation2 + $0x2850] sm:$0xff] }
 0x52b   : > { %13189 = vmatprep.subr.msk.bf16.mxu0 %vm13188_vm12, %v14140_v48  ;;  %vm5165_vm12 = vcmp.eq.s32.totalorder %v3493_v15, %v16993_v52  ;;  %vm12490_vm15 = vmpackc.low %vm5133_vm10, %vm5069_vm9  ;;  %vm5326_vm9 = vcmp.eq.s32.totalorder %v3654_v36, %v16965_v23  ;;  %vm5390_vm10 = vcmp.eq.s32.totalorder %v3718_v39, %v16965_v23  ;;  %v2078_v41 = vcombine.low %v1822_v43, %v1826_v53  ;;  %v4038_v15 = vld [vmem:[#allocation2 + $0x2858] sm:$0xff]  ;;  %v2823_v43 = vld [vmem:[#allocation2 + $0x260] sm:$0xff] }
 0x52c   : > { %vm13194_vm2 = vmpackc.low %vm5165_vm12, %vm5101_vm11  ;;  %vm5358_vm12 = vcmp.eq.s32.totalorder %v3686_v59, %v16970_v16  ;;  %v2079_v22 = vcombine.low %v1830_v8, %v1834_v9  ;;  %v2222_v36 = vrot.slane %v2214_v32, %v16005_v25  ;;  %v2229_v39 = vrot.slane %v2215_v51, %v16005_v25  ;;  %v2791_v9 = vld [vmem:[#allocation2 + $0x160] sm:$0xff]  ;;  %v3080_v32 = vld [vmem:[#allocation2 + $0xa68] sm:$0xff] }
 0x52d   : > { %v3112_v51 = vld [vmem:[#allocation2 + $0xb68] sm:$0xff]  ;;  %v3143_v59 = vld [vmem:[#allocation2 + $0xc60] sm:$0xff] }
 0x531   : > { %12487 = vmatpush1.bf16.xpose.msk.msra.mxu1 %vm12486_vm3, %v14140_v48  ;;  %vm12492_vm3 = vmpackc.low %vm5262_vm14, %vm5198_vm13  ;;  %vm5422_vm13 = vcmp.eq.s32.totalorder %v3750_v1, %v16970_v16  ;;  %v3207_v1 = vld [vmem:[#allocation2 + $0xe60] sm:$0xff] }
 0x532   : > { %13191 = vmatpush1.bf16.xpose.msk.msra.mxu0 %vm13190_vm6, %v14140_v48  ;;  %12489 = vmatprep.subr.msk.bf16.mxu1 %vm12488_vm7, %v14140_v48  ;;  %vm5261_vm6 = vcmp.eq.s32.totalorder %v3589_v56, %v16989_v40  ;;  %vm5229_vm7 = vcmp.eq.s32.totalorder %v3557_v58, %v16993_v52  ;;  %vm13200_vm0 = vmpackc.low %vm5422_vm13, %vm5358_vm12  ;;  %vm5453_vm13 = vcmp.eq.s32.totalorder %v3781_v62, %v16989_v40  ;;  %v2760_v62 = vld [vmem:[#allocation2 + $0x68] sm:$0xff] }
 0x533   : > { %13193 = vmatprep.subr.msk.bf16.mxu0 %vm13192_vm8, %v14140_v48  ;;  %vm5293_vm8 = vcmp.eq.s32.totalorder %v3621_v42, %v16993_v52  ;;  %vm12494_vm11 = vmpackc.low %vm5261_vm6, %vm5197_vm5  ;;  %vm5454_vm5 = vcmp.eq.s32.totalorder %v3782_v60, %v16965_v23  ;;  %vm5518_vm6 = vcmp.eq.s32.totalorder %v3846_v7, %v16965_v23  ;;  %v2086_v56 = vrot.slane %v2078_v41, %v16005_v25  ;;  %v17190_v60 = vld [vmem:[%s14414_s1 + $0x8] sm:$0xff]  ;;  %v2919_v41 = vld [vmem:[#allocation2 + $0x560] sm:$0xff] }
 0x534   : > { %vm13198_vm14 = vmpackc.low %vm5293_vm8, %vm5229_vm7  ;;  %v2093_v58 = vrot.slane %v2079_v22, %v16005_v25  ;;  %v17194_v7 = vrot.slane %v17190_v60, %v16292_v49  ;;  %v2983_v22 = vld [vmem:[#allocation2 + $0x760] sm:$0xff]  ;;  %v3144_v42 = vld [vmem:[#allocation2 + $0xc68] sm:$0xff] }
 0x539   : > { %12491 = vmatpush1.bf16.xpose.msk.msra.mxu1 %vm12490_vm15, %v14140_v48  ;;  %vm12496_vm15 = vmpackc.low %vm5390_vm10, %vm5326_vm9  ;;  %vm5486_vm9 = vcmp.eq.s32.totalorder %v3814_v34, %v16970_v16  ;;  %vm5550_vm10 = vcmp.eq.s32.totalorder %v3878_v61, %v16970_v16  ;;  %v1742_v34 = vld [vmem:[%s14398_s6 + $0x18] sm:$0xff]  ;;  %v2230_v61 = vcombine.low %v2222_v36, %v2229_v39  ;;  %v3208_v36 = vld [vmem:[#allocation2 + $0xe68] sm:$0xff] }
 0x53a   : > { %13195 = vmatpush1.bf16.xpose.msk.msra.mxu0 %vm13194_vm2, %v14140_v48  ;;  %12493 = vmatprep.subr.msk.bf16.mxu1 %vm12492_vm3, %v14140_v48  ;;  %vm5389_vm2 = vcmp.eq.s32.totalorder %v3717_v31, %v16989_v40  ;;  %vm5357_vm3 = vcmp.eq.s32.totalorder %v3685_v45, %v16993_v52  ;;  %vm13204_vm12 = vmpackc.low %vm5550_vm10, %vm5486_vm9  ;;  %vm5581_vm9 = vcmp.eq.s32.totalorder %v3909_v24, %v16989_v40  ;;  %v4069_v45 = vld [vmem:[#allocation2 + $0x2950] sm:$0xff]  ;;  %v3176_v39 = vld [vmem:[#allocation2 + $0xd68] sm:$0xff] }
 0x53b   : > { %13197 = vmatprep.subr.msk.bf16.mxu0 %vm13196_vm4, %v14140_v48  ;;  %vm5421_vm4 = vcmp.eq.s32.totalorder %v3749_v26, %v16993_v52  ;;  %vm12498_vm7 = vmpackc.low %vm5389_vm2, %vm5325_vm1  ;;  %vm5582_vm1 = vcmp.eq.s32.totalorder %v3910_v44, %v16965_v23  ;;  %vm5646_vm2 = vcmp.eq.s32.totalorder %v3974_v2, %v16965_v23  ;;  %vm5645_vm10 = vcmp.eq.s32.totalorder %v3973_v4, %v16989_v40  ;;  %v4133_v26 = vld [vmem:[#allocation2 + $0x2b50] sm:$0xff]  ;;  %v1750_v44 = vld [vmem:[%s14398_s6 + $0x58] sm:$0xff] }
 0x53c   : > { %vm13202_vm8 = vmpackc.low %vm5421_vm4, %vm5357_vm3  ;;  %vm5614_vm4 = vcmp.eq.s32.totalorder %v3942_v27, %v16970_v16  ;;  %v2094_v31 = vcombine.low %v2086_v56, %v2093_v58  ;;  %v2792_v2 = vld [vmem:[#allocation2 + $0x168] sm:$0xff]  ;;  %v17225_v5 = vmul.f32 %v2230_v61, %v1750_v44  ;;  %v2693_v24 = vpack.c.bf16 %v16996_v19, %v16996_v19  ;;  %v3047_v56 = vld [vmem:[#allocation2 + $0x960] sm:$0xff] }
 0x53d   : > { %v2856_v27 = vld [vmem:[#allocation2 + $0x368] sm:$0xff]  ;;  %v3111_v58 = vld [vmem:[#allocation2 + $0xb60] sm:$0xff] }
 0x53e   : > { %v17243_v12 = vrot.slane %v17225_v5, %v16005_v25  ;;  %v3271_v61 = vld [vmem:[#allocation2 + $0x1060] sm:$0xff] }
 0x53f   : > { %v3367_v44 = vld [vmem:[#allocation2 + $0x1360] sm:$0xff] }
 0x540   : > { %v2549_v4 = vcombine.high %v17243_v12, %v17243_v12 }
 0x541   : > { %12495 = vmatpush1.bf16.xpose.msk.msra.mxu1 %vm12494_vm11, %v14140_v48  ;;  %vm12500_vm11 = vmpackc.low %vm5518_vm6, %vm5454_vm5  ;;  %vm5678_vm5 = vcmp.eq.s32.totalorder %v4006_v3, %v16970_v16  ;;  %v17221_v3 = vmul.f32 %v2094_v31, %v1742_v34  ;;  %v3272_v31 = vld [vmem:[#allocation2 + $0x1068] sm:$0xff] }
 0x542   : > { %13199 = vmatpush1.bf16.xpose.msk.msra.mxu0 %vm13198_vm14, %v14140_v48  ;;  %12497 = vmatprep.subr.msk.bf16.mxu1 %vm12496_vm15, %v14140_v48  ;;  %vm5517_vm14 = vcmp.eq.s32.totalorder %v3845_v0, %v16989_v40  ;;  %vm5485_vm15 = vcmp.eq.s32.totalorder %v3813_v37, %v16993_v52  ;;  %v2824_v0 = vld [vmem:[#allocation2 + $0x268] sm:$0xff] }
 0x543   : > { %13201 = vmatprep.subr.msk.bf16.mxu0 %vm13200_vm0, %v14140_v48  ;;  %vm5549_vm0 = vcmp.eq.s32.totalorder %v3877_v38, %v16993_v52  ;;  %vm17129_vm3 = vmpackc.low %vm5517_vm14, %vm5453_vm13  ;;  %vm5710_vm13 = vcmp.eq.s32.totalorder %v4038_v15, %v16965_v23  ;;  %vm5774_vm14 = vcmp.eq.s32.totalorder %v4102_v17, %v16965_v23  ;;  %v17201_v37 = vld [vmem:[%s14414_s1 + $0x28] sm:$0xff]  ;;  %v17239_v8 = vrot.slane %v17221_v3, %v16005_v25 }
 0x544   : > { %vm17139_vm6 = vmpackc.low %vm5549_vm0, %vm5485_vm15  ;;  %vm5742_vm0 = vcmp.eq.s32.totalorder %v4070_v55, %v16970_v16  ;;  %v17205_v38 = vrot.slane %v17201_v37, %v16292_v49  ;;  %v17235_v53 = vrot.slane %v17201_v37, %v16299_v50  ;;  %v2728_v15 = vpack.c.bf16 %v2549_v4, %v2549_v4  ;;  %v3016_v17 = vld [vmem:[#allocation2 + $0x868] sm:$0xff]  ;;  %v3015_v55 = vld [vmem:[#allocation2 + $0x860] sm:$0xff] }
 0x545   : > { %vm17169_vm15 = vmpackc.low %vm5645_vm10, %vm5581_vm9  ;;  %vm4432_vm9 = vcmp.eq.s32.totalorder %v2760_v62, %v17194_v7  ;;  %vm4496_vm10 = vcmp.eq.s32.totalorder %v2824_v0, %v17194_v7  ;;  %v2413_v18 = vcombine.high %v17239_v8, %v17239_v8  ;;  %v3240_v23 = vld [vmem:[#allocation2 + $0xf68] sm:$0xff]  ;;  %v3335_v62 = vld [vmem:[#allocation2 + $0x1260] sm:$0xff] }
 0x546   : > { %v3368_v34 = vld [vmem:[#allocation2 + $0x1368] sm:$0xff]  ;;  %v3303_v0 = vld [vmem:[#allocation2 + $0x1160] sm:$0xff] }
 0x547   : > { %v2696_v19 = vpack.c.bf16 %v2413_v18, %v2413_v18  ;;  %v3560_v18 = vld [vmem:[#allocation2 + $0x1968] sm:$0xff]  ;;  %v3527_v4 = vld [vmem:[#allocation2 + $0x1860] sm:$0xff] }
 0x549   : > { %12499 = vmatpush1.bf16.xpose.msk.msra.mxu1 %vm12498_vm7, %v14140_v48  ;;  %vm17147_vm7 = vmpackc.low %vm5646_vm2, %vm5582_vm1  ;;  %vm5806_vm1 = vcmp.eq.s32.totalorder %v4134_v10, %v16970_v16  ;;  %v4101_v16 = vld [vmem:[#allocation2 + $0x2a50] sm:$0xff]  ;;  %v3079_v10 = vld [vmem:[#allocation2 + $0xa60] sm:$0xff] }
 0x54a   : > { %13203 = vmatpush1.bf16.xpose.msk.msra.mxu0 %vm13202_vm8, %v14140_v48  ;;  %12501 = vmatprep.subr.msk.bf16.mxu1 %vm12500_vm11, %v14140_v48  ;;  %vm13208_vm8 = vmpackc.low %vm5678_vm5, %vm5614_vm4  ;;  %vm5613_vm11 = vcmp.eq.s32.totalorder %v3941_v35, %v16993_v52  ;;  %vm5709_vm5 = vcmp.eq.s32.totalorder %v4037_v11, %v16989_v40  ;;  %v2887_v35 = vld [vmem:[#allocation2 + $0x460] sm:$0xff] }
 0x54b   : > { %13205 = vmatprep.subr.msk.bf16.mxu0 %vm13204_vm12, %v14140_v48  ;;  %vm5677_vm12 = vcmp.eq.s32.totalorder %v4005_v6, %v16993_v52  ;;  %vm17185_vm4 = vmpackc.low %vm5806_vm1, %vm5742_vm0  ;;  %v2951_v6 = vld [vmem:[#allocation2 + $0x660] sm:$0xff] }
 0x54c   : > { %vm17177_vm2 = vmpackc.low %vm5677_vm12, %vm5613_vm11  ;;  %vm4464_vm12 = vcmp.eq.s32.totalorder %v2792_v2, %v17205_v38  ;;  %v3175_v11 = vld [vmem:[#allocation2 + $0xd60] sm:$0xff]  ;;  %v3400_v2 = vld [vmem:[#allocation2 + $0x1468] sm:$0xff] }
 0x551   : > { %12503 = vmatpush1.bf16.xpose.msk.msra.mxu1 %vm17129_vm3, %v14140_v48  ;;  %vm17181_vm3 = vmpackc.low %vm5774_vm14, %vm5710_vm13  ;;  %vm4528_vm13 = vcmp.eq.s32.totalorder %v2856_v27, %v17205_v38  ;;  %v3464_v27 = vld [vmem:[#allocation2 + $0x1668] sm:$0xff] }
 0x552   : > { %13207 = vmatpush1.bf16.xpose.msk.msra.mxu0 %vm17139_vm6, %v14140_v48  ;;  %12505 = vmatprep.subr.msk.bf16.mxu1 %vm17147_vm7, %v14140_v48  ;;  %vm5773_vm6 = vcmp.eq.s32.totalorder %v4101_v16, %v16989_v40  ;;  %vm5741_vm7 = vcmp.eq.s32.totalorder %v4069_v45, %v16993_v52  ;;  %v17231_v40 = vrot.slane %v17190_v60, %v16299_v50  ;;  %vm13216_vm0 = vmpackc.low %vm4528_vm13, %vm4464_vm12  ;;  %v3239_v16 = vld [vmem:[#allocation2 + $0xf60] sm:$0xff]  ;;  %v3336_v45 = vld [vmem:[#allocation2 + $0x1268] sm:$0xff] }
 0x553   : > { %13209 = vmatprep.subr.msk.bf16.mxu0 %vm13208_vm8, %v14140_v48  ;;  %vm5805_vm8 = vcmp.eq.s32.totalorder %v4133_v26, %v16993_v52  ;;  %vm12510_vm11 = vmpackc.low %vm5773_vm6, %vm5709_vm5  ;;  %v2759_v52 = vld [vmem:[#allocation2 + $0x60] sm:$0xff]  ;;  %vm4560_vm5 = vcmp.eq.s32.totalorder %v2888_v13, %v17194_v7  ;;  %vm4624_vm6 = vcmp.eq.s32.totalorder %v2952_v63, %v17194_v7  ;;  %v3304_v26 = vld [vmem:[#allocation2 + $0x1168] sm:$0xff] }
 0x554   : > { %vm13214_vm14 = vmpackc.low %vm5805_vm8, %vm5741_vm7  ;;  %vm4431_vm1 = vcmp.eq.s32.totalorder %v2759_v52, %v17231_v40  ;;  %vm4592_vm8 = vcmp.eq.s32.totalorder %v2920_v14, %v17205_v38  ;;  %vm4559_vm13 = vcmp.eq.s32.totalorder %v2887_v35, %v17231_v40  ;;  %v3432_v52 = vld [vmem:[#allocation2 + $0x1568] sm:$0xff]  ;;  %v3431_v13 = vld [vmem:[#allocation2 + $0x1560] sm:$0xff] }
 0x555   : > { %v3495_v63 = vld [vmem:[#allocation2 + $0x1760] sm:$0xff]  ;;  %v3528_v14 = vld [vmem:[#allocation2 + $0x1868] sm:$0xff] }
 0x556   : > { %v3559_v35 = vld [vmem:[#allocation2 + $0x1960] sm:$0xff] }
 0x559   : > { %12507 = vmatpush1.bf16.xpose.msk.msra.mxu1 %vm17169_vm15, %v14140_v48  ;;  %vm12512_vm15 = vmpackc.low %vm4496_vm10, %vm4432_vm9  ;;  %vm4656_vm9 = vcmp.eq.s32.totalorder %v2984_v57, %v17205_v38  ;;  %v3592_v57 = vld [vmem:[#allocation2 + $0x1a68] sm:$0xff] }
 0x55a   : > { %13211 = vmatpush1.bf16.xpose.msk.msra.mxu0 %vm17177_vm2, %v14140_v48  ;;  %12509 = vmatprep.subr.msk.bf16.mxu1 %vm17181_vm3, %v14140_v48  ;;  %vm4495_vm2 = vcmp.eq.s32.totalorder %v2823_v43, %v17231_v40  ;;  %vm4463_vm3 = vcmp.eq.s32.totalorder %v2791_v9, %v17235_v53  ;;  %vm13220_vm12 = vmpackc.low %vm4656_vm9, %vm4592_vm8  ;;  %vm4687_vm9 = vcmp.eq.s32.totalorder %v3015_v55, %v17231_v40  ;;  %v3496_v43 = vld [vmem:[#allocation2 + $0x1768] sm:$0xff]  ;;  %v3399_v9 = vld [vmem:[#allocation2 + $0x1460] sm:$0xff] }
 0x55b   : > { %13213 = vmatprep.subr.msk.bf16.mxu0 %vm17185_vm4, %v14140_v48  ;;  %vm4527_vm4 = vcmp.eq.s32.totalorder %v2855_v28, %v17235_v53  ;;  %vm12514_vm7 = vmpackc.low %vm4495_vm2, %vm4431_vm1  ;;  %vm4688_vm1 = vcmp.eq.s32.totalorder %v3016_v17, %v17194_v7  ;;  %vm4752_vm2 = vcmp.eq.s32.totalorder %v3080_v32, %v17194_v7  ;;  %v3463_v28 = vld [vmem:[#allocation2 + $0x1660] sm:$0xff]  ;;  %v3784_v55 = vld [vmem:[#allocation2 + $0x2068] sm:$0xff] }
 0x55c   : > { %vm13218_vm10 = vmpackc.low %vm4527_vm4, %vm4463_vm3  ;;  %vm4720_vm4 = vcmp.eq.s32.totalorder %v3048_v54, %v17205_v38  ;;  %v3655_v17 = vld [vmem:[#allocation2 + $0x1c60] sm:$0xff] }
 0x55d   : > { %v3719_v32 = vld [vmem:[#allocation2 + $0x1e60] sm:$0xff] }
 0x55e   : > { %v3687_v54 = vld [vmem:[#allocation2 + $0x1d60] sm:$0xff] }
 0x561   : > { %12511 = vmatpush1.bf16.xpose.msk.msra.mxu1 %vm12510_vm11, %v14140_v48  ;;  %vm12516_vm11 = vmpackc.low %vm4624_vm6, %vm4560_vm5  ;;  %vm4784_vm5 = vcmp.eq.s32.totalorder %v3112_v51, %v17205_v38  ;;  %v3751_v51 = vld [vmem:[#allocation2 + $0x1f60] sm:$0xff] }
 0x562   : > { %13215 = vmatpush1.bf16.xpose.msk.msra.mxu0 %vm13214_vm14, %v14140_v48  ;;  %12513 = vmatprep.subr.msk.bf16.mxu1 %vm12512_vm15, %v14140_v48  ;;  %vm4623_vm14 = vcmp.eq.s32.totalorder %v2951_v6, %v17231_v40  ;;  %vm4591_vm15 = vcmp.eq.s32.totalorder %v2919_v41, %v17235_v53  ;;  %vm13224_vm8 = vmpackc.low %vm4784_vm5, %vm4720_vm4  ;;  %vm4815_vm5 = vcmp.eq.s32.totalorder %v3143_v59, %v17231_v40  ;;  %v3623_v6 = vld [vmem:[#allocation2 + $0x1b60] sm:$0xff]  ;;  %v3720_v41 = vld [vmem:[#allocation2 + $0x1e68] sm:$0xff] }
 0x563   : > { %13217 = vmatprep.subr.msk.bf16.mxu0 %vm13216_vm0, %v14140_v48  ;;  %vm4655_vm0 = vcmp.eq.s32.totalorder %v2983_v22, %v17235_v53  ;;  %vm12518_vm3 = vmpackc.low %vm4623_vm14, %vm4559_vm13  ;;  %vm4816_vm13 = vcmp.eq.s32.totalorder %v3144_v42, %v17194_v7  ;;  %vm4880_vm14 = vcmp.eq.s32.totalorder %v3208_v36, %v17194_v7  ;;  %v3688_v22 = vld [vmem:[#allocation2 + $0x1d68] sm:$0xff]  ;;  %v3783_v42 = vld [vmem:[#allocation2 + $0x2060] sm:$0xff] }
 0x564   : > { %vm13222_vm6 = vmpackc.low %vm4655_vm0, %vm4591_vm15  ;;  %vm4848_vm0 = vcmp.eq.s32.totalorder %v3176_v39, %v17205_v38  ;;  %v3847_v36 = vld [vmem:[#allocation2 + $0x2260] sm:$0xff]  ;;  %v3912_v59 = vld [vmem:[#allocation2 + $0x2468] sm:$0xff] }
 0x565   : > { %v3815_v39 = vld [vmem:[#allocation2 + $0x2160] sm:$0xff] }
 0x568   : > { %9586 = vmatmul.mubr.bf16.vlgmr.msra.gmra.mrb[0].mxu1 %v2693_v24  ;;  %v3624_v24 = vld [vmem:[#allocation2 + $0x1b68] sm:$0xff] }
 0x569   : > { %12515 = vmatpush1.bf16.xpose.msk.msra.mxu1 %vm12514_vm7, %v14140_v48  ;;  %10242 = vmatmul.mubr.bf16.vlgmr.msra.gmra.mrb[0].mxu0 %v2725_v29  ;;  %vm12520_vm7 = vmpackc.low %vm4752_vm2, %vm4688_vm1  ;;  %vm4912_vm1 = vcmp.eq.s32.totalorder %v3240_v23, %v17205_v38  ;;  %v3591_v29 = vld [vmem:[#allocation2 + $0x1a60] sm:$0xff] }
 0x56a   : > { %13219 = vmatpush1.bf16.xpose.msk.msra.mxu0 %vm13218_vm10, %v14140_v48  ;;  %12517 = vmatprep.subr.msk.bf16.mxu1 %vm12516_vm11, %v14140_v48  ;;  %vm4751_vm10 = vcmp.eq.s32.totalorder %v3079_v10, %v17231_v40  ;;  %vm4719_vm11 = vcmp.eq.s32.totalorder %v3047_v56, %v17235_v53  ;;  %vm13228_vm4 = vmpackc.low %vm4912_vm1, %vm4848_vm0  ;;  %vm4943_vm1 = vcmp.eq.s32.totalorder %v3271_v61, %v17231_v40  ;;  %v3848_v10 = vld [vmem:[#allocation2 + $0x2268] sm:$0xff]  ;;  %v3879_v23 = vld [vmem:[#allocation2 + $0x2360] sm:$0xff] }
 0x56b   : > { %13221 = vmatprep.subr.msk.bf16.mxu0 %vm13220_vm12, %v14140_v48  ;;  %9626 = vmatprep.mubr.bf16.mxu1 %v2696_v19  ;;  %vm4783_vm12 = vcmp.eq.s32.totalorder %v3111_v58, %v17235_v53  ;;  %vm12522_vm15 = vmpackc.low %vm4751_vm10, %vm4687_vm9  ;;  %vm4944_vm9 = vcmp.eq.s32.totalorder %v3272_v31, %v17194_v7  ;;  %vm5008_vm10 = vcmp.eq.s32.totalorder %v3336_v45, %v17194_v7  ;;  %v3656_v19 = vld [vmem:[#allocation2 + $0x1c68] sm:$0xff]  ;;  %v3911_v31 = vld [vmem:[#allocation2 + $0x2460] sm:$0xff] }
 0x56c   : > { %10282 = vmatprep.mubr.bf16.mxu0 %v2728_v15  ;;  %vm13226_vm2 = vmpackc.low %vm4783_vm12, %vm4719_vm11  ;;  %vm4976_vm12 = vcmp.eq.s32.totalorder %v3304_v26, %v17205_v38  ;;  %v3752_v15 = vld [vmem:[#allocation2 + $0x1f68] sm:$0xff]  ;;  %v3975_v45 = vld [vmem:[#allocation2 + $0x2660] sm:$0xff] }
 0x56d   : > { %v3816_v56 = vld [vmem:[#allocation2 + $0x2168] sm:$0xff]  ;;  %v3943_v26 = vld [vmem:[#allocation2 + $0x2560] sm:$0xff] }
 0x56e   : > { %v3880_v58 = vld [vmem:[#allocation2 + $0x2368] sm:$0xff] }
 0x56f   : > { %v4040_v61 = vld [vmem:[#allocation2 + $0x2868] sm:$0xff] }
 0x571   : > { %12519 = vmatpush1.bf16.xpose.msk.msra.mxu1 %vm12518_vm3, %v14140_v48  ;;  %vm12524_vm3 = vmpackc.low %vm4880_vm14, %vm4816_vm13  ;;  %vm5040_vm13 = vcmp.eq.s32.totalorder %v3368_v34, %v17205_v38  ;;  %v4007_v34 = vld [vmem:[#allocation2 + $0x2760] sm:$0xff] }
 0x572   : > { %13223 = vmatpush1.bf16.xpose.msk.msra.mxu0 %vm13222_vm6, %v14140_v48  ;;  %12521 = vmatprep.subr.msk.bf16.mxu1 %vm12520_vm7, %v14140_v48  ;;  %vm4879_vm6 = vcmp.eq.s32.totalorder %v3207_v1, %v17231_v40  ;;  %vm4847_vm7 = vcmp.eq.s32.totalorder %v3175_v11, %v17235_v53  ;;  %vm13232_vm0 = vmpackc.low %vm5040_vm13, %vm4976_vm12  ;;  %vm5071_vm13 = vcmp.eq.s32.totalorder %v3399_v9, %v17231_v40  ;;  %v3976_v1 = vld [vmem:[#allocation2 + $0x2668] sm:$0xff] }
 0x573   : > { %13225 = vmatprep.subr.msk.bf16.mxu0 %vm13224_vm8, %v14140_v48  ;;  %vm4911_vm8 = vcmp.eq.s32.totalorder %v3239_v16, %v17235_v53  ;;  %vm12526_vm11 = vmpackc.low %vm4879_vm6, %vm4815_vm5  ;;  %vm5072_vm5 = vcmp.eq.s32.totalorder %v3400_v2, %v17194_v7  ;;  %vm5136_vm6 = vcmp.eq.s32.totalorder %v3464_v27, %v17194_v7  ;;  %v3944_v11 = vld [vmem:[#allocation2 + $0x2568] sm:$0xff]  ;;  %v4039_v2 = vld [vmem:[#allocation2 + $0x2860] sm:$0xff]  ;;  %v17375_v9 = vrot.slane %v17190_v60, %v16289_v47 }
 0x574   : > { %vm13230_vm14 = vmpackc.low %vm4911_vm8, %vm4847_vm7  ;;  %vm5104_vm8 = vcmp.eq.s32.totalorder %v3432_v52, %v17205_v38  ;;  %v4008_v16 = vld [vmem:[#allocation2 + $0x2768] sm:$0xff]  ;;  %v4103_v27 = vld [vmem:[#allocation2 + $0x2a60] sm:$0xff] }
 0x575   : > { %v4071_v52 = vld [vmem:[#allocation2 + $0x2960] sm:$0xff] }
 0x579   : > { %12523 = vmatpush1.bf16.xpose.msk.msra.mxu1 %vm12522_vm15, %v14140_v48  ;;  %vm12528_vm15 = vmpackc.low %vm5008_vm10, %vm4944_vm9  ;;  %vm5168_vm9 = vcmp.eq.s32.totalorder %v3496_v43, %v17205_v38  ;;  %v4135_v43 = vld [vmem:[#allocation2 + $0x2b60] sm:$0xff] }
 0x57a   : > { %13227 = vmatpush1.bf16.xpose.msk.msra.mxu0 %vm13226_vm2, %v14140_v48  ;;  %12525 = vmatprep.subr.msk.bf16.mxu1 %vm12524_vm3, %v14140_v48  ;;  %vm5007_vm2 = vcmp.eq.s32.totalorder %v3335_v62, %v17231_v40  ;;  %vm4975_vm3 = vcmp.eq.s32.totalorder %v3303_v0, %v17235_v53  ;;  %vm13236_vm12 = vmpackc.low %vm5168_vm9, %vm5104_vm8  ;;  %vm5199_vm9 = vcmp.eq.s32.totalorder %v3527_v4, %v17231_v40  ;;  %v4104_v62 = vld [vmem:[#allocation2 + $0x2a68] sm:$0xff]  ;;  %v2857_v4 = vld [vmem:[#allocation2 + $0x370] sm:$0xff] }
 0x57b   : > { %13229 = vmatprep.subr.msk.bf16.mxu0 %vm13228_vm4, %v14140_v48  ;;  %vm5039_vm4 = vcmp.eq.s32.totalorder %v3367_v44, %v17235_v53  ;;  %vm12530_vm7 = vmpackc.low %vm5007_vm2, %vm4943_vm1  ;;  %vm5200_vm1 = vcmp.eq.s32.totalorder %v3528_v14, %v17194_v7  ;;  %vm5264_vm2 = vcmp.eq.s32.totalorder %v3592_v57, %v17194_v7  ;;  %v4072_v0 = vld [vmem:[#allocation2 + $0x2968] sm:$0xff]  ;;  %v2398_v14 = vcombine.high %v17221_v3, %v17221_v3  ;;  %v2825_v3 = vld [vmem:[#allocation2 + $0x270] sm:$0xff] }
 0x57c   : > { %vm13234_vm10 = vmpackc.low %vm5039_vm4, %vm4975_vm3  ;;  %vm5232_vm4 = vcmp.eq.s32.totalorder %v3560_v18, %v17205_v38  ;;  %v4136_v44 = vld [vmem:[#allocation2 + $0x2b68] sm:$0xff]  ;;  %v2534_v57 = vcombine.high %v17225_v5, %v17225_v5  ;;  %v17403_v18 = vrot.slane %v17201_v37, %v16286_v46  ;;  %v2793_v5 = vld [vmem:[#allocation2 + $0x170] sm:$0xff] }
 0x581   : > { %12527 = vmatpush1.bf16.xpose.msk.msra.mxu1 %vm12526_vm11, %v14140_v48  ;;  %vm12532_vm11 = vmpackc.low %vm5136_vm6, %vm5072_vm5  ;;  %vm5296_vm5 = vcmp.eq.s32.totalorder %v3624_v24, %v17205_v38  ;;  %v17406_v24 = vrot.slane %v2398_v14, %v16005_v25  ;;  %v3401_v14 = vld [vmem:[#allocation2 + $0x1470] sm:$0xff] }
 0x582   : > { %13231 = vmatpush1.bf16.xpose.msk.msra.mxu0 %vm13230_vm14, %v14140_v48  ;;  %12529 = vmatprep.subr.msk.bf16.mxu1 %vm12528_vm15, %v14140_v48  ;;  %vm5135_vm14 = vcmp.eq.s32.totalorder %v3463_v28, %v17231_v40  ;;  %vm5103_vm15 = vcmp.eq.s32.totalorder %v3431_v13, %v17235_v53  ;;  %vm13240_vm8 = vmpackc.low %vm5296_vm5, %vm5232_vm4  ;;  %vm5327_vm5 = vcmp.eq.s32.totalorder %v3655_v17, %v17231_v40  ;;  %v2762_v28 = vld [vmem:[#allocation2 + $0x78] sm:$0xff]  ;;  %v2889_v17 = vld [vmem:[#allocation2 + $0x470] sm:$0xff] }
 0x583   : > { %13233 = vmatprep.subr.msk.bf16.mxu0 %vm13232_vm0, %v14140_v48  ;;  %vm5167_vm0 = vcmp.eq.s32.totalorder %v3495_v63, %v17235_v53  ;;  %vm12534_vm3 = vmpackc.low %vm5135_vm14, %vm5071_vm13  ;;  %vm5328_vm13 = vcmp.eq.s32.totalorder %v3656_v19, %v17194_v7  ;;  %vm5392_vm14 = vcmp.eq.s32.totalorder %v3720_v41, %v17194_v7  ;;  %v17380_v13 = vrot.slane %v17201_v37, %v16289_v47  ;;  %v2858_v63 = vld [vmem:[#allocation2 + $0x378] sm:$0xff] }
 0x584   : > { %vm13238_vm6 = vmpackc.low %vm5167_vm0, %vm5103_vm15  ;;  %vm5360_vm0 = vcmp.eq.s32.totalorder %v3688_v22, %v17205_v38  ;;  %v2922_v37 = vld [vmem:[#allocation2 + $0x578] sm:$0xff]  ;;  %v2414_v19 = vcombine.high %v17406_v24, %v17406_v24  ;;  %v2695_v41 = vpack.c.bf16 %v17239_v8, %v17239_v8 }
 0x586   : > { %v2698_v8 = vpack.c.bf16 %v2414_v19, %v2414_v19  ;;  %v3561_v19 = vld [vmem:[#allocation2 + $0x1970] sm:$0xff] }
 0x589   : > { %12531 = vmatpush1.bf16.xpose.msk.msra.mxu1 %vm12530_vm7, %v14140_v48  ;;  %vm12536_vm7 = vmpackc.low %vm5264_vm2, %vm5200_vm1  ;;  %vm5424_vm1 = vcmp.eq.s32.totalorder %v3752_v15, %v17205_v38  ;;  %v2727_v15 = vpack.c.bf16 %v17243_v12, %v17243_v12  ;;  %v3050_v12 = vld [vmem:[#allocation2 + $0x978] sm:$0xff] }
 0x58a   : > { %13235 = vmatpush1.bf16.xpose.msk.msra.mxu0 %vm13234_vm10, %v14140_v48  ;;  %12533 = vmatprep.subr.msk.bf16.mxu1 %vm12532_vm11, %v14140_v48  ;;  %vm5263_vm10 = vcmp.eq.s32.totalorder %v3591_v29, %v17231_v40  ;;  %vm5231_vm11 = vcmp.eq.s32.totalorder %v3559_v35, %v17235_v53  ;;  %vm13244_vm4 = vmpackc.low %vm5424_vm1, %vm5360_vm0  ;;  %vm5455_vm1 = vcmp.eq.s32.totalorder %v3783_v42, %v17231_v40  ;;  %v2954_v35 = vld [vmem:[#allocation2 + $0x678] sm:$0xff]  ;;  %v3017_v42 = vld [vmem:[#allocation2 + $0x870] sm:$0xff] }
 0x58b   : > { %13237 = vmatprep.subr.msk.bf16.mxu0 %vm13236_vm12, %v14140_v48  ;;  %vm5295_vm12 = vcmp.eq.s32.totalorder %v3623_v6, %v17235_v53  ;;  %vm12538_vm15 = vmpackc.low %vm5263_vm10, %vm5199_vm9  ;;  %vm5456_vm9 = vcmp.eq.s32.totalorder %v3784_v55, %v17194_v7  ;;  %vm5520_vm10 = vcmp.eq.s32.totalorder %v3848_v10, %v17194_v7  ;;  %v17409_v29 = vrot.slane %v2534_v57, %v16005_v25  ;;  %v2986_v6 = vld [vmem:[#allocation2 + $0x778] sm:$0xff]  ;;  %v3465_v57 = vld [vmem:[#allocation2 + $0x1670] sm:$0xff] }
 0x58c   : > { %vm13242_vm2 = vmpackc.low %vm5295_vm12, %vm5231_vm11  ;;  %vm5488_vm12 = vcmp.eq.s32.totalorder %v3816_v56, %v17205_v38  ;;  %v3018_v10 = vld [vmem:[#allocation2 + $0x878] sm:$0xff] }
 0x58d   : > { %v2550_v22 = vcombine.high %v17409_v29, %v17409_v29  ;;  %v3082_v56 = vld [vmem:[#allocation2 + $0xa78] sm:$0xff] }
 0x58f   : > { %v2730_v55 = vpack.c.bf16 %v2550_v22, %v2550_v22  ;;  %v3658_v22 = vld [vmem:[#allocation2 + $0x1c78] sm:$0xff] }
 0x591   : > { %12535 = vmatpush1.bf16.xpose.msk.msra.mxu1 %vm12534_vm3, %v14140_v48  ;;  %vm12540_vm3 = vmpackc.low %vm5392_vm14, %vm5328_vm13  ;;  %vm5552_vm13 = vcmp.eq.s32.totalorder %v3880_v58, %v17205_v38  ;;  %v3114_v58 = vld [vmem:[#allocation2 + $0xb78] sm:$0xff] }
 0x592   : > { %13239 = vmatpush1.bf16.xpose.msk.msra.mxu0 %vm13238_vm6, %v14140_v48  ;;  %12537 = vmatprep.subr.msk.bf16.mxu1 %vm12536_vm7, %v14140_v48  ;;  %vm5391_vm6 = vcmp.eq.s32.totalorder %v3719_v32, %v17231_v40  ;;  %vm5359_vm7 = vcmp.eq.s32.totalorder %v3687_v54, %v17235_v53  ;;  %vm13248_vm0 = vmpackc.low %vm5552_vm13, %vm5488_vm12  ;;  %vm5583_vm13 = vcmp.eq.s32.totalorder %v3911_v31, %v17231_v40  ;;  %v2953_v32 = vld [vmem:[#allocation2 + $0x670] sm:$0xff] }
 0x593   : > { %13241 = vmatprep.subr.msk.bf16.mxu0 %vm13240_vm8, %v14140_v48  ;;  %vm5423_vm8 = vcmp.eq.s32.totalorder %v3751_v51, %v17235_v53  ;;  %vm12542_vm11 = vmpackc.low %vm5391_vm6, %vm5327_vm5  ;;  %vm5584_vm5 = vcmp.eq.s32.totalorder %v3912_v59, %v17194_v7  ;;  %vm5648_vm6 = vcmp.eq.s32.totalorder %v3976_v1, %v17194_v7  ;;  %v2921_v54 = vld [vmem:[#allocation2 + $0x570] sm:$0xff]  ;;  %v3146_v59 = vld [vmem:[#allocation2 + $0xc78] sm:$0xff] }
 0x594   : > { %vm13246_vm14 = vmpackc.low %vm5423_vm8, %vm5359_vm7  ;;  %vm5616_vm8 = vcmp.eq.s32.totalorder %v3944_v11, %v17205_v38  ;;  %v2985_v51 = vld [vmem:[#allocation2 + $0x770] sm:$0xff]  ;;  %v3210_v1 = vld [vmem:[#allocation2 + $0xe78] sm:$0xff] }
 0x595   : > { %v3178_v11 = vld [vmem:[#allocation2 + $0xd78] sm:$0xff]  ;;  %v3145_v31 = vld [vmem:[#allocation2 + $0xc70] sm:$0xff] }
 0x599   : > { %12539 = vmatpush1.bf16.xpose.msk.msra.mxu1 %vm12538_vm15, %v14140_v48  ;;  %vm12544_vm15 = vmpackc.low %vm5520_vm10, %vm5456_vm9  ;;  %vm5680_vm9 = vcmp.eq.s32.totalorder %v4008_v16, %v17205_v38  ;;  %v3242_v16 = vld [vmem:[#allocation2 + $0xf78] sm:$0xff] }
 0x59a   : > { %13243 = vmatpush1.bf16.xpose.msk.msra.mxu0 %vm13242_vm2, %v14140_v48  ;;  %12541 = vmatprep.subr.msk.bf16.mxu1 %vm12540_vm3, %v14140_v48  ;;  %vm5519_vm2 = vcmp.eq.s32.totalorder %v3847_v36, %v17231_v40  ;;  %vm5487_vm3 = vcmp.eq.s32.totalorder %v3815_v39, %v17235_v53  ;;  %vm13252_vm12 = vmpackc.low %vm5680_vm9, %vm5616_vm8  ;;  %vm5711_vm9 = vcmp.eq.s32.totalorder %v4039_v2, %v17231_v40  ;;  %v3081_v36 = vld [vmem:[#allocation2 + $0xa70] sm:$0xff] }
 0x59b   : > { %13245 = vmatprep.subr.msk.bf16.mxu0 %vm13244_vm4, %v14140_v48  ;;  %vm5551_vm4 = vcmp.eq.s32.totalorder %v3879_v23, %v17235_v53  ;;  %vm12546_vm7 = vmpackc.low %vm5519_vm2, %vm5455_vm1  ;;  %vm5712_vm1 = vcmp.eq.s32.totalorder %v4040_v61, %v17194_v7  ;;  %vm5776_vm2 = vcmp.eq.s32.totalorder %v4104_v62, %v17194_v7  ;;  %v2826_v7 = vld [vmem:[#allocation2 + $0x278] sm:$0xff]  ;;  %v3049_v39 = vld [vmem:[#allocation2 + $0x970] sm:$0xff] }
 0x59c   : > { %vm13250_vm10 = vmpackc.low %vm5551_vm4, %vm5487_vm3  ;;  %vm5744_vm4 = vcmp.eq.s32.totalorder %v4072_v0, %v17205_v38  ;;  %v3113_v23 = vld [vmem:[#allocation2 + $0xb70] sm:$0xff]  ;;  %v3274_v61 = vld [vmem:[#allocation2 + $0x1078] sm:$0xff] }
 0x59d   : > { %v3338_v62 = vld [vmem:[#allocation2 + $0x1278] sm:$0xff]  ;;  %v3273_v2 = vld [vmem:[#allocation2 + $0x1070] sm:$0xff] }
 0x59e   : > { %v3306_v0 = vld [vmem:[#allocation2 + $0x1178] sm:$0xff] }
 0x5a1   : > { %12543 = vmatpush1.bf16.xpose.msk.msra.mxu1 %vm12542_vm11, %v14140_v48  ;;  %vm12548_vm11 = vmpackc.low %vm5648_vm6, %vm5584_vm5  ;;  %vm5808_vm5 = vcmp.eq.s32.totalorder %v4136_v44, %v17205_v38  ;;  %v2794_v38 = vld [vmem:[#allocation2 + $0x178] sm:$0xff] }
 0x5a2   : > { %13247 = vmatpush1.bf16.xpose.msk.msra.mxu0 %vm13246_vm14, %v14140_v48  ;;  %12545 = vmatprep.subr.msk.bf16.mxu1 %vm12544_vm15, %v14140_v48  ;;  %vm5647_vm14 = vcmp.eq.s32.totalorder %v3975_v45, %v17231_v40  ;;  %vm5615_vm15 = vcmp.eq.s32.totalorder %v3943_v26, %v17235_v53  ;;  %vm13256_vm8 = vmpackc.low %vm5808_vm5, %vm5744_vm4  ;;  %v3209_v45 = vld [vmem:[#allocation2 + $0xe70] sm:$0xff]  ;;  %v3370_v44 = vld [vmem:[#allocation2 + $0x1378] sm:$0xff] }
 0x5a3   : > { %13249 = vmatprep.subr.msk.bf16.mxu0 %vm13248_vm0, %v14140_v48  ;;  %vm5679_vm0 = vcmp.eq.s32.totalorder %v4007_v34, %v17235_v53  ;;  %vm12550_vm3 = vmpackc.low %vm5647_vm14, %vm5583_vm13  ;;  %vm4434_vm13 = vcmp.eq.s32.totalorder %v2762_v28, %v17375_v9  ;;  %vm4498_vm14 = vcmp.eq.s32.totalorder %v2826_v7, %v17375_v9  ;;  %v3177_v26 = vld [vmem:[#allocation2 + $0xd70] sm:$0xff]  ;;  %v3402_v28 = vld [vmem:[#allocation2 + $0x1478] sm:$0xff] }
 0x5a4   : > { %vm13254_vm6 = vmpackc.low %vm5679_vm0, %vm5615_vm15  ;;  %vm4466_vm0 = vcmp.eq.s32.totalorder %v2794_v38, %v17380_v13  ;;  %v3241_v34 = vld [vmem:[#allocation2 + $0xf70] sm:$0xff]  ;;  %v3466_v7 = vld [vmem:[#allocation2 + $0x1678] sm:$0xff] }
 0x5a5   : > { %v3434_v38 = vld [vmem:[#allocation2 + $0x1578] sm:$0xff] }
 0x5a9   : > { %12547 = vmatpush1.bf16.xpose.msk.msra.mxu1 %vm12546_vm7, %v14140_v48  ;;  %vm12552_vm7 = vmpackc.low %vm5776_vm2, %vm5712_vm1  ;;  %vm4530_vm1 = vcmp.eq.s32.totalorder %v2858_v63, %v17380_v13  ;;  %v3498_v63 = vld [vmem:[#allocation2 + $0x1778] sm:$0xff] }
 0x5aa   : > { %13251 = vmatpush1.bf16.xpose.msk.msra.mxu0 %vm13250_vm10, %v14140_v48  ;;  %12549 = vmatprep.subr.msk.bf16.mxu1 %vm12548_vm11, %v14140_v48  ;;  %vm5775_vm10 = vcmp.eq.s32.totalorder %v4103_v27, %v17231_v40  ;;  %vm5743_vm11 = vcmp.eq.s32.totalorder %v4071_v52, %v17235_v53  ;;  %v17399_v40 = vrot.slane %v17190_v60, %v16286_v46  ;;  %vm13260_vm4 = vmpackc.low %vm4530_vm1, %vm4466_vm0  ;;  %v2890_v60 = vld [vmem:[#allocation2 + $0x478] sm:$0xff]  ;;  %v3337_v27 = vld [vmem:[#allocation2 + $0x1270] sm:$0xff] }
 0x5ab   : > { %13253 = vmatprep.subr.msk.bf16.mxu0 %vm13252_vm12, %v14140_v48  ;;  %vm5807_vm12 = vcmp.eq.s32.totalorder %v4135_v43, %v17235_v53  ;;  %vm12554_vm15 = vmpackc.low %vm5775_vm10, %vm5711_vm9  ;;  %v2761_v53 = vld [vmem:[#allocation2 + $0x70] sm:$0xff]  ;;  %vm4562_vm9 = vcmp.eq.s32.totalorder %v2890_v60, %v17375_v9  ;;  %vm4626_vm10 = vcmp.eq.s32.totalorder %v2954_v35, %v17375_v9  ;;  %v3562_v60 = vld [vmem:[#allocation2 + $0x1978] sm:$0xff] }
 0x5ac   : > { %vm13258_vm2 = vmpackc.low %vm5807_vm12, %vm5743_vm11  ;;  %vm4433_vm5 = vcmp.eq.s32.totalorder %v2761_v53, %v17399_v40  ;;  %vm4594_vm12 = vcmp.eq.s32.totalorder %v2922_v37, %v17380_v13  ;;  %vm4561_vm1 = vcmp.eq.s32.totalorder %v2889_v17, %v17399_v40  ;;  %v3305_v52 = vld [vmem:[#allocation2 + $0x1170] sm:$0xff]  ;;  %v3626_v35 = vld [vmem:[#allocation2 + $0x1b78] sm:$0xff] }
 0x5ad   : > { %v3369_v43 = vld [vmem:[#allocation2 + $0x1370] sm:$0xff]  ;;  %v3690_v17 = vld [vmem:[#allocation2 + $0x1d78] sm:$0xff] }
 0x5ae   : > { %v3433_v53 = vld [vmem:[#allocation2 + $0x1570] sm:$0xff] }
 0x5af   : > { %v3529_v37 = vld [vmem:[#allocation2 + $0x1870] sm:$0xff] }
 0x5b1   : > { %12551 = vmatpush1.bf16.xpose.msk.msra.mxu1 %vm12550_vm3, %v14140_v48  ;;  %vm12556_vm3 = vmpackc.low %vm4498_vm14, %vm4434_vm13  ;;  %vm4658_vm13 = vcmp.eq.s32.totalorder %v2986_v6, %v17380_v13  ;;  %v3593_v6 = vld [vmem:[#allocation2 + $0x1a70] sm:$0xff] }
 0x5b2   : > { %13255 = vmatpush1.bf16.xpose.msk.msra.mxu0 %vm13254_vm6, %v14140_v48  ;;  %12553 = vmatprep.subr.msk.bf16.mxu1 %vm12552_vm7, %v14140_v48  ;;  %vm4497_vm6 = vcmp.eq.s32.totalorder %v2825_v3, %v17399_v40  ;;  %vm4465_vm7 = vcmp.eq.s32.totalorder %v2793_v5, %v17403_v18  ;;  %vm13264_vm0 = vmpackc.low %vm4658_vm13, %vm4594_vm12  ;;  %vm4689_vm13 = vcmp.eq.s32.totalorder %v3017_v42, %v17399_v40  ;;  %v3497_v3 = vld [vmem:[#allocation2 + $0x1770] sm:$0xff]  ;;  %v3530_v5 = vld [vmem:[#allocation2 + $0x1878] sm:$0xff] }
 0x5b3   : > { %13257 = vmatprep.subr.msk.bf16.mxu0 %vm13256_vm8, %v14140_v48  ;;  %vm4529_vm8 = vcmp.eq.s32.totalorder %v2857_v4, %v17403_v18  ;;  %vm12558_vm11 = vmpackc.low %vm4497_vm6, %vm4433_vm5  ;;  %vm4690_vm5 = vcmp.eq.s32.totalorder %v3018_v10, %v17375_v9  ;;  %vm4754_vm6 = vcmp.eq.s32.totalorder %v3082_v56, %v17375_v9  ;;  %v3594_v4 = vld [vmem:[#allocation2 + $0x1a78] sm:$0xff]  ;;  %v1743_v42 = vld [vmem:[%s14398_s6 + $0x20] sm:$0xff] }
 0x5b4   : > { %vm13262_vm14 = vmpackc.low %vm4529_vm8, %vm4465_vm7  ;;  %vm4722_vm8 = vcmp.eq.s32.totalorder %v3050_v12, %v17380_v13  ;;  %v3786_v10 = vld [vmem:[#allocation2 + $0x2078] sm:$0xff] }
 0x5b5   : > { %v3850_v56 = vld [vmem:[#allocation2 + $0x2278] sm:$0xff] }
 0x5b6   : > { %v3818_v12 = vld [vmem:[#allocation2 + $0x2178] sm:$0xff] }
 0x5b9   : > { %12555 = vmatpush1.bf16.xpose.msk.msra.mxu1 %vm12554_vm15, %v14140_v48  ;;  %vm12560_vm15 = vmpackc.low %vm4626_vm10, %vm4562_vm9  ;;  %vm4786_vm9 = vcmp.eq.s32.totalorder %v3114_v58, %v17380_v13  ;;  %v3882_v58 = vld [vmem:[#allocation2 + $0x2378] sm:$0xff] }
 0x5ba   : > { %13259 = vmatpush1.bf16.xpose.msk.msra.mxu0 %vm13258_vm2, %v14140_v48  ;;  %12557 = vmatprep.subr.msk.bf16.mxu1 %vm12556_vm3, %v14140_v48  ;;  %vm4625_vm2 = vcmp.eq.s32.totalorder %v2953_v32, %v17399_v40  ;;  %vm4593_vm3 = vcmp.eq.s32.totalorder %v2921_v54, %v17403_v18  ;;  %vm13268_vm12 = vmpackc.low %vm4786_vm9, %vm4722_vm8  ;;  %vm4817_vm9 = vcmp.eq.s32.totalorder %v3145_v31, %v17399_v40  ;;  %v3754_v32 = vld [vmem:[#allocation2 + $0x1f78] sm:$0xff]  ;;  %v3721_v54 = vld [vmem:[#allocation2 + $0x1e70] sm:$0xff] }
 0x5bb   : > { %13261 = vmatprep.subr.msk.bf16.mxu0 %vm13260_vm4, %v14140_v48  ;;  %vm4657_vm4 = vcmp.eq.s32.totalorder %v2985_v51, %v17403_v18  ;;  %vm12562_vm7 = vmpackc.low %vm4625_vm2, %vm4561_vm1  ;;  %vm4818_vm1 = vcmp.eq.s32.totalorder %v3146_v59, %v17375_v9  ;;  %vm4882_vm2 = vcmp.eq.s32.totalorder %v3210_v1, %v17375_v9  ;;  %v3689_v51 = vld [vmem:[#allocation2 + $0x1d70] sm:$0xff]  ;;  %v3914_v1 = vld [vmem:[#allocation2 + $0x2478] sm:$0xff] }
 0x5bc   : > { %vm13266_vm10 = vmpackc.low %vm4657_vm4, %vm4593_vm3  ;;  %vm4850_vm4 = vcmp.eq.s32.totalorder %v3178_v11, %v17380_v13  ;;  %v3881_v59 = vld [vmem:[#allocation2 + $0x2370] sm:$0xff]  ;;  %v3978_v11 = vld [vmem:[#allocation2 + $0x2678] sm:$0xff] }
 0x5bd   : > { %v1761_v31 = vld [vmem:[%s14405_s7 + $0x30] sm:$0xff] }
 0x5c0   : > { %9627 = vmatmul.mubr.bf16.vlgmr.msra.gmra.mrb[0].mxu1 %v2695_v41  ;;  %v3625_v41 = vld [vmem:[#allocation2 + $0x1b70] sm:$0xff] }
 0x5c1   : > { %12559 = vmatpush1.bf16.xpose.msk.msra.mxu1 %vm12558_vm11, %v14140_v48  ;;  %10283 = vmatmul.mubr.bf16.vlgmr.msra.gmra.mrb[0].mxu0 %v2727_v15  ;;  %vm12564_vm11 = vmpackc.low %vm4754_vm6, %vm4690_vm5  ;;  %vm4914_vm5 = vcmp.eq.s32.totalorder %v3242_v16, %v17380_v13  ;;  %v3722_v15 = vld [vmem:[#allocation2 + $0x1e78] sm:$0xff]  ;;  %v1757_v16 = vld [vmem:[%s14405_s7 + $0x10] sm:$0xff] }
 0x5c2   : > { %13263 = vmatpush1.bf16.xpose.msk.msra.mxu0 %vm13262_vm14, %v14140_v48  ;;  %12561 = vmatprep.subr.msk.bf16.mxu1 %vm12560_vm15, %v14140_v48  ;;  %vm4753_vm14 = vcmp.eq.s32.totalorder %v3081_v36, %v17399_v40  ;;  %vm4721_vm15 = vcmp.eq.s32.totalorder %v3049_v39, %v17403_v18  ;;  %vm13272_vm8 = vmpackc.low %vm4914_vm5, %vm4850_vm4  ;;  %vm4945_vm5 = vcmp.eq.s32.totalorder %v3273_v2, %v17399_v40  ;;  %v3785_v36 = vld [vmem:[#allocation2 + $0x2070] sm:$0xff] }
 0x5c3   : > { %13265 = vmatprep.subr.msk.bf16.mxu0 %vm13264_vm0, %v14140_v48  ;;  %9667 = vmatprep.mubr.bf16.mxu1 %v2698_v8  ;;  %vm4785_vm0 = vcmp.eq.s32.totalorder %v3113_v23, %v17403_v18  ;;  %vm12566_vm3 = vmpackc.low %vm4753_vm14, %vm4689_vm13  ;;  %vm4946_vm13 = vcmp.eq.s32.totalorder %v3274_v61, %v17375_v9  ;;  %vm5010_vm14 = vcmp.eq.s32.totalorder %v3338_v62, %v17375_v9  ;;  %v3657_v8 = vld [vmem:[#allocation2 + $0x1c70] sm:$0xff] }
 0x5c4   : > { %10323 = vmatprep.mubr.bf16.mxu0 %v2730_v55  ;;  %vm13270_vm6 = vmpackc.low %vm4785_vm0, %vm4721_vm15  ;;  %vm4978_vm0 = vcmp.eq.s32.totalorder %v3306_v0, %v17380_v13  ;;  %v3753_v55 = vld [vmem:[#allocation2 + $0x1f70] sm:$0xff]  ;;  %v1842_v61 = vrot.slane %v1757_v16, %v15903_v30  ;;  %v1846_v62 = vrot.slane %v1757_v16, %v15991_v20  ;;  %v1850_v0 = vrot.slane %v1757_v16, %v15994_v21 }
 0x5c5   : > { %v3849_v39 = vld [vmem:[#allocation2 + $0x2270] sm:$0xff]  ;;  %v1970_v2 = vrot.slane %v1761_v31, %v15903_v30 }
 0x5c6   : > { %v3817_v23 = vld [vmem:[#allocation2 + $0x2170] sm:$0xff] }
 0x5c9   : > { %12563 = vmatpush1.bf16.xpose.msk.msra.mxu1 %vm12562_vm7, %v14140_v48  ;;  %vm12568_vm7 = vmpackc.low %vm4882_vm2, %vm4818_vm1  ;;  %vm5042_vm1 = vcmp.eq.s32.totalorder %v3370_v44, %v17380_v13  ;;  %v1966_v44 = vrot.slane %v1761_v31, %v15906_v33 }
 0x5ca   : > { %13267 = vmatpush1.bf16.xpose.msk.msra.mxu0 %vm13266_vm10, %v14140_v48  ;;  %12565 = vmatprep.subr.msk.bf16.mxu1 %vm12564_vm11, %v14140_v48  ;;  %vm4881_vm10 = vcmp.eq.s32.totalorder %v3209_v45, %v17399_v40  ;;  %vm4849_vm11 = vcmp.eq.s32.totalorder %v3177_v26, %v17403_v18  ;;  %vm13276_vm4 = vmpackc.low %vm5042_vm1, %vm4978_vm0  ;;  %vm5073_vm1 = vcmp.eq.s32.totalorder %v3401_v14, %v17399_v40  ;;  %v3946_v45 = vld [vmem:[#allocation2 + $0x2578] sm:$0xff]  ;;  %v3945_v14 = vld [vmem:[#allocation2 + $0x2570] sm:$0xff] }
 0x5cb   : > { %13269 = vmatprep.subr.msk.bf16.mxu0 %vm13268_vm12, %v14140_v48  ;;  %vm4913_vm12 = vcmp.eq.s32.totalorder %v3241_v34, %v17403_v18  ;;  %vm12570_vm15 = vmpackc.low %vm4881_vm10, %vm4817_vm9  ;;  %vm5074_vm9 = vcmp.eq.s32.totalorder %v3402_v28, %v17375_v9  ;;  %vm5138_vm10 = vcmp.eq.s32.totalorder %v3466_v7, %v17375_v9  ;;  %v4010_v26 = vld [vmem:[#allocation2 + $0x2778] sm:$0xff]  ;;  %v1838_v34 = vrot.slane %v1757_v16, %v15906_v33  ;;  %v3913_v7 = vld [vmem:[#allocation2 + $0x2470] sm:$0xff] }
 0x5cc   : > { %vm13274_vm2 = vmpackc.low %vm4913_vm12, %vm4849_vm11  ;;  %vm5106_vm12 = vcmp.eq.s32.totalorder %v3434_v38, %v17380_v13  ;;  %v3977_v38 = vld [vmem:[#allocation2 + $0x2670] sm:$0xff]  ;;  %v2860_v16 = vld [vmem:[#allocation2 + $0x388] sm:$0xff] }
 0x5d1   : > { %12567 = vmatpush1.bf16.xpose.msk.msra.mxu1 %vm12566_vm3, %v14140_v48  ;;  %vm12572_vm3 = vmpackc.low %vm5010_vm14, %vm4946_vm13  ;;  %vm5170_vm13 = vcmp.eq.s32.totalorder %v3498_v63, %v17380_v13  ;;  %v2729_v63 = vpack.c.bf16 %v17409_v29, %v17409_v29  ;;  %v3052_v29 = vld [vmem:[#allocation2 + $0x988] sm:$0xff] }
 0x5d2   : > { %13271 = vmatpush1.bf16.xpose.msk.msra.mxu0 %vm13270_vm6, %v14140_v48  ;;  %12569 = vmatprep.subr.msk.bf16.mxu1 %vm12568_vm7, %v14140_v48  ;;  %vm5009_vm6 = vcmp.eq.s32.totalorder %v3337_v27, %v17399_v40  ;;  %vm4977_vm7 = vcmp.eq.s32.totalorder %v3305_v52, %v17403_v18  ;;  %vm13280_vm0 = vmpackc.low %vm5170_vm13, %vm5106_vm12  ;;  %vm5201_vm13 = vcmp.eq.s32.totalorder %v3529_v37, %v17399_v40  ;;  %v4074_v37 = vld [vmem:[#allocation2 + $0x2978] sm:$0xff] }
 0x5d3   : > { %13273 = vmatprep.subr.msk.bf16.mxu0 %vm13272_vm8, %v14140_v48  ;;  %vm5041_vm8 = vcmp.eq.s32.totalorder %v3369_v43, %v17403_v18  ;;  %vm12574_vm11 = vmpackc.low %vm5009_vm6, %vm4945_vm5  ;;  %vm5202_vm5 = vcmp.eq.s32.totalorder %v3530_v5, %v17375_v9  ;;  %vm5266_vm6 = vcmp.eq.s32.totalorder %v3594_v4, %v17375_v9  ;;  %v1974_v27 = vrot.slane %v1761_v31, %v15991_v20  ;;  %v4042_v5 = vld [vmem:[#allocation2 + $0x2878] sm:$0xff]  ;;  %v2988_v43 = vld [vmem:[#allocation2 + $0x788] sm:$0xff] }
 0x5d4   : > { %vm13278_vm14 = vmpackc.low %vm5041_vm8, %vm4977_vm7  ;;  %vm5234_vm8 = vcmp.eq.s32.totalorder %v3562_v60, %v17380_v13  ;;  %v1978_v52 = vrot.slane %v1761_v31, %v15994_v21  ;;  %v4106_v4 = vld [vmem:[#allocation2 + $0x2a78] sm:$0xff]  ;;  %v2231_v60 = vcombine.low %v1966_v44, %v1970_v2  ;;  %v2892_v2 = vld [vmem:[#allocation2 + $0x488] sm:$0xff] }
 0x5d9   : > { %12571 = vmatpush1.bf16.xpose.msk.msra.mxu1 %vm12570_vm15, %v14140_v48  ;;  %vm12576_vm15 = vmpackc.low %vm5138_vm10, %vm5074_vm9  ;;  %vm5298_vm9 = vcmp.eq.s32.totalorder %v3626_v35, %v17380_v13  ;;  %v2232_v35 = vcombine.low %v1974_v27, %v1978_v52  ;;  %v2956_v27 = vld [vmem:[#allocation2 + $0x688] sm:$0xff] }
 0x5da   : > { %13275 = vmatpush1.bf16.xpose.msk.msra.mxu0 %vm13274_vm2, %v14140_v48  ;;  %12573 = vmatprep.subr.msk.bf16.mxu1 %vm12572_vm3, %v14140_v48  ;;  %vm5137_vm2 = vcmp.eq.s32.totalorder %v3465_v57, %v17399_v40  ;;  %vm5105_vm3 = vcmp.eq.s32.totalorder %v3433_v53, %v17403_v18  ;;  %vm13284_vm12 = vmpackc.low %vm5298_vm9, %vm5234_vm8  ;;  %vm5329_vm9 = vcmp.eq.s32.totalorder %v3657_v8, %v17399_v40  ;;  %v4009_v57 = vld [vmem:[#allocation2 + $0x2770] sm:$0xff]  ;;  %v2924_v52 = vld [vmem:[#allocation2 + $0x588] sm:$0xff] }
 0x5db   : > { %13277 = vmatprep.subr.msk.bf16.mxu0 %vm13276_vm4, %v14140_v48  ;;  %vm5169_vm4 = vcmp.eq.s32.totalorder %v3497_v3, %v17403_v18  ;;  %vm12578_vm7 = vmpackc.low %vm5137_vm2, %vm5073_vm1  ;;  %vm5330_vm1 = vcmp.eq.s32.totalorder %v3658_v22, %v17375_v9  ;;  %vm5394_vm2 = vcmp.eq.s32.totalorder %v3722_v15, %v17375_v9  ;;  %v2095_v53 = vcombine.low %v1838_v34, %v1842_v61  ;;  %v3148_v22 = vld [vmem:[#allocation2 + $0xc88] sm:$0xff]  ;;  %v3147_v8 = vld [vmem:[#allocation2 + $0xc80] sm:$0xff] }
 0x5dc   : > { %vm13282_vm10 = vmpackc.low %vm5169_vm4, %vm5105_vm3  ;;  %vm5362_vm4 = vcmp.eq.s32.totalorder %v3690_v17, %v17380_v13  ;;  %v2096_v3 = vcombine.low %v1846_v62, %v1850_v0  ;;  %v2239_v15 = vrot.slane %v2231_v60, %v16005_v25  ;;  %v2246_v17 = vrot.slane %v2232_v35, %v16005_v25  ;;  %v2795_v62 = vld [vmem:[#allocation2 + $0x180] sm:$0xff]  ;;  %v3084_v60 = vld [vmem:[#allocation2 + $0xa88] sm:$0xff] }
 0x5dd   : > { %v2859_v0 = vld [vmem:[#allocation2 + $0x380] sm:$0xff]  ;;  %v3116_v35 = vld [vmem:[#allocation2 + $0xb88] sm:$0xff] }
 0x5e1   : > { %12575 = vmatpush1.bf16.xpose.msk.msra.mxu1 %vm12574_vm11, %v14140_v48  ;;  %vm12580_vm11 = vmpackc.low %vm5266_vm6, %vm5202_vm5  ;;  %vm5426_vm5 = vcmp.eq.s32.totalorder %v3754_v32, %v17380_v13  ;;  %v3244_v32 = vld [vmem:[#allocation2 + $0xf88] sm:$0xff] }
 0x5e2   : > { %13279 = vmatpush1.bf16.xpose.msk.msra.mxu0 %vm13278_vm14, %v14140_v48  ;;  %12577 = vmatprep.subr.msk.bf16.mxu1 %vm12576_vm15, %v14140_v48  ;;  %vm5265_vm14 = vcmp.eq.s32.totalorder %v3593_v6, %v17399_v40  ;;  %vm5233_vm15 = vcmp.eq.s32.totalorder %v3561_v19, %v17403_v18  ;;  %vm13288_vm8 = vmpackc.low %vm5426_vm5, %vm5362_vm4  ;;  %vm5457_vm5 = vcmp.eq.s32.totalorder %v3785_v36, %v17399_v40  ;;  %v4138_v6 = vld [vmem:[#allocation2 + $0x2b78] sm:$0xff] }
 0x5e3   : > { %13281 = vmatprep.subr.msk.bf16.mxu0 %vm13280_vm0, %v14140_v48  ;;  %vm5297_vm0 = vcmp.eq.s32.totalorder %v3625_v41, %v17403_v18  ;;  %vm12582_vm3 = vmpackc.low %vm5265_vm14, %vm5201_vm13  ;;  %vm5458_vm13 = vcmp.eq.s32.totalorder %v3786_v10, %v17375_v9  ;;  %vm5522_vm14 = vcmp.eq.s32.totalorder %v3850_v56, %v17375_v9  ;;  %v2103_v19 = vrot.slane %v2095_v53, %v16005_v25  ;;  %v4073_v56 = vld [vmem:[#allocation2 + $0x2970] sm:$0xff]  ;;  %v2923_v53 = vld [vmem:[#allocation2 + $0x580] sm:$0xff] }
 0x5e4   : > { %vm13286_vm6 = vmpackc.low %vm5297_vm0, %vm5233_vm15  ;;  %v2110_v41 = vrot.slane %v2096_v3, %v16005_v25  ;;  %v2247_v36 = vcombine.low %v2239_v15, %v2246_v17  ;;  %v2987_v3 = vld [vmem:[#allocation2 + $0x780] sm:$0xff]  ;;  %v3212_v15 = vld [vmem:[#allocation2 + $0xe88] sm:$0xff] }
 0x5e5   : > { %v3180_v17 = vld [vmem:[#allocation2 + $0xd88] sm:$0xff] }
 0x5e6   : > { %v2111_v10 = vcombine.low %v2103_v19, %v2110_v41  ;;  %v3051_v19 = vld [vmem:[#allocation2 + $0x980] sm:$0xff] }
 0x5e7   : > { %v3115_v41 = vld [vmem:[#allocation2 + $0xb80] sm:$0xff] }
 0x5e8   : > { %v17637_v31 = vmul.f32 %v2111_v10, %v1743_v42  ;;  %v3276_v10 = vld [vmem:[#allocation2 + $0x1088] sm:$0xff] }
 0x5e9   : > { %12579 = vmatpush1.bf16.xpose.msk.msra.mxu1 %vm12578_vm7, %v14140_v48  ;;  %vm12584_vm7 = vmpackc.low %vm5394_vm2, %vm5330_vm1  ;;  %vm5490_vm1 = vcmp.eq.s32.totalorder %v3818_v12, %v17380_v13  ;;  %vm5554_vm2 = vcmp.eq.s32.totalorder %v3882_v58, %v17380_v13  ;;  %v4137_v12 = vld [vmem:[#allocation2 + $0x2b70] sm:$0xff]  ;;  %v3372_v42 = vld [vmem:[#allocation2 + $0x1388] sm:$0xff] }
 0x5ea   : > { %13283 = vmatpush1.bf16.xpose.msk.msra.mxu0 %vm13282_vm10, %v14140_v48  ;;  %12581 = vmatprep.subr.msk.bf16.mxu1 %vm12580_vm11, %v14140_v48  ;;  %vm5393_vm10 = vcmp.eq.s32.totalorder %v3721_v54, %v17399_v40  ;;  %vm5361_vm11 = vcmp.eq.s32.totalorder %v3689_v51, %v17403_v18  ;;  %vm13292_vm4 = vmpackc.low %vm5554_vm2, %vm5490_vm1  ;;  %vm5585_vm1 = vcmp.eq.s32.totalorder %v3913_v7, %v17399_v40  ;;  %v17605_v54 = vld [vmem:[%s14414_s1 + $0x30] sm:$0xff]  ;;  %v3211_v51 = vld [vmem:[#allocation2 + $0xe80] sm:$0xff] }
 0x5eb   : > { %13285 = vmatprep.subr.msk.bf16.mxu0 %vm13284_vm12, %v14140_v48  ;;  %vm5425_vm12 = vcmp.eq.s32.totalorder %v3753_v55, %v17403_v18  ;;  %vm12586_vm15 = vmpackc.low %vm5393_vm10, %vm5329_vm9  ;;  %vm5586_vm9 = vcmp.eq.s32.totalorder %v3914_v1, %v17375_v9  ;;  %vm5650_vm10 = vcmp.eq.s32.totalorder %v3978_v11, %v17375_v9  ;;  %vm5649_vm2 = vcmp.eq.s32.totalorder %v3977_v38, %v17399_v40  ;;  %v4105_v55 = vld [vmem:[#allocation2 + $0x2a70] sm:$0xff]  ;;  %v1751_v1 = vld [vmem:[%s14398_s6 + $0x60] sm:$0xff] }
 0x5ec   : > { %vm17513_vm0 = vmpackc.low %vm5425_vm12, %vm5361_vm11  ;;  %vm5618_vm12 = vcmp.eq.s32.totalorder %v3946_v45, %v17380_v13  ;;  %v2796_v11 = vld [vmem:[#allocation2 + $0x188] sm:$0xff]  ;;  %v17641_v45 = vmul.f32 %v2247_v36, %v1751_v1  ;;  %v17651_v34 = vrot.slane %v17605_v54, %v15906_v33  ;;  %v17655_v61 = vrot.slane %v17637_v31, %v16005_v25  ;;  %v3275_v36 = vld [vmem:[#allocation2 + $0x1080] sm:$0xff] }
 0x5ed   : > { %v2697_v7 = vpack.c.bf16 %v17406_v24, %v17406_v24  ;;  %v3371_v1 = vld [vmem:[#allocation2 + $0x1380] sm:$0xff] }
 0x5ee   : > { %v17659_v44 = vrot.slane %v17641_v45, %v16005_v25  ;;  %v2430_v28 = vcombine.high %v17655_v61, %v17655_v61 }
 0x5f0   : > { %v2566_v38 = vcombine.high %v17659_v44, %v17659_v44  ;;  %v2700_v24 = vpack.c.bf16 %v2430_v28, %v2430_v28  ;;  %v3564_v28 = vld [vmem:[#allocation2 + $0x1988] sm:$0xff] }
 0x5f1   : > { %12583 = vmatpush1.bf16.xpose.msk.msra.mxu1 %vm12582_vm3, %v14140_v48  ;;  %vm12588_vm3 = vmpackc.low %vm5522_vm14, %vm5458_vm13  ;;  %vm5682_vm13 = vcmp.eq.s32.totalorder %v4010_v26, %v17380_v13  ;;  %v2827_v26 = vld [vmem:[#allocation2 + $0x280] sm:$0xff] }
 0x5f2   : > { %13287 = vmatpush1.bf16.xpose.msk.msra.mxu0 %vm13286_vm6, %v14140_v48  ;;  %12585 = vmatprep.subr.msk.bf16.mxu1 %vm12584_vm7, %v14140_v48  ;;  %vm5521_vm6 = vcmp.eq.s32.totalorder %v3849_v39, %v17399_v40  ;;  %vm5489_vm7 = vcmp.eq.s32.totalorder %v3817_v23, %v17403_v18  ;;  %v2764_v39 = vld [vmem:[#allocation2 + $0x88] sm:$0xff] }
 0x5f3   : > { %13289 = vmatprep.subr.msk.bf16.mxu0 %vm13288_vm8, %v14140_v48  ;;  %vm5553_vm8 = vcmp.eq.s32.totalorder %v3881_v59, %v17403_v18  ;;  %vm17545_vm11 = vmpackc.low %vm5521_vm6, %vm5457_vm5  ;;  %vm5714_vm5 = vcmp.eq.s32.totalorder %v4042_v5, %v17375_v9  ;;  %vm5778_vm6 = vcmp.eq.s32.totalorder %v4106_v4, %v17375_v9  ;;  %v17598_v9 = vld [vmem:[%s14414_s1 + $0x10] sm:$0xff]  ;;  %v2828_v23 = vld [vmem:[#allocation2 + $0x288] sm:$0xff]  ;;  %v17621_v59 = vrot.slane %v17605_v54, %v15903_v30 }
 0x5f4   : > { %vm17555_vm14 = vmpackc.low %vm5553_vm8, %vm5489_vm7  ;;  %vm5746_vm8 = vcmp.eq.s32.totalorder %v4074_v37, %v17380_v13  ;;  %v17613_v58 = vrot.slane %v17598_v9, %v15903_v30  ;;  %v2732_v5 = vpack.c.bf16 %v2566_v38, %v2566_v38  ;;  %v3020_v4 = vld [vmem:[#allocation2 + $0x888] sm:$0xff]  ;;  %v3019_v37 = vld [vmem:[#allocation2 + $0x880] sm:$0xff] }
 0x5f5   : > { %vm17585_vm7 = vmpackc.low %vm5649_vm2, %vm5585_vm1  ;;  %v3531_v38 = vld [vmem:[#allocation2 + $0x1880] sm:$0xff] }
 0x5f6   : > { %vm4436_vm1 = vcmp.eq.s32.totalorder %v2764_v39, %v17613_v58  ;;  %vm4500_vm2 = vcmp.eq.s32.totalorder %v2828_v23, %v17613_v58  ;;  %v3339_v39 = vld [vmem:[#allocation2 + $0x1280] sm:$0xff] }
 0x5f7   : > { %v3307_v23 = vld [vmem:[#allocation2 + $0x1180] sm:$0xff] }
 0x5f9   : > { %12587 = vmatpush1.bf16.xpose.msk.msra.mxu1 %vm12586_vm15, %v14140_v48  ;;  %vm17563_vm15 = vmpackc.low %vm5650_vm10, %vm5586_vm9  ;;  %vm5810_vm9 = vcmp.eq.s32.totalorder %v4138_v6, %v17380_v13  ;;  %v4041_v13 = vld [vmem:[#allocation2 + $0x2870] sm:$0xff]  ;;  %v3083_v6 = vld [vmem:[#allocation2 + $0xa80] sm:$0xff] }
 0x5fa   : > { %13291 = vmatpush1.bf16.xpose.msk.msra.mxu0 %vm17513_vm0, %v14140_v48  ;;  %12589 = vmatprep.subr.msk.bf16.mxu1 %vm12588_vm3, %v14140_v48  ;;  %vm13296_vm0 = vmpackc.low %vm5682_vm13, %vm5618_vm12  ;;  %vm5617_vm3 = vcmp.eq.s32.totalorder %v3945_v14, %v17403_v18  ;;  %vm5713_vm13 = vcmp.eq.s32.totalorder %v4041_v13, %v17399_v40  ;;  %v2891_v14 = vld [vmem:[#allocation2 + $0x480] sm:$0xff] }
 0x5fb   : > { %13293 = vmatprep.subr.msk.bf16.mxu0 %vm13292_vm4, %v14140_v48  ;;  %vm5681_vm4 = vcmp.eq.s32.totalorder %v4009_v57, %v17403_v18  ;;  %vm17607_vm12 = vmpackc.low %vm5810_vm9, %vm5746_vm8  ;;  %v2955_v57 = vld [vmem:[#allocation2 + $0x680] sm:$0xff] }
 0x5fc   : > { %vm17593_vm10 = vmpackc.low %vm5681_vm4, %vm5617_vm3  ;;  %vm4468_vm4 = vcmp.eq.s32.totalorder %v2796_v11, %v17621_v59  ;;  %v3179_v13 = vld [vmem:[#allocation2 + $0xd80] sm:$0xff]  ;;  %v3404_v11 = vld [vmem:[#allocation2 + $0x1488] sm:$0xff] }
 0x601   : > { %12591 = vmatpush1.bf16.xpose.msk.msra.mxu1 %vm17545_vm11, %v14140_v48  ;;  %vm17600_vm11 = vmpackc.low %vm5778_vm6, %vm5714_vm5  ;;  %vm4532_vm5 = vcmp.eq.s32.totalorder %v2860_v16, %v17621_v59  ;;  %v3468_v16 = vld [vmem:[#allocation2 + $0x1688] sm:$0xff] }
 0x602   : > { %13295 = vmatpush1.bf16.xpose.msk.msra.mxu0 %vm17555_vm14, %v14140_v48  ;;  %12593 = vmatprep.subr.msk.bf16.mxu1 %vm17563_vm15, %v14140_v48  ;;  %vm5777_vm14 = vcmp.eq.s32.totalorder %v4105_v55, %v17399_v40  ;;  %vm5745_vm15 = vcmp.eq.s32.totalorder %v4073_v56, %v17403_v18  ;;  %v17647_v40 = vrot.slane %v17598_v9, %v15906_v33  ;;  %vm13304_vm8 = vmpackc.low %vm4532_vm5, %vm4468_vm4  ;;  %v3243_v55 = vld [vmem:[#allocation2 + $0xf80] sm:$0xff]  ;;  %v3340_v56 = vld [vmem:[#allocation2 + $0x1288] sm:$0xff] }
 0x603   : > { %13297 = vmatprep.subr.msk.bf16.mxu0 %vm13296_vm0, %v14140_v48  ;;  %vm5809_vm0 = vcmp.eq.s32.totalorder %v4137_v12, %v17403_v18  ;;  %vm12598_vm3 = vmpackc.low %vm5777_vm14, %vm5713_vm13  ;;  %v2763_v18 = vld [vmem:[#allocation2 + $0x80] sm:$0xff]  ;;  %vm4564_vm13 = vcmp.eq.s32.totalorder %v2892_v2, %v17613_v58  ;;  %vm4628_vm14 = vcmp.eq.s32.totalorder %v2956_v27, %v17613_v58  ;;  %v3308_v12 = vld [vmem:[#allocation2 + $0x1188] sm:$0xff] }
 0x604   : > { %vm13302_vm6 = vmpackc.low %vm5809_vm0, %vm5745_vm15  ;;  %vm4435_vm9 = vcmp.eq.s32.totalorder %v2763_v18, %v17647_v40  ;;  %vm4596_vm0 = vcmp.eq.s32.totalorder %v2924_v52, %v17621_v59  ;;  %vm4563_vm5 = vcmp.eq.s32.totalorder %v2891_v14, %v17647_v40  ;;  %v3436_v18 = vld [vmem:[#allocation2 + $0x1588] sm:$0xff]  ;;  %v3435_v2 = vld [vmem:[#allocation2 + $0x1580] sm:$0xff] }
 0x605   : > { %v3499_v27 = vld [vmem:[#allocation2 + $0x1780] sm:$0xff]  ;;  %v3532_v52 = vld [vmem:[#allocation2 + $0x1888] sm:$0xff] }
 0x606   : > { %v3563_v14 = vld [vmem:[#allocation2 + $0x1980] sm:$0xff] }
 0x609   : > { %12595 = vmatpush1.bf16.xpose.msk.msra.mxu1 %vm17585_vm7, %v14140_v48  ;;  %vm12600_vm7 = vmpackc.low %vm4500_vm2, %vm4436_vm1  ;;  %vm4660_vm1 = vcmp.eq.s32.totalorder %v2988_v43, %v17621_v59  ;;  %v3596_v43 = vld [vmem:[#allocation2 + $0x1a88] sm:$0xff] }
 0x60a   : > { %13299 = vmatpush1.bf16.xpose.msk.msra.mxu0 %vm17593_vm10, %v14140_v48  ;;  %12597 = vmatprep.subr.msk.bf16.mxu1 %vm17600_vm11, %v14140_v48  ;;  %vm4499_vm10 = vcmp.eq.s32.totalorder %v2827_v26, %v17647_v40  ;;  %vm4467_vm11 = vcmp.eq.s32.totalorder %v2795_v62, %v17651_v34  ;;  %vm13308_vm4 = vmpackc.low %vm4660_vm1, %vm4596_vm0  ;;  %vm4691_vm1 = vcmp.eq.s32.totalorder %v3019_v37, %v17647_v40  ;;  %v3500_v26 = vld [vmem:[#allocation2 + $0x1788] sm:$0xff]  ;;  %v3403_v62 = vld [vmem:[#allocation2 + $0x1480] sm:$0xff] }
 0x60b   : > { %13301 = vmatprep.subr.msk.bf16.mxu0 %vm17607_vm12, %v14140_v48  ;;  %vm4531_vm12 = vcmp.eq.s32.totalorder %v2859_v0, %v17651_v34  ;;  %vm12602_vm15 = vmpackc.low %vm4499_vm10, %vm4435_vm9  ;;  %vm4692_vm9 = vcmp.eq.s32.totalorder %v3020_v4, %v17613_v58  ;;  %vm4756_vm10 = vcmp.eq.s32.totalorder %v3084_v60, %v17613_v58  ;;  %v3467_v0 = vld [vmem:[#allocation2 + $0x1680] sm:$0xff]  ;;  %v3788_v37 = vld [vmem:[#allocation2 + $0x2088] sm:$0xff] }
 0x60c   : > { %vm13306_vm2 = vmpackc.low %vm4531_vm12, %vm4467_vm11  ;;  %vm4724_vm12 = vcmp.eq.s32.totalorder %v3052_v29, %v17621_v59  ;;  %v3659_v4 = vld [vmem:[#allocation2 + $0x1c80] sm:$0xff] }
 0x60d   : > { %v3723_v60 = vld [vmem:[#allocation2 + $0x1e80] sm:$0xff] }
 0x60e   : > { %v3691_v29 = vld [vmem:[#allocation2 + $0x1d80] sm:$0xff] }
 0x611   : > { %12599 = vmatpush1.bf16.xpose.msk.msra.mxu1 %vm12598_vm3, %v14140_v48  ;;  %vm12604_vm3 = vmpackc.low %vm4628_vm14, %vm4564_vm13  ;;  %vm4788_vm13 = vcmp.eq.s32.totalorder %v3116_v35, %v17621_v59  ;;  %v3755_v35 = vld [vmem:[#allocation2 + $0x1f80] sm:$0xff] }
 0x612   : > { %13303 = vmatpush1.bf16.xpose.msk.msra.mxu0 %vm13302_vm6, %v14140_v48  ;;  %12601 = vmatprep.subr.msk.bf16.mxu1 %vm12600_vm7, %v14140_v48  ;;  %vm4627_vm6 = vcmp.eq.s32.totalorder %v2955_v57, %v17647_v40  ;;  %vm4595_vm7 = vcmp.eq.s32.totalorder %v2923_v53, %v17651_v34  ;;  %vm13312_vm0 = vmpackc.low %vm4788_vm13, %vm4724_vm12  ;;  %vm4819_vm13 = vcmp.eq.s32.totalorder %v3147_v8, %v17647_v40  ;;  %v3627_v57 = vld [vmem:[#allocation2 + $0x1b80] sm:$0xff]  ;;  %v3724_v53 = vld [vmem:[#allocation2 + $0x1e88] sm:$0xff] }
 0x613   : > { %13305 = vmatprep.subr.msk.bf16.mxu0 %vm13304_vm8, %v14140_v48  ;;  %vm4659_vm8 = vcmp.eq.s32.totalorder %v2987_v3, %v17651_v34  ;;  %vm12606_vm11 = vmpackc.low %vm4627_vm6, %vm4563_vm5  ;;  %vm4820_vm5 = vcmp.eq.s32.totalorder %v3148_v22, %v17613_v58  ;;  %vm4884_vm6 = vcmp.eq.s32.totalorder %v3212_v15, %v17613_v58  ;;  %v3692_v3 = vld [vmem:[#allocation2 + $0x1d88] sm:$0xff]  ;;  %v3787_v22 = vld [vmem:[#allocation2 + $0x2080] sm:$0xff] }
 0x614   : > { %vm13310_vm14 = vmpackc.low %vm4659_vm8, %vm4595_vm7  ;;  %vm4852_vm8 = vcmp.eq.s32.totalorder %v3180_v17, %v17621_v59  ;;  %v3851_v15 = vld [vmem:[#allocation2 + $0x2280] sm:$0xff]  ;;  %v3916_v8 = vld [vmem:[#allocation2 + $0x2488] sm:$0xff] }
 0x615   : > { %v3819_v17 = vld [vmem:[#allocation2 + $0x2180] sm:$0xff] }
 0x618   : > { %9668 = vmatmul.mubr.bf16.vlgmr.msra.gmra.mrb[0].mxu1 %v2697_v7  ;;  %v3628_v7 = vld [vmem:[#allocation2 + $0x1b88] sm:$0xff] }
 0x619   : > { %12603 = vmatpush1.bf16.xpose.msk.msra.mxu1 %vm12602_vm15, %v14140_v48  ;;  %10324 = vmatmul.mubr.bf16.vlgmr.msra.gmra.mrb[0].mxu0 %v2729_v63  ;;  %vm12608_vm15 = vmpackc.low %vm4756_vm10, %vm4692_vm9  ;;  %vm4916_vm9 = vcmp.eq.s32.totalorder %v3244_v32, %v17621_v59  ;;  %v3595_v63 = vld [vmem:[#allocation2 + $0x1a80] sm:$0xff] }
 0x61a   : > { %13307 = vmatpush1.bf16.xpose.msk.msra.mxu0 %vm13306_vm2, %v14140_v48  ;;  %12605 = vmatprep.subr.msk.bf16.mxu1 %vm12604_vm3, %v14140_v48  ;;  %vm4755_vm2 = vcmp.eq.s32.totalorder %v3083_v6, %v17647_v40  ;;  %vm4723_vm3 = vcmp.eq.s32.totalorder %v3051_v19, %v17651_v34  ;;  %vm13316_vm12 = vmpackc.low %vm4916_vm9, %vm4852_vm8  ;;  %vm4947_vm9 = vcmp.eq.s32.totalorder %v3275_v36, %v17647_v40  ;;  %v3852_v6 = vld [vmem:[#allocation2 + $0x2288] sm:$0xff]  ;;  %v3883_v32 = vld [vmem:[#allocation2 + $0x2380] sm:$0xff] }
 0x61b   : > { %13309 = vmatprep.subr.msk.bf16.mxu0 %vm13308_vm4, %v14140_v48  ;;  %9708 = vmatprep.mubr.bf16.mxu1 %v2700_v24  ;;  %vm4787_vm4 = vcmp.eq.s32.totalorder %v3115_v41, %v17651_v34  ;;  %vm12610_vm7 = vmpackc.low %vm4755_vm2, %vm4691_vm1  ;;  %vm4948_vm1 = vcmp.eq.s32.totalorder %v3276_v10, %v17613_v58  ;;  %vm5012_vm2 = vcmp.eq.s32.totalorder %v3340_v56, %v17613_v58  ;;  %v3660_v24 = vld [vmem:[#allocation2 + $0x1c88] sm:$0xff]  ;;  %v3915_v10 = vld [vmem:[#allocation2 + $0x2480] sm:$0xff] }
 0x61c   : > { %10364 = vmatprep.mubr.bf16.mxu0 %v2732_v5  ;;  %vm13314_vm10 = vmpackc.low %vm4787_vm4, %vm4723_vm3  ;;  %vm4980_vm4 = vcmp.eq.s32.totalorder %v3308_v12, %v17621_v59  ;;  %v3756_v5 = vld [vmem:[#allocation2 + $0x1f88] sm:$0xff]  ;;  %v3979_v56 = vld [vmem:[#allocation2 + $0x2680] sm:$0xff] }
 0x61d   : > { %v3820_v19 = vld [vmem:[#allocation2 + $0x2188] sm:$0xff]  ;;  %v3947_v12 = vld [vmem:[#allocation2 + $0x2580] sm:$0xff] }
 0x61e   : > { %v3884_v41 = vld [vmem:[#allocation2 + $0x2388] sm:$0xff] }
 0x61f   : > { %v4044_v36 = vld [vmem:[#allocation2 + $0x2888] sm:$0xff] }
 0x621   : > { %12607 = vmatpush1.bf16.xpose.msk.msra.mxu1 %vm12606_vm11, %v14140_v48  ;;  %vm12612_vm11 = vmpackc.low %vm4884_vm6, %vm4820_vm5  ;;  %vm5044_vm5 = vcmp.eq.s32.totalorder %v3372_v42, %v17621_v59  ;;  %v4011_v42 = vld [vmem:[#allocation2 + $0x2780] sm:$0xff] }
 0x622   : > { %13311 = vmatpush1.bf16.xpose.msk.msra.mxu0 %vm13310_vm14, %v14140_v48  ;;  %12609 = vmatprep.subr.msk.bf16.mxu1 %vm12608_vm15, %v14140_v48  ;;  %vm4883_vm14 = vcmp.eq.s32.totalorder %v3211_v51, %v17647_v40  ;;  %vm4851_vm15 = vcmp.eq.s32.totalorder %v3179_v13, %v17651_v34  ;;  %vm13320_vm8 = vmpackc.low %vm5044_vm5, %vm4980_vm4  ;;  %vm5075_vm5 = vcmp.eq.s32.totalorder %v3403_v62, %v17647_v40  ;;  %v3980_v51 = vld [vmem:[#allocation2 + $0x2688] sm:$0xff] }
 0x623   : > { %13313 = vmatprep.subr.msk.bf16.mxu0 %vm13312_vm0, %v14140_v48  ;;  %vm4915_vm0 = vcmp.eq.s32.totalorder %v3243_v55, %v17651_v34  ;;  %vm12614_vm3 = vmpackc.low %vm4883_vm14, %vm4819_vm13  ;;  %vm5076_vm13 = vcmp.eq.s32.totalorder %v3404_v11, %v17613_v58  ;;  %vm5140_vm14 = vcmp.eq.s32.totalorder %v3468_v16, %v17613_v58  ;;  %v3948_v13 = vld [vmem:[#allocation2 + $0x2588] sm:$0xff]  ;;  %v4043_v11 = vld [vmem:[#allocation2 + $0x2880] sm:$0xff]  ;;  %v17791_v62 = vrot.slane %v17598_v9, %v15994_v21 }
 0x624   : > { %vm13318_vm6 = vmpackc.low %vm4915_vm0, %vm4851_vm15  ;;  %vm5108_vm0 = vcmp.eq.s32.totalorder %v3436_v18, %v17621_v59  ;;  %v4012_v55 = vld [vmem:[#allocation2 + $0x2788] sm:$0xff]  ;;  %v4107_v16 = vld [vmem:[#allocation2 + $0x2a80] sm:$0xff] }
 0x625   : > { %v4075_v18 = vld [vmem:[#allocation2 + $0x2980] sm:$0xff] }
 0x629   : > { %12611 = vmatpush1.bf16.xpose.msk.msra.mxu1 %vm12610_vm7, %v14140_v48  ;;  %vm12616_vm7 = vmpackc.low %vm5012_vm2, %vm4948_vm1  ;;  %vm5172_vm1 = vcmp.eq.s32.totalorder %v3500_v26, %v17621_v59  ;;  %v4139_v26 = vld [vmem:[#allocation2 + $0x2b80] sm:$0xff] }
 0x62a   : > { %13315 = vmatpush1.bf16.xpose.msk.msra.mxu0 %vm13314_vm10, %v14140_v48  ;;  %12613 = vmatprep.subr.msk.bf16.mxu1 %vm12612_vm11, %v14140_v48  ;;  %vm5011_vm10 = vcmp.eq.s32.totalorder %v3339_v39, %v17647_v40  ;;  %vm4979_vm11 = vcmp.eq.s32.totalorder %v3307_v23, %v17651_v34  ;;  %vm13324_vm4 = vmpackc.low %vm5172_vm1, %vm5108_vm0  ;;  %vm5203_vm1 = vcmp.eq.s32.totalorder %v3531_v38, %v17647_v40  ;;  %v4108_v39 = vld [vmem:[#allocation2 + $0x2a88] sm:$0xff]  ;;  %v2861_v38 = vld [vmem:[#allocation2 + $0x390] sm:$0xff] }
 0x62b   : > { %13317 = vmatprep.subr.msk.bf16.mxu0 %vm13316_vm12, %v14140_v48  ;;  %vm5043_vm12 = vcmp.eq.s32.totalorder %v3371_v1, %v17651_v34  ;;  %vm12618_vm15 = vmpackc.low %vm5011_vm10, %vm4947_vm9  ;;  %vm5204_vm9 = vcmp.eq.s32.totalorder %v3532_v52, %v17613_v58  ;;  %vm5268_vm10 = vcmp.eq.s32.totalorder %v3596_v43, %v17613_v58  ;;  %v4076_v23 = vld [vmem:[#allocation2 + $0x2988] sm:$0xff]  ;;  %v2415_v52 = vcombine.high %v17637_v31, %v17637_v31  ;;  %v2829_v31 = vld [vmem:[#allocation2 + $0x290] sm:$0xff] }
 0x62c   : > { %vm13322_vm2 = vmpackc.low %vm5043_vm12, %vm4979_vm11  ;;  %vm5236_vm12 = vcmp.eq.s32.totalorder %v3564_v28, %v17621_v59  ;;  %v4140_v1 = vld [vmem:[#allocation2 + $0x2b88] sm:$0xff]  ;;  %v2551_v43 = vcombine.high %v17641_v45, %v17641_v45  ;;  %v17819_v28 = vrot.slane %v17605_v54, %v15991_v20  ;;  %v2797_v45 = vld [vmem:[#allocation2 + $0x190] sm:$0xff] }
 0x631   : > { %12615 = vmatpush1.bf16.xpose.msk.msra.mxu1 %vm12614_vm3, %v14140_v48  ;;  %vm12620_vm3 = vmpackc.low %vm5140_vm14, %vm5076_vm13  ;;  %vm5300_vm13 = vcmp.eq.s32.totalorder %v3628_v7, %v17621_v59  ;;  %v17822_v7 = vrot.slane %v2415_v52, %v16005_v25  ;;  %v3405_v52 = vld [vmem:[#allocation2 + $0x1490] sm:$0xff] }
 0x632   : > { %13319 = vmatpush1.bf16.xpose.msk.msra.mxu0 %vm13318_vm6, %v14140_v48  ;;  %12617 = vmatprep.subr.msk.bf16.mxu1 %vm12616_vm7, %v14140_v48  ;;  %vm5139_vm6 = vcmp.eq.s32.totalorder %v3467_v0, %v17647_v40  ;;  %vm5107_vm7 = vcmp.eq.s32.totalorder %v3435_v2, %v17651_v34  ;;  %vm13328_vm0 = vmpackc.low %vm5300_vm13, %vm5236_vm12  ;;  %vm5331_vm13 = vcmp.eq.s32.totalorder %v3659_v4, %v17647_v40  ;;  %v2766_v0 = vld [vmem:[#allocation2 + $0x98] sm:$0xff]  ;;  %v2893_v4 = vld [vmem:[#allocation2 + $0x490] sm:$0xff] }
 0x633   : > { %13321 = vmatprep.subr.msk.bf16.mxu0 %vm13320_vm8, %v14140_v48  ;;  %vm5171_vm8 = vcmp.eq.s32.totalorder %v3499_v27, %v17651_v34  ;;  %vm12622_vm11 = vmpackc.low %vm5139_vm6, %vm5075_vm5  ;;  %vm5332_vm5 = vcmp.eq.s32.totalorder %v3660_v24, %v17613_v58  ;;  %vm5396_vm6 = vcmp.eq.s32.totalorder %v3724_v53, %v17613_v58  ;;  %v17796_v2 = vrot.slane %v17605_v54, %v15994_v21  ;;  %v2862_v27 = vld [vmem:[#allocation2 + $0x398] sm:$0xff] }
 0x634   : > { %vm13326_vm14 = vmpackc.low %vm5171_vm8, %vm5107_vm7  ;;  %vm5364_vm8 = vcmp.eq.s32.totalorder %v3692_v3, %v17621_v59  ;;  %v2926_v54 = vld [vmem:[#allocation2 + $0x598] sm:$0xff]  ;;  %v2431_v24 = vcombine.high %v17822_v7, %v17822_v7  ;;  %v2699_v53 = vpack.c.bf16 %v17655_v61, %v17655_v61 }
 0x636   : > { %v2702_v61 = vpack.c.bf16 %v2431_v24, %v2431_v24  ;;  %v3565_v24 = vld [vmem:[#allocation2 + $0x1990] sm:$0xff] }
 0x639   : > { %12619 = vmatpush1.bf16.xpose.msk.msra.mxu1 %vm12618_vm15, %v14140_v48  ;;  %vm12624_vm15 = vmpackc.low %vm5268_vm10, %vm5204_vm9  ;;  %vm5428_vm9 = vcmp.eq.s32.totalorder %v3756_v5, %v17621_v59  ;;  %v2731_v5 = vpack.c.bf16 %v17659_v44, %v17659_v44  ;;  %v3054_v44 = vld [vmem:[#allocation2 + $0x998] sm:$0xff] }
 0x63a   : > { %13323 = vmatpush1.bf16.xpose.msk.msra.mxu0 %vm13322_vm2, %v14140_v48  ;;  %12621 = vmatprep.subr.msk.bf16.mxu1 %vm12620_vm3, %v14140_v48  ;;  %vm5267_vm2 = vcmp.eq.s32.totalorder %v3595_v63, %v17647_v40  ;;  %vm5235_vm3 = vcmp.eq.s32.totalorder %v3563_v14, %v17651_v34  ;;  %vm13332_vm12 = vmpackc.low %vm5428_vm9, %vm5364_vm8  ;;  %vm5459_vm9 = vcmp.eq.s32.totalorder %v3787_v22, %v17647_v40  ;;  %v2958_v14 = vld [vmem:[#allocation2 + $0x698] sm:$0xff]  ;;  %v3021_v22 = vld [vmem:[#allocation2 + $0x890] sm:$0xff] }
 0x63b   : > { %13325 = vmatprep.subr.msk.bf16.mxu0 %vm13324_vm4, %v14140_v48  ;;  %vm5299_vm4 = vcmp.eq.s32.totalorder %v3627_v57, %v17651_v34  ;;  %vm12626_vm7 = vmpackc.low %vm5267_vm2, %vm5203_vm1  ;;  %vm5460_vm1 = vcmp.eq.s32.totalorder %v3788_v37, %v17613_v58  ;;  %vm5524_vm2 = vcmp.eq.s32.totalorder %v3852_v6, %v17613_v58  ;;  %v17825_v63 = vrot.slane %v2551_v43, %v16005_v25  ;;  %v2990_v57 = vld [vmem:[#allocation2 + $0x798] sm:$0xff]  ;;  %v3469_v43 = vld [vmem:[#allocation2 + $0x1690] sm:$0xff] }
 0x63c   : > { %vm13330_vm10 = vmpackc.low %vm5299_vm4, %vm5235_vm3  ;;  %vm5492_vm4 = vcmp.eq.s32.totalorder %v3820_v19, %v17621_v59  ;;  %v3022_v6 = vld [vmem:[#allocation2 + $0x898] sm:$0xff] }
 0x63d   : > { %v2567_v3 = vcombine.high %v17825_v63, %v17825_v63  ;;  %v3086_v19 = vld [vmem:[#allocation2 + $0xa98] sm:$0xff] }
 0x63f   : > { %v2734_v37 = vpack.c.bf16 %v2567_v3, %v2567_v3  ;;  %v3662_v3 = vld [vmem:[#allocation2 + $0x1c98] sm:$0xff] }
 0x641   : > { %12623 = vmatpush1.bf16.xpose.msk.msra.mxu1 %vm12622_vm11, %v14140_v48  ;;  %vm12628_vm11 = vmpackc.low %vm5396_vm6, %vm5332_vm5  ;;  %vm5556_vm5 = vcmp.eq.s32.totalorder %v3884_v41, %v17621_v59  ;;  %v3118_v41 = vld [vmem:[#allocation2 + $0xb98] sm:$0xff] }
 0x642   : > { %13327 = vmatpush1.bf16.xpose.msk.msra.mxu0 %vm13326_vm14, %v14140_v48  ;;  %12625 = vmatprep.subr.msk.bf16.mxu1 %vm12624_vm15, %v14140_v48  ;;  %vm5395_vm14 = vcmp.eq.s32.totalorder %v3723_v60, %v17647_v40  ;;  %vm5363_vm15 = vcmp.eq.s32.totalorder %v3691_v29, %v17651_v34  ;;  %vm13336_vm8 = vmpackc.low %vm5556_vm5, %vm5492_vm4  ;;  %vm5587_vm5 = vcmp.eq.s32.totalorder %v3915_v10, %v17647_v40  ;;  %v2957_v60 = vld [vmem:[#allocation2 + $0x690] sm:$0xff] }
 0x643   : > { %13329 = vmatprep.subr.msk.bf16.mxu0 %vm13328_vm0, %v14140_v48  ;;  %vm5427_vm0 = vcmp.eq.s32.totalorder %v3755_v35, %v17651_v34  ;;  %vm12630_vm3 = vmpackc.low %vm5395_vm14, %vm5331_vm13  ;;  %vm5588_vm13 = vcmp.eq.s32.totalorder %v3916_v8, %v17613_v58  ;;  %vm5652_vm14 = vcmp.eq.s32.totalorder %v3980_v51, %v17613_v58  ;;  %v2925_v29 = vld [vmem:[#allocation2 + $0x590] sm:$0xff]  ;;  %v3150_v8 = vld [vmem:[#allocation2 + $0xc98] sm:$0xff] }
 0x644   : > { %vm13334_vm6 = vmpackc.low %vm5427_vm0, %vm5363_vm15  ;;  %vm5620_vm0 = vcmp.eq.s32.totalorder %v3948_v13, %v17621_v59  ;;  %v2989_v35 = vld [vmem:[#allocation2 + $0x790] sm:$0xff]  ;;  %v3214_v51 = vld [vmem:[#allocation2 + $0xe98] sm:$0xff] }
 0x645   : > { %v3182_v13 = vld [vmem:[#allocation2 + $0xd98] sm:$0xff]  ;;  %v3149_v10 = vld [vmem:[#allocation2 + $0xc90] sm:$0xff] }
 0x649   : > { %12627 = vmatpush1.bf16.xpose.msk.msra.mxu1 %vm12626_vm7, %v14140_v48  ;;  %vm12632_vm7 = vmpackc.low %vm5524_vm2, %vm5460_vm1  ;;  %vm5684_vm1 = vcmp.eq.s32.totalorder %v4012_v55, %v17621_v59  ;;  %v3246_v55 = vld [vmem:[#allocation2 + $0xf98] sm:$0xff] }
 0x64a   : > { %13331 = vmatpush1.bf16.xpose.msk.msra.mxu0 %vm13330_vm10, %v14140_v48  ;;  %12629 = vmatprep.subr.msk.bf16.mxu1 %vm12628_vm11, %v14140_v48  ;;  %vm5523_vm10 = vcmp.eq.s32.totalorder %v3851_v15, %v17647_v40  ;;  %vm5491_vm11 = vcmp.eq.s32.totalorder %v3819_v17, %v17651_v34  ;;  %vm13340_vm4 = vmpackc.low %vm5684_vm1, %vm5620_vm0  ;;  %vm5715_vm1 = vcmp.eq.s32.totalorder %v4043_v11, %v17647_v40  ;;  %v3085_v15 = vld [vmem:[#allocation2 + $0xa90] sm:$0xff] }
 0x64b   : > { %13333 = vmatprep.subr.msk.bf16.mxu0 %vm13332_vm12, %v14140_v48  ;;  %vm5555_vm12 = vcmp.eq.s32.totalorder %v3883_v32, %v17651_v34  ;;  %vm12634_vm15 = vmpackc.low %vm5523_vm10, %vm5459_vm9  ;;  %vm5716_vm9 = vcmp.eq.s32.totalorder %v4044_v36, %v17613_v58  ;;  %vm5780_vm10 = vcmp.eq.s32.totalorder %v4108_v39, %v17613_v58  ;;  %v2830_v58 = vld [vmem:[#allocation2 + $0x298] sm:$0xff]  ;;  %v3053_v17 = vld [vmem:[#allocation2 + $0x990] sm:$0xff] }
 0x64c   : > { %vm13338_vm2 = vmpackc.low %vm5555_vm12, %vm5491_vm11  ;;  %vm5748_vm12 = vcmp.eq.s32.totalorder %v4076_v23, %v17621_v59  ;;  %v3117_v32 = vld [vmem:[#allocation2 + $0xb90] sm:$0xff]  ;;  %v3278_v36 = vld [vmem:[#allocation2 + $0x1098] sm:$0xff] }
 0x64d   : > { %v3342_v39 = vld [vmem:[#allocation2 + $0x1298] sm:$0xff]  ;;  %v3277_v11 = vld [vmem:[#allocation2 + $0x1090] sm:$0xff] }
 0x64e   : > { %v3310_v23 = vld [vmem:[#allocation2 + $0x1198] sm:$0xff] }
 0x651   : > { %12631 = vmatpush1.bf16.xpose.msk.msra.mxu1 %vm12630_vm3, %v14140_v48  ;;  %vm12636_vm3 = vmpackc.low %vm5652_vm14, %vm5588_vm13  ;;  %vm5812_vm13 = vcmp.eq.s32.totalorder %v4140_v1, %v17621_v59  ;;  %v2798_v59 = vld [vmem:[#allocation2 + $0x198] sm:$0xff] }
 0x652   : > { %13335 = vmatpush1.bf16.xpose.msk.msra.mxu0 %vm13334_vm6, %v14140_v48  ;;  %12633 = vmatprep.subr.msk.bf16.mxu1 %vm12632_vm7, %v14140_v48  ;;  %vm5651_vm6 = vcmp.eq.s32.totalorder %v3979_v56, %v17647_v40  ;;  %vm5619_vm7 = vcmp.eq.s32.totalorder %v3947_v12, %v17651_v34  ;;  %vm13344_vm0 = vmpackc.low %vm5812_vm13, %vm5748_vm12  ;;  %v3213_v56 = vld [vmem:[#allocation2 + $0xe90] sm:$0xff]  ;;  %v3374_v1 = vld [vmem:[#allocation2 + $0x1398] sm:$0xff] }
 0x653   : > { %13337 = vmatprep.subr.msk.bf16.mxu0 %vm13336_vm8, %v14140_v48  ;;  %vm5683_vm8 = vcmp.eq.s32.totalorder %v4011_v42, %v17651_v34  ;;  %vm12638_vm11 = vmpackc.low %vm5651_vm6, %vm5587_vm5  ;;  %vm4438_vm5 = vcmp.eq.s32.totalorder %v2766_v0, %v17791_v62  ;;  %vm4502_vm6 = vcmp.eq.s32.totalorder %v2830_v58, %v17791_v62  ;;  %v3181_v12 = vld [vmem:[#allocation2 + $0xd90] sm:$0xff]  ;;  %v3406_v0 = vld [vmem:[#allocation2 + $0x1498] sm:$0xff] }
 0x654   : > { %vm13342_vm14 = vmpackc.low %vm5683_vm8, %vm5619_vm7  ;;  %vm4470_vm8 = vcmp.eq.s32.totalorder %v2798_v59, %v17796_v2  ;;  %v3245_v42 = vld [vmem:[#allocation2 + $0xf90] sm:$0xff]  ;;  %v3470_v58 = vld [vmem:[#allocation2 + $0x1698] sm:$0xff] }
 0x655   : > { %v3438_v59 = vld [vmem:[#allocation2 + $0x1598] sm:$0xff] }
 0x659   : > { %12635 = vmatpush1.bf16.xpose.msk.msra.mxu1 %vm12634_vm15, %v14140_v48  ;;  %vm12640_vm15 = vmpackc.low %vm5780_vm10, %vm5716_vm9  ;;  %vm4534_vm9 = vcmp.eq.s32.totalorder %v2862_v27, %v17796_v2  ;;  %v3502_v27 = vld [vmem:[#allocation2 + $0x1798] sm:$0xff] }
 0x65a   : > { %13339 = vmatpush1.bf16.xpose.msk.msra.mxu0 %vm13338_vm2, %v14140_v48  ;;  %12637 = vmatprep.subr.msk.bf16.mxu1 %vm12636_vm3, %v14140_v48  ;;  %vm5779_vm2 = vcmp.eq.s32.totalorder %v4107_v16, %v17647_v40  ;;  %vm5747_vm3 = vcmp.eq.s32.totalorder %v4075_v18, %v17651_v34  ;;  %v17815_v40 = vrot.slane %v17598_v9, %v15991_v20  ;;  %vm13348_vm12 = vmpackc.low %vm4534_vm9, %vm4470_vm8  ;;  %v2894_v9 = vld [vmem:[#allocation2 + $0x498] sm:$0xff]  ;;  %v3341_v16 = vld [vmem:[#allocation2 + $0x1290] sm:$0xff] }
 0x65b   : > { %13341 = vmatprep.subr.msk.bf16.mxu0 %vm13340_vm4, %v14140_v48  ;;  %vm5811_vm4 = vcmp.eq.s32.totalorder %v4139_v26, %v17651_v34  ;;  %vm12642_vm7 = vmpackc.low %vm5779_vm2, %vm5715_vm1  ;;  %v2765_v34 = vld [vmem:[#allocation2 + $0x90] sm:$0xff]  ;;  %vm4566_vm1 = vcmp.eq.s32.totalorder %v2894_v9, %v17791_v62  ;;  %vm4630_vm2 = vcmp.eq.s32.totalorder %v2958_v14, %v17791_v62  ;;  %v3566_v9 = vld [vmem:[#allocation2 + $0x1998] sm:$0xff] }
 0x65c   : > { %vm13346_vm10 = vmpackc.low %vm5811_vm4, %vm5747_vm3  ;;  %vm4437_vm13 = vcmp.eq.s32.totalorder %v2765_v34, %v17815_v40  ;;  %vm4598_vm4 = vcmp.eq.s32.totalorder %v2926_v54, %v17796_v2  ;;  %vm4565_vm9 = vcmp.eq.s32.totalorder %v2893_v4, %v17815_v40  ;;  %v3309_v18 = vld [vmem:[#allocation2 + $0x1190] sm:$0xff]  ;;  %v3630_v14 = vld [vmem:[#allocation2 + $0x1b98] sm:$0xff] }
 0x65d   : > { %v3373_v26 = vld [vmem:[#allocation2 + $0x1390] sm:$0xff]  ;;  %v3694_v4 = vld [vmem:[#allocation2 + $0x1d98] sm:$0xff] }
 0x65e   : > { %v3437_v34 = vld [vmem:[#allocation2 + $0x1590] sm:$0xff] }
 0x65f   : > { %v3533_v54 = vld [vmem:[#allocation2 + $0x1890] sm:$0xff] }
 0x661   : > { %12639 = vmatpush1.bf16.xpose.msk.msra.mxu1 %vm12638_vm11, %v14140_v48  ;;  %vm12644_vm11 = vmpackc.low %vm4502_vm6, %vm4438_vm5  ;;  %vm4662_vm5 = vcmp.eq.s32.totalorder %v2990_v57, %v17796_v2  ;;  %v3597_v57 = vld [vmem:[#allocation2 + $0x1a90] sm:$0xff] }
 0x662   : > { %13343 = vmatpush1.bf16.xpose.msk.msra.mxu0 %vm13342_vm14, %v14140_v48  ;;  %12641 = vmatprep.subr.msk.bf16.mxu1 %vm12640_vm15, %v14140_v48  ;;  %vm4501_vm14 = vcmp.eq.s32.totalorder %v2829_v31, %v17815_v40  ;;  %vm4469_vm15 = vcmp.eq.s32.totalorder %v2797_v45, %v17819_v28  ;;  %vm13352_vm8 = vmpackc.low %vm4662_vm5, %vm4598_vm4  ;;  %vm4693_vm5 = vcmp.eq.s32.totalorder %v3021_v22, %v17815_v40  ;;  %v3501_v31 = vld [vmem:[#allocation2 + $0x1790] sm:$0xff]  ;;  %v3534_v45 = vld [vmem:[#allocation2 + $0x1898] sm:$0xff] }
 0x663   : > { %13345 = vmatprep.subr.msk.bf16.mxu0 %vm13344_vm0, %v14140_v48  ;;  %vm4533_vm0 = vcmp.eq.s32.totalorder %v2861_v38, %v17819_v28  ;;  %vm12646_vm3 = vmpackc.low %vm4501_vm14, %vm4437_vm13  ;;  %vm4694_vm13 = vcmp.eq.s32.totalorder %v3022_v6, %v17791_v62  ;;  %vm4758_vm14 = vcmp.eq.s32.totalorder %v3086_v19, %v17791_v62  ;;  %v3598_v38 = vld [vmem:[#allocation2 + $0x1a98] sm:$0xff]  ;;  %v3789_v22 = vld [vmem:[#allocation2 + $0x2090] sm:$0xff] }
 0x664   : > { %vm13350_vm6 = vmpackc.low %vm4533_vm0, %vm4469_vm15  ;;  %vm4726_vm0 = vcmp.eq.s32.totalorder %v3054_v44, %v17796_v2  ;;  %v3790_v6 = vld [vmem:[#allocation2 + $0x2098] sm:$0xff] }
 0x665   : > { %v3854_v19 = vld [vmem:[#allocation2 + $0x2298] sm:$0xff] }
 0x666   : > { %v3822_v44 = vld [vmem:[#allocation2 + $0x2198] sm:$0xff] }
 0x669   : > { %12643 = vmatpush1.bf16.xpose.msk.msra.mxu1 %vm12642_vm7, %v14140_v48  ;;  %vm12648_vm7 = vmpackc.low %vm4630_vm2, %vm4566_vm1  ;;  %vm4790_vm1 = vcmp.eq.s32.totalorder %v3118_v41, %v17796_v2  ;;  %v3886_v41 = vld [vmem:[#allocation2 + $0x2398] sm:$0xff] }
 0x66a   : > { %13347 = vmatpush1.bf16.xpose.msk.msra.mxu0 %vm13346_vm10, %v14140_v48  ;;  %12645 = vmatprep.subr.msk.bf16.mxu1 %vm12644_vm11, %v14140_v48  ;;  %vm4629_vm10 = vcmp.eq.s32.totalorder %v2957_v60, %v17815_v40  ;;  %vm4597_vm11 = vcmp.eq.s32.totalorder %v2925_v29, %v17819_v28  ;;  %vm13356_vm4 = vmpackc.low %vm4790_vm1, %vm4726_vm0  ;;  %vm4821_vm1 = vcmp.eq.s32.totalorder %v3149_v10, %v17815_v40  ;;  %v3758_v60 = vld [vmem:[#allocation2 + $0x1f98] sm:$0xff]  ;;  %v3725_v29 = vld [vmem:[#allocation2 + $0x1e90] sm:$0xff] }
 0x66b   : > { %13349 = vmatprep.subr.msk.bf16.mxu0 %vm13348_vm12, %v14140_v48  ;;  %vm4661_vm12 = vcmp.eq.s32.totalorder %v2989_v35, %v17819_v28  ;;  %vm12650_vm15 = vmpackc.low %vm4629_vm10, %vm4565_vm9  ;;  %vm4822_vm9 = vcmp.eq.s32.totalorder %v3150_v8, %v17791_v62  ;;  %vm4886_vm10 = vcmp.eq.s32.totalorder %v3214_v51, %v17791_v62  ;;  %v3693_v35 = vld [vmem:[#allocation2 + $0x1d90] sm:$0xff]  ;;  %v3918_v8 = vld [vmem:[#allocation2 + $0x2498] sm:$0xff] }
 0x66c   : > { %vm13354_vm2 = vmpackc.low %vm4661_vm12, %vm4597_vm11  ;;  %vm4854_vm12 = vcmp.eq.s32.totalorder %v3182_v13, %v17796_v2  ;;  %v3982_v51 = vld [vmem:[#allocation2 + $0x2698] sm:$0xff]  ;;  %v13910_v10 = vld [vmem:[%s14405_s7 + $0x10] sm:$0xff] }
 0x66d   : > { %v3950_v13 = vld [vmem:[#allocation2 + $0x2598] sm:$0xff] }
 0x670   : > { %9709 = vmatmul.mubr.bf16.vlgmr.msra.gmra.mrb[0].mxu1 %v2699_v53  ;;  %v3629_v53 = vld [vmem:[#allocation2 + $0x1b90] sm:$0xff] }
 0x671   : > { %12647 = vmatpush1.bf16.xpose.msk.msra.mxu1 %vm12646_vm3, %v14140_v48  ;;  %10365 = vmatmul.mubr.bf16.vlgmr.msra.gmra.mrb[0].mxu0 %v2731_v5  ;;  %vm12652_vm3 = vmpackc.low %vm4758_vm14, %vm4694_vm13  ;;  %vm4918_vm13 = vcmp.eq.s32.totalorder %v3246_v55, %v17796_v2  ;;  %v3726_v5 = vld [vmem:[#allocation2 + $0x1e98] sm:$0xff] }
 0x672   : > { %13351 = vmatpush1.bf16.xpose.msk.msra.mxu0 %vm13350_vm6, %v14140_v48  ;;  %12649 = vmatprep.subr.msk.bf16.mxu1 %vm12648_vm7, %v14140_v48  ;;  %vm4757_vm6 = vcmp.eq.s32.totalorder %v3085_v15, %v17815_v40  ;;  %vm4725_vm7 = vcmp.eq.s32.totalorder %v3053_v17, %v17819_v28  ;;  %vm13360_vm0 = vmpackc.low %vm4918_vm13, %vm4854_vm12  ;;  %vm4949_vm13 = vcmp.eq.s32.totalorder %v3277_v11, %v17815_v40  ;;  %v3853_v15 = vld [vmem:[#allocation2 + $0x2290] sm:$0xff]  ;;  %v4014_v55 = vld [vmem:[#allocation2 + $0x2798] sm:$0xff] }
 0x673   : > { %13353 = vmatprep.subr.msk.bf16.mxu0 %vm13352_vm8, %v14140_v48  ;;  %9749 = vmatprep.mubr.bf16.mxu1 %v2702_v61  ;;  %vm4789_vm8 = vcmp.eq.s32.totalorder %v3117_v32, %v17819_v28  ;;  %vm12654_vm11 = vmpackc.low %vm4757_vm6, %vm4693_vm5  ;;  %vm4950_vm5 = vcmp.eq.s32.totalorder %v3278_v36, %v17791_v62  ;;  %vm5014_vm6 = vcmp.eq.s32.totalorder %v3342_v39, %v17791_v62  ;;  %v3661_v61 = vld [vmem:[#allocation2 + $0x1c90] sm:$0xff] }
 0x674   : > { %10405 = vmatprep.mubr.bf16.mxu0 %v2734_v37  ;;  %vm13358_vm14 = vmpackc.low %vm4789_vm8, %vm4725_vm7  ;;  %vm4982_vm8 = vcmp.eq.s32.totalorder %v3310_v23, %v17796_v2  ;;  %v3757_v37 = vld [vmem:[#allocation2 + $0x1f90] sm:$0xff]  ;;  %v1866_v36 = vrot.slane %v13910_v10, %v16289_v47 }
 0x675   : > { %v3821_v17 = vld [vmem:[#allocation2 + $0x2190] sm:$0xff] }
 0x676   : > { %v3885_v32 = vld [vmem:[#allocation2 + $0x2390] sm:$0xff] }
 0x677   : > { %v13911_v39 = vld [vmem:[%s14405_s7 + $0x30] sm:$0xff] }
 0x678   : > { %v1982_v23 = vrot.slane %v13911_v39, %v16299_v50  ;;  %v1990_v11 = vrot.slane %v13911_v39, %v16286_v46 }
 0x679   : > { %12651 = vmatpush1.bf16.xpose.msk.msra.mxu1 %vm12650_vm15, %v14140_v48  ;;  %vm12656_vm15 = vmpackc.low %vm4886_vm10, %vm4822_vm9  ;;  %vm5046_vm9 = vcmp.eq.s32.totalorder %v3374_v1, %v17796_v2  ;;  %v1986_v1 = vrot.slane %v13911_v39, %v16292_v49 }
 0x67a   : > { %13355 = vmatpush1.bf16.xpose.msk.msra.mxu0 %vm13354_vm2, %v14140_v48  ;;  %12653 = vmatprep.subr.msk.bf16.mxu1 %vm12652_vm3, %v14140_v48  ;;  %vm4885_vm2 = vcmp.eq.s32.totalorder %v3213_v56, %v17815_v40  ;;  %vm4853_vm3 = vcmp.eq.s32.totalorder %v3181_v12, %v17819_v28  ;;  %vm13364_vm12 = vmpackc.low %vm5046_vm9, %vm4982_vm8  ;;  %vm5077_vm9 = vcmp.eq.s32.totalorder %v3405_v52, %v17815_v40  ;;  %v4013_v52 = vld [vmem:[#allocation2 + $0x2790] sm:$0xff] }
 0x67b   : > { %13357 = vmatprep.subr.msk.bf16.mxu0 %vm13356_vm4, %v14140_v48  ;;  %vm4917_vm4 = vcmp.eq.s32.totalorder %v3245_v42, %v17819_v28  ;;  %vm12658_vm7 = vmpackc.low %vm4885_vm2, %vm4821_vm1  ;;  %vm5078_vm1 = vcmp.eq.s32.totalorder %v3406_v0, %v17791_v62  ;;  %vm5142_vm2 = vcmp.eq.s32.totalorder %v3470_v58, %v17791_v62  ;;  %v1854_v56 = vrot.slane %v13910_v10, %v16299_v50  ;;  %v3917_v0 = vld [vmem:[#allocation2 + $0x2490] sm:$0xff] }
 0x67c   : > { %vm13362_vm10 = vmpackc.low %vm4917_vm4, %vm4853_vm3  ;;  %vm5110_vm4 = vcmp.eq.s32.totalorder %v3438_v59, %v17796_v2  ;;  %v1858_v12 = vrot.slane %v13910_v10, %v16292_v49  ;;  %v1862_v42 = vrot.slane %v13910_v10, %v16286_v46  ;;  %v3981_v58 = vld [vmem:[#allocation2 + $0x2690] sm:$0xff]  ;;  %v2733_v59 = vpack.c.bf16 %v17825_v63, %v17825_v63  ;;  %v3056_v63 = vld [vmem:[#allocation2 + $0x9a8] sm:$0xff] }
 0x681   : > { %12655 = vmatpush1.bf16.xpose.msk.msra.mxu1 %vm12654_vm11, %v14140_v48  ;;  %vm12660_vm11 = vmpackc.low %vm5014_vm6, %vm4950_vm5  ;;  %vm5174_vm5 = vcmp.eq.s32.totalorder %v3502_v27, %v17796_v2  ;;  %v3949_v27 = vld [vmem:[#allocation2 + $0x2590] sm:$0xff] }
 0x682   : > { %13359 = vmatpush1.bf16.xpose.msk.msra.mxu0 %vm13358_vm14, %v14140_v48  ;;  %12657 = vmatprep.subr.msk.bf16.mxu1 %vm12656_vm15, %v14140_v48  ;;  %vm5013_vm14 = vcmp.eq.s32.totalorder %v3341_v16, %v17815_v40  ;;  %vm4981_vm15 = vcmp.eq.s32.totalorder %v3309_v18, %v17819_v28  ;;  %vm13368_vm8 = vmpackc.low %vm5174_vm5, %vm5110_vm4  ;;  %vm5205_vm5 = vcmp.eq.s32.totalorder %v3533_v54, %v17815_v40  ;;  %v4142_v54 = vld [vmem:[#allocation2 + $0x2b98] sm:$0xff]  ;;  %v2992_v18 = vld [vmem:[#allocation2 + $0x7a8] sm:$0xff] }
 0x683   : > { %13361 = vmatprep.subr.msk.bf16.mxu0 %vm13360_vm0, %v14140_v48  ;;  %vm5045_vm0 = vcmp.eq.s32.totalorder %v3373_v26, %v17819_v28  ;;  %vm12662_vm3 = vmpackc.low %vm5013_vm14, %vm4949_vm13  ;;  %vm5206_vm13 = vcmp.eq.s32.totalorder %v3534_v45, %v17791_v62  ;;  %vm5270_vm14 = vcmp.eq.s32.totalorder %v3598_v38, %v17791_v62  ;;  %v1994_v16 = vrot.slane %v13911_v39, %v16289_v47  ;;  %v4110_v45 = vld [vmem:[#allocation2 + $0x2a98] sm:$0xff]  ;;  %v2863_v39 = vld [vmem:[#allocation2 + $0x3a0] sm:$0xff] }
 0x684   : > { %vm13366_vm6 = vmpackc.low %vm5045_vm0, %vm4981_vm15  ;;  %vm5238_vm0 = vcmp.eq.s32.totalorder %v3566_v9, %v17796_v2  ;;  %v2248_v38 = vcombine.low %v1982_v23, %v1986_v1  ;;  %v2896_v1 = vld [vmem:[#allocation2 + $0x4a8] sm:$0xff] }
 0x685   : > { %v2249_v9 = vcombine.low %v1990_v11, %v1994_v16  ;;  %v2960_v11 = vld [vmem:[#allocation2 + $0x6a8] sm:$0xff] }
 0x686   : > { %v2928_v16 = vld [vmem:[#allocation2 + $0x5a8] sm:$0xff] }
 0x689   : > { %12659 = vmatpush1.bf16.xpose.msk.msra.mxu1 %vm12658_vm7, %v14140_v48  ;;  %vm12664_vm7 = vmpackc.low %vm5142_vm2, %vm5078_vm1  ;;  %vm5302_vm1 = vcmp.eq.s32.totalorder %v3630_v14, %v17796_v2  ;;  %v4078_v14 = vld [vmem:[#allocation2 + $0x2998] sm:$0xff] }
 0x68a   : > { %13363 = vmatpush1.bf16.xpose.msk.msra.mxu0 %vm13362_vm10, %v14140_v48  ;;  %12661 = vmatprep.subr.msk.bf16.mxu1 %vm12660_vm11, %v14140_v48  ;;  %vm5141_vm10 = vcmp.eq.s32.totalorder %v3469_v43, %v17815_v40  ;;  %vm5109_vm11 = vcmp.eq.s32.totalorder %v3437_v34, %v17819_v28  ;;  %vm13372_vm4 = vmpackc.low %vm5302_vm1, %vm5238_vm0  ;;  %vm5333_vm1 = vcmp.eq.s32.totalorder %v3661_v61, %v17815_v40  ;;  %v4045_v61 = vld [vmem:[#allocation2 + $0x2890] sm:$0xff] }
 0x68b   : > { %13365 = vmatprep.subr.msk.bf16.mxu0 %vm13364_vm12, %v14140_v48  ;;  %vm5173_vm12 = vcmp.eq.s32.totalorder %v3501_v31, %v17819_v28  ;;  %vm12666_vm15 = vmpackc.low %vm5141_vm10, %vm5077_vm9  ;;  %vm5334_vm9 = vcmp.eq.s32.totalorder %v3662_v3, %v17791_v62  ;;  %vm5398_vm10 = vcmp.eq.s32.totalorder %v3726_v5, %v17791_v62  ;;  %v2112_v43 = vcombine.low %v1854_v56, %v1858_v12  ;;  %v4046_v31 = vld [vmem:[#allocation2 + $0x2898] sm:$0xff]  ;;  %v2831_v56 = vld [vmem:[#allocation2 + $0x2a0] sm:$0xff] }
 0x68c   : > { %vm13370_vm2 = vmpackc.low %vm5173_vm12, %vm5109_vm11  ;;  %vm5366_vm12 = vcmp.eq.s32.totalorder %v3694_v4, %v17796_v2  ;;  %v2113_v34 = vcombine.low %v1862_v42, %v1866_v36  ;;  %v2256_v3 = vrot.slane %v2248_v38, %v16005_v25  ;;  %v2263_v5 = vrot.slane %v2249_v9, %v16005_v25  ;;  %v2799_v36 = vld [vmem:[#allocation2 + $0x1a0] sm:$0xff]  ;;  %v3088_v38 = vld [vmem:[#allocation2 + $0xaa8] sm:$0xff] }
 0x68d   : > { %v3120_v9 = vld [vmem:[#allocation2 + $0xba8] sm:$0xff]  ;;  %v3151_v4 = vld [vmem:[#allocation2 + $0xca0] sm:$0xff] }
 0x691   : > { %12663 = vmatpush1.bf16.xpose.msk.msra.mxu1 %vm12662_vm3, %v14140_v48  ;;  %vm12668_vm3 = vmpackc.low %vm5270_vm14, %vm5206_vm13  ;;  %vm5430_vm13 = vcmp.eq.s32.totalorder %v3758_v60, %v17796_v2  ;;  %v3215_v60 = vld [vmem:[#allocation2 + $0xea0] sm:$0xff] }
 0x692   : > { %13367 = vmatpush1.bf16.xpose.msk.msra.mxu0 %vm13366_vm6, %v14140_v48  ;;  %12665 = vmatprep.subr.msk.bf16.mxu1 %vm12664_vm7, %v14140_v48  ;;  %vm5269_vm6 = vcmp.eq.s32.totalorder %v3597_v57, %v17815_v40  ;;  %vm5237_vm7 = vcmp.eq.s32.totalorder %v3565_v24, %v17819_v28  ;;  %vm13376_vm0 = vmpackc.low %vm5430_vm13, %vm5366_vm12  ;;  %vm5461_vm13 = vcmp.eq.s32.totalorder %v3789_v22, %v17815_v40  ;;  %v2768_v22 = vld [vmem:[#allocation2 + $0xa8] sm:$0xff] }
 0x693   : > { %13369 = vmatprep.subr.msk.bf16.mxu0 %vm13368_vm8, %v14140_v48  ;;  %vm5301_vm8 = vcmp.eq.s32.totalorder %v3629_v53, %v17819_v28  ;;  %vm12670_vm11 = vmpackc.low %vm5269_vm6, %vm5205_vm5  ;;  %vm5462_vm5 = vcmp.eq.s32.totalorder %v3790_v6, %v17791_v62  ;;  %vm5526_vm6 = vcmp.eq.s32.totalorder %v3854_v19, %v17791_v62  ;;  %v2120_v57 = vrot.slane %v2112_v43, %v16005_v25  ;;  %v18016_v6 = vld [vmem:[%s14414_s1 + $0x10] sm:$0xff]  ;;  %v2927_v43 = vld [vmem:[#allocation2 + $0x5a0] sm:$0xff] }
 0x694   : > { %vm13374_vm14 = vmpackc.low %vm5301_vm8, %vm5237_vm7  ;;  %v2127_v24 = vrot.slane %v2113_v34, %v16005_v25  ;;  %v18020_v19 = vrot.slane %v18016_v6, %v16292_v49  ;;  %v2991_v34 = vld [vmem:[#allocation2 + $0x7a0] sm:$0xff]  ;;  %v3152_v53 = vld [vmem:[#allocation2 + $0xca8] sm:$0xff] }
 0x699   : > { %12667 = vmatpush1.bf16.xpose.msk.msra.mxu1 %vm12666_vm15, %v14140_v48  ;;  %vm12672_vm15 = vmpackc.low %vm5398_vm10, %vm5334_vm9  ;;  %vm5494_vm9 = vcmp.eq.s32.totalorder %v3822_v44, %v17796_v2  ;;  %vm5558_vm10 = vcmp.eq.s32.totalorder %v3886_v41, %v17796_v2  ;;  %v1744_v44 = vld [vmem:[%s14398_s6 + $0x28] sm:$0xff]  ;;  %v2264_v41 = vcombine.low %v2256_v3, %v2263_v5 }
 0x69a   : > { %13371 = vmatpush1.bf16.xpose.msk.msra.mxu0 %vm13370_vm2, %v14140_v48  ;;  %12669 = vmatprep.subr.msk.bf16.mxu1 %vm12668_vm3, %v14140_v48  ;;  %vm5397_vm2 = vcmp.eq.s32.totalorder %v3725_v29, %v17815_v40  ;;  %vm5365_vm3 = vcmp.eq.s32.totalorder %v3693_v35, %v17819_v28  ;;  %vm13380_vm12 = vmpackc.low %vm5558_vm10, %vm5494_vm9  ;;  %vm5589_vm9 = vcmp.eq.s32.totalorder %v3917_v0, %v17815_v40  ;;  %v4077_v35 = vld [vmem:[#allocation2 + $0x2990] sm:$0xff]  ;;  %v3216_v3 = vld [vmem:[#allocation2 + $0xea8] sm:$0xff] }
 0x69b   : > { %13373 = vmatprep.subr.msk.bf16.mxu0 %vm13372_vm4, %v14140_v48  ;;  %vm5429_vm4 = vcmp.eq.s32.totalorder %v3757_v37, %v17819_v28  ;;  %vm12674_vm7 = vmpackc.low %vm5397_vm2, %vm5333_vm1  ;;  %vm5590_vm1 = vcmp.eq.s32.totalorder %v3918_v8, %v17791_v62  ;;  %vm5654_vm2 = vcmp.eq.s32.totalorder %v3982_v51, %v17791_v62  ;;  %vm5653_vm10 = vcmp.eq.s32.totalorder %v3981_v58, %v17815_v40  ;;  %v4141_v37 = vld [vmem:[#allocation2 + $0x2b90] sm:$0xff]  ;;  %v1752_v8 = vld [vmem:[%s14398_s6 + $0x68] sm:$0xff] }
 0x69c   : > { %vm13378_vm8 = vmpackc.low %vm5429_vm4, %vm5365_vm3  ;;  %vm5622_vm4 = vcmp.eq.s32.totalorder %v3950_v13, %v17796_v2  ;;  %v2128_v29 = vcombine.low %v2120_v57, %v2127_v24  ;;  %v2800_v51 = vld [vmem:[#allocation2 + $0x1a8] sm:$0xff]  ;;  %v18051_v10 = vmul.f32 %v2264_v41, %v1752_v8  ;;  %v2701_v0 = vpack.c.bf16 %v17822_v7, %v17822_v7  ;;  %v3055_v57 = vld [vmem:[#allocation2 + $0x9a0] sm:$0xff] }
 0x69d   : > { %v2864_v13 = vld [vmem:[#allocation2 + $0x3a8] sm:$0xff]  ;;  %v3119_v24 = vld [vmem:[#allocation2 + $0xba0] sm:$0xff] }
 0x69e   : > { %v18069_v23 = vrot.slane %v18051_v10, %v16005_v25  ;;  %v3184_v5 = vld [vmem:[#allocation2 + $0xda8] sm:$0xff]  ;;  %v3279_v41 = vld [vmem:[#allocation2 + $0x10a0] sm:$0xff] }
 0x69f   : > { %v3375_v8 = vld [vmem:[#allocation2 + $0x13a0] sm:$0xff] }
 0x6a0   : > { %v2583_v58 = vcombine.high %v18069_v23, %v18069_v23 }
 0x6a1   : > { %12671 = vmatpush1.bf16.xpose.msk.msra.mxu1 %vm12670_vm11, %v14140_v48  ;;  %vm12676_vm11 = vmpackc.low %vm5526_vm6, %vm5462_vm5  ;;  %vm5686_vm5 = vcmp.eq.s32.totalorder %v4014_v55, %v17796_v2  ;;  %v18047_v55 = vmul.f32 %v2128_v29, %v1744_v44  ;;  %v3280_v29 = vld [vmem:[#allocation2 + $0x10a8] sm:$0xff] }
 0x6a2   : > { %13375 = vmatpush1.bf16.xpose.msk.msra.mxu0 %vm13374_vm14, %v14140_v48  ;;  %12673 = vmatprep.subr.msk.bf16.mxu1 %vm12672_vm15, %v14140_v48  ;;  %vm5525_vm14 = vcmp.eq.s32.totalorder %v3853_v15, %v17815_v40  ;;  %vm5493_vm15 = vcmp.eq.s32.totalorder %v3821_v17, %v17819_v28  ;;  %v2832_v15 = vld [vmem:[#allocation2 + $0x2a8] sm:$0xff]  ;;  %v18027_v17 = vld [vmem:[%s14414_s1 + $0x30] sm:$0xff] }
 0x6a3   : > { %13377 = vmatprep.subr.msk.bf16.mxu0 %vm13376_vm0, %v14140_v48  ;;  %vm5557_vm0 = vcmp.eq.s32.totalorder %v3885_v32, %v17819_v28  ;;  %vm17955_vm3 = vmpackc.low %vm5525_vm14, %vm5461_vm13  ;;  %vm5718_vm13 = vcmp.eq.s32.totalorder %v4046_v31, %v17791_v62  ;;  %vm5782_vm14 = vcmp.eq.s32.totalorder %v4110_v45, %v17791_v62  ;;  %v18031_v32 = vrot.slane %v18027_v17, %v16292_v49  ;;  %v3024_v45 = vld [vmem:[#allocation2 + $0x8a8] sm:$0xff] }
 0x6a4   : > { %vm17965_vm6 = vmpackc.low %vm5557_vm0, %vm5493_vm15  ;;  %vm5750_vm0 = vcmp.eq.s32.totalorder %v4078_v14, %v17796_v2  ;;  %v18061_v12 = vrot.slane %v18027_v17, %v16299_v50  ;;  %v18065_v42 = vrot.slane %v18047_v55, %v16005_v25  ;;  %v2736_v31 = vpack.c.bf16 %v2583_v58, %v2583_v58  ;;  %v3023_v14 = vld [vmem:[#allocation2 + $0x8a0] sm:$0xff]  ;;  %v3248_v62 = vld [vmem:[#allocation2 + $0xfa8] sm:$0xff] }
 0x6a5   : > { %vm17995_vm15 = vmpackc.low %vm5653_vm10, %vm5589_vm9  ;;  %vm4440_vm9 = vcmp.eq.s32.totalorder %v2768_v22, %v18020_v19  ;;  %vm4504_vm10 = vcmp.eq.s32.totalorder %v2832_v15, %v18020_v19  ;;  %v3376_v44 = vld [vmem:[#allocation2 + $0x13a8] sm:$0xff]  ;;  %v3343_v22 = vld [vmem:[#allocation2 + $0x12a0] sm:$0xff] }
 0x6a6   : > { %v2447_v26 = vcombine.high %v18065_v42, %v18065_v42  ;;  %v3311_v15 = vld [vmem:[#allocation2 + $0x11a0] sm:$0xff] }
 0x6a7   : > { %v3535_v58 = vld [vmem:[#allocation2 + $0x18a0] sm:$0xff] }
 0x6a8   : > { %v2704_v7 = vpack.c.bf16 %v2447_v26, %v2447_v26  ;;  %v3568_v26 = vld [vmem:[#allocation2 + $0x19a8] sm:$0xff] }
 0x6a9   : > { %12675 = vmatpush1.bf16.xpose.msk.msra.mxu1 %vm12674_vm7, %v14140_v48  ;;  %vm17973_vm7 = vmpackc.low %vm5654_vm2, %vm5590_vm1  ;;  %vm5814_vm1 = vcmp.eq.s32.totalorder %v4142_v54, %v17796_v2  ;;  %v4109_v2 = vld [vmem:[#allocation2 + $0x2a90] sm:$0xff]  ;;  %v3087_v54 = vld [vmem:[#allocation2 + $0xaa0] sm:$0xff] }
 0x6aa   : > { %13379 = vmatpush1.bf16.xpose.msk.msra.mxu0 %vm13378_vm8, %v14140_v48  ;;  %12677 = vmatprep.subr.msk.bf16.mxu1 %vm12676_vm11, %v14140_v48  ;;  %vm13384_vm8 = vmpackc.low %vm5686_vm5, %vm5622_vm4  ;;  %vm5621_vm11 = vcmp.eq.s32.totalorder %v3949_v27, %v17819_v28  ;;  %vm5717_vm5 = vcmp.eq.s32.totalorder %v4045_v61, %v17815_v40  ;;  %v2895_v27 = vld [vmem:[#allocation2 + $0x4a0] sm:$0xff] }
 0x6ab   : > { %13381 = vmatprep.subr.msk.bf16.mxu0 %vm13380_vm12, %v14140_v48  ;;  %vm5685_vm12 = vcmp.eq.s32.totalorder %v4013_v52, %v17819_v28  ;;  %vm18011_vm4 = vmpackc.low %vm5814_vm1, %vm5750_vm0  ;;  %v2959_v52 = vld [vmem:[#allocation2 + $0x6a0] sm:$0xff] }
 0x6ac   : > { %vm18003_vm2 = vmpackc.low %vm5685_vm12, %vm5621_vm11  ;;  %vm4472_vm12 = vcmp.eq.s32.totalorder %v2800_v51, %v18031_v32  ;;  %v3183_v61 = vld [vmem:[#allocation2 + $0xda0] sm:$0xff]  ;;  %v3408_v51 = vld [vmem:[#allocation2 + $0x14a8] sm:$0xff] }
 0x6b1   : > { %12679 = vmatpush1.bf16.xpose.msk.msra.mxu1 %vm17955_vm3, %v14140_v48  ;;  %vm18007_vm3 = vmpackc.low %vm5782_vm14, %vm5718_vm13  ;;  %vm4536_vm13 = vcmp.eq.s32.totalorder %v2864_v13, %v18031_v32  ;;  %v3472_v13 = vld [vmem:[#allocation2 + $0x16a8] sm:$0xff] }
 0x6b2   : > { %13383 = vmatpush1.bf16.xpose.msk.msra.mxu0 %vm17965_vm6, %v14140_v48  ;;  %12681 = vmatprep.subr.msk.bf16.mxu1 %vm17973_vm7, %v14140_v48  ;;  %vm5781_vm6 = vcmp.eq.s32.totalorder %v4109_v2, %v17815_v40  ;;  %vm5749_vm7 = vcmp.eq.s32.totalorder %v4077_v35, %v17819_v28  ;;  %v18057_v40 = vrot.slane %v18016_v6, %v16299_v50  ;;  %vm13392_vm0 = vmpackc.low %vm4536_vm13, %vm4472_vm12  ;;  %v3247_v2 = vld [vmem:[#allocation2 + $0xfa0] sm:$0xff]  ;;  %v3344_v35 = vld [vmem:[#allocation2 + $0x12a8] sm:$0xff] }
 0x6b3   : > { %13385 = vmatprep.subr.msk.bf16.mxu0 %vm13384_vm8, %v14140_v48  ;;  %vm5813_vm8 = vcmp.eq.s32.totalorder %v4141_v37, %v17819_v28  ;;  %vm12686_vm11 = vmpackc.low %vm5781_vm6, %vm5717_vm5  ;;  %v2767_v28 = vld [vmem:[#allocation2 + $0xa0] sm:$0xff]  ;;  %vm4568_vm5 = vcmp.eq.s32.totalorder %v2896_v1, %v18020_v19  ;;  %vm4632_vm6 = vcmp.eq.s32.totalorder %v2960_v11, %v18020_v19  ;;  %v3312_v37 = vld [vmem:[#allocation2 + $0x11a8] sm:$0xff] }
 0x6b4   : > { %vm13390_vm14 = vmpackc.low %vm5813_vm8, %vm5749_vm7  ;;  %vm4439_vm1 = vcmp.eq.s32.totalorder %v2767_v28, %v18057_v40  ;;  %vm4600_vm8 = vcmp.eq.s32.totalorder %v2928_v16, %v18031_v32  ;;  %vm4567_vm13 = vcmp.eq.s32.totalorder %v2895_v27, %v18057_v40  ;;  %v3440_v28 = vld [vmem:[#allocation2 + $0x15a8] sm:$0xff]  ;;  %v3439_v1 = vld [vmem:[#allocation2 + $0x15a0] sm:$0xff] }
 0x6b5   : > { %v3503_v11 = vld [vmem:[#allocation2 + $0x17a0] sm:$0xff]  ;;  %v3536_v16 = vld [vmem:[#allocation2 + $0x18a8] sm:$0xff] }
 0x6b6   : > { %v3567_v27 = vld [vmem:[#allocation2 + $0x19a0] sm:$0xff] }
 0x6b9   : > { %12683 = vmatpush1.bf16.xpose.msk.msra.mxu1 %vm17995_vm15, %v14140_v48  ;;  %vm12688_vm15 = vmpackc.low %vm4504_vm10, %vm4440_vm9  ;;  %vm4664_vm9 = vcmp.eq.s32.totalorder %v2992_v18, %v18031_v32  ;;  %v3600_v18 = vld [vmem:[#allocation2 + $0x1aa8] sm:$0xff] }
 0x6ba   : > { %13387 = vmatpush1.bf16.xpose.msk.msra.mxu0 %vm18003_vm2, %v14140_v48  ;;  %12685 = vmatprep.subr.msk.bf16.mxu1 %vm18007_vm3, %v14140_v48  ;;  %vm4503_vm2 = vcmp.eq.s32.totalorder %v2831_v56, %v18057_v40  ;;  %vm4471_vm3 = vcmp.eq.s32.totalorder %v2799_v36, %v18061_v12  ;;  %vm13396_vm12 = vmpackc.low %vm4664_vm9, %vm4600_vm8  ;;  %vm4695_vm9 = vcmp.eq.s32.totalorder %v3023_v14, %v18057_v40  ;;  %v3504_v56 = vld [vmem:[#allocation2 + $0x17a8] sm:$0xff]  ;;  %v3407_v36 = vld [vmem:[#allocation2 + $0x14a0] sm:$0xff] }
 0x6bb   : > { %13389 = vmatprep.subr.msk.bf16.mxu0 %vm18011_vm4, %v14140_v48  ;;  %vm4535_vm4 = vcmp.eq.s32.totalorder %v2863_v39, %v18061_v12  ;;  %vm12690_vm7 = vmpackc.low %vm4503_vm2, %vm4439_vm1  ;;  %vm4696_vm1 = vcmp.eq.s32.totalorder %v3024_v45, %v18020_v19  ;;  %vm4760_vm2 = vcmp.eq.s32.totalorder %v3088_v38, %v18020_v19  ;;  %v3471_v39 = vld [vmem:[#allocation2 + $0x16a0] sm:$0xff]  ;;  %v3792_v14 = vld [vmem:[#allocation2 + $0x20a8] sm:$0xff] }
 0x6bc   : > { %vm13394_vm10 = vmpackc.low %vm4535_vm4, %vm4471_vm3  ;;  %vm4728_vm4 = vcmp.eq.s32.totalorder %v3056_v63, %v18031_v32  ;;  %v3663_v45 = vld [vmem:[#allocation2 + $0x1ca0] sm:$0xff] }
 0x6bd   : > { %v3727_v38 = vld [vmem:[#allocation2 + $0x1ea0] sm:$0xff] }
 0x6be   : > { %v3695_v63 = vld [vmem:[#allocation2 + $0x1da0] sm:$0xff] }
 0x6c1   : > { %12687 = vmatpush1.bf16.xpose.msk.msra.mxu1 %vm12686_vm11, %v14140_v48  ;;  %vm12692_vm11 = vmpackc.low %vm4632_vm6, %vm4568_vm5  ;;  %vm4792_vm5 = vcmp.eq.s32.totalorder %v3120_v9, %v18031_v32  ;;  %v3759_v9 = vld [vmem:[#allocation2 + $0x1fa0] sm:$0xff] }
 0x6c2   : > { %13391 = vmatpush1.bf16.xpose.msk.msra.mxu0 %vm13390_vm14, %v14140_v48  ;;  %12689 = vmatprep.subr.msk.bf16.mxu1 %vm12688_vm15, %v14140_v48  ;;  %vm4631_vm14 = vcmp.eq.s32.totalorder %v2959_v52, %v18057_v40  ;;  %vm4599_vm15 = vcmp.eq.s32.totalorder %v2927_v43, %v18061_v12  ;;  %vm13400_vm8 = vmpackc.low %vm4792_vm5, %vm4728_vm4  ;;  %vm4823_vm5 = vcmp.eq.s32.totalorder %v3151_v4, %v18057_v40  ;;  %v3631_v52 = vld [vmem:[#allocation2 + $0x1ba0] sm:$0xff]  ;;  %v3728_v43 = vld [vmem:[#allocation2 + $0x1ea8] sm:$0xff] }
 0x6c3   : > { %13393 = vmatprep.subr.msk.bf16.mxu0 %vm13392_vm0, %v14140_v48  ;;  %vm4663_vm0 = vcmp.eq.s32.totalorder %v2991_v34, %v18061_v12  ;;  %vm12694_vm3 = vmpackc.low %vm4631_vm14, %vm4567_vm13  ;;  %vm4824_vm13 = vcmp.eq.s32.totalorder %v3152_v53, %v18020_v19  ;;  %vm4888_vm14 = vcmp.eq.s32.totalorder %v3216_v3, %v18020_v19  ;;  %v3696_v34 = vld [vmem:[#allocation2 + $0x1da8] sm:$0xff]  ;;  %v3791_v53 = vld [vmem:[#allocation2 + $0x20a0] sm:$0xff] }
 0x6c4   : > { %vm13398_vm6 = vmpackc.low %vm4663_vm0, %vm4599_vm15  ;;  %vm4856_vm0 = vcmp.eq.s32.totalorder %v3184_v5, %v18031_v32  ;;  %v3855_v3 = vld [vmem:[#allocation2 + $0x22a0] sm:$0xff]  ;;  %v3920_v4 = vld [vmem:[#allocation2 + $0x24a8] sm:$0xff] }
 0x6c5   : > { %v3823_v5 = vld [vmem:[#allocation2 + $0x21a0] sm:$0xff] }
 0x6c8   : > { %9750 = vmatmul.mubr.bf16.vlgmr.msra.gmra.mrb[0].mxu1 %v2701_v0  ;;  %v3632_v0 = vld [vmem:[#allocation2 + $0x1ba8] sm:$0xff] }
 0x6c9   : > { %12691 = vmatpush1.bf16.xpose.msk.msra.mxu1 %vm12690_vm7, %v14140_v48  ;;  %10406 = vmatmul.mubr.bf16.vlgmr.msra.gmra.mrb[0].mxu0 %v2733_v59  ;;  %vm12696_vm7 = vmpackc.low %vm4760_vm2, %vm4696_vm1  ;;  %vm4920_vm1 = vcmp.eq.s32.totalorder %v3248_v62, %v18031_v32  ;;  %v3599_v59 = vld [vmem:[#allocation2 + $0x1aa0] sm:$0xff] }
 0x6ca   : > { %13395 = vmatpush1.bf16.xpose.msk.msra.mxu0 %vm13394_vm10, %v14140_v48  ;;  %12693 = vmatprep.subr.msk.bf16.mxu1 %vm12692_vm11, %v14140_v48  ;;  %vm4759_vm10 = vcmp.eq.s32.totalorder %v3087_v54, %v18057_v40  ;;  %vm4727_vm11 = vcmp.eq.s32.totalorder %v3055_v57, %v18061_v12  ;;  %vm13404_vm4 = vmpackc.low %vm4920_vm1, %vm4856_vm0  ;;  %vm4951_vm1 = vcmp.eq.s32.totalorder %v3279_v41, %v18057_v40  ;;  %v3856_v54 = vld [vmem:[#allocation2 + $0x22a8] sm:$0xff]  ;;  %v3887_v62 = vld [vmem:[#allocation2 + $0x23a0] sm:$0xff] }
 0x6cb   : > { %13397 = vmatprep.subr.msk.bf16.mxu0 %vm13396_vm12, %v14140_v48  ;;  %9790 = vmatprep.mubr.bf16.mxu1 %v2704_v7  ;;  %vm4791_vm12 = vcmp.eq.s32.totalorder %v3119_v24, %v18061_v12  ;;  %vm12698_vm15 = vmpackc.low %vm4759_vm10, %vm4695_vm9  ;;  %vm4952_vm9 = vcmp.eq.s32.totalorder %v3280_v29, %v18020_v19  ;;  %vm5016_vm10 = vcmp.eq.s32.totalorder %v3344_v35, %v18020_v19  ;;  %v3664_v7 = vld [vmem:[#allocation2 + $0x1ca8] sm:$0xff]  ;;  %v3919_v29 = vld [vmem:[#allocation2 + $0x24a0] sm:$0xff] }
 0x6cc   : > { %10446 = vmatprep.mubr.bf16.mxu0 %v2736_v31  ;;  %vm13402_vm2 = vmpackc.low %vm4791_vm12, %vm4727_vm11  ;;  %vm4984_vm12 = vcmp.eq.s32.totalorder %v3312_v37, %v18031_v32  ;;  %v3760_v31 = vld [vmem:[#allocation2 + $0x1fa8] sm:$0xff]  ;;  %v3983_v35 = vld [vmem:[#allocation2 + $0x26a0] sm:$0xff] }
 0x6cd   : > { %v3824_v57 = vld [vmem:[#allocation2 + $0x21a8] sm:$0xff]  ;;  %v3951_v37 = vld [vmem:[#allocation2 + $0x25a0] sm:$0xff] }
 0x6ce   : > { %v3888_v24 = vld [vmem:[#allocation2 + $0x23a8] sm:$0xff] }
 0x6cf   : > { %v4048_v41 = vld [vmem:[#allocation2 + $0x28a8] sm:$0xff] }
 0x6d1   : > { %12695 = vmatpush1.bf16.xpose.msk.msra.mxu1 %vm12694_vm3, %v14140_v48  ;;  %vm12700_vm3 = vmpackc.low %vm4888_vm14, %vm4824_vm13  ;;  %vm5048_vm13 = vcmp.eq.s32.totalorder %v3376_v44, %v18031_v32  ;;  %v4015_v44 = vld [vmem:[#allocation2 + $0x27a0] sm:$0xff] }
 0x6d2   : > { %13399 = vmatpush1.bf16.xpose.msk.msra.mxu0 %vm13398_vm6, %v14140_v48  ;;  %12697 = vmatprep.subr.msk.bf16.mxu1 %vm12696_vm7, %v14140_v48  ;;  %vm4887_vm6 = vcmp.eq.s32.totalorder %v3215_v60, %v18057_v40  ;;  %vm4855_vm7 = vcmp.eq.s32.totalorder %v3183_v61, %v18061_v12  ;;  %vm13408_vm0 = vmpackc.low %vm5048_vm13, %vm4984_vm12  ;;  %vm5079_vm13 = vcmp.eq.s32.totalorder %v3407_v36, %v18057_v40  ;;  %v3984_v60 = vld [vmem:[#allocation2 + $0x26a8] sm:$0xff] }
 0x6d3   : > { %13401 = vmatprep.subr.msk.bf16.mxu0 %vm13400_vm8, %v14140_v48  ;;  %vm4919_vm8 = vcmp.eq.s32.totalorder %v3247_v2, %v18061_v12  ;;  %vm12702_vm11 = vmpackc.low %vm4887_vm6, %vm4823_vm5  ;;  %vm5080_vm5 = vcmp.eq.s32.totalorder %v3408_v51, %v18020_v19  ;;  %vm5144_vm6 = vcmp.eq.s32.totalorder %v3472_v13, %v18020_v19  ;;  %v3952_v61 = vld [vmem:[#allocation2 + $0x25a8] sm:$0xff]  ;;  %v4047_v51 = vld [vmem:[#allocation2 + $0x28a0] sm:$0xff]  ;;  %v18201_v36 = vrot.slane %v18016_v6, %v16289_v47 }
 0x6d4   : > { %vm13406_vm14 = vmpackc.low %vm4919_vm8, %vm4855_vm7  ;;  %vm5112_vm8 = vcmp.eq.s32.totalorder %v3440_v28, %v18031_v32  ;;  %v4016_v2 = vld [vmem:[#allocation2 + $0x27a8] sm:$0xff]  ;;  %v4111_v13 = vld [vmem:[#allocation2 + $0x2aa0] sm:$0xff] }
 0x6d5   : > { %v4079_v28 = vld [vmem:[#allocation2 + $0x29a0] sm:$0xff] }
 0x6d9   : > { %12699 = vmatpush1.bf16.xpose.msk.msra.mxu1 %vm12698_vm15, %v14140_v48  ;;  %vm12704_vm15 = vmpackc.low %vm5016_vm10, %vm4952_vm9  ;;  %vm5176_vm9 = vcmp.eq.s32.totalorder %v3504_v56, %v18031_v32  ;;  %v4143_v56 = vld [vmem:[#allocation2 + $0x2ba0] sm:$0xff] }
 0x6da   : > { %13403 = vmatpush1.bf16.xpose.msk.msra.mxu0 %vm13402_vm2, %v14140_v48  ;;  %12701 = vmatprep.subr.msk.bf16.mxu1 %vm12700_vm3, %v14140_v48  ;;  %vm5015_vm2 = vcmp.eq.s32.totalorder %v3343_v22, %v18057_v40  ;;  %vm4983_vm3 = vcmp.eq.s32.totalorder %v3311_v15, %v18061_v12  ;;  %vm13412_vm12 = vmpackc.low %vm5176_vm9, %vm5112_vm8  ;;  %vm5207_vm9 = vcmp.eq.s32.totalorder %v3535_v58, %v18057_v40  ;;  %v4112_v22 = vld [vmem:[#allocation2 + $0x2aa8] sm:$0xff]  ;;  %v2865_v58 = vld [vmem:[#allocation2 + $0x3b0] sm:$0xff] }
 0x6db   : > { %13405 = vmatprep.subr.msk.bf16.mxu0 %vm13404_vm4, %v14140_v48  ;;  %vm5047_vm4 = vcmp.eq.s32.totalorder %v3375_v8, %v18061_v12  ;;  %vm12706_vm7 = vmpackc.low %vm5015_vm2, %vm4951_vm1  ;;  %vm5208_vm1 = vcmp.eq.s32.totalorder %v3536_v16, %v18020_v19  ;;  %vm5272_vm2 = vcmp.eq.s32.totalorder %v3600_v18, %v18020_v19  ;;  %v4080_v15 = vld [vmem:[#allocation2 + $0x29a8] sm:$0xff]  ;;  %v2432_v16 = vcombine.high %v18047_v55, %v18047_v55  ;;  %v2833_v55 = vld [vmem:[#allocation2 + $0x2b0] sm:$0xff] }
 0x6dc   : > { %vm13410_vm10 = vmpackc.low %vm5047_vm4, %vm4983_vm3  ;;  %vm5240_vm4 = vcmp.eq.s32.totalorder %v3568_v26, %v18031_v32  ;;  %v4144_v8 = vld [vmem:[#allocation2 + $0x2ba8] sm:$0xff]  ;;  %v2568_v18 = vcombine.high %v18051_v10, %v18051_v10  ;;  %v18229_v26 = vrot.slane %v18027_v17, %v16286_v46  ;;  %v2801_v10 = vld [vmem:[#allocation2 + $0x1b0] sm:$0xff] }
 0x6e1   : > { %12703 = vmatpush1.bf16.xpose.msk.msra.mxu1 %vm12702_vm11, %v14140_v48  ;;  %vm12708_vm11 = vmpackc.low %vm5144_vm6, %vm5080_vm5  ;;  %vm5304_vm5 = vcmp.eq.s32.totalorder %v3632_v0, %v18031_v32  ;;  %v18232_v0 = vrot.slane %v2432_v16, %v16005_v25  ;;  %v3409_v16 = vld [vmem:[#allocation2 + $0x14b0] sm:$0xff] }
 0x6e2   : > { %13407 = vmatpush1.bf16.xpose.msk.msra.mxu0 %vm13406_vm14, %v14140_v48  ;;  %12705 = vmatprep.subr.msk.bf16.mxu1 %vm12704_vm15, %v14140_v48  ;;  %vm5143_vm14 = vcmp.eq.s32.totalorder %v3471_v39, %v18057_v40  ;;  %vm5111_vm15 = vcmp.eq.s32.totalorder %v3439_v1, %v18061_v12  ;;  %vm13416_vm8 = vmpackc.low %vm5304_vm5, %vm5240_vm4  ;;  %vm5335_vm5 = vcmp.eq.s32.totalorder %v3663_v45, %v18057_v40  ;;  %v2770_v39 = vld [vmem:[#allocation2 + $0xb8] sm:$0xff]  ;;  %v2897_v45 = vld [vmem:[#allocation2 + $0x4b0] sm:$0xff] }
 0x6e3   : > { %13409 = vmatprep.subr.msk.bf16.mxu0 %vm13408_vm0, %v14140_v48  ;;  %vm5175_vm0 = vcmp.eq.s32.totalorder %v3503_v11, %v18061_v12  ;;  %vm12710_vm3 = vmpackc.low %vm5143_vm14, %vm5079_vm13  ;;  %vm5336_vm13 = vcmp.eq.s32.totalorder %v3664_v7, %v18020_v19  ;;  %vm5400_vm14 = vcmp.eq.s32.totalorder %v3728_v43, %v18020_v19  ;;  %v18206_v1 = vrot.slane %v18027_v17, %v16289_v47  ;;  %v2866_v11 = vld [vmem:[#allocation2 + $0x3b8] sm:$0xff] }
 0x6e4   : > { %vm13414_vm6 = vmpackc.low %vm5175_vm0, %vm5111_vm15  ;;  %vm5368_vm0 = vcmp.eq.s32.totalorder %v3696_v34, %v18031_v32  ;;  %v2930_v17 = vld [vmem:[#allocation2 + $0x5b8] sm:$0xff]  ;;  %v2448_v7 = vcombine.high %v18232_v0, %v18232_v0  ;;  %v2703_v43 = vpack.c.bf16 %v18065_v42, %v18065_v42 }
 0x6e6   : > { %v2706_v42 = vpack.c.bf16 %v2448_v7, %v2448_v7  ;;  %v3569_v7 = vld [vmem:[#allocation2 + $0x19b0] sm:$0xff] }
 0x6e9   : > { %12707 = vmatpush1.bf16.xpose.msk.msra.mxu1 %vm12706_vm7, %v14140_v48  ;;  %vm12712_vm7 = vmpackc.low %vm5272_vm2, %vm5208_vm1  ;;  %vm5432_vm1 = vcmp.eq.s32.totalorder %v3760_v31, %v18031_v32  ;;  %v2735_v31 = vpack.c.bf16 %v18069_v23, %v18069_v23  ;;  %v3058_v23 = vld [vmem:[#allocation2 + $0x9b8] sm:$0xff] }
 0x6ea   : > { %13411 = vmatpush1.bf16.xpose.msk.msra.mxu0 %vm13410_vm10, %v14140_v48  ;;  %12709 = vmatprep.subr.msk.bf16.mxu1 %vm12708_vm11, %v14140_v48  ;;  %vm5271_vm10 = vcmp.eq.s32.totalorder %v3599_v59, %v18057_v40  ;;  %vm5239_vm11 = vcmp.eq.s32.totalorder %v3567_v27, %v18061_v12  ;;  %vm13420_vm4 = vmpackc.low %vm5432_vm1, %vm5368_vm0  ;;  %vm5463_vm1 = vcmp.eq.s32.totalorder %v3791_v53, %v18057_v40  ;;  %v2962_v27 = vld [vmem:[#allocation2 + $0x6b8] sm:$0xff]  ;;  %v3025_v53 = vld [vmem:[#allocation2 + $0x8b0] sm:$0xff] }
 0x6eb   : > { %13413 = vmatprep.subr.msk.bf16.mxu0 %vm13412_vm12, %v14140_v48  ;;  %vm5303_vm12 = vcmp.eq.s32.totalorder %v3631_v52, %v18061_v12  ;;  %vm12714_vm15 = vmpackc.low %vm5271_vm10, %vm5207_vm9  ;;  %vm5464_vm9 = vcmp.eq.s32.totalorder %v3792_v14, %v18020_v19  ;;  %vm5528_vm10 = vcmp.eq.s32.totalorder %v3856_v54, %v18020_v19  ;;  %v18235_v59 = vrot.slane %v2568_v18, %v16005_v25  ;;  %v2994_v52 = vld [vmem:[#allocation2 + $0x7b8] sm:$0xff]  ;;  %v3473_v18 = vld [vmem:[#allocation2 + $0x16b0] sm:$0xff] }
 0x6ec   : > { %vm13418_vm2 = vmpackc.low %vm5303_vm12, %vm5239_vm11  ;;  %vm5496_vm12 = vcmp.eq.s32.totalorder %v3824_v57, %v18031_v32  ;;  %v3026_v54 = vld [vmem:[#allocation2 + $0x8b8] sm:$0xff] }
 0x6ed   : > { %v2584_v34 = vcombine.high %v18235_v59, %v18235_v59  ;;  %v3090_v57 = vld [vmem:[#allocation2 + $0xab8] sm:$0xff] }
 0x6ef   : > { %v2738_v14 = vpack.c.bf16 %v2584_v34, %v2584_v34  ;;  %v3666_v34 = vld [vmem:[#allocation2 + $0x1cb8] sm:$0xff] }
 0x6f1   : > { %12711 = vmatpush1.bf16.xpose.msk.msra.mxu1 %vm12710_vm3, %v14140_v48  ;;  %vm12716_vm3 = vmpackc.low %vm5400_vm14, %vm5336_vm13  ;;  %vm5560_vm13 = vcmp.eq.s32.totalorder %v3888_v24, %v18031_v32  ;;  %v3122_v24 = vld [vmem:[#allocation2 + $0xbb8] sm:$0xff] }
 0x6f2   : > { %13415 = vmatpush1.bf16.xpose.msk.msra.mxu0 %vm13414_vm6, %v14140_v48  ;;  %12713 = vmatprep.subr.msk.bf16.mxu1 %vm12712_vm7, %v14140_v48  ;;  %vm5399_vm6 = vcmp.eq.s32.totalorder %v3727_v38, %v18057_v40  ;;  %vm5367_vm7 = vcmp.eq.s32.totalorder %v3695_v63, %v18061_v12  ;;  %vm13424_vm0 = vmpackc.low %vm5560_vm13, %vm5496_vm12  ;;  %vm5591_vm13 = vcmp.eq.s32.totalorder %v3919_v29, %v18057_v40  ;;  %v2961_v38 = vld [vmem:[#allocation2 + $0x6b0] sm:$0xff] }
 0x6f3   : > { %13417 = vmatprep.subr.msk.bf16.mxu0 %vm13416_vm8, %v14140_v48  ;;  %vm5431_vm8 = vcmp.eq.s32.totalorder %v3759_v9, %v18061_v12  ;;  %vm12718_vm11 = vmpackc.low %vm5399_vm6, %vm5335_vm5  ;;  %vm5592_vm5 = vcmp.eq.s32.totalorder %v3920_v4, %v18020_v19  ;;  %vm5656_vm6 = vcmp.eq.s32.totalorder %v3984_v60, %v18020_v19  ;;  %v2929_v63 = vld [vmem:[#allocation2 + $0x5b0] sm:$0xff]  ;;  %v3154_v4 = vld [vmem:[#allocation2 + $0xcb8] sm:$0xff] }
 0x6f4   : > { %vm13422_vm14 = vmpackc.low %vm5431_vm8, %vm5367_vm7  ;;  %vm5624_vm8 = vcmp.eq.s32.totalorder %v3952_v61, %v18031_v32  ;;  %v2993_v9 = vld [vmem:[#allocation2 + $0x7b0] sm:$0xff]  ;;  %v3218_v60 = vld [vmem:[#allocation2 + $0xeb8] sm:$0xff] }
 0x6f5   : > { %v3186_v61 = vld [vmem:[#allocation2 + $0xdb8] sm:$0xff]  ;;  %v3153_v29 = vld [vmem:[#allocation2 + $0xcb0] sm:$0xff] }
 0x6f9   : > { %12715 = vmatpush1.bf16.xpose.msk.msra.mxu1 %vm12714_vm15, %v14140_v48  ;;  %vm12720_vm15 = vmpackc.low %vm5528_vm10, %vm5464_vm9  ;;  %vm5688_vm9 = vcmp.eq.s32.totalorder %v4016_v2, %v18031_v32  ;;  %v3250_v2 = vld [vmem:[#allocation2 + $0xfb8] sm:$0xff] }
 0x6fa   : > { %13419 = vmatpush1.bf16.xpose.msk.msra.mxu0 %vm13418_vm2, %v14140_v48  ;;  %12717 = vmatprep.subr.msk.bf16.mxu1 %vm12716_vm3, %v14140_v48  ;;  %vm5527_vm2 = vcmp.eq.s32.totalorder %v3855_v3, %v18057_v40  ;;  %vm5495_vm3 = vcmp.eq.s32.totalorder %v3823_v5, %v18061_v12  ;;  %vm13428_vm12 = vmpackc.low %vm5688_vm9, %vm5624_vm8  ;;  %vm5719_vm9 = vcmp.eq.s32.totalorder %v4047_v51, %v18057_v40  ;;  %v3089_v3 = vld [vmem:[#allocation2 + $0xab0] sm:$0xff] }
 0x6fb   : > { %13421 = vmatprep.subr.msk.bf16.mxu0 %vm13420_vm4, %v14140_v48  ;;  %vm5559_vm4 = vcmp.eq.s32.totalorder %v3887_v62, %v18061_v12  ;;  %vm12722_vm7 = vmpackc.low %vm5527_vm2, %vm5463_vm1  ;;  %vm5720_vm1 = vcmp.eq.s32.totalorder %v4048_v41, %v18020_v19  ;;  %vm5784_vm2 = vcmp.eq.s32.totalorder %v4112_v22, %v18020_v19  ;;  %v2834_v19 = vld [vmem:[#allocation2 + $0x2b8] sm:$0xff]  ;;  %v3057_v5 = vld [vmem:[#allocation2 + $0x9b0] sm:$0xff] }
 0x6fc   : > { %vm13426_vm10 = vmpackc.low %vm5559_vm4, %vm5495_vm3  ;;  %vm5752_vm4 = vcmp.eq.s32.totalorder %v4080_v15, %v18031_v32  ;;  %v3121_v62 = vld [vmem:[#allocation2 + $0xbb0] sm:$0xff]  ;;  %v3282_v41 = vld [vmem:[#allocation2 + $0x10b8] sm:$0xff] }
 0x6fd   : > { %v3346_v22 = vld [vmem:[#allocation2 + $0x12b8] sm:$0xff]  ;;  %v3281_v51 = vld [vmem:[#allocation2 + $0x10b0] sm:$0xff] }
 0x6fe   : > { %v3314_v15 = vld [vmem:[#allocation2 + $0x11b8] sm:$0xff] }
 0x701   : > { %12719 = vmatpush1.bf16.xpose.msk.msra.mxu1 %vm12718_vm11, %v14140_v48  ;;  %vm12724_vm11 = vmpackc.low %vm5656_vm6, %vm5592_vm5  ;;  %vm5816_vm5 = vcmp.eq.s32.totalorder %v4144_v8, %v18031_v32  ;;  %v2802_v32 = vld [vmem:[#allocation2 + $0x1b8] sm:$0xff] }
 0x702   : > { %13423 = vmatpush1.bf16.xpose.msk.msra.mxu0 %vm13422_vm14, %v14140_v48  ;;  %12721 = vmatprep.subr.msk.bf16.mxu1 %vm12720_vm15, %v14140_v48  ;;  %vm5655_vm14 = vcmp.eq.s32.totalorder %v3983_v35, %v18057_v40  ;;  %vm5623_vm15 = vcmp.eq.s32.totalorder %v3951_v37, %v18061_v12  ;;  %vm13432_vm8 = vmpackc.low %vm5816_vm5, %vm5752_vm4  ;;  %v3217_v35 = vld [vmem:[#allocation2 + $0xeb0] sm:$0xff]  ;;  %v3378_v8 = vld [vmem:[#allocation2 + $0x13b8] sm:$0xff] }
 0x703   : > { %13425 = vmatprep.subr.msk.bf16.mxu0 %vm13424_vm0, %v14140_v48  ;;  %vm5687_vm0 = vcmp.eq.s32.totalorder %v4015_v44, %v18061_v12  ;;  %vm12726_vm3 = vmpackc.low %vm5655_vm14, %vm5591_vm13  ;;  %vm4442_vm13 = vcmp.eq.s32.totalorder %v2770_v39, %v18201_v36  ;;  %vm4506_vm14 = vcmp.eq.s32.totalorder %v2834_v19, %v18201_v36  ;;  %v3185_v37 = vld [vmem:[#allocation2 + $0xdb0] sm:$0xff]  ;;  %v3410_v39 = vld [vmem:[#allocation2 + $0x14b8] sm:$0xff] }
 0x704   : > { %vm13430_vm6 = vmpackc.low %vm5687_vm0, %vm5623_vm15  ;;  %vm4474_vm0 = vcmp.eq.s32.totalorder %v2802_v32, %v18206_v1  ;;  %v3249_v44 = vld [vmem:[#allocation2 + $0xfb0] sm:$0xff]  ;;  %v3474_v19 = vld [vmem:[#allocation2 + $0x16b8] sm:$0xff] }
 0x705   : > { %v3442_v32 = vld [vmem:[#allocation2 + $0x15b8] sm:$0xff] }
 0x709   : > { %12723 = vmatpush1.bf16.xpose.msk.msra.mxu1 %vm12722_vm7, %v14140_v48  ;;  %vm12728_vm7 = vmpackc.low %vm5784_vm2, %vm5720_vm1  ;;  %vm4538_vm1 = vcmp.eq.s32.totalorder %v2866_v11, %v18206_v1  ;;  %v3506_v11 = vld [vmem:[#allocation2 + $0x17b8] sm:$0xff] }
 0x70a   : > { %13427 = vmatpush1.bf16.xpose.msk.msra.mxu0 %vm13426_vm10, %v14140_v48  ;;  %12725 = vmatprep.subr.msk.bf16.mxu1 %vm12724_vm11, %v14140_v48  ;;  %vm5783_vm10 = vcmp.eq.s32.totalorder %v4111_v13, %v18057_v40  ;;  %vm5751_vm11 = vcmp.eq.s32.totalorder %v4079_v28, %v18061_v12  ;;  %v18225_v40 = vrot.slane %v18016_v6, %v16286_v46  ;;  %vm13436_vm4 = vmpackc.low %vm4538_vm1, %vm4474_vm0  ;;  %v2898_v6 = vld [vmem:[#allocation2 + $0x4b8] sm:$0xff]  ;;  %v3345_v13 = vld [vmem:[#allocation2 + $0x12b0] sm:$0xff] }
 0x70b   : > { %13429 = vmatprep.subr.msk.bf16.mxu0 %vm13428_vm12, %v14140_v48  ;;  %vm5815_vm12 = vcmp.eq.s32.totalorder %v4143_v56, %v18061_v12  ;;  %vm12730_vm15 = vmpackc.low %vm5783_vm10, %vm5719_vm9  ;;  %v2769_v12 = vld [vmem:[#allocation2 + $0xb0] sm:$0xff]  ;;  %vm4570_vm9 = vcmp.eq.s32.totalorder %v2898_v6, %v18201_v36  ;;  %vm4634_vm10 = vcmp.eq.s32.totalorder %v2962_v27, %v18201_v36  ;;  %v3570_v6 = vld [vmem:[#allocation2 + $0x19b8] sm:$0xff] }
 0x70c   : > { %vm13434_vm2 = vmpackc.low %vm5815_vm12, %vm5751_vm11  ;;  %vm4441_vm5 = vcmp.eq.s32.totalorder %v2769_v12, %v18225_v40  ;;  %vm4602_vm12 = vcmp.eq.s32.totalorder %v2930_v17, %v18206_v1  ;;  %vm4569_vm1 = vcmp.eq.s32.totalorder %v2897_v45, %v18225_v40  ;;  %v3313_v28 = vld [vmem:[#allocation2 + $0x11b0] sm:$0xff]  ;;  %v3634_v27 = vld [vmem:[#allocation2 + $0x1bb8] sm:$0xff] }
 0x70d   : > { %v3377_v56 = vld [vmem:[#allocation2 + $0x13b0] sm:$0xff]  ;;  %v3698_v45 = vld [vmem:[#allocation2 + $0x1db8] sm:$0xff] }
 0x70e   : > { %v3441_v12 = vld [vmem:[#allocation2 + $0x15b0] sm:$0xff] }
 0x70f   : > { %v3537_v17 = vld [vmem:[#allocation2 + $0x18b0] sm:$0xff] }
 0x711   : > { %12727 = vmatpush1.bf16.xpose.msk.msra.mxu1 %vm12726_vm3, %v14140_v48  ;;  %vm12732_vm3 = vmpackc.low %vm4506_vm14, %vm4442_vm13  ;;  %vm4666_vm13 = vcmp.eq.s32.totalorder %v2994_v52, %v18206_v1  ;;  %v3601_v52 = vld [vmem:[#allocation2 + $0x1ab0] sm:$0xff] }
 0x712   : > { %13431 = vmatpush1.bf16.xpose.msk.msra.mxu0 %vm13430_vm6, %v14140_v48  ;;  %12729 = vmatprep.subr.msk.bf16.mxu1 %vm12728_vm7, %v14140_v48  ;;  %vm4505_vm6 = vcmp.eq.s32.totalorder %v2833_v55, %v18225_v40  ;;  %vm4473_vm7 = vcmp.eq.s32.totalorder %v2801_v10, %v18229_v26  ;;  %vm13440_vm0 = vmpackc.low %vm4666_vm13, %vm4602_vm12  ;;  %vm4697_vm13 = vcmp.eq.s32.totalorder %v3025_v53, %v18225_v40  ;;  %v3505_v55 = vld [vmem:[#allocation2 + $0x17b0] sm:$0xff]  ;;  %v3538_v10 = vld [vmem:[#allocation2 + $0x18b8] sm:$0xff] }
 0x713   : > { %13433 = vmatprep.subr.msk.bf16.mxu0 %vm13432_vm8, %v14140_v48  ;;  %vm4537_vm8 = vcmp.eq.s32.totalorder %v2865_v58, %v18229_v26  ;;  %vm12734_vm11 = vmpackc.low %vm4505_vm6, %vm4441_vm5  ;;  %vm4698_vm5 = vcmp.eq.s32.totalorder %v3026_v54, %v18201_v36  ;;  %vm4762_vm6 = vcmp.eq.s32.totalorder %v3090_v57, %v18201_v36  ;;  %v3602_v58 = vld [vmem:[#allocation2 + $0x1ab8] sm:$0xff]  ;;  %v1745_v53 = vld [vmem:[%s14398_s6 + $0x30] sm:$0xff] }
 0x714   : > { %vm13438_vm14 = vmpackc.low %vm4537_vm8, %vm4473_vm7  ;;  %vm4730_vm8 = vcmp.eq.s32.totalorder %v3058_v23, %v18206_v1  ;;  %v3794_v54 = vld [vmem:[#allocation2 + $0x20b8] sm:$0xff] }
 0x715   : > { %v3858_v57 = vld [vmem:[#allocation2 + $0x22b8] sm:$0xff] }
 0x716   : > { %v3826_v23 = vld [vmem:[#allocation2 + $0x21b8] sm:$0xff] }
 0x719   : > { %12731 = vmatpush1.bf16.xpose.msk.msra.mxu1 %vm12730_vm15, %v14140_v48  ;;  %vm12736_vm15 = vmpackc.low %vm4634_vm10, %vm4570_vm9  ;;  %vm4794_vm9 = vcmp.eq.s32.totalorder %v3122_v24, %v18206_v1  ;;  %v3890_v24 = vld [vmem:[#allocation2 + $0x23b8] sm:$0xff] }
 0x71a   : > { %13435 = vmatpush1.bf16.xpose.msk.msra.mxu0 %vm13434_vm2, %v14140_v48  ;;  %12733 = vmatprep.subr.msk.bf16.mxu1 %vm12732_vm3, %v14140_v48  ;;  %vm4633_vm2 = vcmp.eq.s32.totalorder %v2961_v38, %v18225_v40  ;;  %vm4601_vm3 = vcmp.eq.s32.totalorder %v2929_v63, %v18229_v26  ;;  %vm13444_vm12 = vmpackc.low %vm4794_vm9, %vm4730_vm8  ;;  %vm4825_vm9 = vcmp.eq.s32.totalorder %v3153_v29, %v18225_v40  ;;  %v3762_v38 = vld [vmem:[#allocation2 + $0x1fb8] sm:$0xff]  ;;  %v3729_v63 = vld [vmem:[#allocation2 + $0x1eb0] sm:$0xff] }
 0x71b   : > { %13437 = vmatprep.subr.msk.bf16.mxu0 %vm13436_vm4, %v14140_v48  ;;  %vm4665_vm4 = vcmp.eq.s32.totalorder %v2993_v9, %v18229_v26  ;;  %vm12738_vm7 = vmpackc.low %vm4633_vm2, %vm4569_vm1  ;;  %vm4826_vm1 = vcmp.eq.s32.totalorder %v3154_v4, %v18201_v36  ;;  %vm4890_vm2 = vcmp.eq.s32.totalorder %v3218_v60, %v18201_v36  ;;  %v3697_v9 = vld [vmem:[#allocation2 + $0x1db0] sm:$0xff]  ;;  %v3922_v60 = vld [vmem:[#allocation2 + $0x24b8] sm:$0xff] }
 0x71c   : > { %vm13442_vm10 = vmpackc.low %vm4665_vm4, %vm4601_vm3  ;;  %vm4858_vm4 = vcmp.eq.s32.totalorder %v3186_v61, %v18206_v1  ;;  %v3889_v4 = vld [vmem:[#allocation2 + $0x23b0] sm:$0xff]  ;;  %v3986_v61 = vld [vmem:[#allocation2 + $0x26b8] sm:$0xff] }
 0x71d   : > { %v1762_v29 = vld [vmem:[%s14405_s7 + $0x38] sm:$0xff] }
 0x720   : > { %9791 = vmatmul.mubr.bf16.vlgmr.msra.gmra.mrb[0].mxu1 %v2703_v43  ;;  %v3633_v43 = vld [vmem:[#allocation2 + $0x1bb0] sm:$0xff] }
 0x721   : > { %12735 = vmatpush1.bf16.xpose.msk.msra.mxu1 %vm12734_vm11, %v14140_v48  ;;  %10447 = vmatmul.mubr.bf16.vlgmr.msra.gmra.mrb[0].mxu0 %v2735_v31  ;;  %vm12740_vm11 = vmpackc.low %vm4762_vm6, %vm4698_vm5  ;;  %vm4922_vm5 = vcmp.eq.s32.totalorder %v3250_v2, %v18206_v1  ;;  %v3730_v31 = vld [vmem:[#allocation2 + $0x1eb8] sm:$0xff] }
 0x722   : > { %13439 = vmatpush1.bf16.xpose.msk.msra.mxu0 %vm13438_vm14, %v14140_v48  ;;  %12737 = vmatprep.subr.msk.bf16.mxu1 %vm12736_vm15, %v14140_v48  ;;  %vm4761_vm14 = vcmp.eq.s32.totalorder %v3089_v3, %v18225_v40  ;;  %vm4729_vm15 = vcmp.eq.s32.totalorder %v3057_v5, %v18229_v26  ;;  %vm13448_vm8 = vmpackc.low %vm4922_vm5, %vm4858_vm4  ;;  %vm4953_vm5 = vcmp.eq.s32.totalorder %v3281_v51, %v18225_v40  ;;  %v3793_v3 = vld [vmem:[#allocation2 + $0x20b0] sm:$0xff]  ;;  %v1758_v2 = vld [vmem:[%s14405_s7 + $0x18] sm:$0xff] }
 0x723   : > { %13441 = vmatprep.subr.msk.bf16.mxu0 %vm13440_vm0, %v14140_v48  ;;  %9831 = vmatprep.mubr.bf16.mxu1 %v2706_v42  ;;  %vm4793_vm0 = vcmp.eq.s32.totalorder %v3121_v62, %v18229_v26  ;;  %vm12742_vm3 = vmpackc.low %vm4761_vm14, %vm4697_vm13  ;;  %vm4954_vm13 = vcmp.eq.s32.totalorder %v3282_v41, %v18201_v36  ;;  %vm5018_vm14 = vcmp.eq.s32.totalorder %v3346_v22, %v18201_v36  ;;  %v3665_v42 = vld [vmem:[#allocation2 + $0x1cb0] sm:$0xff] }
 0x724   : > { %10487 = vmatprep.mubr.bf16.mxu0 %v2738_v14  ;;  %vm13446_vm6 = vmpackc.low %vm4793_vm0, %vm4729_vm15  ;;  %vm4986_vm0 = vcmp.eq.s32.totalorder %v3314_v15, %v18206_v1  ;;  %v3761_v14 = vld [vmem:[#allocation2 + $0x1fb0] sm:$0xff]  ;;  %v1874_v41 = vrot.slane %v1758_v2, %v15903_v30  ;;  %v1878_v22 = vrot.slane %v1758_v2, %v15991_v20  ;;  %v1882_v15 = vrot.slane %v1758_v2, %v15994_v21 }
 0x725   : > { %v3857_v5 = vld [vmem:[#allocation2 + $0x22b0] sm:$0xff]  ;;  %v2002_v51 = vrot.slane %v1762_v29, %v15903_v30 }
 0x726   : > { %v3825_v62 = vld [vmem:[#allocation2 + $0x21b0] sm:$0xff] }
 0x729   : > { %12739 = vmatpush1.bf16.xpose.msk.msra.mxu1 %vm12738_vm7, %v14140_v48  ;;  %vm12744_vm7 = vmpackc.low %vm4890_vm2, %vm4826_vm1  ;;  %vm5050_vm1 = vcmp.eq.s32.totalorder %v3378_v8, %v18206_v1  ;;  %v1998_v8 = vrot.slane %v1762_v29, %v15906_v33 }
 0x72a   : > { %13443 = vmatpush1.bf16.xpose.msk.msra.mxu0 %vm13442_vm10, %v14140_v48  ;;  %12741 = vmatprep.subr.msk.bf16.mxu1 %vm12740_vm11, %v14140_v48  ;;  %vm4889_vm10 = vcmp.eq.s32.totalorder %v3217_v35, %v18225_v40  ;;  %vm4857_vm11 = vcmp.eq.s32.totalorder %v3185_v37, %v18229_v26  ;;  %vm13452_vm4 = vmpackc.low %vm5050_vm1, %vm4986_vm0  ;;  %vm5081_vm1 = vcmp.eq.s32.totalorder %v3409_v16, %v18225_v40  ;;  %v3954_v35 = vld [vmem:[#allocation2 + $0x25b8] sm:$0xff]  ;;  %v3953_v16 = vld [vmem:[#allocation2 + $0x25b0] sm:$0xff] }
 0x72b   : > { %13445 = vmatprep.subr.msk.bf16.mxu0 %vm13444_vm12, %v14140_v48  ;;  %vm4921_vm12 = vcmp.eq.s32.totalorder %v3249_v44, %v18229_v26  ;;  %vm12746_vm15 = vmpackc.low %vm4889_vm10, %vm4825_vm9  ;;  %vm5082_vm9 = vcmp.eq.s32.totalorder %v3410_v39, %v18201_v36  ;;  %vm5146_vm10 = vcmp.eq.s32.totalorder %v3474_v19, %v18201_v36  ;;  %v4018_v37 = vld [vmem:[#allocation2 + $0x27b8] sm:$0xff]  ;;  %v1870_v44 = vrot.slane %v1758_v2, %v15906_v33  ;;  %v3921_v19 = vld [vmem:[#allocation2 + $0x24b0] sm:$0xff] }
 0x72c   : > { %vm13450_vm2 = vmpackc.low %vm4921_vm12, %vm4857_vm11  ;;  %vm5114_vm12 = vcmp.eq.s32.totalorder %v3442_v32, %v18206_v1  ;;  %v3985_v32 = vld [vmem:[#allocation2 + $0x26b0] sm:$0xff]  ;;  %v2868_v2 = vld [vmem:[#allocation2 + $0x3c8] sm:$0xff] }
 0x731   : > { %12743 = vmatpush1.bf16.xpose.msk.msra.mxu1 %vm12742_vm3, %v14140_v48  ;;  %vm12748_vm3 = vmpackc.low %vm5018_vm14, %vm4954_vm13  ;;  %vm5178_vm13 = vcmp.eq.s32.totalorder %v3506_v11, %v18206_v1  ;;  %v2963_v11 = vld [vmem:[#allocation2 + $0x6c0] sm:$0xff] }
 0x732   : > { %13447 = vmatpush1.bf16.xpose.msk.msra.mxu0 %vm13446_vm6, %v14140_v48  ;;  %12745 = vmatprep.subr.msk.bf16.mxu1 %vm12744_vm7, %v14140_v48  ;;  %vm5017_vm6 = vcmp.eq.s32.totalorder %v3345_v13, %v18225_v40  ;;  %vm4985_vm7 = vcmp.eq.s32.totalorder %v3313_v28, %v18229_v26  ;;  %vm13456_vm0 = vmpackc.low %vm5178_vm13, %vm5114_vm12  ;;  %vm5209_vm13 = vcmp.eq.s32.totalorder %v3537_v17, %v18225_v40  ;;  %v4082_v17 = vld [vmem:[#allocation2 + $0x29b8] sm:$0xff] }
 0x733   : > { %13449 = vmatprep.subr.msk.bf16.mxu0 %vm13448_vm8, %v14140_v48  ;;  %vm5049_vm8 = vcmp.eq.s32.totalorder %v3377_v56, %v18229_v26  ;;  %vm12750_vm11 = vmpackc.low %vm5017_vm6, %vm4953_vm5  ;;  %vm5210_vm5 = vcmp.eq.s32.totalorder %v3538_v10, %v18201_v36  ;;  %vm5274_vm6 = vcmp.eq.s32.totalorder %v3602_v58, %v18201_v36  ;;  %v2006_v13 = vrot.slane %v1762_v29, %v15991_v20  ;;  %v4050_v10 = vld [vmem:[#allocation2 + $0x28b8] sm:$0xff] }
 0x734   : > { %vm13454_vm14 = vmpackc.low %vm5049_vm8, %vm4985_vm7  ;;  %vm5242_vm8 = vcmp.eq.s32.totalorder %v3570_v6, %v18206_v1  ;;  %v2010_v28 = vrot.slane %v1762_v29, %v15994_v21  ;;  %v4114_v58 = vld [vmem:[#allocation2 + $0x2ab8] sm:$0xff]  ;;  %v2265_v6 = vcombine.low %v1998_v8, %v2002_v51  ;;  %v2900_v8 = vld [vmem:[#allocation2 + $0x4c8] sm:$0xff]  ;;  %v2705_v56 = vpack.c.bf16 %v18232_v0, %v18232_v0 }
 0x735   : > { %v2964_v51 = vld [vmem:[#allocation2 + $0x6c8] sm:$0xff] }
 0x739   : > { %12747 = vmatpush1.bf16.xpose.msk.msra.mxu1 %vm12746_vm15, %v14140_v48  ;;  %vm12752_vm15 = vmpackc.low %vm5146_vm10, %vm5082_vm9  ;;  %vm5306_vm9 = vcmp.eq.s32.totalorder %v3634_v27, %v18206_v1  ;;  %v2266_v27 = vcombine.low %v2006_v13, %v2010_v28  ;;  %v2996_v13 = vld [vmem:[#allocation2 + $0x7c8] sm:$0xff] }
 0x73a   : > { %13451 = vmatpush1.bf16.xpose.msk.msra.mxu0 %vm13450_vm2, %v14140_v48  ;;  %12749 = vmatprep.subr.msk.bf16.mxu1 %vm12748_vm3, %v14140_v48  ;;  %vm5145_vm2 = vcmp.eq.s32.totalorder %v3473_v18, %v18225_v40  ;;  %vm5113_vm3 = vcmp.eq.s32.totalorder %v3441_v12, %v18229_v26  ;;  %vm13460_vm12 = vmpackc.low %vm5306_vm9, %vm5242_vm8  ;;  %vm5337_vm9 = vcmp.eq.s32.totalorder %v3665_v42, %v18225_v40  ;;  %v4017_v18 = vld [vmem:[#allocation2 + $0x27b0] sm:$0xff]  ;;  %v3187_v42 = vld [vmem:[#allocation2 + $0xdc0] sm:$0xff] }
 0x73b   : > { %13453 = vmatprep.subr.msk.bf16.mxu0 %vm13452_vm4, %v14140_v48  ;;  %vm5177_vm4 = vcmp.eq.s32.totalorder %v3505_v55, %v18229_v26  ;;  %vm12754_vm7 = vmpackc.low %vm5145_vm2, %vm5081_vm1  ;;  %vm5338_vm1 = vcmp.eq.s32.totalorder %v3666_v34, %v18201_v36  ;;  %vm5402_vm2 = vcmp.eq.s32.totalorder %v3730_v31, %v18201_v36  ;;  %v2129_v12 = vcombine.low %v1870_v44, %v1874_v41  ;;  %v2803_v41 = vld [vmem:[#allocation2 + $0x1c0] sm:$0xff]  ;;  %v3188_v34 = vld [vmem:[#allocation2 + $0xdc8] sm:$0xff] }
 0x73c   : > { %vm13458_vm10 = vmpackc.low %vm5177_vm4, %vm5113_vm3  ;;  %vm5370_vm4 = vcmp.eq.s32.totalorder %v3698_v45, %v18206_v1  ;;  %v2130_v55 = vcombine.low %v1878_v22, %v1882_v15  ;;  %v2273_v31 = vrot.slane %v2265_v6, %v16005_v25  ;;  %v2280_v45 = vrot.slane %v2266_v27, %v16005_v25  ;;  %v2867_v22 = vld [vmem:[#allocation2 + $0x3c0] sm:$0xff] }
 0x73d   : > { %v3027_v6 = vld [vmem:[#allocation2 + $0x8c0] sm:$0xff] }
 0x73e   : > { %v3091_v27 = vld [vmem:[#allocation2 + $0xac0] sm:$0xff] }
 0x741   : > { %12751 = vmatpush1.bf16.xpose.msk.msra.mxu1 %vm12750_vm11, %v14140_v48  ;;  %vm12756_vm11 = vmpackc.low %vm5274_vm6, %vm5210_vm5  ;;  %vm5434_vm5 = vcmp.eq.s32.totalorder %v3762_v38, %v18206_v1  ;;  %v3219_v38 = vld [vmem:[#allocation2 + $0xec0] sm:$0xff] }
 0x742   : > { %13455 = vmatpush1.bf16.xpose.msk.msra.mxu0 %vm13454_vm14, %v14140_v48  ;;  %12753 = vmatprep.subr.msk.bf16.mxu1 %vm12752_vm15, %v14140_v48  ;;  %vm5273_vm14 = vcmp.eq.s32.totalorder %v3601_v52, %v18225_v40  ;;  %vm5241_vm15 = vcmp.eq.s32.totalorder %v3569_v7, %v18229_v26  ;;  %vm13464_vm8 = vmpackc.low %vm5434_vm5, %vm5370_vm4  ;;  %vm5465_vm5 = vcmp.eq.s32.totalorder %v3793_v3, %v18225_v40  ;;  %v4146_v52 = vld [vmem:[#allocation2 + $0x2bb8] sm:$0xff] }
 0x743   : > { %13457 = vmatprep.subr.msk.bf16.mxu0 %vm13456_vm0, %v14140_v48  ;;  %vm5305_vm0 = vcmp.eq.s32.totalorder %v3633_v43, %v18229_v26  ;;  %vm12758_vm3 = vmpackc.low %vm5273_vm14, %vm5209_vm13  ;;  %vm5466_vm13 = vcmp.eq.s32.totalorder %v3794_v54, %v18201_v36  ;;  %vm5530_vm14 = vcmp.eq.s32.totalorder %v3858_v57, %v18201_v36  ;;  %v2137_v7 = vrot.slane %v2129_v12, %v16005_v25  ;;  %v4081_v57 = vld [vmem:[#allocation2 + $0x29b0] sm:$0xff] }
 0x744   : > { %vm13462_vm6 = vmpackc.low %vm5305_vm0, %vm5241_vm15  ;;  %v2144_v43 = vrot.slane %v2130_v55, %v16005_v25  ;;  %v2281_v3 = vcombine.low %v2273_v31, %v2280_v45  ;;  %v3028_v55 = vld [vmem:[#allocation2 + $0x8c8] sm:$0xff]  ;;  %v3155_v45 = vld [vmem:[#allocation2 + $0xcc0] sm:$0xff] }
 0x745   : > { %v3252_v31 = vld [vmem:[#allocation2 + $0xfc8] sm:$0xff] }
 0x746   : > { %v2145_v54 = vcombine.low %v2137_v7, %v2144_v43  ;;  %v3156_v7 = vld [vmem:[#allocation2 + $0xcc8] sm:$0xff] }
 0x747   : > { %v3220_v43 = vld [vmem:[#allocation2 + $0xec8] sm:$0xff] }
 0x749   : > { %12755 = vmatpush1.bf16.xpose.msk.msra.mxu1 %vm12754_vm7, %v14140_v48  ;;  %vm12760_vm7 = vmpackc.low %vm5402_vm2, %vm5338_vm1  ;;  %vm5498_vm1 = vcmp.eq.s32.totalorder %v3826_v23, %v18206_v1  ;;  %vm5562_vm2 = vcmp.eq.s32.totalorder %v3890_v24, %v18206_v1  ;;  %v4145_v23 = vld [vmem:[#allocation2 + $0x2bb0] sm:$0xff] }
 0x74a   : > { %13459 = vmatpush1.bf16.xpose.msk.msra.mxu0 %vm13458_vm10, %v14140_v48  ;;  %12757 = vmatprep.subr.msk.bf16.mxu1 %vm12756_vm11, %v14140_v48  ;;  %vm5401_vm10 = vcmp.eq.s32.totalorder %v3729_v63, %v18225_v40  ;;  %vm5369_vm11 = vcmp.eq.s32.totalorder %v3697_v9, %v18229_v26  ;;  %vm13468_vm4 = vmpackc.low %vm5562_vm2, %vm5498_vm1  ;;  %vm5593_vm1 = vcmp.eq.s32.totalorder %v3921_v19, %v18225_v40  ;;  %v18431_v63 = vld [vmem:[%s14414_s1 + $0x38] sm:$0xff]  ;;  %v3251_v9 = vld [vmem:[#allocation2 + $0xfc0] sm:$0xff] }
 0x74b   : > { %13461 = vmatprep.subr.msk.bf16.mxu0 %vm13460_vm12, %v14140_v48  ;;  %vm5433_vm12 = vcmp.eq.s32.totalorder %v3761_v14, %v18229_v26  ;;  %vm12762_vm15 = vmpackc.low %vm5401_vm10, %vm5337_vm9  ;;  %vm5594_vm9 = vcmp.eq.s32.totalorder %v3922_v60, %v18201_v36  ;;  %vm5658_vm10 = vcmp.eq.s32.totalorder %v3986_v61, %v18201_v36  ;;  %vm5657_vm2 = vcmp.eq.s32.totalorder %v3985_v32, %v18225_v40  ;;  %v4113_v14 = vld [vmem:[#allocation2 + $0x2ab0] sm:$0xff]  ;;  %v2804_v61 = vld [vmem:[#allocation2 + $0x1c8] sm:$0xff] }
 0x74c   : > { %vm18339_vm0 = vmpackc.low %vm5433_vm12, %vm5369_vm11  ;;  %vm5626_vm12 = vcmp.eq.s32.totalorder %v3954_v35, %v18206_v1  ;;  %v1753_v60 = vld [vmem:[%s14398_s6 + $0x70] sm:$0xff]  ;;  %v2835_v35 = vld [vmem:[#allocation2 + $0x2c0] sm:$0xff]  ;;  %v2737_v19 = vpack.c.bf16 %v18235_v59, %v18235_v59 }
 0x74d   : > { %v18467_v29 = vmul.f32 %v2281_v3, %v1753_v60  ;;  %v2899_v32 = vld [vmem:[#allocation2 + $0x4c0] sm:$0xff]  ;;  %v3060_v59 = vld [vmem:[#allocation2 + $0x9c8] sm:$0xff] }
 0x74e   : > { %v3315_v3 = vld [vmem:[#allocation2 + $0x11c0] sm:$0xff]  ;;  %v3476_v60 = vld [vmem:[#allocation2 + $0x16c8] sm:$0xff] }
 0x74f   : > { %v18485_v15 = vrot.slane %v18467_v29, %v16005_v25 }
 0x751   : > { %12759 = vmatpush1.bf16.xpose.msk.msra.mxu1 %vm12758_vm3, %v14140_v48  ;;  %vm12764_vm3 = vmpackc.low %vm5530_vm14, %vm5466_vm13  ;;  %vm5690_vm13 = vcmp.eq.s32.totalorder %v4018_v37, %v18206_v1  ;;  %v18477_v37 = vrot.slane %v18431_v63, %v15906_v33  ;;  %v2600_v39 = vcombine.high %v18485_v15, %v18485_v15 }
 0x752   : > { %13463 = vmatpush1.bf16.xpose.msk.msra.mxu0 %vm13462_vm6, %v14140_v48  ;;  %12761 = vmatprep.subr.msk.bf16.mxu1 %vm12760_vm7, %v14140_v48  ;;  %vm5529_vm6 = vcmp.eq.s32.totalorder %v3857_v5, %v18225_v40  ;;  %vm5497_vm7 = vcmp.eq.s32.totalorder %v3825_v62, %v18229_v26  ;;  %v2772_v5 = vld [vmem:[#allocation2 + $0xc8] sm:$0xff] }
 0x753   : > { %13465 = vmatprep.subr.msk.bf16.mxu0 %vm13464_vm8, %v14140_v48  ;;  %vm5561_vm8 = vcmp.eq.s32.totalorder %v3889_v4, %v18229_v26  ;;  %vm18371_vm11 = vmpackc.low %vm5529_vm6, %vm5465_vm5  ;;  %vm5722_vm5 = vcmp.eq.s32.totalorder %v4050_v10, %v18201_v36  ;;  %vm5786_vm6 = vcmp.eq.s32.totalorder %v4114_v58, %v18201_v36  ;;  %v18424_v36 = vld [vmem:[%s14414_s1 + $0x18] sm:$0xff]  ;;  %v2836_v62 = vld [vmem:[#allocation2 + $0x2c8] sm:$0xff]  ;;  %v18447_v4 = vrot.slane %v18431_v63, %v15903_v30 }
 0x754   : > { %vm18381_vm14 = vmpackc.low %vm5561_vm8, %vm5497_vm7  ;;  %vm5754_vm8 = vcmp.eq.s32.totalorder %v4082_v17, %v18206_v1  ;;  %v18439_v24 = vrot.slane %v18424_v36, %v15903_v30  ;;  %v18463_v30 = vmul.f32 %v2145_v54, %v1745_v53  ;;  %v2740_v12 = vpack.c.bf16 %v2600_v39, %v2600_v39  ;;  %v3092_v10 = vld [vmem:[#allocation2 + $0xac8] sm:$0xff]  ;;  %v3059_v17 = vld [vmem:[#allocation2 + $0x9c0] sm:$0xff] }
 0x755   : > { %vm18411_vm7 = vmpackc.low %vm5657_vm2, %vm5593_vm1  ;;  %v3124_v58 = vld [vmem:[#allocation2 + $0xbc8] sm:$0xff]  ;;  %v3347_v53 = vld [vmem:[#allocation2 + $0x12c0] sm:$0xff] }
 0x756   : > { %vm4444_vm1 = vcmp.eq.s32.totalorder %v2772_v5, %v18439_v24  ;;  %vm4508_vm2 = vcmp.eq.s32.totalorder %v2836_v62, %v18439_v24  ;;  %v18481_v44 = vrot.slane %v18463_v30, %v16005_v25  ;;  %v3316_v54 = vld [vmem:[#allocation2 + $0x11c8] sm:$0xff]  ;;  %v3379_v5 = vld [vmem:[#allocation2 + $0x13c0] sm:$0xff] }
 0x757   : > { %v3412_v62 = vld [vmem:[#allocation2 + $0x14c8] sm:$0xff]  ;;  %v3571_v39 = vld [vmem:[#allocation2 + $0x19c0] sm:$0xff] }
 0x758   : > { %v2464_v28 = vcombine.high %v18481_v44, %v18481_v44 }
 0x759   : > { %12763 = vmatpush1.bf16.xpose.msk.msra.mxu1 %vm12762_vm15, %v14140_v48  ;;  %vm18389_vm15 = vmpackc.low %vm5658_vm10, %vm5594_vm9  ;;  %vm5818_vm9 = vcmp.eq.s32.totalorder %v4146_v52, %v18206_v1  ;;  %v4049_v1 = vld [vmem:[#allocation2 + $0x28b0] sm:$0xff]  ;;  %v3123_v52 = vld [vmem:[#allocation2 + $0xbc0] sm:$0xff] }
 0x75a   : > { %13467 = vmatpush1.bf16.xpose.msk.msra.mxu0 %vm18339_vm0, %v14140_v48  ;;  %12765 = vmatprep.subr.msk.bf16.mxu1 %vm12764_vm3, %v14140_v48  ;;  %vm13472_vm0 = vmpackc.low %vm5690_vm13, %vm5626_vm12  ;;  %vm5625_vm3 = vcmp.eq.s32.totalorder %v3953_v16, %v18229_v26  ;;  %vm5721_vm13 = vcmp.eq.s32.totalorder %v4049_v1, %v18225_v40  ;;  %v2708_v0 = vpack.c.bf16 %v2464_v28, %v2464_v28  ;;  %v2931_v16 = vld [vmem:[#allocation2 + $0x5c0] sm:$0xff]  ;;  %v3284_v1 = vld [vmem:[#allocation2 + $0x10c8] sm:$0xff] }
 0x75b   : > { %13469 = vmatprep.subr.msk.bf16.mxu0 %vm13468_vm4, %v14140_v48  ;;  %vm5689_vm4 = vcmp.eq.s32.totalorder %v4017_v18, %v18229_v26  ;;  %vm18433_vm12 = vmpackc.low %vm5818_vm9, %vm5754_vm8  ;;  %v2995_v18 = vld [vmem:[#allocation2 + $0x7c0] sm:$0xff] }
 0x75c   : > { %vm18419_vm10 = vmpackc.low %vm5689_vm4, %vm5625_vm3  ;;  %vm4476_vm4 = vcmp.eq.s32.totalorder %v2804_v61, %v18447_v4  ;;  %v3444_v61 = vld [vmem:[#allocation2 + $0x15c8] sm:$0xff]  ;;  %v3539_v28 = vld [vmem:[#allocation2 + $0x18c0] sm:$0xff] }
 0x761   : > { %12767 = vmatpush1.bf16.xpose.msk.msra.mxu1 %vm18371_vm11, %v14140_v48  ;;  %vm18426_vm11 = vmpackc.low %vm5786_vm6, %vm5722_vm5  ;;  %vm4540_vm5 = vcmp.eq.s32.totalorder %v2868_v2, %v18447_v4  ;;  %v3508_v2 = vld [vmem:[#allocation2 + $0x17c8] sm:$0xff] }
 0x762   : > { %13471 = vmatpush1.bf16.xpose.msk.msra.mxu0 %vm18381_vm14, %v14140_v48  ;;  %12769 = vmatprep.subr.msk.bf16.mxu1 %vm18389_vm15, %v14140_v48  ;;  %vm5785_vm14 = vcmp.eq.s32.totalorder %v4113_v14, %v18225_v40  ;;  %vm5753_vm15 = vcmp.eq.s32.totalorder %v4081_v57, %v18229_v26  ;;  %v18473_v40 = vrot.slane %v18424_v36, %v15906_v33  ;;  %vm13480_vm8 = vmpackc.low %vm4540_vm5, %vm4476_vm4  ;;  %v2932_v33 = vld [vmem:[#allocation2 + $0x5c8] sm:$0xff] }
 0x763   : > { %13473 = vmatprep.subr.msk.bf16.mxu0 %vm13472_vm0, %v14140_v48  ;;  %vm5817_vm0 = vcmp.eq.s32.totalorder %v4145_v23, %v18229_v26  ;;  %vm12774_vm3 = vmpackc.low %vm5785_vm14, %vm5721_vm13  ;;  %v2771_v26 = vld [vmem:[#allocation2 + $0xc0] sm:$0xff]  ;;  %vm4572_vm13 = vcmp.eq.s32.totalorder %v2900_v8, %v18439_v24  ;;  %vm4636_vm14 = vcmp.eq.s32.totalorder %v2964_v51, %v18439_v24  ;;  %v3348_v14 = vld [vmem:[#allocation2 + $0x12c8] sm:$0xff] }
 0x764   : > { %vm13478_vm6 = vmpackc.low %vm5817_vm0, %vm5753_vm15  ;;  %vm4443_vm9 = vcmp.eq.s32.totalorder %v2771_v26, %v18473_v40  ;;  %vm4604_vm0 = vcmp.eq.s32.totalorder %v2932_v33, %v18447_v4  ;;  %vm4571_vm5 = vcmp.eq.s32.totalorder %v2899_v32, %v18473_v40  ;;  %v3380_v57 = vld [vmem:[#allocation2 + $0x13c8] sm:$0xff]  ;;  %v3283_v23 = vld [vmem:[#allocation2 + $0x10c0] sm:$0xff] }
 0x765   : > { %v3411_v26 = vld [vmem:[#allocation2 + $0x14c0] sm:$0xff]  ;;  %v3540_v8 = vld [vmem:[#allocation2 + $0x18c8] sm:$0xff] }
 0x766   : > { %v3604_v51 = vld [vmem:[#allocation2 + $0x1ac8] sm:$0xff] }
 0x767   : > { %v3572_v33 = vld [vmem:[#allocation2 + $0x19c8] sm:$0xff] }
 0x768   : > { %v3668_v32 = vld [vmem:[#allocation2 + $0x1cc8] sm:$0xff] }
 0x769   : > { %12771 = vmatpush1.bf16.xpose.msk.msra.mxu1 %vm18411_vm7, %v14140_v48  ;;  %vm12776_vm7 = vmpackc.low %vm4508_vm2, %vm4444_vm1  ;;  %vm4668_vm1 = vcmp.eq.s32.totalorder %v2996_v13, %v18447_v4  ;;  %v3636_v13 = vld [vmem:[#allocation2 + $0x1bc8] sm:$0xff] }
 0x76a   : > { %13475 = vmatpush1.bf16.xpose.msk.msra.mxu0 %vm18419_vm10, %v14140_v48  ;;  %12773 = vmatprep.subr.msk.bf16.mxu1 %vm18426_vm11, %v14140_v48  ;;  %vm4507_vm10 = vcmp.eq.s32.totalorder %v2835_v35, %v18473_v40  ;;  %vm4475_vm11 = vcmp.eq.s32.totalorder %v2803_v41, %v18477_v37  ;;  %vm13484_vm4 = vmpackc.low %vm4668_vm1, %vm4604_vm0  ;;  %vm4699_vm1 = vcmp.eq.s32.totalorder %v3027_v6, %v18473_v40  ;;  %v3475_v35 = vld [vmem:[#allocation2 + $0x16c0] sm:$0xff]  ;;  %v3828_v6 = vld [vmem:[#allocation2 + $0x21c8] sm:$0xff] }
 0x76b   : > { %13477 = vmatprep.subr.msk.bf16.mxu0 %vm18433_vm12, %v14140_v48  ;;  %vm4539_vm12 = vcmp.eq.s32.totalorder %v2867_v22, %v18477_v37  ;;  %vm12778_vm15 = vmpackc.low %vm4507_vm10, %vm4443_vm9  ;;  %vm4700_vm9 = vcmp.eq.s32.totalorder %v3028_v55, %v18439_v24  ;;  %vm4764_vm10 = vcmp.eq.s32.totalorder %v3092_v10, %v18439_v24  ;;  %v3443_v41 = vld [vmem:[#allocation2 + $0x15c0] sm:$0xff] }
 0x76c   : > { %vm13482_vm2 = vmpackc.low %vm4539_vm12, %vm4475_vm11  ;;  %vm4732_vm12 = vcmp.eq.s32.totalorder %v3060_v59, %v18447_v4  ;;  %v3507_v22 = vld [vmem:[#allocation2 + $0x17c0] sm:$0xff]  ;;  %v3796_v59 = vld [vmem:[#allocation2 + $0x20c8] sm:$0xff] }
 0x76d   : > { %v3699_v55 = vld [vmem:[#allocation2 + $0x1dc0] sm:$0xff] }
 0x76e   : > { %v3763_v10 = vld [vmem:[#allocation2 + $0x1fc0] sm:$0xff] }
 0x771   : > { %12775 = vmatpush1.bf16.xpose.msk.msra.mxu1 %vm12774_vm3, %v14140_v48  ;;  %vm12780_vm3 = vmpackc.low %vm4636_vm14, %vm4572_vm13  ;;  %vm4796_vm13 = vcmp.eq.s32.totalorder %v3124_v58, %v18447_v4  ;;  %v3860_v58 = vld [vmem:[#allocation2 + $0x22c8] sm:$0xff] }
 0x772   : > { %13479 = vmatpush1.bf16.xpose.msk.msra.mxu0 %vm13478_vm6, %v14140_v48  ;;  %12777 = vmatprep.subr.msk.bf16.mxu1 %vm12776_vm7, %v14140_v48  ;;  %vm4635_vm6 = vcmp.eq.s32.totalorder %v2963_v11, %v18473_v40  ;;  %vm4603_vm7 = vcmp.eq.s32.totalorder %v2931_v16, %v18477_v37  ;;  %vm13488_vm0 = vmpackc.low %vm4796_vm13, %vm4732_vm12  ;;  %vm4827_vm13 = vcmp.eq.s32.totalorder %v3155_v45, %v18473_v40  ;;  %v3732_v11 = vld [vmem:[#allocation2 + $0x1ec8] sm:$0xff] }
 0x773   : > { %13481 = vmatprep.subr.msk.bf16.mxu0 %vm13480_vm8, %v14140_v48  ;;  %vm4667_vm8 = vcmp.eq.s32.totalorder %v2995_v18, %v18477_v37  ;;  %vm12782_vm11 = vmpackc.low %vm4635_vm6, %vm4571_vm5  ;;  %vm4828_vm5 = vcmp.eq.s32.totalorder %v3156_v7, %v18439_v24  ;;  %vm4892_vm6 = vcmp.eq.s32.totalorder %v3220_v43, %v18439_v24  ;;  %v3764_v16 = vld [vmem:[#allocation2 + $0x1fc8] sm:$0xff]  ;;  %v3667_v18 = vld [vmem:[#allocation2 + $0x1cc0] sm:$0xff] }
 0x774   : > { %vm13486_vm14 = vmpackc.low %vm4667_vm8, %vm4603_vm7  ;;  %vm4860_vm8 = vcmp.eq.s32.totalorder %v3188_v34, %v18447_v4  ;;  %v3827_v7 = vld [vmem:[#allocation2 + $0x21c0] sm:$0xff]  ;;  %v3924_v34 = vld [vmem:[#allocation2 + $0x24c8] sm:$0xff] }
 0x775   : > { %v3891_v43 = vld [vmem:[#allocation2 + $0x23c0] sm:$0xff]  ;;  %v3956_v45 = vld [vmem:[#allocation2 + $0x25c8] sm:$0xff] }
 0x778   : > { %9832 = vmatmul.mubr.bf16.vlgmr.msra.gmra.mrb[0].mxu1 %v2705_v56  ;;  %v3603_v56 = vld [vmem:[#allocation2 + $0x1ac0] sm:$0xff] }
 0x779   : > { %12779 = vmatpush1.bf16.xpose.msk.msra.mxu1 %vm12778_vm15, %v14140_v48  ;;  %10488 = vmatmul.mubr.bf16.vlgmr.msra.gmra.mrb[0].mxu0 %v2737_v19  ;;  %vm12784_vm15 = vmpackc.low %vm4764_vm10, %vm4700_vm9  ;;  %vm4924_vm9 = vcmp.eq.s32.totalorder %v3252_v31, %v18447_v4  ;;  %v3635_v19 = vld [vmem:[#allocation2 + $0x1bc0] sm:$0xff]  ;;  %v3988_v31 = vld [vmem:[#allocation2 + $0x26c8] sm:$0xff] }
 0x77a   : > { %13483 = vmatpush1.bf16.xpose.msk.msra.mxu0 %vm13482_vm2, %v14140_v48  ;;  %12781 = vmatprep.subr.msk.bf16.mxu1 %vm12780_vm3, %v14140_v48  ;;  %vm4763_vm2 = vcmp.eq.s32.totalorder %v3091_v27, %v18473_v40  ;;  %vm4731_vm3 = vcmp.eq.s32.totalorder %v3059_v17, %v18477_v37  ;;  %vm13492_vm12 = vmpackc.low %vm4924_vm9, %vm4860_vm8  ;;  %vm4955_vm9 = vcmp.eq.s32.totalorder %v3283_v23, %v18473_v40  ;;  %v3892_v27 = vld [vmem:[#allocation2 + $0x23c8] sm:$0xff]  ;;  %v3795_v17 = vld [vmem:[#allocation2 + $0x20c0] sm:$0xff] }
 0x77b   : > { %13485 = vmatprep.subr.msk.bf16.mxu0 %vm13484_vm4, %v14140_v48  ;;  %9872 = vmatprep.mubr.bf16.mxu1 %v2708_v0  ;;  %vm4795_vm4 = vcmp.eq.s32.totalorder %v3123_v52, %v18477_v37  ;;  %vm12786_vm7 = vmpackc.low %vm4763_vm2, %vm4699_vm1  ;;  %vm4956_vm1 = vcmp.eq.s32.totalorder %v3284_v1, %v18439_v24  ;;  %vm5020_vm2 = vcmp.eq.s32.totalorder %v3348_v14, %v18439_v24  ;;  %v3700_v0 = vld [vmem:[#allocation2 + $0x1dc8] sm:$0xff]  ;;  %v3859_v52 = vld [vmem:[#allocation2 + $0x22c0] sm:$0xff] }
 0x77c   : > { %10528 = vmatprep.mubr.bf16.mxu0 %v2740_v12  ;;  %vm13490_vm10 = vmpackc.low %vm4795_vm4, %vm4731_vm3  ;;  %vm4988_vm4 = vcmp.eq.s32.totalorder %v3316_v54, %v18447_v4  ;;  %v3731_v12 = vld [vmem:[#allocation2 + $0x1ec0] sm:$0xff]  ;;  %v4052_v54 = vld [vmem:[#allocation2 + $0x28c8] sm:$0xff] }
 0x77d   : > { %v3955_v1 = vld [vmem:[#allocation2 + $0x25c0] sm:$0xff]  ;;  %v4084_v23 = vld [vmem:[#allocation2 + $0x29c8] sm:$0xff] }
 0x77e   : > { %v4019_v14 = vld [vmem:[#allocation2 + $0x27c0] sm:$0xff] }
 0x781   : > { %12783 = vmatpush1.bf16.xpose.msk.msra.mxu1 %vm12782_vm11, %v14140_v48  ;;  %vm12788_vm11 = vmpackc.low %vm4892_vm6, %vm4828_vm5  ;;  %vm5052_vm5 = vcmp.eq.s32.totalorder %v3380_v57, %v18447_v4  ;;  %v4116_v57 = vld [vmem:[#allocation2 + $0x2ac8] sm:$0xff] }
 0x782   : > { %13487 = vmatpush1.bf16.xpose.msk.msra.mxu0 %vm13486_vm14, %v14140_v48  ;;  %12785 = vmatprep.subr.msk.bf16.mxu1 %vm12784_vm15, %v14140_v48  ;;  %vm4891_vm14 = vcmp.eq.s32.totalorder %v3219_v38, %v18473_v40  ;;  %vm4859_vm15 = vcmp.eq.s32.totalorder %v3187_v42, %v18477_v37  ;;  %vm13496_vm8 = vmpackc.low %vm5052_vm5, %vm4988_vm4  ;;  %vm5083_vm5 = vcmp.eq.s32.totalorder %v3411_v26, %v18473_v40  ;;  %v4020_v38 = vld [vmem:[#allocation2 + $0x27c8] sm:$0xff]  ;;  %v3923_v42 = vld [vmem:[#allocation2 + $0x24c0] sm:$0xff] }
 0x783   : > { %13489 = vmatprep.subr.msk.bf16.mxu0 %vm13488_vm0, %v14140_v48  ;;  %vm4923_vm0 = vcmp.eq.s32.totalorder %v3251_v9, %v18477_v37  ;;  %vm12790_vm3 = vmpackc.low %vm4891_vm14, %vm4827_vm13  ;;  %vm5084_vm13 = vcmp.eq.s32.totalorder %v3412_v62, %v18439_v24  ;;  %vm5148_vm14 = vcmp.eq.s32.totalorder %v3476_v60, %v18439_v24  ;;  %v3987_v9 = vld [vmem:[#allocation2 + $0x26c0] sm:$0xff]  ;;  %v18622_v26 = vrot.slane %v18431_v63, %v15994_v21 }
 0x784   : > { %vm13494_vm6 = vmpackc.low %vm4923_vm0, %vm4859_vm15  ;;  %vm5116_vm0 = vcmp.eq.s32.totalorder %v3444_v61, %v18447_v4  ;;  %v4083_v62 = vld [vmem:[#allocation2 + $0x29c0] sm:$0xff]  ;;  %v18617_v61 = vrot.slane %v18424_v36, %v15994_v21  ;;  %v2449_v21 = vcombine.high %v18463_v30, %v18463_v30  ;;  %v2837_v30 = vld [vmem:[#allocation2 + $0x2d0] sm:$0xff] }
 0x785   : > { %v4147_v60 = vld [vmem:[#allocation2 + $0x2bc0] sm:$0xff] }
 0x789   : > { %12787 = vmatpush1.bf16.xpose.msk.msra.mxu1 %vm12786_vm7, %v14140_v48  ;;  %vm12792_vm7 = vmpackc.low %vm5020_vm2, %vm4956_vm1  ;;  %vm5180_vm1 = vcmp.eq.s32.totalorder %v3508_v2, %v18447_v4  ;;  %v2774_v2 = vld [vmem:[#allocation2 + $0xd8] sm:$0xff] }
 0x78a   : > { %13491 = vmatpush1.bf16.xpose.msk.msra.mxu0 %vm13490_vm10, %v14140_v48  ;;  %12789 = vmatprep.subr.msk.bf16.mxu1 %vm12788_vm11, %v14140_v48  ;;  %vm5019_vm10 = vcmp.eq.s32.totalorder %v3347_v53, %v18473_v40  ;;  %vm4987_vm11 = vcmp.eq.s32.totalorder %v3315_v3, %v18477_v37  ;;  %vm13500_vm4 = vmpackc.low %vm5180_vm1, %vm5116_vm0  ;;  %vm5211_vm1 = vcmp.eq.s32.totalorder %v3539_v28, %v18473_v40  ;;  %v4148_v53 = vld [vmem:[#allocation2 + $0x2bc8] sm:$0xff]  ;;  %v4051_v3 = vld [vmem:[#allocation2 + $0x28c0] sm:$0xff] }
 0x78b   : > { %13493 = vmatprep.subr.msk.bf16.mxu0 %vm13492_vm12, %v14140_v48  ;;  %vm5051_vm12 = vcmp.eq.s32.totalorder %v3379_v5, %v18477_v37  ;;  %vm12794_vm15 = vmpackc.low %vm5019_vm10, %vm4955_vm9  ;;  %vm5212_vm9 = vcmp.eq.s32.totalorder %v3540_v8, %v18439_v24  ;;  %vm5276_vm10 = vcmp.eq.s32.totalorder %v3604_v51, %v18439_v24  ;;  %v4115_v5 = vld [vmem:[#allocation2 + $0x2ac0] sm:$0xff]  ;;  %v18648_v8 = vrot.slane %v2449_v21, %v16005_v25  ;;  %v2869_v51 = vld [vmem:[#allocation2 + $0x3d0] sm:$0xff] }
 0x78c   : > { %vm13498_vm2 = vmpackc.low %vm5051_vm12, %vm4987_vm11  ;;  %vm5244_vm12 = vcmp.eq.s32.totalorder %v3572_v33, %v18447_v4  ;;  %v3542_v21 = vld [vmem:[#allocation2 + $0x18d8] sm:$0xff] }
 0x78d   : > { %v2465_v28 = vcombine.high %v18648_v8, %v18648_v8 }
 0x791   : > { %12791 = vmatpush1.bf16.xpose.msk.msra.mxu1 %vm12790_vm3, %v14140_v48  ;;  %vm12796_vm3 = vmpackc.low %vm5148_vm14, %vm5084_vm13  ;;  %vm5308_vm13 = vcmp.eq.s32.totalorder %v3636_v13, %v18447_v4  ;;  %v2966_v13 = vld [vmem:[#allocation2 + $0x6d8] sm:$0xff] }
 0x792   : > { %13495 = vmatpush1.bf16.xpose.msk.msra.mxu0 %vm13494_vm6, %v14140_v48  ;;  %12793 = vmatprep.subr.msk.bf16.mxu1 %vm12792_vm7, %v14140_v48  ;;  %vm5147_vm6 = vcmp.eq.s32.totalorder %v3475_v35, %v18473_v40  ;;  %vm5115_vm7 = vcmp.eq.s32.totalorder %v3443_v41, %v18477_v37  ;;  %vm13504_vm0 = vmpackc.low %vm5308_vm13, %vm5244_vm12  ;;  %vm5339_vm13 = vcmp.eq.s32.totalorder %v3667_v18, %v18473_v40  ;;  %v2870_v35 = vld [vmem:[#allocation2 + $0x3d8] sm:$0xff] }
 0x793   : > { %13497 = vmatprep.subr.msk.bf16.mxu0 %vm13496_vm8, %v14140_v48  ;;  %vm5179_vm8 = vcmp.eq.s32.totalorder %v3507_v22, %v18477_v37  ;;  %vm12798_vm11 = vmpackc.low %vm5147_vm6, %vm5083_vm5  ;;  %vm5340_vm5 = vcmp.eq.s32.totalorder %v3668_v32, %v18439_v24  ;;  %vm5404_vm6 = vcmp.eq.s32.totalorder %v3732_v11, %v18439_v24  ;;  %v2585_v41 = vcombine.high %v18467_v29, %v18467_v29  ;;  %v2805_v29 = vld [vmem:[#allocation2 + $0x1d0] sm:$0xff] }
 0x794   : > { %vm13502_vm14 = vmpackc.low %vm5179_vm8, %vm5115_vm7  ;;  %vm5372_vm8 = vcmp.eq.s32.totalorder %v3700_v0, %v18447_v4  ;;  %v18645_v22 = vrot.slane %v18431_v63, %v15991_v20  ;;  %v2998_v63 = vld [vmem:[#allocation2 + $0x7d8] sm:$0xff]  ;;  %v2901_v32 = vld [vmem:[#allocation2 + $0x4d0] sm:$0xff] }
 0x795   : > { %v18651_v33 = vrot.slane %v2585_v41, %v16005_v25  ;;  %v2965_v11 = vld [vmem:[#allocation2 + $0x6d0] sm:$0xff]  ;;  %v3606_v41 = vld [vmem:[#allocation2 + $0x1ad8] sm:$0xff] }
 0x796   : > { %v2933_v0 = vld [vmem:[#allocation2 + $0x5d0] sm:$0xff] }
 0x799   : > { %12795 = vmatpush1.bf16.xpose.msk.msra.mxu1 %vm12794_vm15, %v14140_v48  ;;  %vm12800_vm15 = vmpackc.low %vm5276_vm10, %vm5212_vm9  ;;  %vm5436_vm9 = vcmp.eq.s32.totalorder %v3764_v16, %v18447_v4  ;;  %v2997_v16 = vld [vmem:[#allocation2 + $0x7d0] sm:$0xff] }
 0x79a   : > { %13499 = vmatpush1.bf16.xpose.msk.msra.mxu0 %vm13498_vm2, %v14140_v48  ;;  %12797 = vmatprep.subr.msk.bf16.mxu1 %vm12796_vm3, %v14140_v48  ;;  %vm5275_vm2 = vcmp.eq.s32.totalorder %v3603_v56, %v18473_v40  ;;  %vm5243_vm3 = vcmp.eq.s32.totalorder %v3571_v39, %v18477_v37  ;;  %vm13508_vm12 = vmpackc.low %vm5436_vm9, %vm5372_vm8  ;;  %vm5467_vm9 = vcmp.eq.s32.totalorder %v3795_v17, %v18473_v40  ;;  %v3158_v17 = vld [vmem:[#allocation2 + $0xcd8] sm:$0xff] }
 0x79b   : > { %13501 = vmatprep.subr.msk.bf16.mxu0 %vm13500_vm4, %v14140_v48  ;;  %vm5307_vm4 = vcmp.eq.s32.totalorder %v3635_v19, %v18477_v37  ;;  %vm12802_vm7 = vmpackc.low %vm5275_vm2, %vm5211_vm1  ;;  %vm5468_vm1 = vcmp.eq.s32.totalorder %v3796_v59, %v18439_v24  ;;  %vm5532_vm2 = vcmp.eq.s32.totalorder %v3860_v58, %v18439_v24  ;;  %v2707_v56 = vpack.c.bf16 %v18481_v44, %v18481_v44  ;;  %v3029_v59 = vld [vmem:[#allocation2 + $0x8d0] sm:$0xff] }
 0x79c   : > { %vm13506_vm10 = vmpackc.low %vm5307_vm4, %vm5243_vm3  ;;  %vm5500_vm4 = vcmp.eq.s32.totalorder %v3828_v6, %v18447_v4  ;;  %v2601_v39 = vcombine.high %v18651_v33, %v18651_v33  ;;  %v2739_v19 = vpack.c.bf16 %v18485_v15, %v18485_v15  ;;  %v2710_v44 = vpack.c.bf16 %v2465_v28, %v2465_v28  ;;  %v3062_v15 = vld [vmem:[#allocation2 + $0x9d8] sm:$0xff]  ;;  %v3093_v58 = vld [vmem:[#allocation2 + $0xad0] sm:$0xff] }
 0x79d   : > { %v3061_v6 = vld [vmem:[#allocation2 + $0x9d0] sm:$0xff]  ;;  %v3702_v28 = vld [vmem:[#allocation2 + $0x1dd8] sm:$0xff] }
 0x79e   : > { %v2742_v18 = vpack.c.bf16 %v2601_v39, %v2601_v39  ;;  %v3669_v39 = vld [vmem:[#allocation2 + $0x1cd0] sm:$0xff] }
 0x7a1   : > { %12799 = vmatpush1.bf16.xpose.msk.msra.mxu1 %vm12798_vm11, %v14140_v48  ;;  %vm12804_vm11 = vmpackc.low %vm5404_vm6, %vm5340_vm5  ;;  %vm5564_vm5 = vcmp.eq.s32.totalorder %v3892_v27, %v18447_v4  ;;  %v3125_v27 = vld [vmem:[#allocation2 + $0xbd0] sm:$0xff] }
 0x7a2   : > { %13503 = vmatpush1.bf16.xpose.msk.msra.mxu0 %vm13502_vm14, %v14140_v48  ;;  %12801 = vmatprep.subr.msk.bf16.mxu1 %vm12800_vm15, %v14140_v48  ;;  %vm5403_vm14 = vcmp.eq.s32.totalorder %v3731_v12, %v18473_v40  ;;  %vm5371_vm15 = vcmp.eq.s32.totalorder %v3699_v55, %v18477_v37  ;;  %vm13512_vm8 = vmpackc.low %vm5564_vm5, %vm5500_vm4  ;;  %vm5595_vm5 = vcmp.eq.s32.totalorder %v3923_v42, %v18473_v40  ;;  %v3030_v12 = vld [vmem:[#allocation2 + $0x8d8] sm:$0xff] }
 0x7a3   : > { %13505 = vmatprep.subr.msk.bf16.mxu0 %vm13504_vm0, %v14140_v48  ;;  %vm5435_vm0 = vcmp.eq.s32.totalorder %v3763_v10, %v18477_v37  ;;  %vm12806_vm3 = vmpackc.low %vm5403_vm14, %vm5339_vm13  ;;  %vm5596_vm13 = vcmp.eq.s32.totalorder %v3924_v34, %v18439_v24  ;;  %vm5660_vm14 = vcmp.eq.s32.totalorder %v3988_v31, %v18439_v24  ;;  %v3094_v55 = vld [vmem:[#allocation2 + $0xad8] sm:$0xff]  ;;  %v3157_v34 = vld [vmem:[#allocation2 + $0xcd0] sm:$0xff] }
 0x7a4   : > { %vm13510_vm6 = vmpackc.low %vm5435_vm0, %vm5371_vm15  ;;  %vm5628_vm0 = vcmp.eq.s32.totalorder %v3956_v45, %v18447_v4  ;;  %v3126_v10 = vld [vmem:[#allocation2 + $0xbd8] sm:$0xff]  ;;  %v3221_v31 = vld [vmem:[#allocation2 + $0xed0] sm:$0xff] }
 0x7a5   : > { %v3189_v45 = vld [vmem:[#allocation2 + $0xdd0] sm:$0xff]  ;;  %v3286_v42 = vld [vmem:[#allocation2 + $0x10d8] sm:$0xff] }
 0x7a9   : > { %12803 = vmatpush1.bf16.xpose.msk.msra.mxu1 %vm12802_vm7, %v14140_v48  ;;  %vm12808_vm7 = vmpackc.low %vm5532_vm2, %vm5468_vm1  ;;  %vm5692_vm1 = vcmp.eq.s32.totalorder %v4020_v38, %v18447_v4  ;;  %v3253_v38 = vld [vmem:[#allocation2 + $0xfd0] sm:$0xff] }
 0x7aa   : > { %13507 = vmatpush1.bf16.xpose.msk.msra.mxu0 %vm13506_vm10, %v14140_v48  ;;  %12805 = vmatprep.subr.msk.bf16.mxu1 %vm12804_vm11, %v14140_v48  ;;  %vm5531_vm10 = vcmp.eq.s32.totalorder %v3859_v52, %v18473_v40  ;;  %vm5499_vm11 = vcmp.eq.s32.totalorder %v3827_v7, %v18477_v37  ;;  %vm13516_vm4 = vmpackc.low %vm5692_vm1, %vm5628_vm0  ;;  %vm5723_vm1 = vcmp.eq.s32.totalorder %v4051_v3, %v18473_v40  ;;  %v3222_v52 = vld [vmem:[#allocation2 + $0xed8] sm:$0xff] }
 0x7ab   : > { %13509 = vmatprep.subr.msk.bf16.mxu0 %vm13508_vm12, %v14140_v48  ;;  %vm5563_vm12 = vcmp.eq.s32.totalorder %v3891_v43, %v18477_v37  ;;  %vm12810_vm15 = vmpackc.low %vm5531_vm10, %vm5467_vm9  ;;  %vm5724_vm9 = vcmp.eq.s32.totalorder %v4052_v54, %v18439_v24  ;;  %vm5788_vm10 = vcmp.eq.s32.totalorder %v4116_v57, %v18439_v24  ;;  %v2838_v24 = vld [vmem:[#allocation2 + $0x2d8] sm:$0xff]  ;;  %v3285_v54 = vld [vmem:[#allocation2 + $0x10d0] sm:$0xff] }
 0x7ac   : > { %vm13514_vm2 = vmpackc.low %vm5563_vm12, %vm5499_vm11  ;;  %vm5756_vm12 = vcmp.eq.s32.totalorder %v4084_v23, %v18447_v4  ;;  %v3190_v7 = vld [vmem:[#allocation2 + $0xdd8] sm:$0xff]  ;;  %v3349_v57 = vld [vmem:[#allocation2 + $0x12d0] sm:$0xff] }
 0x7ad   : > { %v3254_v43 = vld [vmem:[#allocation2 + $0xfd8] sm:$0xff]  ;;  %v3317_v23 = vld [vmem:[#allocation2 + $0x11d0] sm:$0xff] }
 0x7ae   : > { %v3414_v3 = vld [vmem:[#allocation2 + $0x14d8] sm:$0xff] }
 0x7b1   : > { %12807 = vmatpush1.bf16.xpose.msk.msra.mxu1 %vm12806_vm3, %v14140_v48  ;;  %vm12812_vm3 = vmpackc.low %vm5660_vm14, %vm5596_vm13  ;;  %vm5820_vm13 = vcmp.eq.s32.totalorder %v4148_v53, %v18447_v4  ;;  %v2806_v4 = vld [vmem:[#allocation2 + $0x1d8] sm:$0xff]  ;;  %v3381_v53 = vld [vmem:[#allocation2 + $0x13d0] sm:$0xff] }
 0x7b2   : > { %13511 = vmatpush1.bf16.xpose.msk.msra.mxu0 %vm13510_vm6, %v14140_v48  ;;  %12809 = vmatprep.subr.msk.bf16.mxu1 %vm12808_vm7, %v14140_v48  ;;  %vm5659_vm6 = vcmp.eq.s32.totalorder %v3987_v9, %v18473_v40  ;;  %vm5627_vm7 = vcmp.eq.s32.totalorder %v3955_v1, %v18477_v37  ;;  %vm13520_vm0 = vmpackc.low %vm5820_vm13, %vm5756_vm12  ;;  %v3350_v9 = vld [vmem:[#allocation2 + $0x12d8] sm:$0xff] }
 0x7b3   : > { %13513 = vmatprep.subr.msk.bf16.mxu0 %vm13512_vm8, %v14140_v48  ;;  %vm5691_vm8 = vcmp.eq.s32.totalorder %v4019_v14, %v18477_v37  ;;  %vm12814_vm11 = vmpackc.low %vm5659_vm6, %vm5595_vm5  ;;  %vm4446_vm5 = vcmp.eq.s32.totalorder %v2774_v2, %v18617_v61  ;;  %vm4510_vm6 = vcmp.eq.s32.totalorder %v2838_v24, %v18617_v61  ;;  %v3318_v1 = vld [vmem:[#allocation2 + $0x11d8] sm:$0xff]  ;;  %v3413_v2 = vld [vmem:[#allocation2 + $0x14d0] sm:$0xff] }
 0x7b4   : > { %vm13518_vm14 = vmpackc.low %vm5691_vm8, %vm5627_vm7  ;;  %vm4478_vm8 = vcmp.eq.s32.totalorder %v2806_v4, %v18622_v26  ;;  %v3382_v14 = vld [vmem:[#allocation2 + $0x13d8] sm:$0xff]  ;;  %v3477_v24 = vld [vmem:[#allocation2 + $0x16d0] sm:$0xff] }
 0x7b5   : > { %v3445_v4 = vld [vmem:[#allocation2 + $0x15d0] sm:$0xff] }
 0x7b9   : > { %12811 = vmatpush1.bf16.xpose.msk.msra.mxu1 %vm12810_vm15, %v14140_v48  ;;  %vm12816_vm15 = vmpackc.low %vm5788_vm10, %vm5724_vm9  ;;  %vm4542_vm9 = vcmp.eq.s32.totalorder %v2870_v35, %v18622_v26  ;;  %v3509_v35 = vld [vmem:[#allocation2 + $0x17d0] sm:$0xff] }
 0x7ba   : > { %13515 = vmatpush1.bf16.xpose.msk.msra.mxu0 %vm13514_vm2, %v14140_v48  ;;  %12813 = vmatprep.subr.msk.bf16.mxu1 %vm12812_vm3, %v14140_v48  ;;  %vm5787_vm2 = vcmp.eq.s32.totalorder %v4115_v5, %v18473_v40  ;;  %vm5755_vm3 = vcmp.eq.s32.totalorder %v4083_v62, %v18477_v37  ;;  %v18641_v40 = vrot.slane %v18424_v36, %v15991_v20  ;;  %vm13524_vm12 = vmpackc.low %vm4542_vm9, %vm4478_vm8  ;;  %v2902_v36 = vld [vmem:[#allocation2 + $0x4d8] sm:$0xff] }
 0x7bb   : > { %13517 = vmatprep.subr.msk.bf16.mxu0 %vm13516_vm4, %v14140_v48  ;;  %vm5819_vm4 = vcmp.eq.s32.totalorder %v4147_v60, %v18477_v37  ;;  %vm12818_vm7 = vmpackc.low %vm5787_vm2, %vm5723_vm1  ;;  %v2773_v37 = vld [vmem:[#allocation2 + $0xd0] sm:$0xff]  ;;  %v2934_v20 = vld [vmem:[#allocation2 + $0x5d8] sm:$0xff]  ;;  %vm4574_vm1 = vcmp.eq.s32.totalorder %v2902_v36, %v18617_v61  ;;  %vm4638_vm2 = vcmp.eq.s32.totalorder %v2966_v13, %v18617_v61 }
 0x7bc   : > { %vm13522_vm10 = vmpackc.low %vm5819_vm4, %vm5755_vm3  ;;  %vm4445_vm13 = vcmp.eq.s32.totalorder %v2773_v37, %v18641_v40  ;;  %vm4606_vm4 = vcmp.eq.s32.totalorder %v2934_v20, %v18622_v26  ;;  %vm4573_vm9 = vcmp.eq.s32.totalorder %v2901_v32, %v18641_v40  ;;  %v3478_v5 = vld [vmem:[#allocation2 + $0x16d8] sm:$0xff]  ;;  %v3573_v36 = vld [vmem:[#allocation2 + $0x19d0] sm:$0xff] }
 0x7bd   : > { %v3446_v62 = vld [vmem:[#allocation2 + $0x15d8] sm:$0xff]  ;;  %v3637_v13 = vld [vmem:[#allocation2 + $0x1bd0] sm:$0xff] }
 0x7be   : > { %v3510_v60 = vld [vmem:[#allocation2 + $0x17d8] sm:$0xff]  ;;  %v3701_v32 = vld [vmem:[#allocation2 + $0x1dd0] sm:$0xff] }
 0x7bf   : > { %v3574_v37 = vld [vmem:[#allocation2 + $0x19d8] sm:$0xff] }
 0x7c0   : > { %v3670_v20 = vld [vmem:[#allocation2 + $0x1cd8] sm:$0xff] }
 0x7c1   : > { %12815 = vmatpush1.bf16.xpose.msk.msra.mxu1 %vm12814_vm11, %v14140_v48  ;;  %vm12820_vm11 = vmpackc.low %vm4510_vm6, %vm4446_vm5  ;;  %vm4670_vm5 = vcmp.eq.s32.totalorder %v2998_v63, %v18622_v26  ;;  %v3734_v63 = vld [vmem:[#allocation2 + $0x1ed8] sm:$0xff] }
 0x7c2   : > { %13519 = vmatpush1.bf16.xpose.msk.msra.mxu0 %vm13518_vm14, %v14140_v48  ;;  %12817 = vmatprep.subr.msk.bf16.mxu1 %vm12816_vm15, %v14140_v48  ;;  %vm4509_vm14 = vcmp.eq.s32.totalorder %v2837_v30, %v18641_v40  ;;  %vm4477_vm15 = vcmp.eq.s32.totalorder %v2805_v29, %v18645_v22  ;;  %vm13528_vm8 = vmpackc.low %vm4670_vm5, %vm4606_vm4  ;;  %vm4701_vm5 = vcmp.eq.s32.totalorder %v3029_v59, %v18641_v40  ;;  %v3638_v30 = vld [vmem:[#allocation2 + $0x1bd8] sm:$0xff]  ;;  %v3541_v29 = vld [vmem:[#allocation2 + $0x18d0] sm:$0xff] }
 0x7c3   : > { %13521 = vmatprep.subr.msk.bf16.mxu0 %vm13520_vm0, %v14140_v48  ;;  %vm4541_vm0 = vcmp.eq.s32.totalorder %v2869_v51, %v18645_v22  ;;  %vm12822_vm3 = vmpackc.low %vm4509_vm14, %vm4445_vm13  ;;  %vm4702_vm13 = vcmp.eq.s32.totalorder %v3030_v12, %v18617_v61  ;;  %vm4766_vm14 = vcmp.eq.s32.totalorder %v3094_v55, %v18617_v61  ;;  %v3605_v51 = vld [vmem:[#allocation2 + $0x1ad0] sm:$0xff]  ;;  %v3926_v59 = vld [vmem:[#allocation2 + $0x24d8] sm:$0xff] }
 0x7c4   : > { %vm13526_vm6 = vmpackc.low %vm4541_vm0, %vm4477_vm15  ;;  %vm4734_vm0 = vcmp.eq.s32.totalorder %v3062_v15, %v18622_v26  ;;  %v3797_v12 = vld [vmem:[#allocation2 + $0x20d0] sm:$0xff] }
 0x7c5   : > { %v3861_v55 = vld [vmem:[#allocation2 + $0x22d0] sm:$0xff] }
 0x7c6   : > { %v3829_v15 = vld [vmem:[#allocation2 + $0x21d0] sm:$0xff] }
 0x7c9   : > { %12819 = vmatpush1.bf16.xpose.msk.msra.mxu1 %vm12818_vm7, %v14140_v48  ;;  %vm12824_vm7 = vmpackc.low %vm4638_vm2, %vm4574_vm1  ;;  %vm4798_vm1 = vcmp.eq.s32.totalorder %v3126_v10, %v18622_v26  ;;  %v3893_v10 = vld [vmem:[#allocation2 + $0x23d0] sm:$0xff] }
 0x7ca   : > { %13523 = vmatpush1.bf16.xpose.msk.msra.mxu0 %vm13522_vm10, %v14140_v48  ;;  %12821 = vmatprep.subr.msk.bf16.mxu1 %vm12820_vm11, %v14140_v48  ;;  %vm4637_vm10 = vcmp.eq.s32.totalorder %v2965_v11, %v18641_v40  ;;  %vm4605_vm11 = vcmp.eq.s32.totalorder %v2933_v0, %v18645_v22  ;;  %vm13532_vm4 = vmpackc.low %vm4798_vm1, %vm4734_vm0  ;;  %vm4829_vm1 = vcmp.eq.s32.totalorder %v3157_v34, %v18641_v40  ;;  %v3765_v11 = vld [vmem:[#allocation2 + $0x1fd0] sm:$0xff]  ;;  %v3862_v0 = vld [vmem:[#allocation2 + $0x22d8] sm:$0xff] }
 0x7cb   : > { %13525 = vmatprep.subr.msk.bf16.mxu0 %vm13524_vm12, %v14140_v48  ;;  %vm4669_vm12 = vcmp.eq.s32.totalorder %v2997_v16, %v18645_v22  ;;  %vm12826_vm15 = vmpackc.low %vm4637_vm10, %vm4573_vm9  ;;  %vm4830_vm9 = vcmp.eq.s32.totalorder %v3158_v17, %v18617_v61  ;;  %vm4894_vm10 = vcmp.eq.s32.totalorder %v3222_v52, %v18617_v61  ;;  %v3830_v16 = vld [vmem:[#allocation2 + $0x21d8] sm:$0xff] }
 0x7cc   : > { %vm13530_vm2 = vmpackc.low %vm4669_vm12, %vm4605_vm11  ;;  %vm4862_vm12 = vcmp.eq.s32.totalorder %v3190_v7, %v18622_v26  ;;  %v13914_v17 = vld [vmem:[%s14405_s7 + $0x18] sm:$0xff] }
 0x7cd   : > { %v1886_v52 = vrot.slane %v13914_v17, %v16299_v50  ;;  %v1890_v7 = vrot.slane %v13914_v17, %v16292_v49  ;;  %v1898_v34 = vrot.slane %v13914_v17, %v16289_v47 }
 0x7d0   : > { %9873 = vmatmul.mubr.bf16.vlgmr.msra.gmra.mrb[0].mxu1 %v2707_v56  ;;  %v3766_v56 = vld [vmem:[#allocation2 + $0x1fd8] sm:$0xff] }
 0x7d1   : > { %12823 = vmatpush1.bf16.xpose.msk.msra.mxu1 %vm12822_vm3, %v14140_v48  ;;  %10529 = vmatmul.mubr.bf16.vlgmr.msra.gmra.mrb[0].mxu0 %v2739_v19  ;;  %vm12828_vm3 = vmpackc.low %vm4766_vm14, %vm4702_vm13  ;;  %vm4926_vm13 = vcmp.eq.s32.totalorder %v3254_v43, %v18622_v26  ;;  %v3733_v19 = vld [vmem:[#allocation2 + $0x1ed0] sm:$0xff]  ;;  %v1894_v43 = vrot.slane %v13914_v17, %v16286_v46  ;;  %v2871_v17 = vld [vmem:[#allocation2 + $0x3e0] sm:$0xff] }
 0x7d2   : > { %13527 = vmatpush1.bf16.xpose.msk.msra.mxu0 %vm13526_vm6, %v14140_v48  ;;  %12825 = vmatprep.subr.msk.bf16.mxu1 %vm12824_vm7, %v14140_v48  ;;  %vm4765_vm6 = vcmp.eq.s32.totalorder %v3093_v58, %v18641_v40  ;;  %vm4733_vm7 = vcmp.eq.s32.totalorder %v3061_v6, %v18645_v22  ;;  %vm13536_vm0 = vmpackc.low %vm4926_vm13, %vm4862_vm12  ;;  %vm4957_vm13 = vcmp.eq.s32.totalorder %v3285_v54, %v18641_v40  ;;  %v3990_v58 = vld [vmem:[#allocation2 + $0x26d8] sm:$0xff]  ;;  %v3925_v54 = vld [vmem:[#allocation2 + $0x24d0] sm:$0xff] }
 0x7d3   : > { %13529 = vmatprep.subr.msk.bf16.mxu0 %vm13528_vm8, %v14140_v48  ;;  %9913 = vmatprep.mubr.bf16.mxu1 %v2710_v44  ;;  %vm4797_vm8 = vcmp.eq.s32.totalorder %v3125_v27, %v18645_v22  ;;  %vm12830_vm11 = vmpackc.low %vm4765_vm6, %vm4701_vm5  ;;  %vm4958_vm5 = vcmp.eq.s32.totalorder %v3286_v42, %v18617_v61  ;;  %vm5022_vm6 = vcmp.eq.s32.totalorder %v3350_v9, %v18617_v61  ;;  %v3798_v44 = vld [vmem:[#allocation2 + $0x20d8] sm:$0xff] }
 0x7d4   : > { %10569 = vmatprep.mubr.bf16.mxu0 %v2742_v18  ;;  %vm13534_vm14 = vmpackc.low %vm4797_vm8, %vm4733_vm7  ;;  %vm4990_vm8 = vcmp.eq.s32.totalorder %v3318_v1, %v18622_v26  ;;  %v3894_v18 = vld [vmem:[#allocation2 + $0x23d8] sm:$0xff]  ;;  %v2967_v1 = vld [vmem:[#allocation2 + $0x6e0] sm:$0xff] }
 0x7d5   : > { %v3958_v6 = vld [vmem:[#allocation2 + $0x25d8] sm:$0xff] }
 0x7d6   : > { %v4022_v27 = vld [vmem:[#allocation2 + $0x27d8] sm:$0xff] }
 0x7d9   : > { %12827 = vmatpush1.bf16.xpose.msk.msra.mxu1 %vm12826_vm15, %v14140_v48  ;;  %vm12832_vm15 = vmpackc.low %vm4894_vm10, %vm4830_vm9  ;;  %vm5054_vm9 = vcmp.eq.s32.totalorder %v3382_v14, %v18622_v26  ;;  %v2935_v14 = vld [vmem:[#allocation2 + $0x5e0] sm:$0xff] }
 0x7da   : > { %13531 = vmatpush1.bf16.xpose.msk.msra.mxu0 %vm13530_vm2, %v14140_v48  ;;  %12829 = vmatprep.subr.msk.bf16.mxu1 %vm12828_vm3, %v14140_v48  ;;  %vm4893_vm2 = vcmp.eq.s32.totalorder %v3221_v31, %v18641_v40  ;;  %vm4861_vm3 = vcmp.eq.s32.totalorder %v3189_v45, %v18645_v22  ;;  %vm13540_vm12 = vmpackc.low %vm5054_vm9, %vm4990_vm8  ;;  %vm5085_vm9 = vcmp.eq.s32.totalorder %v3413_v2, %v18641_v40  ;;  %v13915_v31 = vld [vmem:[%s14405_s7 + $0x38] sm:$0xff] }
 0x7db   : > { %13533 = vmatprep.subr.msk.bf16.mxu0 %vm13532_vm4, %v14140_v48  ;;  %vm4925_vm4 = vcmp.eq.s32.totalorder %v3253_v38, %v18645_v22  ;;  %vm12834_vm7 = vmpackc.low %vm4893_vm2, %vm4829_vm1  ;;  %vm5086_vm1 = vcmp.eq.s32.totalorder %v3414_v3, %v18617_v61  ;;  %vm5150_vm2 = vcmp.eq.s32.totalorder %v3478_v5, %v18617_v61  ;;  %v2014_v45 = vrot.slane %v13915_v31, %v16299_v50  ;;  %v4021_v3 = vld [vmem:[#allocation2 + $0x27d0] sm:$0xff]  ;;  %v4118_v2 = vld [vmem:[#allocation2 + $0x2ad8] sm:$0xff] }
 0x7dc   : > { %vm13538_vm10 = vmpackc.low %vm4925_vm4, %vm4861_vm3  ;;  %vm5118_vm4 = vcmp.eq.s32.totalorder %v3446_v62, %v18622_v26  ;;  %v2018_v38 = vrot.slane %v13915_v31, %v16292_v49  ;;  %v2022_v42 = vrot.slane %v13915_v31, %v16286_v46  ;;  %v2026_v9 = vrot.slane %v13915_v31, %v16289_v47 }
 0x7dd   : > { %v2146_v5 = vcombine.low %v1886_v52, %v1890_v7  ;;  %v2147_v62 = vcombine.low %v1894_v43, %v1898_v34  ;;  %v2904_v7 = vld [vmem:[#allocation2 + $0x4e8] sm:$0xff] }
 0x7de   : > { %v2968_v43 = vld [vmem:[#allocation2 + $0x6e8] sm:$0xff] }
 0x7df   : > { %v3000_v34 = vld [vmem:[#allocation2 + $0x7e8] sm:$0xff] }
 0x7e1   : > { %12831 = vmatpush1.bf16.xpose.msk.msra.mxu1 %vm12830_vm11, %v14140_v48  ;;  %vm12836_vm11 = vmpackc.low %vm5022_vm6, %vm4958_vm5  ;;  %vm5182_vm5 = vcmp.eq.s32.totalorder %v3510_v60, %v18622_v26  ;;  %v4054_v60 = vld [vmem:[#allocation2 + $0x28d8] sm:$0xff] }
 0x7e2   : > { %13535 = vmatpush1.bf16.xpose.msk.msra.mxu0 %vm13534_vm14, %v14140_v48  ;;  %12833 = vmatprep.subr.msk.bf16.mxu1 %vm12832_vm15, %v14140_v48  ;;  %vm5021_vm14 = vcmp.eq.s32.totalorder %v3349_v57, %v18641_v40  ;;  %vm4989_vm15 = vcmp.eq.s32.totalorder %v3317_v23, %v18645_v22  ;;  %vm13544_vm8 = vmpackc.low %vm5182_vm5, %vm5118_vm4  ;;  %vm5213_vm5 = vcmp.eq.s32.totalorder %v3541_v29, %v18641_v40  ;;  %v3989_v57 = vld [vmem:[#allocation2 + $0x26d0] sm:$0xff]  ;;  %v3032_v23 = vld [vmem:[#allocation2 + $0x8e8] sm:$0xff] }
 0x7e3   : > { %13537 = vmatprep.subr.msk.bf16.mxu0 %vm13536_vm0, %v14140_v48  ;;  %vm5053_vm0 = vcmp.eq.s32.totalorder %v3381_v53, %v18645_v22  ;;  %vm12838_vm3 = vmpackc.low %vm5021_vm14, %vm4957_vm13  ;;  %vm5214_vm13 = vcmp.eq.s32.totalorder %v3542_v21, %v18617_v61  ;;  %vm5278_vm14 = vcmp.eq.s32.totalorder %v3606_v41, %v18617_v61  ;;  %v3957_v53 = vld [vmem:[#allocation2 + $0x25d0] sm:$0xff]  ;;  %v4150_v21 = vld [vmem:[#allocation2 + $0x2bd8] sm:$0xff]  ;;  %v2154_v41 = vrot.slane %v2146_v5, %v16005_v25 }
 0x7e4   : > { %vm13542_vm6 = vmpackc.low %vm5053_vm0, %vm4989_vm15  ;;  %vm5246_vm0 = vcmp.eq.s32.totalorder %v3574_v37, %v18622_v26  ;;  %v2161_v37 = vrot.slane %v2147_v62, %v16005_v25  ;;  %v3031_v5 = vld [vmem:[#allocation2 + $0x8e0] sm:$0xff] }
 0x7e5   : > { %v3095_v62 = vld [vmem:[#allocation2 + $0xae0] sm:$0xff] }
 0x7e9   : > { %12835 = vmatpush1.bf16.xpose.msk.msra.mxu1 %vm12834_vm7, %v14140_v48  ;;  %vm12840_vm7 = vmpackc.low %vm5150_vm2, %vm5086_vm1  ;;  %vm5310_vm1 = vcmp.eq.s32.totalorder %v3638_v30, %v18622_v26  ;;  %v3191_v30 = vld [vmem:[#allocation2 + $0xde0] sm:$0xff] }
 0x7ea   : > { %13539 = vmatpush1.bf16.xpose.msk.msra.mxu0 %vm13538_vm10, %v14140_v48  ;;  %12837 = vmatprep.subr.msk.bf16.mxu1 %vm12836_vm11, %v14140_v48  ;;  %vm5149_vm10 = vcmp.eq.s32.totalorder %v3477_v24, %v18641_v40  ;;  %vm5117_vm11 = vcmp.eq.s32.totalorder %v3445_v4, %v18645_v22  ;;  %vm13548_vm4 = vmpackc.low %vm5310_vm1, %vm5246_vm0  ;;  %vm5341_vm1 = vcmp.eq.s32.totalorder %v3669_v39, %v18641_v40  ;;  %v18842_v39 = vld [vmem:[%s14414_s1 + $0x18] sm:$0xff] }
 0x7eb   : > { %13541 = vmatprep.subr.msk.bf16.mxu0 %vm13540_vm12, %v14140_v48  ;;  %vm5181_vm12 = vcmp.eq.s32.totalorder %v3509_v35, %v18645_v22  ;;  %vm12842_vm15 = vmpackc.low %vm5149_vm10, %vm5085_vm9  ;;  %vm5342_vm9 = vcmp.eq.s32.totalorder %v3670_v20, %v18617_v61  ;;  %vm5406_vm10 = vcmp.eq.s32.totalorder %v3734_v63, %v18617_v61  ;;  %v2282_v24 = vcombine.low %v2014_v45, %v2018_v38  ;;  %v4086_v35 = vld [vmem:[#allocation2 + $0x29d8] sm:$0xff]  ;;  %v4053_v20 = vld [vmem:[#allocation2 + $0x28d0] sm:$0xff] }
 0x7ec   : > { %vm13546_vm2 = vmpackc.low %vm5181_vm12, %vm5117_vm11  ;;  %vm5374_vm12 = vcmp.eq.s32.totalorder %v3702_v28, %v18622_v26  ;;  %v2283_v4 = vcombine.low %v2022_v42, %v2026_v9  ;;  %v2162_v63 = vcombine.low %v2154_v41, %v2161_v37  ;;  %v4085_v28 = vld [vmem:[#allocation2 + $0x29d0] sm:$0xff]  ;;  %v2709_v45 = vpack.c.bf16 %v18648_v8, %v18648_v8  ;;  %v2903_v9 = vld [vmem:[#allocation2 + $0x4e0] sm:$0xff] }
 0x7ed   : > { %v2290_v29 = vrot.slane %v2282_v24, %v16005_v25  ;;  %v2741_v42 = vpack.c.bf16 %v18651_v33, %v18651_v33  ;;  %v3064_v33 = vld [vmem:[#allocation2 + $0x9e8] sm:$0xff]  ;;  %v3159_v41 = vld [vmem:[#allocation2 + $0xce0] sm:$0xff] }
 0x7ee   : > { %v3160_v24 = vld [vmem:[#allocation2 + $0xce8] sm:$0xff]  ;;  %v3223_v37 = vld [vmem:[#allocation2 + $0xee0] sm:$0xff] }
 0x7f1   : > { %12839 = vmatpush1.bf16.xpose.msk.msra.mxu1 %vm12838_vm3, %v14140_v48  ;;  %vm12844_vm3 = vmpackc.low %vm5278_vm14, %vm5214_vm13  ;;  %vm5438_vm13 = vcmp.eq.s32.totalorder %v3766_v56, %v18622_v26  ;;  %v4149_v56 = vld [vmem:[#allocation2 + $0x2bd0] sm:$0xff] }
 0x7f2   : > { %13543 = vmatpush1.bf16.xpose.msk.msra.mxu0 %vm13542_vm6, %v14140_v48  ;;  %12841 = vmatprep.subr.msk.bf16.mxu1 %vm12840_vm7, %v14140_v48  ;;  %vm5277_vm6 = vcmp.eq.s32.totalorder %v3605_v51, %v18641_v40  ;;  %vm5245_vm7 = vcmp.eq.s32.totalorder %v3573_v36, %v18645_v22  ;;  %vm13552_vm0 = vmpackc.low %vm5438_vm13, %vm5374_vm12  ;;  %vm5469_vm13 = vcmp.eq.s32.totalorder %v3797_v12, %v18641_v40  ;;  %v1754_v12 = vld [vmem:[%s14398_s6 + $0x78] sm:$0xff]  ;;  %v3320_v36 = vld [vmem:[#allocation2 + $0x11e8] sm:$0xff] }
 0x7f3   : > { %13545 = vmatprep.subr.msk.bf16.mxu0 %vm13544_vm8, %v14140_v48  ;;  %vm5309_vm8 = vcmp.eq.s32.totalorder %v3637_v13, %v18645_v22  ;;  %vm12846_vm11 = vmpackc.low %vm5277_vm6, %vm5213_vm5  ;;  %vm5470_vm5 = vcmp.eq.s32.totalorder %v3798_v44, %v18617_v61  ;;  %vm5534_vm6 = vcmp.eq.s32.totalorder %v3862_v0, %v18617_v61  ;;  %v2297_v51 = vrot.slane %v2283_v4, %v16005_v25  ;;  %v2776_v44 = vld [vmem:[#allocation2 + $0xe8] sm:$0xff] }
 0x7f4   : > { %vm13550_vm14 = vmpackc.low %vm5309_vm8, %vm5245_vm7  ;;  %v2840_v0 = vld [vmem:[#allocation2 + $0x2e8] sm:$0xff] }
 0x7f5   : > { %v3224_v4 = vld [vmem:[#allocation2 + $0xee8] sm:$0xff] }
 0x7f6   : > { %v3384_v13 = vld [vmem:[#allocation2 + $0x13e8] sm:$0xff] }
 0x7f9   : > { %12843 = vmatpush1.bf16.xpose.msk.msra.mxu1 %vm12842_vm15, %v14140_v48  ;;  %vm12848_vm15 = vmpackc.low %vm5406_vm10, %vm5342_vm9  ;;  %vm5502_vm9 = vcmp.eq.s32.totalorder %v3830_v16, %v18622_v26  ;;  %vm5566_vm10 = vcmp.eq.s32.totalorder %v3894_v18, %v18622_v26  ;;  %v18853_v16 = vld [vmem:[%s14414_s1 + $0x38] sm:$0xff] }
 0x7fa   : > { %13547 = vmatpush1.bf16.xpose.msk.msra.mxu0 %vm13546_vm2, %v14140_v48  ;;  %12845 = vmatprep.subr.msk.bf16.mxu1 %vm12844_vm3, %v14140_v48  ;;  %vm5405_vm2 = vcmp.eq.s32.totalorder %v3733_v19, %v18641_v40  ;;  %vm5373_vm3 = vcmp.eq.s32.totalorder %v3701_v32, %v18645_v22  ;;  %vm13556_vm12 = vmpackc.low %vm5566_vm10, %vm5502_vm9  ;;  %vm5597_vm9 = vcmp.eq.s32.totalorder %v3925_v54, %v18641_v40  ;;  %v1746_v32 = vld [vmem:[%s14398_s6 + $0x38] sm:$0xff]  ;;  %v2999_v54 = vld [vmem:[#allocation2 + $0x7e0] sm:$0xff] }
 0x7fb   : > { %13549 = vmatprep.subr.msk.bf16.mxu0 %vm13548_vm4, %v14140_v48  ;;  %vm5437_vm4 = vcmp.eq.s32.totalorder %v3765_v11, %v18645_v22  ;;  %vm12850_vm7 = vmpackc.low %vm5405_vm2, %vm5341_vm1  ;;  %vm5598_vm1 = vcmp.eq.s32.totalorder %v3926_v59, %v18617_v61  ;;  %vm5662_vm2 = vcmp.eq.s32.totalorder %v3990_v58, %v18617_v61  ;;  %vm5661_vm10 = vcmp.eq.s32.totalorder %v3989_v57, %v18641_v40  ;;  %v2839_v59 = vld [vmem:[#allocation2 + $0x2e0] sm:$0xff] }
 0x7fc   : > { %vm13554_vm8 = vmpackc.low %vm5437_vm4, %vm5373_vm3  ;;  %vm5630_vm4 = vcmp.eq.s32.totalorder %v3958_v6, %v18622_v26  ;;  %v18846_v19 = vrot.slane %v18842_v39, %v16292_v49  ;;  %v2298_v11 = vcombine.low %v2290_v29, %v2297_v51  ;;  %v18857_v18 = vrot.slane %v18853_v16, %v16292_v49  ;;  %v3255_v29 = vld [vmem:[#allocation2 + $0xfe0] sm:$0xff]  ;;  %v3288_v51 = vld [vmem:[#allocation2 + $0x10e8] sm:$0xff] }
 0x7fd   : > { %v18873_v49 = vmul.f32 %v2162_v63, %v1746_v32  ;;  %v18887_v58 = vrot.slane %v18853_v16, %v16299_v50  ;;  %v3319_v63 = vld [vmem:[#allocation2 + $0x11e0] sm:$0xff]  ;;  %v3480_v32 = vld [vmem:[#allocation2 + $0x16e8] sm:$0xff] }
 0x7ff   : > { %v18891_v6 = vrot.slane %v18873_v49, %v16005_v25 }
 0x801   : > { %12847 = vmatpush1.bf16.xpose.msk.msra.mxu1 %vm12846_vm11, %v14140_v48  ;;  %vm12852_vm11 = vmpackc.low %vm5534_vm6, %vm5470_vm5  ;;  %vm5694_vm5 = vcmp.eq.s32.totalorder %v4022_v27, %v18622_v26  ;;  %v2807_v27 = vld [vmem:[#allocation2 + $0x1e0] sm:$0xff]  ;;  %v2481_v31 = vcombine.high %v18891_v6, %v18891_v6 }
 0x802   : > { %13551 = vmatpush1.bf16.xpose.msk.msra.mxu0 %vm13550_vm14, %v14140_v48  ;;  %12849 = vmatprep.subr.msk.bf16.mxu1 %vm12848_vm15, %v14140_v48  ;;  %vm5533_vm14 = vcmp.eq.s32.totalorder %v3861_v55, %v18641_v40  ;;  %vm5501_vm15 = vcmp.eq.s32.totalorder %v3829_v15, %v18645_v22  ;;  %v2808_v55 = vld [vmem:[#allocation2 + $0x1e8] sm:$0xff] }
 0x803   : > { %13553 = vmatprep.subr.msk.bf16.mxu0 %vm13552_vm0, %v14140_v48  ;;  %vm5565_vm0 = vcmp.eq.s32.totalorder %v3893_v10, %v18645_v22  ;;  %vm18781_vm3 = vmpackc.low %vm5533_vm14, %vm5469_vm13  ;;  %vm5726_vm13 = vcmp.eq.s32.totalorder %v4054_v60, %v18617_v61  ;;  %vm5790_vm14 = vcmp.eq.s32.totalorder %v4118_v2, %v18617_v61  ;;  %v2872_v15 = vld [vmem:[#allocation2 + $0x3e8] sm:$0xff]  ;;  %v18877_v10 = vmul.f32 %v2298_v11, %v1754_v12  ;;  %v3063_v60 = vld [vmem:[#allocation2 + $0x9e0] sm:$0xff] }
 0x804   : > { %vm18791_vm6 = vmpackc.low %vm5565_vm0, %vm5501_vm15  ;;  %vm5758_vm0 = vcmp.eq.s32.totalorder %v4086_v35, %v18622_v26  ;;  %v2712_v8 = vpack.c.bf16 %v2481_v31, %v2481_v31  ;;  %v3127_v2 = vld [vmem:[#allocation2 + $0xbe0] sm:$0xff]  ;;  %v3192_v35 = vld [vmem:[#allocation2 + $0xde8] sm:$0xff] }
 0x805   : > { %vm18821_vm15 = vmpackc.low %vm5661_vm10, %vm5597_vm9  ;;  %vm4448_vm9 = vcmp.eq.s32.totalorder %v2776_v44, %v18846_v19  ;;  %vm4512_vm10 = vcmp.eq.s32.totalorder %v2840_v0, %v18846_v19  ;;  %v18895_v52 = vrot.slane %v18877_v10, %v16005_v25  ;;  %v3352_v61 = vld [vmem:[#allocation2 + $0x12e8] sm:$0xff]  ;;  %v3415_v0 = vld [vmem:[#allocation2 + $0x14e0] sm:$0xff] }
 0x806   : > { %v3448_v11 = vld [vmem:[#allocation2 + $0x15e8] sm:$0xff]  ;;  %v3479_v12 = vld [vmem:[#allocation2 + $0x16e0] sm:$0xff] }
 0x807   : > { %v2617_v38 = vcombine.high %v18895_v52, %v18895_v52  ;;  %v3512_v44 = vld [vmem:[#allocation2 + $0x17e8] sm:$0xff] }
 0x808   : > { %v3672_v31 = vld [vmem:[#allocation2 + $0x1ce8] sm:$0xff] }
 0x809   : > { %12851 = vmatpush1.bf16.xpose.msk.msra.mxu1 %vm12850_vm7, %v14140_v48  ;;  %vm18799_vm7 = vmpackc.low %vm5662_vm2, %vm5598_vm1  ;;  %vm5822_vm1 = vcmp.eq.s32.totalorder %v4150_v21, %v18622_v26  ;;  %v4117_v26 = vld [vmem:[#allocation2 + $0x2ad0] sm:$0xff]  ;;  %v2744_v57 = vpack.c.bf16 %v2617_v38, %v2617_v38  ;;  %v3256_v21 = vld [vmem:[#allocation2 + $0xfe8] sm:$0xff] }
 0x80a   : > { %13555 = vmatpush1.bf16.xpose.msk.msra.mxu0 %vm13554_vm8, %v14140_v48  ;;  %12853 = vmatprep.subr.msk.bf16.mxu1 %vm12852_vm11, %v14140_v48  ;;  %vm13560_vm8 = vmpackc.low %vm5694_vm5, %vm5630_vm4  ;;  %vm5629_vm11 = vcmp.eq.s32.totalorder %v3957_v53, %v18645_v22  ;;  %vm5725_vm5 = vcmp.eq.s32.totalorder %v4053_v20, %v18641_v40  ;;  %v3096_v53 = vld [vmem:[#allocation2 + $0xae8] sm:$0xff]  ;;  %v3287_v20 = vld [vmem:[#allocation2 + $0x10e0] sm:$0xff] }
 0x80b   : > { %13557 = vmatprep.subr.msk.bf16.mxu0 %vm13556_vm12, %v14140_v48  ;;  %vm5693_vm12 = vcmp.eq.s32.totalorder %v4021_v3, %v18645_v22  ;;  %vm18837_vm4 = vmpackc.low %vm5822_vm1, %vm5758_vm0  ;;  %v3128_v3 = vld [vmem:[#allocation2 + $0xbe8] sm:$0xff] }
 0x80c   : > { %vm18829_vm2 = vmpackc.low %vm5693_vm12, %vm5629_vm11  ;;  %vm4480_vm12 = vcmp.eq.s32.totalorder %v2808_v55, %v18857_v18  ;;  %v3447_v55 = vld [vmem:[#allocation2 + $0x15e0] sm:$0xff]  ;;  %v3704_v38 = vld [vmem:[#allocation2 + $0x1de8] sm:$0xff] }
 0x811   : > { %12855 = vmatpush1.bf16.xpose.msk.msra.mxu1 %vm18781_vm3, %v14140_v48  ;;  %vm18833_vm3 = vmpackc.low %vm5790_vm14, %vm5726_vm13  ;;  %vm4544_vm13 = vcmp.eq.s32.totalorder %v2872_v15, %v18857_v18  ;;  %v3511_v15 = vld [vmem:[#allocation2 + $0x17e0] sm:$0xff] }
 0x812   : > { %13559 = vmatpush1.bf16.xpose.msk.msra.mxu0 %vm18791_vm6, %v14140_v48  ;;  %12857 = vmatprep.subr.msk.bf16.mxu1 %vm18799_vm7, %v14140_v48  ;;  %vm5789_vm6 = vcmp.eq.s32.totalorder %v4117_v26, %v18641_v40  ;;  %vm5757_vm7 = vcmp.eq.s32.totalorder %v4085_v28, %v18645_v22  ;;  %v18883_v40 = vrot.slane %v18842_v39, %v16299_v50  ;;  %vm13568_vm0 = vmpackc.low %vm4544_vm13, %vm4480_vm12  ;;  %v2936_v50 = vld [vmem:[#allocation2 + $0x5e8] sm:$0xff]  ;;  %v3351_v26 = vld [vmem:[#allocation2 + $0x12e0] sm:$0xff] }
 0x813   : > { %13561 = vmatprep.subr.msk.bf16.mxu0 %vm13560_vm8, %v14140_v48  ;;  %vm5821_vm8 = vcmp.eq.s32.totalorder %v4149_v56, %v18645_v22  ;;  %vm12862_vm11 = vmpackc.low %vm5789_vm6, %vm5725_vm5  ;;  %v2775_v22 = vld [vmem:[#allocation2 + $0xe0] sm:$0xff]  ;;  %vm4576_vm5 = vcmp.eq.s32.totalorder %v2904_v7, %v18846_v19  ;;  %vm4640_vm6 = vcmp.eq.s32.totalorder %v2968_v43, %v18846_v19  ;;  %v3416_v56 = vld [vmem:[#allocation2 + $0x14e8] sm:$0xff] }
 0x814   : > { %vm13566_vm14 = vmpackc.low %vm5821_vm8, %vm5757_vm7  ;;  %vm4447_vm1 = vcmp.eq.s32.totalorder %v2775_v22, %v18883_v40  ;;  %vm4608_vm8 = vcmp.eq.s32.totalorder %v2936_v50, %v18857_v18  ;;  %vm4575_vm13 = vcmp.eq.s32.totalorder %v2903_v9, %v18883_v40  ;;  %v3383_v28 = vld [vmem:[#allocation2 + $0x13e0] sm:$0xff]  ;;  %v3544_v22 = vld [vmem:[#allocation2 + $0x18e8] sm:$0xff] }
 0x815   : > { %v3543_v7 = vld [vmem:[#allocation2 + $0x18e0] sm:$0xff] }
 0x816   : > { %v3607_v43 = vld [vmem:[#allocation2 + $0x1ae0] sm:$0xff] }
 0x817   : > { %v3575_v50 = vld [vmem:[#allocation2 + $0x19e0] sm:$0xff] }
 0x818   : > { %v3671_v9 = vld [vmem:[#allocation2 + $0x1ce0] sm:$0xff] }
 0x819   : > { %12859 = vmatpush1.bf16.xpose.msk.msra.mxu1 %vm18821_vm15, %v14140_v48  ;;  %vm12864_vm15 = vmpackc.low %vm4512_vm10, %vm4448_vm9  ;;  %vm4672_vm9 = vcmp.eq.s32.totalorder %v3000_v34, %v18857_v18  ;;  %v3639_v34 = vld [vmem:[#allocation2 + $0x1be0] sm:$0xff] }
 0x81a   : > { %13563 = vmatpush1.bf16.xpose.msk.msra.mxu0 %vm18829_vm2, %v14140_v48  ;;  %12861 = vmatprep.subr.msk.bf16.mxu1 %vm18833_vm3, %v14140_v48  ;;  %vm4511_vm2 = vcmp.eq.s32.totalorder %v2839_v59, %v18883_v40  ;;  %vm4479_vm3 = vcmp.eq.s32.totalorder %v2807_v27, %v18887_v58  ;;  %vm13572_vm12 = vmpackc.low %vm4672_vm9, %vm4608_vm8  ;;  %vm4703_vm9 = vcmp.eq.s32.totalorder %v3031_v5, %v18883_v40  ;;  %v3608_v59 = vld [vmem:[#allocation2 + $0x1ae8] sm:$0xff]  ;;  %v3831_v5 = vld [vmem:[#allocation2 + $0x21e0] sm:$0xff] }
 0x81b   : > { %13565 = vmatprep.subr.msk.bf16.mxu0 %vm18837_vm4, %v14140_v48  ;;  %vm4543_vm4 = vcmp.eq.s32.totalorder %v2871_v17, %v18887_v58  ;;  %vm12866_vm7 = vmpackc.low %vm4511_vm2, %vm4447_vm1  ;;  %vm4704_vm1 = vcmp.eq.s32.totalorder %v3032_v23, %v18846_v19  ;;  %vm4768_vm2 = vcmp.eq.s32.totalorder %v3096_v53, %v18846_v19  ;;  %v3576_v27 = vld [vmem:[#allocation2 + $0x19e8] sm:$0xff] }
 0x81c   : > { %vm13570_vm10 = vmpackc.low %vm4543_vm4, %vm4479_vm3  ;;  %vm4736_vm4 = vcmp.eq.s32.totalorder %v3064_v33, %v18857_v18  ;;  %v3640_v17 = vld [vmem:[#allocation2 + $0x1be8] sm:$0xff]  ;;  %v3799_v33 = vld [vmem:[#allocation2 + $0x20e0] sm:$0xff] }
 0x81d   : > { %v3832_v23 = vld [vmem:[#allocation2 + $0x21e8] sm:$0xff] }
 0x81e   : > { %v3896_v53 = vld [vmem:[#allocation2 + $0x23e8] sm:$0xff] }
 0x821   : > { %12863 = vmatpush1.bf16.xpose.msk.msra.mxu1 %vm12862_vm11, %v14140_v48  ;;  %vm12868_vm11 = vmpackc.low %vm4640_vm6, %vm4576_vm5  ;;  %vm4800_vm5 = vcmp.eq.s32.totalorder %v3128_v3, %v18857_v18  ;;  %v3863_v3 = vld [vmem:[#allocation2 + $0x22e0] sm:$0xff] }
 0x822   : > { %13567 = vmatpush1.bf16.xpose.msk.msra.mxu0 %vm13566_vm14, %v14140_v48  ;;  %12865 = vmatprep.subr.msk.bf16.mxu1 %vm12864_vm15, %v14140_v48  ;;  %vm4639_vm14 = vcmp.eq.s32.totalorder %v2967_v1, %v18883_v40  ;;  %vm4607_vm15 = vcmp.eq.s32.totalorder %v2935_v14, %v18887_v58  ;;  %vm13576_vm8 = vmpackc.low %vm4800_vm5, %vm4736_vm4  ;;  %vm4831_vm5 = vcmp.eq.s32.totalorder %v3159_v41, %v18883_v40  ;;  %v3735_v1 = vld [vmem:[#allocation2 + $0x1ee0] sm:$0xff] }
 0x823   : > { %13569 = vmatprep.subr.msk.bf16.mxu0 %vm13568_vm0, %v14140_v48  ;;  %vm4671_vm0 = vcmp.eq.s32.totalorder %v2999_v54, %v18887_v58  ;;  %vm12870_vm3 = vmpackc.low %vm4639_vm14, %vm4575_vm13  ;;  %vm4832_vm13 = vcmp.eq.s32.totalorder %v3160_v24, %v18846_v19  ;;  %vm4896_vm14 = vcmp.eq.s32.totalorder %v3224_v4, %v18846_v19  ;;  %v3767_v14 = vld [vmem:[#allocation2 + $0x1fe0] sm:$0xff]  ;;  %v3800_v54 = vld [vmem:[#allocation2 + $0x20e8] sm:$0xff] }
 0x824   : > { %vm13574_vm6 = vmpackc.low %vm4671_vm0, %vm4607_vm15  ;;  %vm4864_vm0 = vcmp.eq.s32.totalorder %v3192_v35, %v18857_v18  ;;  %v3960_v24 = vld [vmem:[#allocation2 + $0x25e8] sm:$0xff]  ;;  %v3927_v35 = vld [vmem:[#allocation2 + $0x24e0] sm:$0xff] }
 0x825   : > { %v4024_v4 = vld [vmem:[#allocation2 + $0x27e8] sm:$0xff]  ;;  %v3959_v41 = vld [vmem:[#allocation2 + $0x25e0] sm:$0xff] }
 0x828   : > { %9914 = vmatmul.mubr.bf16.vlgmr.msra.gmra.mrb[0].mxu1 %v2709_v45  ;;  %v3736_v45 = vld [vmem:[#allocation2 + $0x1ee8] sm:$0xff] }
 0x829   : > { %12867 = vmatpush1.bf16.xpose.msk.msra.mxu1 %vm12866_vm7, %v14140_v48  ;;  %10570 = vmatmul.mubr.bf16.vlgmr.msra.gmra.mrb[0].mxu0 %v2741_v42  ;;  %vm12872_vm7 = vmpackc.low %vm4768_vm2, %vm4704_vm1  ;;  %vm4928_vm1 = vcmp.eq.s32.totalorder %v3256_v21, %v18857_v18  ;;  %v3768_v42 = vld [vmem:[#allocation2 + $0x1fe8] sm:$0xff]  ;;  %v3991_v21 = vld [vmem:[#allocation2 + $0x26e0] sm:$0xff] }
 0x82a   : > { %13571 = vmatpush1.bf16.xpose.msk.msra.mxu0 %vm13570_vm10, %v14140_v48  ;;  %12869 = vmatprep.subr.msk.bf16.mxu1 %vm12868_vm11, %v14140_v48  ;;  %vm4767_vm10 = vcmp.eq.s32.totalorder %v3095_v62, %v18883_v40  ;;  %vm4735_vm11 = vcmp.eq.s32.totalorder %v3063_v60, %v18887_v58  ;;  %vm13580_vm4 = vmpackc.low %vm4928_vm1, %vm4864_vm0  ;;  %vm4959_vm1 = vcmp.eq.s32.totalorder %v3287_v20, %v18883_v40  ;;  %v3895_v62 = vld [vmem:[#allocation2 + $0x23e0] sm:$0xff]  ;;  %v3928_v60 = vld [vmem:[#allocation2 + $0x24e8] sm:$0xff] }
 0x82b   : > { %13573 = vmatprep.subr.msk.bf16.mxu0 %vm13572_vm12, %v14140_v48  ;;  %9954 = vmatprep.mubr.bf16.mxu1 %v2712_v8  ;;  %vm4799_vm12 = vcmp.eq.s32.totalorder %v3127_v2, %v18887_v58  ;;  %vm12874_vm15 = vmpackc.low %vm4767_vm10, %vm4703_vm9  ;;  %vm4960_vm9 = vcmp.eq.s32.totalorder %v3288_v51, %v18846_v19  ;;  %vm5024_vm10 = vcmp.eq.s32.totalorder %v3352_v61, %v18846_v19  ;;  %v3703_v8 = vld [vmem:[#allocation2 + $0x1de0] sm:$0xff]  ;;  %v3992_v2 = vld [vmem:[#allocation2 + $0x26e8] sm:$0xff] }
 0x82c   : > { %10610 = vmatprep.mubr.bf16.mxu0 %v2744_v57  ;;  %vm13578_vm2 = vmpackc.low %vm4799_vm12, %vm4735_vm11  ;;  %vm4992_vm12 = vcmp.eq.s32.totalorder %v3320_v36, %v18857_v18  ;;  %v3864_v57 = vld [vmem:[#allocation2 + $0x22e8] sm:$0xff]  ;;  %v4055_v36 = vld [vmem:[#allocation2 + $0x28e0] sm:$0xff] }
 0x82d   : > { %v4088_v51 = vld [vmem:[#allocation2 + $0x29e8] sm:$0xff]  ;;  %v4087_v20 = vld [vmem:[#allocation2 + $0x29e0] sm:$0xff] }
 0x82e   : > { %v4152_v61 = vld [vmem:[#allocation2 + $0x2be8] sm:$0xff] }
 0x831   : > { %12871 = vmatpush1.bf16.xpose.msk.msra.mxu1 %vm12870_vm3, %v14140_v48  ;;  %vm12876_vm3 = vmpackc.low %vm4896_vm14, %vm4832_vm13  ;;  %vm5056_vm13 = vcmp.eq.s32.totalorder %v3384_v13, %v18857_v18  ;;  %v4119_v13 = vld [vmem:[#allocation2 + $0x2ae0] sm:$0xff] }
 0x832   : > { %13575 = vmatpush1.bf16.xpose.msk.msra.mxu0 %vm13574_vm6, %v14140_v48  ;;  %12873 = vmatprep.subr.msk.bf16.mxu1 %vm12872_vm7, %v14140_v48  ;;  %vm4895_vm6 = vcmp.eq.s32.totalorder %v3223_v37, %v18883_v40  ;;  %vm4863_vm7 = vcmp.eq.s32.totalorder %v3191_v30, %v18887_v58  ;;  %vm13584_vm0 = vmpackc.low %vm5056_vm13, %vm4992_vm12  ;;  %vm5087_vm13 = vcmp.eq.s32.totalorder %v3415_v0, %v18883_v40  ;;  %v4023_v37 = vld [vmem:[#allocation2 + $0x27e0] sm:$0xff]  ;;  %v4056_v30 = vld [vmem:[#allocation2 + $0x28e8] sm:$0xff] }
 0x833   : > { %13577 = vmatprep.subr.msk.bf16.mxu0 %vm13576_vm8, %v14140_v48  ;;  %vm4927_vm8 = vcmp.eq.s32.totalorder %v3255_v29, %v18887_v58  ;;  %vm12878_vm11 = vmpackc.low %vm4895_vm6, %vm4831_vm5  ;;  %vm5088_vm5 = vcmp.eq.s32.totalorder %v3416_v56, %v18846_v19  ;;  %vm5152_vm6 = vcmp.eq.s32.totalorder %v3480_v32, %v18846_v19  ;;  %v4120_v29 = vld [vmem:[#allocation2 + $0x2ae8] sm:$0xff]  ;;  %v19032_v56 = vrot.slane %v18853_v16, %v16289_v47  ;;  %v2874_v32 = vld [vmem:[#allocation2 + $0x3f8] sm:$0xff] }
 0x834   : > { %vm13582_vm14 = vmpackc.low %vm4927_vm8, %vm4863_vm7  ;;  %vm5120_vm8 = vcmp.eq.s32.totalorder %v3448_v11, %v18857_v18  ;;  %v2602_v11 = vcombine.high %v18877_v10, %v18877_v10  ;;  %v2809_v10 = vld [vmem:[#allocation2 + $0x1f0] sm:$0xff] }
 0x839   : > { %12875 = vmatpush1.bf16.xpose.msk.msra.mxu1 %vm12874_vm15, %v14140_v48  ;;  %vm12880_vm15 = vmpackc.low %vm5024_vm10, %vm4960_vm9  ;;  %vm5184_vm9 = vcmp.eq.s32.totalorder %v3512_v44, %v18857_v18  ;;  %v19055_v44 = vrot.slane %v18853_v16, %v16286_v46  ;;  %v3002_v16 = vld [vmem:[#allocation2 + $0x7f8] sm:$0xff] }
 0x83a   : > { %13579 = vmatpush1.bf16.xpose.msk.msra.mxu0 %vm13578_vm2, %v14140_v48  ;;  %12877 = vmatprep.subr.msk.bf16.mxu1 %vm12876_vm3, %v14140_v48  ;;  %vm5023_vm2 = vcmp.eq.s32.totalorder %v3351_v26, %v18883_v40  ;;  %vm4991_vm3 = vcmp.eq.s32.totalorder %v3319_v63, %v18887_v58  ;;  %vm13588_vm12 = vmpackc.low %vm5184_vm9, %vm5120_vm8  ;;  %vm5215_vm9 = vcmp.eq.s32.totalorder %v3543_v7, %v18883_v40  ;;  %v4151_v26 = vld [vmem:[#allocation2 + $0x2be0] sm:$0xff]  ;;  %v2905_v7 = vld [vmem:[#allocation2 + $0x4f0] sm:$0xff] }
 0x83b   : > { %13581 = vmatprep.subr.msk.bf16.mxu0 %vm13580_vm4, %v14140_v48  ;;  %vm5055_vm4 = vcmp.eq.s32.totalorder %v3383_v28, %v18887_v58  ;;  %vm12882_vm7 = vmpackc.low %vm5023_vm2, %vm4959_vm1  ;;  %vm5216_vm1 = vcmp.eq.s32.totalorder %v3544_v22, %v18846_v19  ;;  %vm5280_vm2 = vcmp.eq.s32.totalorder %v3608_v59, %v18846_v19  ;;  %v19027_v63 = vrot.slane %v18842_v39, %v16289_v47  ;;  %v2778_v28 = vld [vmem:[#allocation2 + $0xf8] sm:$0xff] }
 0x83c   : > { %vm13586_vm10 = vmpackc.low %vm5055_vm4, %vm4991_vm3  ;;  %vm5248_vm4 = vcmp.eq.s32.totalorder %v3576_v27, %v18857_v18  ;;  %v2466_v47 = vcombine.high %v18873_v49, %v18873_v49  ;;  %v2841_v49 = vld [vmem:[#allocation2 + $0x2f0] sm:$0xff]  ;;  %v2711_v59 = vpack.c.bf16 %v18891_v6, %v18891_v6 }
 0x83e   : > { %v19058_v0 = vrot.slane %v2466_v47, %v16005_v25  ;;  %v3545_v47 = vld [vmem:[#allocation2 + $0x18f0] sm:$0xff] }
 0x840   : > { %v2482_v22 = vcombine.high %v19058_v0, %v19058_v0 }
 0x841   : > { %12879 = vmatpush1.bf16.xpose.msk.msra.mxu1 %vm12878_vm11, %v14140_v48  ;;  %vm12884_vm11 = vmpackc.low %vm5152_vm6, %vm5088_vm5  ;;  %vm5312_vm5 = vcmp.eq.s32.totalorder %v3640_v17, %v18857_v18  ;;  %v2743_v17 = vpack.c.bf16 %v18895_v52, %v18895_v52  ;;  %v3066_v52 = vld [vmem:[#allocation2 + $0x9f8] sm:$0xff] }
 0x842   : > { %13583 = vmatpush1.bf16.xpose.msk.msra.mxu0 %vm13582_vm14, %v14140_v48  ;;  %12881 = vmatprep.subr.msk.bf16.mxu1 %vm12880_vm15, %v14140_v48  ;;  %vm5151_vm14 = vcmp.eq.s32.totalorder %v3479_v12, %v18883_v40  ;;  %vm5119_vm15 = vcmp.eq.s32.totalorder %v3447_v55, %v18887_v58  ;;  %vm13592_vm8 = vmpackc.low %vm5312_vm5, %vm5248_vm4  ;;  %vm5343_vm5 = vcmp.eq.s32.totalorder %v3671_v9, %v18883_v40  ;;  %v2873_v12 = vld [vmem:[#allocation2 + $0x3f0] sm:$0xff] }
 0x843   : > { %13585 = vmatprep.subr.msk.bf16.mxu0 %vm13584_vm0, %v14140_v48  ;;  %vm5183_vm0 = vcmp.eq.s32.totalorder %v3511_v15, %v18887_v58  ;;  %vm12886_vm3 = vmpackc.low %vm5151_vm14, %vm5087_vm13  ;;  %vm5344_vm13 = vcmp.eq.s32.totalorder %v3672_v31, %v18846_v19  ;;  %vm5408_vm14 = vcmp.eq.s32.totalorder %v3736_v45, %v18846_v19  ;;  %v19061_v55 = vrot.slane %v2602_v11, %v16005_v25  ;;  %v2970_v15 = vld [vmem:[#allocation2 + $0x6f8] sm:$0xff]  ;;  %v3033_v9 = vld [vmem:[#allocation2 + $0x8f0] sm:$0xff] }
 0x844   : > { %vm13590_vm6 = vmpackc.low %vm5183_vm0, %vm5119_vm15  ;;  %vm5376_vm0 = vcmp.eq.s32.totalorder %v3704_v38, %v18857_v18  ;;  %v2714_v6 = vpack.c.bf16 %v2482_v22, %v2482_v22  ;;  %v3034_v45 = vld [vmem:[#allocation2 + $0x8f8] sm:$0xff]  ;;  %v3609_v11 = vld [vmem:[#allocation2 + $0x1af0] sm:$0xff] }
 0x845   : > { %v2618_v27 = vcombine.high %v19061_v55, %v19061_v55  ;;  %v3098_v38 = vld [vmem:[#allocation2 + $0xaf8] sm:$0xff]  ;;  %v3705_v22 = vld [vmem:[#allocation2 + $0x1df0] sm:$0xff] }
 0x847   : > { %v2746_v31 = vpack.c.bf16 %v2618_v27, %v2618_v27  ;;  %v3802_v27 = vld [vmem:[#allocation2 + $0x20f8] sm:$0xff] }
 0x849   : > { %12883 = vmatpush1.bf16.xpose.msk.msra.mxu1 %vm12882_vm7, %v14140_v48  ;;  %vm12888_vm7 = vmpackc.low %vm5280_vm2, %vm5216_vm1  ;;  %vm5440_vm1 = vcmp.eq.s32.totalorder %v3768_v42, %v18857_v18  ;;  %v3130_v42 = vld [vmem:[#allocation2 + $0xbf8] sm:$0xff] }
 0x84a   : > { %13587 = vmatpush1.bf16.xpose.msk.msra.mxu0 %vm13586_vm10, %v14140_v48  ;;  %12885 = vmatprep.subr.msk.bf16.mxu1 %vm12884_vm11, %v14140_v48  ;;  %vm5279_vm10 = vcmp.eq.s32.totalorder %v3607_v43, %v18883_v40  ;;  %vm5247_vm11 = vcmp.eq.s32.totalorder %v3575_v50, %v18887_v58  ;;  %vm13596_vm4 = vmpackc.low %vm5440_vm1, %vm5376_vm0  ;;  %vm5471_vm1 = vcmp.eq.s32.totalorder %v3799_v33, %v18883_v40  ;;  %v2969_v43 = vld [vmem:[#allocation2 + $0x6f0] sm:$0xff] }
 0x84b   : > { %13589 = vmatprep.subr.msk.bf16.mxu0 %vm13588_vm12, %v14140_v48  ;;  %vm5311_vm12 = vcmp.eq.s32.totalorder %v3639_v34, %v18887_v58  ;;  %vm12890_vm15 = vmpackc.low %vm5279_vm10, %vm5215_vm9  ;;  %vm5472_vm9 = vcmp.eq.s32.totalorder %v3800_v54, %v18846_v19  ;;  %vm5536_vm10 = vcmp.eq.s32.totalorder %v3864_v57, %v18846_v19  ;;  %v2937_v50 = vld [vmem:[#allocation2 + $0x5f0] sm:$0xff]  ;;  %v3162_v54 = vld [vmem:[#allocation2 + $0xcf8] sm:$0xff] }
 0x84c   : > { %vm13594_vm2 = vmpackc.low %vm5311_vm12, %vm5247_vm11  ;;  %vm5504_vm12 = vcmp.eq.s32.totalorder %v3832_v23, %v18857_v18  ;;  %v3001_v34 = vld [vmem:[#allocation2 + $0x7f0] sm:$0xff]  ;;  %v3226_v57 = vld [vmem:[#allocation2 + $0xef8] sm:$0xff] }
 0x84d   : > { %v3194_v23 = vld [vmem:[#allocation2 + $0xdf8] sm:$0xff]  ;;  %v3161_v33 = vld [vmem:[#allocation2 + $0xcf0] sm:$0xff] }
 0x851   : > { %12887 = vmatpush1.bf16.xpose.msk.msra.mxu1 %vm12886_vm3, %v14140_v48  ;;  %vm12892_vm3 = vmpackc.low %vm5408_vm14, %vm5344_vm13  ;;  %vm5568_vm13 = vcmp.eq.s32.totalorder %v3896_v53, %v18857_v18  ;;  %v3258_v53 = vld [vmem:[#allocation2 + $0xff8] sm:$0xff] }
 0x852   : > { %13591 = vmatpush1.bf16.xpose.msk.msra.mxu0 %vm13590_vm6, %v14140_v48  ;;  %12889 = vmatprep.subr.msk.bf16.mxu1 %vm12888_vm7, %v14140_v48  ;;  %vm5407_vm6 = vcmp.eq.s32.totalorder %v3735_v1, %v18883_v40  ;;  %vm5375_vm7 = vcmp.eq.s32.totalorder %v3703_v8, %v18887_v58  ;;  %vm13600_vm0 = vmpackc.low %vm5568_vm13, %vm5504_vm12  ;;  %vm5599_vm13 = vcmp.eq.s32.totalorder %v3927_v35, %v18883_v40  ;;  %v3097_v1 = vld [vmem:[#allocation2 + $0xaf0] sm:$0xff] }
 0x853   : > { %13593 = vmatprep.subr.msk.bf16.mxu0 %vm13592_vm8, %v14140_v48  ;;  %vm5439_vm8 = vcmp.eq.s32.totalorder %v3767_v14, %v18887_v58  ;;  %vm12894_vm11 = vmpackc.low %vm5407_vm6, %vm5343_vm5  ;;  %vm5600_vm5 = vcmp.eq.s32.totalorder %v3928_v60, %v18846_v19  ;;  %vm5664_vm6 = vcmp.eq.s32.totalorder %v3992_v2, %v18846_v19  ;;  %v3065_v8 = vld [vmem:[#allocation2 + $0x9f0] sm:$0xff]  ;;  %v3290_v60 = vld [vmem:[#allocation2 + $0x10f8] sm:$0xff] }
 0x854   : > { %vm13598_vm14 = vmpackc.low %vm5439_vm8, %vm5375_vm7  ;;  %vm5632_vm8 = vcmp.eq.s32.totalorder %v3960_v24, %v18857_v18  ;;  %v3129_v14 = vld [vmem:[#allocation2 + $0xbf0] sm:$0xff]  ;;  %v3354_v2 = vld [vmem:[#allocation2 + $0x12f8] sm:$0xff] }
 0x855   : > { %v3322_v24 = vld [vmem:[#allocation2 + $0x11f8] sm:$0xff]  ;;  %v3289_v35 = vld [vmem:[#allocation2 + $0x10f0] sm:$0xff] }
 0x859   : > { %12891 = vmatpush1.bf16.xpose.msk.msra.mxu1 %vm12890_vm15, %v14140_v48  ;;  %vm12896_vm15 = vmpackc.low %vm5536_vm10, %vm5472_vm9  ;;  %vm5696_vm9 = vcmp.eq.s32.totalorder %v4024_v4, %v18857_v18  ;;  %v3386_v4 = vld [vmem:[#allocation2 + $0x13f8] sm:$0xff] }
 0x85a   : > { %13595 = vmatpush1.bf16.xpose.msk.msra.mxu0 %vm13594_vm2, %v14140_v48  ;;  %12893 = vmatprep.subr.msk.bf16.mxu1 %vm12892_vm3, %v14140_v48  ;;  %vm5535_vm2 = vcmp.eq.s32.totalorder %v3863_v3, %v18883_v40  ;;  %vm5503_vm3 = vcmp.eq.s32.totalorder %v3831_v5, %v18887_v58  ;;  %vm13604_vm12 = vmpackc.low %vm5696_vm9, %vm5632_vm8  ;;  %vm5727_vm9 = vcmp.eq.s32.totalorder %v4055_v36, %v18883_v40  ;;  %v3225_v3 = vld [vmem:[#allocation2 + $0xef0] sm:$0xff] }
 0x85b   : > { %13597 = vmatprep.subr.msk.bf16.mxu0 %vm13596_vm4, %v14140_v48  ;;  %vm5567_vm4 = vcmp.eq.s32.totalorder %v3895_v62, %v18887_v58  ;;  %vm12898_vm7 = vmpackc.low %vm5535_vm2, %vm5471_vm1  ;;  %vm5728_vm1 = vcmp.eq.s32.totalorder %v4056_v30, %v18846_v19  ;;  %vm5792_vm2 = vcmp.eq.s32.totalorder %v4120_v29, %v18846_v19  ;;  %v2842_v19 = vld [vmem:[#allocation2 + $0x2f8] sm:$0xff]  ;;  %v3193_v5 = vld [vmem:[#allocation2 + $0xdf0] sm:$0xff] }
 0x85c   : > { %vm13602_vm10 = vmpackc.low %vm5567_vm4, %vm5503_vm3  ;;  %vm5760_vm4 = vcmp.eq.s32.totalorder %v4088_v51, %v18857_v18  ;;  %v3257_v62 = vld [vmem:[#allocation2 + $0xff0] sm:$0xff]  ;;  %v3418_v30 = vld [vmem:[#allocation2 + $0x14f8] sm:$0xff] }
 0x85d   : > { %v3482_v29 = vld [vmem:[#allocation2 + $0x16f8] sm:$0xff]  ;;  %v3417_v36 = vld [vmem:[#allocation2 + $0x14f0] sm:$0xff] }
 0x85e   : > { %v3450_v51 = vld [vmem:[#allocation2 + $0x15f8] sm:$0xff] }
 0x861   : > { %12895 = vmatpush1.bf16.xpose.msk.msra.mxu1 %vm12894_vm11, %v14140_v48  ;;  %vm12900_vm11 = vmpackc.low %vm5664_vm6, %vm5600_vm5  ;;  %vm5824_vm5 = vcmp.eq.s32.totalorder %v4152_v61, %v18857_v18  ;;  %v2810_v18 = vld [vmem:[#allocation2 + $0x1f8] sm:$0xff] }
 0x862   : > { %13599 = vmatpush1.bf16.xpose.msk.msra.mxu0 %vm13598_vm14, %v14140_v48  ;;  %12897 = vmatprep.subr.msk.bf16.mxu1 %vm12896_vm15, %v14140_v48  ;;  %vm5663_vm14 = vcmp.eq.s32.totalorder %v3991_v21, %v18883_v40  ;;  %vm5631_vm15 = vcmp.eq.s32.totalorder %v3959_v41, %v18887_v58  ;;  %vm13608_vm8 = vmpackc.low %vm5824_vm5, %vm5760_vm4  ;;  %v3353_v21 = vld [vmem:[#allocation2 + $0x12f0] sm:$0xff]  ;;  %v3514_v61 = vld [vmem:[#allocation2 + $0x17f8] sm:$0xff] }
 0x863   : > { %13601 = vmatprep.subr.msk.bf16.mxu0 %vm13600_vm0, %v14140_v48  ;;  %vm5695_vm0 = vcmp.eq.s32.totalorder %v4023_v37, %v18887_v58  ;;  %vm12902_vm3 = vmpackc.low %vm5663_vm14, %vm5599_vm13  ;;  %vm4450_vm13 = vcmp.eq.s32.totalorder %v2778_v28, %v19027_v63  ;;  %vm4514_vm14 = vcmp.eq.s32.totalorder %v2842_v19, %v19027_v63  ;;  %v3321_v41 = vld [vmem:[#allocation2 + $0x11f0] sm:$0xff]  ;;  %v3546_v28 = vld [vmem:[#allocation2 + $0x18f8] sm:$0xff] }
 0x864   : > { %vm13606_vm6 = vmpackc.low %vm5695_vm0, %vm5631_vm15  ;;  %vm4482_vm0 = vcmp.eq.s32.totalorder %v2810_v18, %v19032_v56  ;;  %v3385_v37 = vld [vmem:[#allocation2 + $0x13f0] sm:$0xff]  ;;  %v3610_v19 = vld [vmem:[#allocation2 + $0x1af8] sm:$0xff] }
 0x865   : > { %v3578_v18 = vld [vmem:[#allocation2 + $0x19f8] sm:$0xff] }
 0x869   : > { %12899 = vmatpush1.bf16.xpose.msk.msra.mxu1 %vm12898_vm7, %v14140_v48  ;;  %vm12904_vm7 = vmpackc.low %vm5792_vm2, %vm5728_vm1  ;;  %vm4546_vm1 = vcmp.eq.s32.totalorder %v2874_v32, %v19032_v56  ;;  %v3642_v32 = vld [vmem:[#allocation2 + $0x1bf8] sm:$0xff] }
 0x86a   : > { %13603 = vmatpush1.bf16.xpose.msk.msra.mxu0 %vm13602_vm10, %v14140_v48  ;;  %12901 = vmatprep.subr.msk.bf16.mxu1 %vm12900_vm11, %v14140_v48  ;;  %vm5791_vm10 = vcmp.eq.s32.totalorder %v4119_v13, %v18883_v40  ;;  %vm5759_vm11 = vcmp.eq.s32.totalorder %v4087_v20, %v18887_v58  ;;  %v19051_v40 = vrot.slane %v18842_v39, %v16286_v46  ;;  %vm13612_vm4 = vmpackc.low %vm4546_vm1, %vm4482_vm0  ;;  %v2906_v39 = vld [vmem:[#allocation2 + $0x4f8] sm:$0xff]  ;;  %v3481_v13 = vld [vmem:[#allocation2 + $0x16f0] sm:$0xff] }
 0x86b   : > { %13605 = vmatprep.subr.msk.bf16.mxu0 %vm13604_vm12, %v14140_v48  ;;  %vm5823_vm12 = vcmp.eq.s32.totalorder %v4151_v26, %v18887_v58  ;;  %vm12906_vm15 = vmpackc.low %vm5791_vm10, %vm5727_vm9  ;;  %v2777_v58 = vld [vmem:[#allocation2 + $0xf0] sm:$0xff]  ;;  %v2938_v46 = vld [vmem:[#allocation2 + $0x5f8] sm:$0xff]  ;;  %vm4578_vm9 = vcmp.eq.s32.totalorder %v2906_v39, %v19027_v63  ;;  %vm4642_vm10 = vcmp.eq.s32.totalorder %v2970_v15, %v19027_v63 }
 0x86c   : > { %vm13610_vm2 = vmpackc.low %vm5823_vm12, %vm5759_vm11  ;;  %vm4449_vm5 = vcmp.eq.s32.totalorder %v2777_v58, %v19051_v40  ;;  %vm4610_vm12 = vcmp.eq.s32.totalorder %v2938_v46, %v19032_v56  ;;  %vm4577_vm1 = vcmp.eq.s32.totalorder %v2905_v7, %v19051_v40  ;;  %v3449_v20 = vld [vmem:[#allocation2 + $0x15f0] sm:$0xff]  ;;  %v3706_v39 = vld [vmem:[#allocation2 + $0x1df8] sm:$0xff] }
 0x86d   : > { %v3513_v26 = vld [vmem:[#allocation2 + $0x17f0] sm:$0xff]  ;;  %v3770_v15 = vld [vmem:[#allocation2 + $0x1ff8] sm:$0xff] }
 0x86e   : > { %v3577_v58 = vld [vmem:[#allocation2 + $0x19f0] sm:$0xff]  ;;  %v3834_v7 = vld [vmem:[#allocation2 + $0x21f8] sm:$0xff] }
 0x86f   : > { %v3673_v46 = vld [vmem:[#allocation2 + $0x1cf0] sm:$0xff] }
 0x871   : > { %12903 = vmatpush1.bf16.xpose.msk.msra.mxu1 %vm12902_vm3, %v14140_v48  ;;  %vm12908_vm3 = vmpackc.low %vm4514_vm14, %vm4450_vm13  ;;  %vm4674_vm13 = vcmp.eq.s32.totalorder %v3002_v16, %v19032_v56  ;;  %v3737_v16 = vld [vmem:[#allocation2 + $0x1ef0] sm:$0xff] }
 0x872   : > { %13607 = vmatpush1.bf16.xpose.msk.msra.mxu0 %vm13606_vm6, %v14140_v48  ;;  %12905 = vmatprep.subr.msk.bf16.mxu1 %vm12904_vm7, %v14140_v48  ;;  %vm4513_vm6 = vcmp.eq.s32.totalorder %v2841_v49, %v19051_v40  ;;  %vm4481_vm7 = vcmp.eq.s32.totalorder %v2809_v10, %v19055_v44  ;;  %vm13616_vm0 = vmpackc.low %vm4674_vm13, %vm4610_vm12  ;;  %vm4705_vm13 = vcmp.eq.s32.totalorder %v3033_v9, %v19051_v40  ;;  %v3641_v49 = vld [vmem:[#allocation2 + $0x1bf0] sm:$0xff]  ;;  %v3674_v10 = vld [vmem:[#allocation2 + $0x1cf8] sm:$0xff] }
 0x873   : > { %13609 = vmatprep.subr.msk.bf16.mxu0 %vm13608_vm8, %v14140_v48  ;;  %vm4545_vm8 = vcmp.eq.s32.totalorder %v2873_v12, %v19055_v44  ;;  %vm12910_vm11 = vmpackc.low %vm4513_vm6, %vm4449_vm5  ;;  %vm4706_vm5 = vcmp.eq.s32.totalorder %v3034_v45, %v19027_v63  ;;  %vm4770_vm6 = vcmp.eq.s32.totalorder %v3098_v38, %v19027_v63  ;;  %v3738_v12 = vld [vmem:[#allocation2 + $0x1ef8] sm:$0xff]  ;;  %v3929_v9 = vld [vmem:[#allocation2 + $0x24f0] sm:$0xff] }
 0x874   : > { %vm13614_vm14 = vmpackc.low %vm4545_vm8, %vm4481_vm7  ;;  %vm4738_vm8 = vcmp.eq.s32.totalorder %v3066_v52, %v19032_v56  ;;  %v3930_v45 = vld [vmem:[#allocation2 + $0x24f8] sm:$0xff] }
 0x875   : > { %v3994_v38 = vld [vmem:[#allocation2 + $0x26f8] sm:$0xff] }
 0x876   : > { %v3962_v52 = vld [vmem:[#allocation2 + $0x25f8] sm:$0xff] }
 0x879   : > { %12907 = vmatpush1.bf16.xpose.msk.msra.mxu1 %vm12906_vm15, %v14140_v48  ;;  %vm12912_vm15 = vmpackc.low %vm4642_vm10, %vm4578_vm9  ;;  %vm4802_vm9 = vcmp.eq.s32.totalorder %v3130_v42, %v19032_v56  ;;  %v4026_v42 = vld [vmem:[#allocation2 + $0x27f8] sm:$0xff] }
 0x87a   : > { %13611 = vmatpush1.bf16.xpose.msk.msra.mxu0 %vm13610_vm2, %v14140_v48  ;;  %12909 = vmatprep.subr.msk.bf16.mxu1 %vm12908_vm3, %v14140_v48  ;;  %vm4641_vm2 = vcmp.eq.s32.totalorder %v2969_v43, %v19051_v40  ;;  %vm4609_vm3 = vcmp.eq.s32.totalorder %v2937_v50, %v19055_v44  ;;  %vm13620_vm12 = vmpackc.low %vm4802_vm9, %vm4738_vm8  ;;  %vm4833_vm9 = vcmp.eq.s32.totalorder %v3161_v33, %v19051_v40  ;;  %v3898_v43 = vld [vmem:[#allocation2 + $0x23f8] sm:$0xff]  ;;  %v3865_v50 = vld [vmem:[#allocation2 + $0x22f0] sm:$0xff] }
 0x87b   : > { %13613 = vmatprep.subr.msk.bf16.mxu0 %vm13612_vm4, %v14140_v48  ;;  %vm4673_vm4 = vcmp.eq.s32.totalorder %v3001_v34, %v19055_v44  ;;  %vm12914_vm7 = vmpackc.low %vm4641_vm2, %vm4577_vm1  ;;  %vm4834_vm1 = vcmp.eq.s32.totalorder %v3162_v54, %v19027_v63  ;;  %vm4898_vm2 = vcmp.eq.s32.totalorder %v3226_v57, %v19027_v63  ;;  %v3833_v34 = vld [vmem:[#allocation2 + $0x21f0] sm:$0xff]  ;;  %v4058_v54 = vld [vmem:[#allocation2 + $0x28f8] sm:$0xff] }
 0x87c   : > { %vm13618_vm10 = vmpackc.low %vm4673_vm4, %vm4609_vm3  ;;  %vm4866_vm4 = vcmp.eq.s32.totalorder %v3194_v23, %v19032_v56  ;;  %v4122_v57 = vld [vmem:[#allocation2 + $0x2af8] sm:$0xff]  ;;  %v4057_v33 = vld [vmem:[#allocation2 + $0x28f0] sm:$0xff] }
 0x87d   : > { %v4090_v23 = vld [vmem:[#allocation2 + $0x29f8] sm:$0xff] }
 0x880   : > { %9955 = vmatmul.mubr.bf16.vlgmr.msra.gmra.mrb[0].mxu1 %v2711_v59  ;;  %v3769_v59 = vld [vmem:[#allocation2 + $0x1ff0] sm:$0xff] }
 0x881   : > { %12911 = vmatpush1.bf16.xpose.msk.msra.mxu1 %vm12910_vm11, %v14140_v48  ;;  %10611 = vmatmul.mubr.bf16.vlgmr.msra.gmra.mrb[0].mxu0 %v2743_v17  ;;  %vm12916_vm11 = vmpackc.low %vm4770_vm6, %vm4706_vm5  ;;  %vm4930_vm5 = vcmp.eq.s32.totalorder %v3258_v53, %v19032_v56  ;;  %v3866_v17 = vld [vmem:[#allocation2 + $0x22f8] sm:$0xff] }
 0x882   : > { %13615 = vmatpush1.bf16.xpose.msk.msra.mxu0 %vm13614_vm14, %v14140_v48  ;;  %12913 = vmatprep.subr.msk.bf16.mxu1 %vm12912_vm15, %v14140_v48  ;;  %vm4769_vm14 = vcmp.eq.s32.totalorder %v3097_v1, %v19051_v40  ;;  %vm4737_vm15 = vcmp.eq.s32.totalorder %v3065_v8, %v19055_v44  ;;  %vm13624_vm8 = vmpackc.low %vm4930_vm5, %vm4866_vm4  ;;  %vm4961_vm5 = vcmp.eq.s32.totalorder %v3289_v35, %v19051_v40  ;;  %v3993_v1 = vld [vmem:[#allocation2 + $0x26f0] sm:$0xff]  ;;  %v4154_v53 = vld [vmem:[#allocation2 + $0x2bf8] sm:$0xff] }
 0x883   : > { %13617 = vmatprep.subr.msk.bf16.mxu0 %vm13616_vm0, %v14140_v48  ;;  %9995 = vmatprep.mubr.bf16.mxu1 %v2714_v6  ;;  %vm4801_vm0 = vcmp.eq.s32.totalorder %v3129_v14, %v19055_v44  ;;  %vm12918_vm3 = vmpackc.low %vm4769_vm14, %vm4705_vm13  ;;  %vm4962_vm13 = vcmp.eq.s32.totalorder %v3290_v60, %v19027_v63  ;;  %vm5026_vm14 = vcmp.eq.s32.totalorder %v3354_v2, %v19027_v63  ;;  %v3801_v6 = vld [vmem:[#allocation2 + $0x20f0] sm:$0xff] }
 0x884   : > { %10651 = vmatprep.mubr.bf16.mxu0 %v2746_v31  ;;  %vm13622_vm6 = vmpackc.low %vm4801_vm0, %vm4737_vm15  ;;  %vm4994_vm0 = vcmp.eq.s32.totalorder %v3322_v24, %v19032_v56  ;;  %v3897_v31 = vld [vmem:[#allocation2 + $0x23f0] sm:$0xff] }
 0x885   : > { %v3961_v8 = vld [vmem:[#allocation2 + $0x25f0] sm:$0xff] }
 0x886   : > { %v4025_v14 = vld [vmem:[#allocation2 + $0x27f0] sm:$0xff] }
 0x889   : > { %12915 = vmatpush1.bf16.xpose.msk.msra.mxu1 %vm12914_vm7, %v14140_v48  ;;  %vm12920_vm7 = vmpackc.low %vm4898_vm2, %vm4834_vm1  ;;  %vm5058_vm1 = vcmp.eq.s32.totalorder %v3386_v4, %v19032_v56 }
 0x88a   : > { %13619 = vmatpush1.bf16.xpose.msk.msra.mxu0 %vm13618_vm10, %v14140_v48  ;;  %12917 = vmatprep.subr.msk.bf16.mxu1 %vm12916_vm11, %v14140_v48  ;;  %vm4897_vm10 = vcmp.eq.s32.totalorder %v3225_v3, %v19051_v40  ;;  %vm4865_vm11 = vcmp.eq.s32.totalorder %v3193_v5, %v19055_v44  ;;  %vm13628_vm4 = vmpackc.low %vm5058_vm1, %vm4994_vm0  ;;  %vm5089_vm1 = vcmp.eq.s32.totalorder %v3417_v36, %v19051_v40  ;;  %v4121_v3 = vld [vmem:[#allocation2 + $0x2af0] sm:$0xff] }
 0x88b   : > { %13621 = vmatprep.subr.msk.bf16.mxu0 %vm13620_vm12, %v14140_v48  ;;  %vm4929_vm12 = vcmp.eq.s32.totalorder %v3257_v62, %v19055_v44  ;;  %vm12922_vm15 = vmpackc.low %vm4897_vm10, %vm4833_vm9  ;;  %vm5090_vm9 = vcmp.eq.s32.totalorder %v3418_v30, %v19027_v63  ;;  %vm5154_vm10 = vcmp.eq.s32.totalorder %v3482_v29, %v19027_v63  ;;  %v4089_v5 = vld [vmem:[#allocation2 + $0x29f0] sm:$0xff] }
 0x88c   : > { %vm13626_vm2 = vmpackc.low %vm4929_vm12, %vm4865_vm11  ;;  %vm5122_vm12 = vcmp.eq.s32.totalorder %v3450_v51, %v19032_v56  ;;  %v4153_v62 = vld [vmem:[#allocation2 + $0x2bf0] sm:$0xff] }
 0x891   : > { %12919 = vmatpush1.bf16.xpose.msk.msra.mxu1 %vm12918_vm3, %v14140_v48  ;;  %vm12924_vm3 = vmpackc.low %vm5026_vm14, %vm4962_vm13  ;;  %vm5186_vm13 = vcmp.eq.s32.totalorder %v3514_v61, %v19032_v56 }
 0x892   : > { %13623 = vmatpush1.bf16.xpose.msk.msra.mxu0 %vm13622_vm6, %v14140_v48  ;;  %12921 = vmatprep.subr.msk.bf16.mxu1 %vm12920_vm7, %v14140_v48  ;;  %vm5025_vm6 = vcmp.eq.s32.totalorder %v3353_v21, %v19051_v40  ;;  %vm4993_vm7 = vcmp.eq.s32.totalorder %v3321_v41, %v19055_v44  ;;  %vm13632_vm0 = vmpackc.low %vm5186_vm13, %vm5122_vm12  ;;  %vm5217_vm13 = vcmp.eq.s32.totalorder %v3545_v47, %v19051_v40 }
 0x893   : > { %13625 = vmatprep.subr.msk.bf16.mxu0 %vm13624_vm8, %v14140_v48  ;;  %vm5057_vm8 = vcmp.eq.s32.totalorder %v3385_v37, %v19055_v44  ;;  %vm12926_vm11 = vmpackc.low %vm5025_vm6, %vm4961_vm5  ;;  %vm5218_vm5 = vcmp.eq.s32.totalorder %v3546_v28, %v19027_v63  ;;  %vm5282_vm6 = vcmp.eq.s32.totalorder %v3610_v19, %v19027_v63 }
 0x894   : > { %vm13630_vm14 = vmpackc.low %vm5057_vm8, %vm4993_vm7  ;;  %vm5250_vm8 = vcmp.eq.s32.totalorder %v3578_v18, %v19032_v56 }
 0x899   : > { %12923 = vmatpush1.bf16.xpose.msk.msra.mxu1 %vm12922_vm15, %v14140_v48  ;;  %vm12928_vm15 = vmpackc.low %vm5154_vm10, %vm5090_vm9  ;;  %vm5314_vm9 = vcmp.eq.s32.totalorder %v3642_v32, %v19032_v56 }
 0x89a   : > { %13627 = vmatpush1.bf16.xpose.msk.msra.mxu0 %vm13626_vm2, %v14140_v48  ;;  %12925 = vmatprep.subr.msk.bf16.mxu1 %vm12924_vm3, %v14140_v48  ;;  %vm5153_vm2 = vcmp.eq.s32.totalorder %v3481_v13, %v19051_v40  ;;  %vm5121_vm3 = vcmp.eq.s32.totalorder %v3449_v20, %v19055_v44  ;;  %vm13636_vm12 = vmpackc.low %vm5314_vm9, %vm5250_vm8  ;;  %vm5345_vm9 = vcmp.eq.s32.totalorder %v3673_v46, %v19051_v40 }
 0x89b   : > { %13629 = vmatprep.subr.msk.bf16.mxu0 %vm13628_vm4, %v14140_v48  ;;  %vm5185_vm4 = vcmp.eq.s32.totalorder %v3513_v26, %v19055_v44  ;;  %vm12930_vm7 = vmpackc.low %vm5153_vm2, %vm5089_vm1  ;;  %vm5346_vm1 = vcmp.eq.s32.totalorder %v3674_v10, %v19027_v63  ;;  %vm5410_vm2 = vcmp.eq.s32.totalorder %v3738_v12, %v19027_v63 }
 0x89c   : > { %vm13634_vm10 = vmpackc.low %vm5185_vm4, %vm5121_vm3  ;;  %vm5378_vm4 = vcmp.eq.s32.totalorder %v3706_v39, %v19032_v56 }
 0x8a1   : > { %12927 = vmatpush1.bf16.xpose.msk.msra.mxu1 %vm12926_vm11, %v14140_v48  ;;  %vm12932_vm11 = vmpackc.low %vm5282_vm6, %vm5218_vm5  ;;  %vm5442_vm5 = vcmp.eq.s32.totalorder %v3770_v15, %v19032_v56 }
 0x8a2   : > { %13631 = vmatpush1.bf16.xpose.msk.msra.mxu0 %vm13630_vm14, %v14140_v48  ;;  %12929 = vmatprep.subr.msk.bf16.mxu1 %vm12928_vm15, %v14140_v48  ;;  %vm5281_vm14 = vcmp.eq.s32.totalorder %v3609_v11, %v19051_v40  ;;  %vm5249_vm15 = vcmp.eq.s32.totalorder %v3577_v58, %v19055_v44  ;;  %vm13640_vm8 = vmpackc.low %vm5442_vm5, %vm5378_vm4  ;;  %vm5473_vm5 = vcmp.eq.s32.totalorder %v3801_v6, %v19051_v40 }
 0x8a3   : > { %13633 = vmatprep.subr.msk.bf16.mxu0 %vm13632_vm0, %v14140_v48  ;;  %vm5313_vm0 = vcmp.eq.s32.totalorder %v3641_v49, %v19055_v44  ;;  %vm12934_vm3 = vmpackc.low %vm5281_vm14, %vm5217_vm13  ;;  %vm5474_vm13 = vcmp.eq.s32.totalorder %v3802_v27, %v19027_v63  ;;  %vm5538_vm14 = vcmp.eq.s32.totalorder %v3866_v17, %v19027_v63 }
 0x8a4   : > { %vm13638_vm6 = vmpackc.low %vm5313_vm0, %vm5249_vm15  ;;  %vm5506_vm0 = vcmp.eq.s32.totalorder %v3834_v7, %v19032_v56 }
 0x8a9   : > { %12931 = vmatpush1.bf16.xpose.msk.msra.mxu1 %vm12930_vm7, %v14140_v48  ;;  %vm12936_vm7 = vmpackc.low %vm5410_vm2, %vm5346_vm1  ;;  %vm5570_vm1 = vcmp.eq.s32.totalorder %v3898_v43, %v19032_v56 }
 0x8aa   : > { %13635 = vmatpush1.bf16.xpose.msk.msra.mxu0 %vm13634_vm10, %v14140_v48  ;;  %12933 = vmatprep.subr.msk.bf16.mxu1 %vm12932_vm11, %v14140_v48  ;;  %vm5409_vm10 = vcmp.eq.s32.totalorder %v3737_v16, %v19051_v40  ;;  %vm5377_vm11 = vcmp.eq.s32.totalorder %v3705_v22, %v19055_v44  ;;  %vm13644_vm4 = vmpackc.low %vm5570_vm1, %vm5506_vm0  ;;  %vm5601_vm1 = vcmp.eq.s32.totalorder %v3929_v9, %v19051_v40 }
 0x8ab   : > { %13637 = vmatprep.subr.msk.bf16.mxu0 %vm13636_vm12, %v14140_v48  ;;  %vm5441_vm12 = vcmp.eq.s32.totalorder %v3769_v59, %v19055_v44  ;;  %vm12938_vm15 = vmpackc.low %vm5409_vm10, %vm5345_vm9  ;;  %vm5602_vm9 = vcmp.eq.s32.totalorder %v3930_v45, %v19027_v63  ;;  %vm5666_vm10 = vcmp.eq.s32.totalorder %v3994_v38, %v19027_v63 }
 0x8ac   : > { %vm13642_vm2 = vmpackc.low %vm5441_vm12, %vm5377_vm11  ;;  %vm5634_vm12 = vcmp.eq.s32.totalorder %v3962_v52, %v19032_v56 }
 0x8b1   : > { %12935 = vmatpush1.bf16.xpose.msk.msra.mxu1 %vm12934_vm3, %v14140_v48  ;;  %vm12940_vm3 = vmpackc.low %vm5538_vm14, %vm5474_vm13  ;;  %vm5698_vm13 = vcmp.eq.s32.totalorder %v4026_v42, %v19032_v56 }
 0x8b2   : > { %13639 = vmatpush1.bf16.xpose.msk.msra.mxu0 %vm13638_vm6, %v14140_v48  ;;  %12937 = vmatprep.subr.msk.bf16.mxu1 %vm12936_vm7, %v14140_v48  ;;  %vm5537_vm6 = vcmp.eq.s32.totalorder %v3865_v50, %v19051_v40  ;;  %vm5505_vm7 = vcmp.eq.s32.totalorder %v3833_v34, %v19055_v44  ;;  %vm13648_vm0 = vmpackc.low %vm5698_vm13, %vm5634_vm12  ;;  %vm5729_vm13 = vcmp.eq.s32.totalorder %v4057_v33, %v19051_v40 }
 0x8b3   : > { %13641 = vmatprep.subr.msk.bf16.mxu0 %vm13640_vm8, %v14140_v48  ;;  %vm5569_vm8 = vcmp.eq.s32.totalorder %v3897_v31, %v19055_v44  ;;  %vm12942_vm11 = vmpackc.low %vm5537_vm6, %vm5473_vm5  ;;  %vm5730_vm5 = vcmp.eq.s32.totalorder %v4058_v54, %v19027_v63  ;;  %vm5794_vm6 = vcmp.eq.s32.totalorder %v4122_v57, %v19027_v63  ;;  %v2713_v63 = vpack.c.bf16 %v19058_v0, %v19058_v0 }
 0x8b4   : > { %vm13646_vm14 = vmpackc.low %vm5569_vm8, %vm5505_vm7  ;;  %vm5762_vm8 = vcmp.eq.s32.totalorder %v4090_v23, %v19032_v56 }
 0x8b9   : > { %12939 = vmatpush1.bf16.xpose.msk.msra.mxu1 %vm12938_vm15, %v14140_v48  ;;  %vm12944_vm15 = vmpackc.low %vm5666_vm10, %vm5602_vm9  ;;  %vm5826_vm9 = vcmp.eq.s32.totalorder %v4154_v53, %v19032_v56  ;;  %v2745_v56 = vpack.c.bf16 %v19061_v55, %v19061_v55  ;;  %v9347_v55 = vld [vmem:[%s14416_s17] sm:$0xf] }
 0x8ba   : > { %13643 = vmatpush1.bf16.xpose.msk.msra.mxu0 %vm13642_vm2, %v14140_v48  ;;  %12941 = vmatprep.subr.msk.bf16.mxu1 %vm12940_vm3, %v14140_v48  ;;  %vm5665_vm2 = vcmp.eq.s32.totalorder %v3993_v1, %v19051_v40  ;;  %vm5633_vm3 = vcmp.eq.s32.totalorder %v3961_v8, %v19055_v44  ;;  %vm13652_vm12 = vmpackc.low %vm5826_vm9, %vm5762_vm8 }
 0x8bb   : > { %13645 = vmatprep.subr.msk.bf16.mxu0 %vm13644_vm4, %v14140_v48  ;;  %vm5697_vm4 = vcmp.eq.s32.totalorder %v4025_v14, %v19055_v44  ;;  %vm12946_vm7 = vmpackc.low %vm5665_vm2, %vm5601_vm1 }
 0x8bc   : > { %vm13650_vm10 = vmpackc.low %vm5697_vm4, %vm5633_vm3  ;;  %vm10672_vm3 = vcmask 1041408   ;;  %vm10673_vm4 = vcmask 388098  }
 0x8c1   : > { %12943 = vmatpush1.bf16.xpose.msk.msra.mxu1 %vm12942_vm11, %v14140_v48  ;;  %vm12948_vm11 = vmpackc.low %vm5794_vm6, %vm5730_vm5 }
 0x8c2   : > { %13647 = vmatpush1.bf16.xpose.msk.msra.mxu0 %vm13646_vm14, %v14140_v48  ;;  %12945 = vmatprep.subr.msk.bf16.mxu1 %vm12944_vm15, %v14140_v48  ;;  %vm5793_vm14 = vcmp.eq.s32.totalorder %v4121_v3, %v19051_v40  ;;  %vm5761_vm15 = vcmp.eq.s32.totalorder %v4089_v5, %v19055_v44  ;;  %vm10674_vm5 = vmor %vm10673_vm4, %vm10672_vm3 }
 0x8c3   : > { %13649 = vmatprep.subr.msk.bf16.mxu0 %vm13648_vm0, %v14140_v48  ;;  %vm5825_vm0 = vcmp.eq.s32.totalorder %v4153_v62, %v19055_v44  ;;  %vm12950_vm1 = vmpackc.low %vm5793_vm14, %vm5729_vm13 }
 0x8c4   : > { %vm13654_vm2 = vmpackc.low %vm5825_vm0, %vm5761_vm15 }
 0x8c9   : > { %12947 = vmatpush1.bf16.xpose.msk.msra.mxu1 %vm12946_vm7, %v14140_v48 }
 0x8ca   : > { %13651 = vmatpush1.bf16.xpose.msk.msra.mxu0 %vm13650_vm10, %v14140_v48  ;;  %12949 = vmatprep.subr.msk.bf16.mxu1 %vm12948_vm11, %v14140_v48 }
 0x8cb   : > { %13653 = vmatprep.subr.msk.bf16.mxu0 %vm13652_vm12, %v14140_v48 }
 0x8d1   : > { %12951 = vmatpush1.bf16.xpose.msk.msra.mxu1 %vm12950_vm1, %v14140_v48 }
 0x8d2   : > { %13655 = vmatpush1.bf16.xpose.msk.msra.mxu0 %vm13654_vm2, %v14140_v48 }
 0x8d8   : > { %9996 = vmatmul.mubr.bf16.vlgmr.msra.gmra.mrb[0].mxu1 %v2713_v63 }
 0x8d9   : > { %10652 = vmatmul.mubr.bf16.vlgmr.msra.gmra.mrb[0].mxu0 %v2745_v56 }
 0x9ab   : > { %v9997_v40 = vpop.f32.mrb[0].mxu1 }
 0x9ac   : > { %v10653_v60 = vpop.f32.mrb[0].mxu0  ;;  %v9999_v44 = vpop.f32.mrb[1].mxu1 }
 0x9ad   : > { %v13665_v2 = vadd.f32 %v10653_v60, %v9997_v40  ;;  %v10655_v24 = vpop.f32.mrb[1].mxu0  ;;  %v10001_v4 = vpop.f32.mrb[2].mxu1 }
 0x9ae   : > { %v13666_v35 = vadd.f32 %v10655_v24, %v9999_v44  ;;  %v10657_v48 = vpop.f32.mrb[2].mxu0  ;;  %v10002_v21 = vpop.f32.mrb[3].mxu1 }
 0x9af   : > { %v10658_v0 = vpop.f32.mrb[3].mxu0 }
 0x9b0   : > { %v10662_v41 = vcombine.low %v13665_v2, %v13666_v35 }
 0x9b2   : > { %v10669_v37 = vrot.slane %v10662_v41, %v16005_v25 }
 0x9b4   : > { %v10671_v30 = vadd.f32 %v10669_v37, %v9347_v55 }
 0x9b6   : > { %10675 = vst.msk [vmem:[%s14416_s17] sm:$0xf] %vm10674_vm5, %v10671_v30 }
 0x9b7   : > { %14021 = shalt.err (!%p14018_p12)
}
 0x9b8   : > { %s14022_s28 = scalar_lea.hbm %s19212_s9, 64  ;;  %s14026_s20 = scalar_lea.hbm %s19280_s3, 128 }
 0x9b9   : > { %p14023_p4 = scmp.ne.s32.totalorder %s19212_s9, %s14022_s28  ;;  %p14027_p2 = scmp.lt.u32.totalorder %s19212_s9, %s19280_s3 }
 0x9ba   : > { %p14028_p5 = scmp.lt.u32.totalorder %s14026_s20, %s14022_s28  ;;  %p14030_p10 = scmp.lt.u32.totalorder %s14022_s28, %s19212_s9 }
 0x9bb   : > { %p14024_p6 = pnand %p14023_p4, %p19422_p7 }
 0x9bc   : > { %p14029_p3 = por %p14028_p5, %p14027_p2 }
 0x9bd   : > { %p14025_p9 = pneg %p14024_p6 }
 0x9be   : > { %p14031_p13 = por %p14030_p10, %p14029_p3 }
 0x9c0   : > { %p14032_p8 = pnand %p14031_p13, %p14025_p9 }
 0x9c2   : > { %14035 = shalt.err (!%p14032_p8)
}
 0x9c3   : > { %13793 = dma.vmem_to_hbm [thread:$0]  (%p19422_p7), %s19214_s23, 64, %s19212_s9, %s10677_s27  }
 0x9c4 PF: > { %s19423_s29 = sld [smem:[#allocation21_spill]]  ;;  %p13810_p11 = scmp.ge.s32.totalorder %s14134_s22, 2 }
 0x9c5   : > { %s10703_s21 = sand.u32 1, %s14094_s12  }
 0x9c6   : > { %s10704_s7 = scalar_lea.sflag [#allocation5], %s10703_s21 }
 0x9ca   : > { %p19424_p0 = scmp.ne.s32.totalorder %s19423_s29, 0 }
 0x9cc   : > { %p13806_p1 = pnand %p13810_p11, %p19424_p0 }
 0x9ce   : > { %14089 = dma.done.wait (!%p13806_p1), %s10704_s7, 64  }
 0x9cf   : > { %14091 = vsyncadd (!%p13806_p1), %s10704_s7, 4294967232  ;;  %s22_s22 = sadd.s32 1, %s14134_s22   ;;  %s19425_s24 = sld [smem:[#allocation13_spill]] }
 0x9d0   : > { %p19_p12 = scmp.ge.s32.totalorder %s22_s22, 22   ;;  %s19426_s14 = sld [smem:[#allocation19_spill]] }
 0x9d1   : > { %s19427_s10 = sld [smem:[#allocation14_spill]]  ;;  %s19428_s17 = sld [smem:[#allocation20_spill]] }
 0x9d2   : > { %s19429_s18 = sld [smem:[#allocation15_spill]]  ;;  %s19430_s19 = sld [smem:[#allocation16_spill]] }
 0x9d3   : > { %s19431_s20 = sld [smem:[#allocation17_spill]]  ;;  %s19432_s21 = sld [smem:[#allocation18_spill]] }
 0x9d4   : > { %s19433_s12 = smov %s14098_s13  ;;  %s19435_s15 = smov %s14110_s16 }
 0x9d5   : > { %s19434_s13 = smov %s19425_s24  ;;  %21 = sbr.rel (!%p19_p12) target bundleno = 13 (0xd), region = 105 }
 0x9d7   : > { %s19436_s16 = smov %s19427_s10 }
 0x9dc   :  { %10709 = vsyncpa [#allocation4], 1 }
 0x9dd   :  { %10711 = vsyncpa [#allocation4 + $0x1], 1 }
 0x9de   :  { %10712 = vsyncpa [#allocation7], 1 }
 0x9df   :  { %10714 = vsyncpa [#allocation7 + $0x1], 1 }
 0x9e0   :  { %10715 = vsyncpa [#allocation5], 1 }
 0x9e1   :  { %10717 = vsyncpa [#allocation5 + $0x1], 1 }

</bundles_post_ra>
